<compile_context>
chip_gen: v5e
topology: v5e:2x2
jax: 0.10.0
libtpu: 0.0.40
codegen_flags: <defaults>
</compile_context>

<pallas_src>
import numpy as np
import jax
import jax.numpy as jnp
from jax import lax
from jax.experimental import pallas as pl
from jax.experimental.pallas import tpu as pltpu

# -----------------------------------------------------------------------------
# Network geometry. 12x12 input is the spatial size the conv stack implies:
# 12 -(conv1 s2)-> 6 -(conv2 s2)-> 3 -(conv3)-> 3 -(conv4)-> 3 -(pool 3x3)-> 1,
# so that x.view(-1, 256*1*1) is valid.
# -----------------------------------------------------------------------------
H_IN = W_IN = 12
BN_EPS = 1e-5


# -----------------------------------------------------------------------------
# Host-side lowering: conv -> dense linear map
# -----------------------------------------------------------------------------
def conv_to_dense(w, hin, win, stride, pad):
    """PyTorch conv weight [Cout, Cin, kh, kw] -> dense map of shape
    [hin*win*Cin, ho*wo*Cout] with channels-last flattening
    idx_in = (qi*win + qj)*Cin + cin, idx_out = (oi*wo + oj)*Cout + cout.
    Zero padding is implicit (out-of-bounds taps stay zero)."""
    w = np.asarray(w, np.float32)
    cout, cin, kh, kw = w.shape
    ho = (hin + 2 * pad - kh) // stride + 1
    wo = (win + 2 * pad - kw) // stride + 1
    big = np.zeros((hin * win * cin, ho * wo * cout), np.float32)
    for oi in range(ho):
        for oj in range(wo):
            ob = (oi * wo + oj) * cout
            for di in range(kh):
                qi = oi * stride - pad + di
                if qi < 0 or qi >= hin:
                    continue
                for dj in range(kw):
                    qj = oj * stride - pad + dj
                    if qj < 0 or qj >= win:
                        continue
                    ib = (qi * win + qj) * cin
                    big[ib:ib + cin, ob:ob + cout] = w[:, :, di, dj].T
    return big, ho, wo


def _pad2(a, rows, cols):
    out = np.zeros((rows, cols), np.float32)
    out[:a.shape[0], :a.shape[1]] = a
    return out


def _pad1(a, n):
    out = np.zeros((n,), np.float32)
    out[:a.shape[0]] = a
    return out


# -----------------------------------------------------------------------------
# Parameters
# -----------------------------------------------------------------------------
def init_raw_params(key):
    """Deterministic synthetic params with the shapes Net.__init__ implies.
    Conv weights in PyTorch layout [Cout, Cin, kh, kw]; FC weights as [in, out]."""
    def nrm(k, shape, fan_in):
        return jax.random.normal(k, shape, jnp.float32) / jnp.sqrt(float(fan_in))

    ks = jax.random.split(key, 14)
    p = {}
    p["cw1"], p["cb1"] = nrm(ks[0], (8, 1, 7, 7), 49), nrm(ks[1], (8,), 49)
    p["cw2"], p["cb2"] = nrm(ks[2], (32, 8, 5, 5), 200), nrm(ks[3], (32,), 200)
    p["cw3"], p["cb3"] = nrm(ks[4], (64, 32, 5, 5), 800), nrm(ks[5], (64,), 800)
    p["cw4"], p["cb4"] = nrm(ks[6], (256, 64, 3, 3), 576), nrm(ks[7], (256,), 576)
    p["wfc1"], p["bfc1"] = nrm(ks[8], (256, 256), 256), nrm(ks[9], (256,), 256)
    p["wfc4"], p["bfc4"] = nrm(ks[10], (256, 64), 256), nrm(ks[11], (64,), 256)
    p["wfc5"], p["bfc5"] = nrm(ks[12], (64, 4), 64), nrm(ks[13], (4,), 64)
    return p


def build_kernel_params(raw):
    """Lower convs to dense maps, zero-pad feature dims to 128-lane multiples,
    fold eval-mode BatchNorm into conv1, cast MXU operands to bf16."""
    # conv layers -> dense maps; spatial sizes 12 -> 6 -> 3 -> 3 -> 3
    big1, ho1, wo1 = conv_to_dense(raw["cw1"], 12, 12, 2, 3)   # [144, 288]
    big2, ho2, wo2 = conv_to_dense(raw["cw2"], 6, 6, 2, 2)     # [288, 288]
    big3, ho3, wo3 = conv_to_dense(raw["cw3"], 3, 3, 1, 2)     # [288, 576]
    big4, ho4, wo4 = conv_to_dense(raw["cw4"], 3, 3, 1, 1)     # [576, 2304]
    bias1 = np.tile(np.asarray(raw["cb1"], np.float32), ho1 * wo1)   # [288]
    bias2 = np.tile(np.asarray(raw["cb2"], np.float32), ho2 * wo2)   # [288]
    bias3 = np.tile(np.asarray(raw["cb3"], np.float32), ho3 * wo3)   # [576]
    bias4 = np.tile(np.asarray(raw["cb4"], np.float32), ho4 * wo4)   # [2304]

    # Fold eval-mode BatchNorm2d(1): conv1(x/sqrt(1+eps)) == scaled conv1 map.
    big1 = big1 / np.sqrt(1.0 + BN_EPS)

    # Zero-pad feature dims: 288 -> 384, 288 -> 384, 576 -> 640 (2304 already
    # 18*128).  Padded activation entries are ReLU(0+0)=0 and the next layer's
    # extra rows are zero, so results are unchanged.
    D1, D2, D3, D4 = 384, 384, 640, 2304
    kp = {
        "w1": _pad2(big1, 144, D1), "b1": _pad1(bias1, D1),
        "w2": _pad2(big2, D1, D2),  "b2": _pad1(bias2, D2),
        "w3": _pad2(big3, D2, D3),  "b3": _pad1(bias3, D3),
        "w4": _pad2(big4, D3, D4),  "b4": _pad1(bias4, D4),
        # FC layers: pad out dims 64 -> 128 and 4 -> 128 for lane-dense stores.
        "wfc1": np.asarray(raw["wfc1"], np.float32),
        "bfc1": np.asarray(raw["bfc1"], np.float32),
        "wfc4": _pad2(np.asarray(raw["wfc4"], np.float32), 256, 128),
        "bfc4": _pad1(np.asarray(raw["bfc4"], np.float32), 128),
        "wfc5": _pad2(np.asarray(raw["wfc5"], np.float32), 128, 128),
        "bfc5": _pad1(np.asarray(raw["bfc5"], np.float32), 128),
    }

    out = {}
    for k in ("w1", "w2", "w3", "w4", "wfc1", "wfc4", "wfc5"):
        out[k] = jnp.asarray(kp[k], jnp.bfloat16)          # bf16 MXU operands
    for k in ("b1", "b2", "b3", "b4", "bfc1", "bfc4", "bfc5"):
        out[k] = jnp.asarray(kp[k], jnp.float32).reshape(1, -1)  # f32 biases
    return out


# -----------------------------------------------------------------------------
# Fused Pallas kernel: whole forward pass, single VMEM-resident block
# -----------------------------------------------------------------------------
def _fused_net_kernel(x_ref, w1_ref, b1_ref, w2_ref, b2_ref, w3_ref, b3_ref,
                      w4_ref, b4_ref, wf1_ref, bf1_ref, wf4_ref, bf4_ref,
                      wf5_ref, bf5_ref, o_ref):
    def dense(a, w_ref, b_ref, relu=True):
        # bf16 MXU inputs, f32 accumulation, f32 bias + ReLU epilogue (VPU).
        y = jnp.dot(a.astype(jnp.bfloat16), w_ref[...],
                    preferred_element_type=jnp.float32)
        y = y + b_ref[...]
        if relu:
            y = jnp.maximum(y, 0.0)
        return y

    a = x_ref[...]                               # [B, 144]   (BN folded into w1)
    a = dense(a, w1_ref, b1_ref)                 # conv1+ReLU -> [B, 384]
    a = dense(a, w2_ref, b2_ref)                 # conv2+ReLU -> [B, 384]
    a = dense(a, w3_ref, b3_ref)                 # conv3+ReLU -> [B, 640]
    a = dense(a, w4_ref, b4_ref)                 # conv4+ReLU -> [B, 2304]

    # MaxPool2d(3, stride=1) on the 3x3 map == max over the 9 spatial
    # positions; slices are 256-lane aligned, so this is a few VPU maxes.
    pooled = a[:, 0:256]
    for p in range(1, 9):
        pooled = jnp.maximum(pooled, a[:, p * 256:(p + 1) * 256])

    a = dense(pooled, wf1_ref, bf1_ref)          # fc1+ReLU -> [B, 256]
    a = dense(a, wf4_ref, bf4_ref)               # fc4+ReLU -> [B, 128] (64 real)
    a = dense(a, wf5_ref, bf5_ref, relu=False)   # fc5      -> [B, 128] (4 real)
    o_ref[...] = a.astype(o_ref.dtype)


_VMEM_SPEC = pl.BlockSpec(memory_space=pltpu.MemorySpace.VMEM)


@jax.jit
def net_forward(params, x):
    """x: [B, 1, 12, 12] float32 (NCHW) -> Q-values [B, 4]."""
    B = x.shape[0]
    assert x.shape[1:] == (1, H_IN, W_IN)
    # Cin == 1, so the NCHW flatten equals the channels-last flatten the
    # dense conv maps expect: index (i*12 + j).
    x_flat = x.reshape(B, H_IN * W_IN).astype(jnp.float32)
    out = pl.pallas_call(
        _fused_net_kernel,
        out_shape=jax.ShapeDtypeStruct((B, 128), jnp.float32),
        in_specs=[_VMEM_SPEC] * 15,
        out_specs=_VMEM_SPEC,
    )(x_flat,
      params["w1"], params["b1"], params["w2"], params["b2"],
      params["w3"], params["b3"], params["w4"], params["b4"],
      params["wfc1"], params["bfc1"], params["wfc4"], params["bfc4"],
      params["wfc5"], params["bfc5"])
    return out[:, :4]   # drop lane padding of the fc5 output


# -----------------------------------------------------------------------------
# Pure-JAX f32 reference (eval-mode semantics) for a sanity check
# -----------------------------------------------------------------------------
def reference_forward(raw, x):
    y = x / jnp.sqrt(1.0 + BN_EPS)                      # fresh-stats BatchNorm2d(1)
    for wk, bk, s, p in (("cw1", "cb1", 2, 3), ("cw2", "cb2", 2, 2),
                         ("cw3", "cb3", 1, 2), ("cw4", "cb4", 1, 1)):
        y = lax.conv_general_dilated(
            y, raw[wk], window_strides=(s, s), padding=[(p, p), (p, p)],
            dimension_numbers=("NCHW", "OIHW", "NCHW"))
        y = jax.nn.relu(y + raw[bk].reshape(1, -1, 1, 1))
    y = jnp.max(y, axis=(2, 3))                         # 3x3/1 pool on 3x3 map
    y = jax.nn.relu(y @ raw["wfc1"] + raw["bfc1"])      # dropout == identity (eval)
    y = jax.nn.relu(y @ raw["wfc4"] + raw["bfc4"])
    return y @ raw["wfc5"] + raw["bfc5"]


if __name__ == "__main__":
    key = jax.random.PRNGKey(0)
    pkey, xkey = jax.random.split(key)
    raw = init_raw_params(pkey)
    params = build_kernel_params(raw)

    # Small batch (8 fills the sublane dim); 12x12 board as required by the
    # conv stack.  For DQN training throughput, batch >= 64 (and a parallel
    # batch grid axis on v7x) is the next step — not needed at this size.
    B = 8
    x = jax.random.normal(xkey, (B, 1, H_IN, W_IN), dtype=jnp.float32)

    out = jax.block_until_ready(net_forward(params, x))
    assert out.shape == (B, 4) and out.dtype == jnp.float32

    # Loose-tolerance check vs the f32 reference (kernel uses bf16 MXU
    # operands with f32 accumulation).
    ref = jax.block_until_ready(reference_forward(raw, x))
    np.testing.assert_allclose(np.asarray(out), np.asarray(ref),
                               rtol=0.1, atol=0.1)

    print("KERNEL_OK")
</pallas_src>

<mosaic_0001>
module attributes {stable_mosaic.version = 11 : i64} {
  func.func @_fused_net_kernel(%arg0: memref<8x144xf32, #tpu.memory_space<vmem>>, %arg1: memref<144x384xbf16, #tpu.memory_space<vmem>>, %arg2: memref<1x384xf32, #tpu.memory_space<vmem>>, %arg3: memref<384x384xbf16, #tpu.memory_space<vmem>>, %arg4: memref<1x384xf32, #tpu.memory_space<vmem>>, %arg5: memref<384x640xbf16, #tpu.memory_space<vmem>>, %arg6: memref<1x640xf32, #tpu.memory_space<vmem>>, %arg7: memref<640x2304xbf16, #tpu.memory_space<vmem>>, %arg8: memref<1x2304xf32, #tpu.memory_space<vmem>>, %arg9: memref<256x256xbf16, #tpu.memory_space<vmem>>, %arg10: memref<1x256xf32, #tpu.memory_space<vmem>>, %arg11: memref<256x128xbf16, #tpu.memory_space<vmem>>, %arg12: memref<1x128xf32, #tpu.memory_space<vmem>>, %arg13: memref<128x128xbf16, #tpu.memory_space<vmem>>, %arg14: memref<1x128xf32, #tpu.memory_space<vmem>>, %arg15: memref<8x128xf32, #tpu.memory_space<vmem>>) attributes {dimension_semantics = [], scalar_prefetch = 0 : i64, scratch_operands = 0 : i64, tpu.core_type = #tpu.core_type<tc>} {
    %c0 = arith.constant 0 : index
    %c0_0 = arith.constant 0 : index
    %0 = vector.load %arg0[%c0, %c0_0] : memref<8x144xf32, #tpu.memory_space<vmem>>, vector<8x144xf32>
    %1 = arith.truncf %0 : vector<8x144xf32> to vector<8x144xbf16>
    %c0_1 = arith.constant 0 : index
    %c0_2 = arith.constant 0 : index
    %2 = vector.load %arg1[%c0_1, %c0_2] : memref<144x384xbf16, #tpu.memory_space<vmem>>, vector<144x384xbf16>
    %cst = arith.constant dense<0.000000e+00> : vector<8x384xf32>
    %3 = tpu.matmul %1, %2, %cst {dimension_numbers = #tpu.dot_dimension_numbers<[1], [0], [0], [1], [0, 0, 1, 1], [], []>} : vector<8x144xbf16>, vector<144x384xbf16>, vector<8x384xf32> -> vector<8x384xf32>
    %c0_3 = arith.constant 0 : index
    %c0_4 = arith.constant 0 : index
    %4 = vector.load %arg2[%c0_3, %c0_4] : memref<1x384xf32, #tpu.memory_space<vmem>>, vector<1x384xf32>
    %5 = vector.broadcast %4 : vector<1x384xf32> to vector<8x384xf32>
    %6 = arith.addf %3, %5 : vector<8x384xf32>
    %cst_5 = arith.constant 0.000000e+00 : f32
    %7 = vector.broadcast %cst_5 : f32 to vector<8x384xf32>
    %8 = arith.maximumf %6, %7 : vector<8x384xf32>
    %9 = arith.truncf %8 : vector<8x384xf32> to vector<8x384xbf16>
    %c0_6 = arith.constant 0 : index
    %c0_7 = arith.constant 0 : index
    %10 = vector.load %arg3[%c0_6, %c0_7] : memref<384x384xbf16, #tpu.memory_space<vmem>>, vector<384x384xbf16>
    %cst_8 = arith.constant dense<0.000000e+00> : vector<8x384xf32>
    %11 = tpu.matmul %9, %10, %cst_8 {dimension_numbers = #tpu.dot_dimension_numbers<[1], [0], [0], [1], [0, 0, 1, 1], [], []>} : vector<8x384xbf16>, vector<384x384xbf16>, vector<8x384xf32> -> vector<8x384xf32>
    %c0_9 = arith.constant 0 : index
    %c0_10 = arith.constant 0 : index
    %12 = vector.load %arg4[%c0_9, %c0_10] : memref<1x384xf32, #tpu.memory_space<vmem>>, vector<1x384xf32>
    %13 = vector.broadcast %12 : vector<1x384xf32> to vector<8x384xf32>
    %14 = arith.addf %11, %13 : vector<8x384xf32>
    %cst_11 = arith.constant 0.000000e+00 : f32
    %15 = vector.broadcast %cst_11 : f32 to vector<8x384xf32>
    %16 = arith.maximumf %14, %15 : vector<8x384xf32>
    %17 = arith.truncf %16 : vector<8x384xf32> to vector<8x384xbf16>
    %c0_12 = arith.constant 0 : index
    %c0_13 = arith.constant 0 : index
    %18 = vector.load %arg5[%c0_12, %c0_13] : memref<384x640xbf16, #tpu.memory_space<vmem>>, vector<384x640xbf16>
    %cst_14 = arith.constant dense<0.000000e+00> : vector<8x640xf32>
    %19 = tpu.matmul %17, %18, %cst_14 {dimension_numbers = #tpu.dot_dimension_numbers<[1], [0], [0], [1], [0, 0, 1, 1], [], []>} : vector<8x384xbf16>, vector<384x640xbf16>, vector<8x640xf32> -> vector<8x640xf32>
    %c0_15 = arith.constant 0 : index
    %c0_16 = arith.constant 0 : index
    %20 = vector.load %arg6[%c0_15, %c0_16] : memref<1x640xf32, #tpu.memory_space<vmem>>, vector<1x640xf32>
    %21 = vector.broadcast %20 : vector<1x640xf32> to vector<8x640xf32>
    %22 = arith.addf %19, %21 : vector<8x640xf32>
    %cst_17 = arith.constant 0.000000e+00 : f32
    %23 = vector.broadcast %cst_17 : f32 to vector<8x640xf32>
    %24 = arith.maximumf %22, %23 : vector<8x640xf32>
    %25 = arith.truncf %24 : vector<8x640xf32> to vector<8x640xbf16>
    %c0_18 = arith.constant 0 : index
    %c0_19 = arith.constant 0 : index
    %26 = vector.load %arg7[%c0_18, %c0_19] : memref<640x2304xbf16, #tpu.memory_space<vmem>>, vector<640x2304xbf16>
    %cst_20 = arith.constant dense<0.000000e+00> : vector<8x2304xf32>
    %27 = tpu.matmul %25, %26, %cst_20 {dimension_numbers = #tpu.dot_dimension_numbers<[1], [0], [0], [1], [0, 0, 1, 1], [], []>} : vector<8x640xbf16>, vector<640x2304xbf16>, vector<8x2304xf32> -> vector<8x2304xf32>
    %c0_21 = arith.constant 0 : index
    %c0_22 = arith.constant 0 : index
    %28 = vector.load %arg8[%c0_21, %c0_22] : memref<1x2304xf32, #tpu.memory_space<vmem>>, vector<1x2304xf32>
    %29 = vector.broadcast %28 : vector<1x2304xf32> to vector<8x2304xf32>
    %30 = arith.addf %27, %29 : vector<8x2304xf32>
    %cst_23 = arith.constant 0.000000e+00 : f32
    %31 = vector.broadcast %cst_23 : f32 to vector<8x2304xf32>
    %32 = arith.maximumf %30, %31 : vector<8x2304xf32>
    %33 = vector.extract_strided_slice %32 {offsets = [0, 0], sizes = [8, 256], strides = [1, 1]} : vector<8x2304xf32> to vector<8x256xf32>
    %34 = vector.extract_strided_slice %32 {offsets = [0, 256], sizes = [8, 256], strides = [1, 1]} : vector<8x2304xf32> to vector<8x256xf32>
    %35 = arith.maximumf %33, %34 : vector<8x256xf32>
    %36 = vector.extract_strided_slice %32 {offsets = [0, 512], sizes = [8, 256], strides = [1, 1]} : vector<8x2304xf32> to vector<8x256xf32>
    %37 = arith.maximumf %35, %36 : vector<8x256xf32>
    %38 = vector.extract_strided_slice %32 {offsets = [0, 768], sizes = [8, 256], strides = [1, 1]} : vector<8x2304xf32> to vector<8x256xf32>
    %39 = arith.maximumf %37, %38 : vector<8x256xf32>
    %40 = vector.extract_strided_slice %32 {offsets = [0, 1024], sizes = [8, 256], strides = [1, 1]} : vector<8x2304xf32> to vector<8x256xf32>
    %41 = arith.maximumf %39, %40 : vector<8x256xf32>
    %42 = vector.extract_strided_slice %32 {offsets = [0, 1280], sizes = [8, 256], strides = [1, 1]} : vector<8x2304xf32> to vector<8x256xf32>
    %43 = arith.maximumf %41, %42 : vector<8x256xf32>
    %44 = vector.extract_strided_slice %32 {offsets = [0, 1536], sizes = [8, 256], strides = [1, 1]} : vector<8x2304xf32> to vector<8x256xf32>
    %45 = arith.maximumf %43, %44 : vector<8x256xf32>
    %46 = vector.extract_strided_slice %32 {offsets = [0, 1792], sizes = [8, 256], strides = [1, 1]} : vector<8x2304xf32> to vector<8x256xf32>
    %47 = arith.maximumf %45, %46 : vector<8x256xf32>
    %48 = vector.extract_strided_slice %32 {offsets = [0, 2048], sizes = [8, 256], strides = [1, 1]} : vector<8x2304xf32> to vector<8x256xf32>
    %49 = arith.maximumf %47, %48 : vector<8x256xf32>
    %50 = arith.truncf %49 : vector<8x256xf32> to vector<8x256xbf16>
    %c0_24 = arith.constant 0 : index
    %c0_25 = arith.constant 0 : index
    %51 = vector.load %arg9[%c0_24, %c0_25] : memref<256x256xbf16, #tpu.memory_space<vmem>>, vector<256x256xbf16>
    %cst_26 = arith.constant dense<0.000000e+00> : vector<8x256xf32>
    %52 = tpu.matmul %50, %51, %cst_26 {dimension_numbers = #tpu.dot_dimension_numbers<[1], [0], [0], [1], [0, 0, 1, 1], [], []>} : vector<8x256xbf16>, vector<256x256xbf16>, vector<8x256xf32> -> vector<8x256xf32>
    %c0_27 = arith.constant 0 : index
    %c0_28 = arith.constant 0 : index
    %53 = vector.load %arg10[%c0_27, %c0_28] : memref<1x256xf32, #tpu.memory_space<vmem>>, vector<1x256xf32>
    %54 = vector.broadcast %53 : vector<1x256xf32> to vector<8x256xf32>
    %55 = arith.addf %52, %54 : vector<8x256xf32>
    %cst_29 = arith.constant 0.000000e+00 : f32
    %56 = vector.broadcast %cst_29 : f32 to vector<8x256xf32>
    %57 = arith.maximumf %55, %56 : vector<8x256xf32>
    %58 = arith.truncf %57 : vector<8x256xf32> to vector<8x256xbf16>
    %c0_30 = arith.constant 0 : index
    %c0_31 = arith.constant 0 : index
    %59 = vector.load %arg11[%c0_30, %c0_31] : memref<256x128xbf16, #tpu.memory_space<vmem>>, vector<256x128xbf16>
    %cst_32 = arith.constant dense<0.000000e+00> : vector<8x128xf32>
    %60 = tpu.matmul %58, %59, %cst_32 {dimension_numbers = #tpu.dot_dimension_numbers<[1], [0], [0], [1], [0, 0, 1, 1], [], []>} : vector<8x256xbf16>, vector<256x128xbf16>, vector<8x128xf32> -> vector<8x128xf32>
    %c0_33 = arith.constant 0 : index
    %c0_34 = arith.constant 0 : index
    %61 = vector.load %arg12[%c0_33, %c0_34] : memref<1x128xf32, #tpu.memory_space<vmem>>, vector<1x128xf32>
    %62 = vector.broadcast %61 : vector<1x128xf32> to vector<8x128xf32>
    %63 = arith.addf %60, %62 : vector<8x128xf32>
    %cst_35 = arith.constant 0.000000e+00 : f32
    %64 = vector.broadcast %cst_35 : f32 to vector<8x128xf32>
    %65 = arith.maximumf %63, %64 : vector<8x128xf32>
    %66 = arith.truncf %65 : vector<8x128xf32> to vector<8x128xbf16>
    %c0_36 = arith.constant 0 : index
    %c0_37 = arith.constant 0 : index
    %67 = vector.load %arg13[%c0_36, %c0_37] : memref<128x128xbf16, #tpu.memory_space<vmem>>, vector<128x128xbf16>
    %cst_38 = arith.constant dense<0.000000e+00> : vector<8x128xf32>
    %68 = tpu.matmul %66, %67, %cst_38 {dimension_numbers = #tpu.dot_dimension_numbers<[1], [0], [0], [1], [0, 0, 1, 1], [], []>} : vector<8x128xbf16>, vector<128x128xbf16>, vector<8x128xf32> -> vector<8x128xf32>
    %c0_39 = arith.constant 0 : index
    %c0_40 = arith.constant 0 : index
    %69 = vector.load %arg14[%c0_39, %c0_40] : memref<1x128xf32, #tpu.memory_space<vmem>>, vector<1x128xf32>
    %70 = vector.broadcast %69 : vector<1x128xf32> to vector<8x128xf32>
    %71 = arith.addf %68, %70 : vector<8x128xf32>
    %c0_41 = arith.constant 0 : index
    %c0_42 = arith.constant 0 : index
    %72 = vector.load %arg15[%c0_41, %c0_42] : memref<8x128xf32, #tpu.memory_space<vmem>>, vector<8x128xf32>
    tpu.vector_store %arg15[%c0_41, %c0_42], %71 {strides = array<i32>} : memref<8x128xf32, #tpu.memory_space<vmem>>, vector<8x128xf32>,
    return
  }
}

</mosaic_0001>

<bundles_post_ra>
// kernel: net_forward.1
= control target key start
LH: loop header
LB: loop body
LE: loop exit
PB: predicated region body
PF: predicated region fallthrough
CT: control target
= control target key end

     0   :  { %20 = vsyncpa [#allocation3], 0  ;;  %s14074_s0 = inlined_call_operand.vmem [shape: f32[8,144], index: 0, kind: input, shape index: {}]   ;;  %s14075_s1 = inlined_call_operand.hbm [shape: bf16[144,384], index: 1, kind: input, shape index: {}]   ;;  %s14076_s2 = inlined_call_operand.hbm [shape: f32[1,384], index: 2, kind: input, shape index: {}]   ;;  %s14077_s3 = inlined_call_operand.hbm [shape: bf16[384,384], index: 3, kind: input, shape index: {}]   ;;  %s14078_s4 = inlined_call_operand.hbm [shape: f32[1,384], index: 4, kind: input, shape index: {}]   ;;  %s14079_s5 = inlined_call_operand.hbm [shape: bf16[384,640], index: 5, kind: input, shape index: {}]   ;;  %s14080_s6 = inlined_call_operand.hbm [shape: f32[1,640], index: 6, kind: input, shape index: {}]   ;;  %s14081_s7 = inlined_call_operand.hbm [shape: bf16[640,2304], index: 7, kind: input, shape index: {}]   ;;  %s14082_s8 = inlined_call_operand.hbm [shape: f32[1,2304], index: 8, kind: input, shape index: {}]   ;;  %s14083_s9 = inlined_call_operand.hbm [shape: bf16[256,256], index: 9, kind: input, shape index: {}]   ;;  %s14084_s10 = inlined_call_operand.hbm [shape: f32[1,256], index: 10, kind: input, shape index: {}]   ;;  %s14085_s11 = inlined_call_operand.hbm [shape: bf16[256,128], index: 11, kind: input, shape index: {}]   ;;  %s14086_s12 = inlined_call_operand.hbm [shape: f32[1,128], index: 12, kind: input, shape index: {}]   ;;  %s14087_s13 = inlined_call_operand.hbm [shape: bf16[128,128], index: 13, kind: input, shape index: {}]   ;;  %s14088_s14 = inlined_call_operand.hbm [shape: f32[1,128], index: 14, kind: input, shape index: {}]   ;;  %s14089_s15 = inlined_call_operand.vmem [shape: f32[8,128], index: 15, kind: output, shape index: {}]  }
   0x1   :  { %21 = vsyncpa [#allocation5], 0 }
   0x2   :  { %22 = vsyncpa [#allocation8], 0 }
   0x3   :  { %23 = vsyncpa [#allocation11], 0 }
   0x4   :  { %24 = vsyncpa [#allocation14], 0 }
   0x5   :  { %25 = vsyncpa [#allocation17], 0 }
   0x6   :  { %26 = vsyncpa [#allocation20], 0  ;;  %s48_s20 = sshll.u32 %s14076_s2, 4  ;;  %s49_s20 = int_to_ptr.hbm [resolvable:$true] %s48_s20 }
   0x7   :  { %27 = vsyncpa [#allocation23], 0  ;;  %s13566_s21 = smov [#allocation4]   ;;  %s72_s25 = sshll.u32 %s14078_s4, 4  ;;  %s73_s25 = int_to_ptr.hbm [resolvable:$true] %s72_s25 }
   0x8   :  { %s50_s22 = sshll.u32 %s13566_s21, 4  ;;  %s13567_s26 = smov [#allocation7]   ;;  %s51_s22 = int_to_ptr.vmem [resolvable:$true] %s50_s22 }
   0x9   :  { %53 = dma.hbm_to_vmem [thread:$0]  %s49_s20, 48, %s51_s22, [#allocation5]  }
   0xa   :  { %s74_s27 = sshll.u32 %s13567_s26, 4  ;;  %s96_s30 = sshll.u32 %s14080_s6, 4  ;;  %s75_s27 = int_to_ptr.vmem [resolvable:$true] %s74_s27  ;;  %s97_s30 = int_to_ptr.hbm [resolvable:$true] %s96_s30 }
   0xb   :  { %77 = dma.hbm_to_vmem [thread:$0]  %s73_s25, 48, %s75_s27, [#allocation8]  }
   0xc   :  { %s120_s17 = sshll.u32 %s14082_s8, 4  ;;  %s13568_s18 = smov [#allocation10]   ;;  %s121_s17 = int_to_ptr.hbm [resolvable:$true] %s120_s17 }
   0xd   :  { %s98_s19 = sshll.u32 %s13568_s18, 4  ;;  %s13569_s4 = smov [#allocation13]   ;;  %s99_s19 = int_to_ptr.vmem [resolvable:$true] %s98_s19 }
   0xe   :  { %101 = dma.hbm_to_vmem [thread:$0]  %s97_s30, 80, %s99_s19, [#allocation11]  }
   0xf   :  { %s122_s20 = sshll.u32 %s13569_s4, 4  ;;  %s144_s23 = sshll.u32 %s14084_s10, 4  ;;  %s123_s20 = int_to_ptr.vmem [resolvable:$true] %s122_s20  ;;  %s145_s23 = int_to_ptr.hbm [resolvable:$true] %s144_s23 }
  0x10   :  { %125 = dma.hbm_to_vmem [thread:$0]  %s121_s17, 288, %s123_s20, [#allocation14]  }
  0x11   :  { %s168_s25 = sshll.u32 %s14086_s12, 4  ;;  %s13570_s26 = smov [#allocation16]   ;;  %s169_s25 = int_to_ptr.hbm [resolvable:$true] %s168_s25 }
  0x12   :  { %s146_s8 = sshll.u32 %s13570_s26, 4  ;;  %s13571_s27 = smov [#allocation19]   ;;  %s147_s8 = int_to_ptr.vmem [resolvable:$true] %s146_s8 }
  0x13   :  { %149 = dma.hbm_to_vmem [thread:$0]  %s145_s23, 32, %s147_s8, [#allocation17]  }
  0x14   :  { %s170_s28 = sshll.u32 %s13571_s27, 4  ;;  %s34_s2 = sshll.u32 %s14075_s1, 4  ;;  %s171_s28 = int_to_ptr.vmem [resolvable:$true] %s170_s28  ;;  %s35_s2 = int_to_ptr.hbm [resolvable:$true] %s34_s2 }
  0x15   :  { %173 = dma.hbm_to_vmem [thread:$0]  %s169_s25, 16, %s171_s28, [#allocation20]  }
  0x16   :  { %s13572_s10 = smov [#allocation2]   ;;  %s58_s12 = sshll.u32 %s14077_s3, 4  ;;  %s59_s12 = int_to_ptr.hbm [resolvable:$true] %s58_s12 }
  0x17   :  { %s36_s16 = sshll.u32 %s13572_s10, 4  ;;  %s13573_s19 = smov 192   ;;  %s37_s16 = int_to_ptr.vmem [resolvable:$true] %s36_s16 }
  0x18   :  { %s13574_s4 = smov 12   ;;  %s13575_s20 = smov [#allocation6]  }
  0x19   :  { %42 = dma.hbm_to_vmem [thread:$0]  %s35_s2, 3456, %s37_s16, [#allocation3], %s13573_s19, %s13573_s19, %s13574_s4  }
  0x1a   :  { %s60_s21 = sshll.u32 %s13575_s20, 4  ;;  %s82_s1 = sshll.u32 %s14079_s5, 4  ;;  %s61_s21 = int_to_ptr.vmem [resolvable:$true] %s60_s21  ;;  %s83_s1 = int_to_ptr.hbm [resolvable:$true] %s82_s1 }
  0x1b   :  { %66 = dma.hbm_to_vmem [thread:$0]  %s59_s12, 9216, %s61_s21, [#allocation5], %s13573_s19, %s13573_s19, %s13574_s4  }
  0x1c   :  { %s13576_s6 = smov [#allocation9]   ;;  %s106_s3 = sshll.u32 %s14081_s7, 4  ;;  %s107_s3 = int_to_ptr.hbm [resolvable:$true] %s106_s3 }
  0x1d   :  { %s84_s24 = sshll.u32 %s13576_s6, 4  ;;  %s13577_s8 = smov 320   ;;  %s85_s24 = int_to_ptr.vmem [resolvable:$true] %s84_s24 }
  0x1e   :  { %s13578_s27 = smov 20   ;;  %s13579_s28 = smov [#allocation12]  }
  0x1f   :  { %90 = dma.hbm_to_vmem [thread:$0]  %s83_s1, 15360, %s85_s24, [#allocation8], %s13577_s8, %s13577_s8, %s13578_s27  }
  0x20   :  { %s108_s29 = sshll.u32 %s13579_s28, 4  ;;  %s13580_s30 = smov 1152   ;;  %s109_s29 = int_to_ptr.vmem [resolvable:$true] %s108_s29 }
  0x21   :  { %s13581_s2 = smov 72   ;;  %s130_s16 = sshll.u32 %s14083_s9, 4  ;;  %s131_s16 = int_to_ptr.hbm [resolvable:$true] %s130_s16 }
  0x22   :  { %114 = dma.hbm_to_vmem [thread:$0]  %s107_s3, 92160, %s109_s29, [#allocation11], %s13580_s30, %s13580_s30, %s13581_s2  }
  0x23   :  { %s13582_s17 = smov [#allocation15]   ;;  %s154_s19 = sshll.u32 %s14085_s11, 4  ;;  %s155_s19 = int_to_ptr.hbm [resolvable:$true] %s154_s19 }
  0x24   :  { %s132_s18 = sshll.u32 %s13582_s17, 4  ;;  %s13583_s4 = smov 128   ;;  %s133_s18 = int_to_ptr.vmem [resolvable:$true] %s132_s18 }
  0x25   :  { %s13584_s20 = smov 8   ;;  %s13585_s21 = smov [#allocation18]  }
  0x26   :  { %138 = dma.hbm_to_vmem [thread:$0]  %s131_s16, 4096, %s133_s18, [#allocation14], %s13583_s4, %s13583_s4, %s13584_s20  }
  0x27   :  { %s156_s22 = sshll.u32 %s13585_s21, 4  ;;  %s13586_s23 = smov 64   ;;  %s157_s22 = int_to_ptr.vmem [resolvable:$true] %s156_s22 }
  0x28   :  { %s13587_s1 = smov 4   ;;  %s178_s24 = sshll.u32 %s14087_s13, 4  ;;  %s179_s24 = int_to_ptr.hbm [resolvable:$true] %s178_s24 }
  0x29   :  { %162 = dma.hbm_to_vmem [thread:$0]  %s155_s19, 2048, %s157_s22, [#allocation17], %s13586_s23, %s13586_s23, %s13587_s1  }
  0x2a   :  { %s13588_s25 = smov [#allocation21]   ;;  %s192_s8 = sshll.u32 %s14088_s14, 4  ;;  %s193_s8 = int_to_ptr.hbm [resolvable:$true] %s192_s8 }
  0x2b   :  { %s180_s26 = sshll.u32 %s13588_s25, 4  ;;  %s13589_s27 = smov [#allocation22]   ;;  %s181_s26 = int_to_ptr.vmem [resolvable:$true] %s180_s26 }
  0x2c   :  { %186 = dma.hbm_to_vmem [thread:$0]  %s179_s24, 1024, %s181_s26, [#allocation20], %s13586_s23, %s13586_s23, %s13587_s1  }
  0x2d   :  { %s194_s28 = sshll.u32 %s13589_s27, 4  ;;  %s195_s28 = int_to_ptr.vmem [resolvable:$true] %s194_s28 }
  0x2e   :  { %197 = dma.hbm_to_vmem [thread:$0]  %s193_s8, 16, %s195_s28, [#allocation23]  }
  0x2f   :  { %13550 = dma.done.wait [#allocation3], 3456  }
  0x30   :  { %13551 = vsyncadd [#allocation3], 4294963840 }
  0x31   :  { %13552 = dma.done.wait [#allocation5], 9264  }
  0x32   :  { %13553 = vsyncadd [#allocation5], 4294958032 }
  0x33   :  { %13554 = dma.done.wait [#allocation8], 15408  }
  0x34   :  { %13555 = vsyncadd [#allocation8], 4294951888 }
  0x35   :  { %13556 = dma.done.wait [#allocation11], 92240  }
  0x36   :  { %13557 = vsyncadd [#allocation11], 4294875056 }
  0x37   :  { %13558 = dma.done.wait [#allocation14], 4384  }
  0x38   :  { %13559 = vsyncadd [#allocation14], 4294962912 }
  0x39   :  { %13560 = dma.done.wait [#allocation17], 2080  }
  0x3a   :  { %13561 = vsyncadd [#allocation17], 4294965216 }
  0x3b   :  { %13562 = dma.done.wait [#allocation20], 1040  }
  0x3c   :  { %13563 = vsyncadd [#allocation20], 4294966256 }
  0x3d   :  { %13564 = dma.done.wait [#allocation23], 16  }
  0x3e   :  { %13565 = vsyncadd [#allocation23], 4294967280  ;;  %v8293_v0 = vld [vmem:[#allocation2 + $0xa8] sm:$0xf]  ;;  %v12212_v1 = vld [vmem:[#allocation2 + $0xb0] sm:$0xf0] }
  0x3f   :  { %v8305_v2 = vld [vmem:[#allocation2 + $0xc0] sm:$0xf]  ;;  %v8294_v3 = vor.u32 %v12212_v1, %v8293_v0  ;;  %v12215_v4 = vld [vmem:[#allocation2 + $0xc8] sm:$0xf0]  ;;  %v8295_v6 = vld [vmem:[#allocation2 + $0xb4] sm:$0xf0] }
  0x40   :  { %v12211_v5 = vld [vmem:[#allocation2 + $0xac] sm:$0xf]  ;;  %v8306_v7 = vor.u32 %v12215_v4, %v8305_v2  ;;  %v8301_v9 = vld [vmem:[#allocation2 + $0xb0] sm:$0xf]  ;;  %v12213_v10 = vld [vmem:[#allocation2 + $0xb8] sm:$0xf0] }
  0x41   :  { %v8298_v8 = vor.u32 %v12211_v5, %v8295_v6  ;;  %v8281_v11 = vld [vmem:[#allocation2 + $0x90] sm:$0xf]  ;;  %451 = vmatpush.bf16.msra.mxu0 %v8294_v3  ;;  %v8302_v12 = vor.u32 %v12213_v10, %v8301_v9  ;;  %v12209_v13 = vld [vmem:[#allocation2 + $0x98] sm:$0xf0]  ;;  %v12208_v14 = vld [vmem:[#allocation2 + $0x94] sm:$0xf] }
  0x42   :  { %v8283_v15 = vld [vmem:[#allocation2 + $0x9c] sm:$0xf0]  ;;  %471 = vmatpush.bf16.msra.mxu1 %v8306_v7  ;;  %v8282_v16 = vor.u32 %v12209_v13, %v8281_v11  ;;  %v8289_v18 = vld [vmem:[#allocation2 + $0x98] sm:$0xf]  ;;  %v12210_v19 = vld [vmem:[#allocation2 + $0xa0] sm:$0xf0] }
  0x43   :  { %477 = vmatpush.bf16.msra.mxu2 %v8298_v8  ;;  %v8286_v17 = vor.u32 %v12208_v14, %v8283_v15  ;;  %v8269_v20 = vld [vmem:[#allocation2 + $0x78] sm:$0xf]  ;;  %v8290_v21 = vor.u32 %v12210_v19, %v8289_v18  ;;  %v12206_v22 = vld [vmem:[#allocation2 + $0x80] sm:$0xf0]  ;;  %v12205_v23 = vld [vmem:[#allocation2 + $0x7c] sm:$0xf] }
  0x44   :  { %v8271_v24 = vld [vmem:[#allocation2 + $0x84] sm:$0xf0]  ;;  %v8277_v25 = vld [vmem:[#allocation2 + $0x80] sm:$0xf]  ;;  %v12207_v26 = vld [vmem:[#allocation2 + $0x88] sm:$0xf0]  ;;  %v8270_v27 = vor.u32 %v12206_v22, %v8269_v20 }
  0x45   :  { %452 = vmatpush.bf16.msra.mxu0 %v8282_v16  ;;  %v8274_v28 = vor.u32 %v12205_v23, %v8271_v24  ;;  %v8257_v29 = vld [vmem:[#allocation2 + $0x60] sm:$0xf]  ;;  %v12203_v30 = vld [vmem:[#allocation2 + $0x68] sm:$0xf0]  ;;  %v8278_v31 = vor.u32 %v12207_v26, %v8277_v25  ;;  %v12202_v32 = vld [vmem:[#allocation2 + $0x64] sm:$0xf] }
  0x46   :  { %503 = vmatpush.bf16.msrb.mxu1 %v8302_v12  ;;  %v8259_v33 = vld [vmem:[#allocation2 + $0x6c] sm:$0xf0]  ;;  %v256_v34 = vld [vmem:[%s14074_s0 + $0x8] sm:$0xff]  ;;  %vm447_vm0 = vcmask 130048   ;;  %v12204_v36 = vld [vmem:[#allocation2 + $0x70] sm:$0xf0]  ;;  %v8258_v38 = vor.u32 %v12203_v30, %v8257_v29 }
  0x47   :  { %478 = vmatpush.bf16.msra.mxu2 %v8286_v17  ;;  %v8265_v35 = vld [vmem:[#allocation2 + $0x68] sm:$0xf]  ;;  %v13715_v37 = vpack.c.bf16 %v256_v34, %v256_v34  ;;  %v8262_v39 = vor.u32 %v12202_v32, %v8259_v33  ;;  %v12200_v41 = vld [vmem:[#allocation2 + $0x50] sm:$0xf0]  ;;  %v12199_v43 = vld [vmem:[#allocation2 + $0x4c] sm:$0xf] }
  0x48   :  { %v8245_v40 = vld [vmem:[#allocation2 + $0x48] sm:$0xf]  ;;  %v8266_v42 = vor.u32 %v12204_v36, %v8265_v35  ;;  %v8247_v44 = vld [vmem:[#allocation2 + $0x54] sm:$0xf0]  ;;  %v8253_v45 = vld [vmem:[#allocation2 + $0x50] sm:$0xf] }
  0x49   :  { %453 = vmatpush.bf16.msra.mxu0 %v8270_v27  ;;  %8315 = vmatmul.msk.bf16.vlgmr.msra.gmra.mxu1 %vm447_vm0, %v13715_v37  ;;  %v12201_v46 = vld [vmem:[#allocation2 + $0x58] sm:$0xf0]  ;;  %v8246_v47 = vor.u32 %v12200_v41, %v8245_v40  ;;  %v8313_v48 = vld [vmem:[#allocation2 + $0xc8] sm:$0xf]  ;;  %v12216_v49 = vld [vmem:[#allocation2 + $0xd0] sm:$0xf0]  ;;  %v8250_v50 = vor.u32 %v12199_v43, %v8247_v44 }
  0x4a   :  { %504 = vmatpush.bf16.msrb.mxu1 %v8290_v21  ;;  %v8233_v51 = vld [vmem:[#allocation2 + $0x30] sm:$0xf]  ;;  %v12197_v52 = vld [vmem:[#allocation2 + $0x38] sm:$0xf0]  ;;  %v8314_v53 = vor.u32 %v12216_v49, %v8313_v48  ;;  %v8254_v54 = vor.u32 %v12201_v46, %v8253_v45  ;;  %v12196_v55 = vld [vmem:[#allocation2 + $0x34] sm:$0xf] }
  0x4b   :  { %479 = vmatpush.bf16.msra.mxu2 %v8274_v28  ;;  %v8235_v56 = vld [vmem:[#allocation2 + $0x3c] sm:$0xf0]  ;;  %v8241_v57 = vld [vmem:[#allocation2 + $0x38] sm:$0xf]  ;;  %v12198_v58 = vld [vmem:[#allocation2 + $0x40] sm:$0xf0]  ;;  %v8234_v60 = vor.u32 %v12197_v52, %v8233_v51 }
  0x4c   :  { %523 = vmatpush.bf16.msra.mxu3 %v8314_v53  ;;  %v8404_v59 = vld [vmem:[#allocation6 + $0xa8] sm:$0xf]  ;;  %v12239_v61 = vld [vmem:[#allocation6 + $0xb0] sm:$0xf0]  ;;  %v8392_v62 = vld [vmem:[#allocation6 + $0x90] sm:$0xf]  ;;  %v8238_v0 = vor.u32 %v12196_v55, %v8235_v56  ;;  %v8242_v4 = vor.u32 %v12198_v58, %v8241_v57 }
  0x4d   :  { %454 = vmatpush.bf16.msra.mxu0 %v8258_v38  ;;  %v12236_v63 = vld [vmem:[#allocation6 + $0x98] sm:$0xf0]  ;;  %v12194_v2 = vld [vmem:[#allocation2 + $0x20] sm:$0xf0]  ;;  %v8405_v3 = vor.u32 %v12239_v61, %v8404_v59  ;;  %v12193_v5 = vld [vmem:[#allocation2 + $0x1c] sm:$0xf] }
  0x4e   :  { %505 = vmatpush.bf16.msrb.mxu1 %v8278_v31  ;;  %v8221_v1 = vld [vmem:[#allocation2 + $0x18] sm:$0xf]  ;;  %v8223_v6 = vld [vmem:[#allocation2 + $0x24] sm:$0xf0]  ;;  %v8229_v7 = vld [vmem:[#allocation2 + $0x20] sm:$0xf]  ;;  %v8393_v9 = vor.u32 %v12236_v63, %v8392_v62 }
  0x4f   :  { %480 = vmatpush.bf16.msra.mxu2 %v8262_v39  ;;  %8317 = vmatmul.msk.bf16.vlgmr.msra.gmra.mxu3 %vm447_vm0, %v13715_v37  ;;  %v12195_v8 = vld [vmem:[#allocation2 + $0x28] sm:$0xf0]  ;;  %v8222_v10 = vor.u32 %v12194_v2, %v8221_v1  ;;  %v8209_v11 = vld [vmem:[#allocation2] sm:$0xf]  ;;  %v8380_v12 = vld [vmem:[#allocation6 + $0x78] sm:$0xf]  ;;  %v8226_v14 = vor.u32 %v12193_v5, %v8223_v6 }
  0x50   :  { %1023 = vmatpush.bf16.msrb.mxu3 %v8405_v3  ;;  %v12233_v13 = vld [vmem:[#allocation6 + $0x80] sm:$0xf0]  ;;  %v12191_v15 = vld [vmem:[#allocation2 + $0x8] sm:$0xf0]  ;;  %v12190_v16 = vld [vmem:[#allocation2 + $0x4] sm:$0xf]  ;;  %v8230_v18 = vor.u32 %v12195_v8, %v8229_v7 }
  0x51   :  { %455 = vmatpush.bf16.msra.mxu0 %v8246_v47  ;;  %v8211_v17 = vld [vmem:[#allocation2 + $0xc] sm:$0xf0]  ;;  %v8217_v19 = vld [vmem:[#allocation2 + $0x8] sm:$0xf]  ;;  %v12214_v20 = vld [vmem:[#allocation2 + $0xc4] sm:$0xf]  ;;  %v8381_v23 = vor.u32 %v12233_v13, %v8380_v12  ;;  %v8210_v26 = vor.u32 %v12191_v15, %v8209_v11 }
  0x52   :  { %506 = vmatpush.bf16.msrb.mxu1 %v8266_v42  ;;  %v8307_v21 = vld [vmem:[#allocation2 + $0xcc] sm:$0xf0]  ;;  %v12192_v22 = vld [vmem:[#allocation2 + $0x10] sm:$0xf0]  ;;  %v8596_v24 = vld [vmem:[#allocation6 + $0x228] sm:$0xf]  ;;  %v8214_v30 = vor.u32 %v12190_v16, %v8211_v17 }
  0x53   :  { %481 = vmatpush.bf16.msra.mxu2 %v8250_v50  ;;  %v12287_v25 = vld [vmem:[#allocation6 + $0x230] sm:$0xf0]  ;;  %v255_v27 = vld [vmem:[%s14074_s0] sm:$0xff]  ;;  %v8368_v28 = vld [vmem:[#allocation6 + $0x60] sm:$0xf]  ;;  %v8310_v31 = vor.u32 %v12214_v20, %v8307_v21  ;;  %v8218_v34 = vor.u32 %v12192_v22, %v8217_v19 }
  0x54   :  { %1024 = vmatpush.bf16.msrb.mxu3 %v8393_v9  ;;  %v12230_v29 = vld [vmem:[#allocation6 + $0x68] sm:$0xf0]  ;;  %v8406_v33 = vld [vmem:[#allocation6 + $0xb4] sm:$0xf0]  ;;  %v8597_v35 = vor.u32 %v12287_v25, %v8596_v24  ;;  %v8500_v36 = vld [vmem:[#allocation6 + $0x168] sm:$0xf]  ;;  %v257_v39 = vpack.c.bf16 %v255_v27, %v255_v27 }
  0x55   :  { %456 = vmatpush.bf16.msra.mxu0 %v8234_v60  ;;  %v12238_v32 = vld [vmem:[#allocation6 + $0xac] sm:$0xf]  ;;  %v12263_v38 = vld [vmem:[#allocation6 + $0x170] sm:$0xf0]  ;;  %v8369_v40 = vor.u32 %v12230_v29, %v8368_v28  ;;  %v8584_v41 = vld [vmem:[#allocation6 + $0x210] sm:$0xf] }
  0x56   :  { %507 = vmatpush.bf16.msrb.mxu1 %v8254_v54  ;;  %v12284_v42 = vld [vmem:[#allocation6 + $0x218] sm:$0xf0]  ;;  %v8409_v43 = vor.u32 %v12238_v32, %v8406_v33  ;;  %v8356_v44 = vld [vmem:[#allocation6 + $0x48] sm:$0xf]  ;;  %v12227_v45 = vld [vmem:[#allocation6 + $0x50] sm:$0xf0]  ;;  %v8501_v48 = vor.u32 %v12263_v38, %v8500_v36 }
  0x57   :  { %482 = vmatpush.bf16.msra.mxu2 %v8238_v0  ;;  %v12235_v46 = vld [vmem:[#allocation6 + $0x94] sm:$0xf]  ;;  %v8394_v47 = vld [vmem:[#allocation6 + $0x9c] sm:$0xf0]  ;;  %v8585_v49 = vor.u32 %v12284_v42, %v8584_v41  ;;  %v8488_v50 = vld [vmem:[#allocation6 + $0x150] sm:$0xf]  ;;  %v8357_v52 = vor.u32 %v12227_v45, %v8356_v44 }
  0x58   :  { %1025 = vmatpush.bf16.msrb.mxu3 %v8381_v23  ;;  %v12260_v51 = vld [vmem:[#allocation6 + $0x158] sm:$0xf0]  ;;  %v8572_v53 = vld [vmem:[#allocation6 + $0x1f8] sm:$0xf]  ;;  %v12281_v54 = vld [vmem:[#allocation6 + $0x200] sm:$0xf0]  ;;  %v8397_v55 = vor.u32 %v12235_v46, %v8394_v47 }
  0x59   :  { %457 = vmatpush.bf16.msra.mxu0 %v8222_v10  ;;  %v8344_v56 = vld [vmem:[#allocation6 + $0x30] sm:$0xf]  ;;  %v12224_v57 = vld [vmem:[#allocation6 + $0x38] sm:$0xf0]  ;;  %v8382_v59 = vld [vmem:[#allocation6 + $0x84] sm:$0xf0]  ;;  %v8489_v60 = vor.u32 %v12260_v51, %v8488_v50  ;;  %v8573_v61 = vor.u32 %v12281_v54, %v8572_v53 }
  0x5a   :  { %508 = vmatpush.bf16.msrb.mxu1 %v8242_v4  ;;  %v12232_v58 = vld [vmem:[#allocation6 + $0x7c] sm:$0xf]  ;;  %v8345_v62 = vor.u32 %v12224_v57, %v8344_v56  ;;  %v8560_v63 = vld [vmem:[#allocation6 + $0x1e0] sm:$0xf]  ;;  %v12278_v0 = vld [vmem:[#allocation6 + $0x1e8] sm:$0xf0] }
  0x5b   :  { %483 = vmatpush.bf16.msra.mxu2 %v8226_v14  ;;  %v8385_v1 = vor.u32 %v12232_v58, %v8382_v59  ;;  %v8332_v2 = vld [vmem:[#allocation6 + $0x18] sm:$0xf]  ;;  %v12221_v3 = vld [vmem:[#allocation6 + $0x20] sm:$0xf0]  ;;  %v8370_v5 = vld [vmem:[#allocation6 + $0x6c] sm:$0xf0]  ;;  %v8561_v6 = vor.u32 %v12278_v0, %v8560_v63 }
  0x5c   :  { %1026 = vmatpush.bf16.msrb.mxu3 %v8369_v40  ;;  %v12229_v4 = vld [vmem:[#allocation6 + $0x64] sm:$0xf]  ;;  %v8333_v7 = vor.u32 %v12221_v3, %v8332_v2  ;;  %v8548_v8 = vld [vmem:[#allocation6 + $0x1c8] sm:$0xf]  ;;  %v12275_v9 = vld [vmem:[#allocation6 + $0x1d0] sm:$0xf0] }
  0x5d   :  { %458 = vmatpush.bf16.msra.mxu0 %v8210_v26  ;;  %v8373_v10 = vor.u32 %v12229_v4, %v8370_v5  ;;  %v8320_v11 = vld [vmem:[#allocation6] sm:$0xf]  ;;  %v12218_v12 = vld [vmem:[#allocation6 + $0x8] sm:$0xf0]  ;;  %v8358_v14 = vld [vmem:[#allocation6 + $0x54] sm:$0xf0]  ;;  %v8549_v17 = vor.u32 %v12275_v9, %v8548_v8 }
  0x5e   :  { %509 = vmatpush.bf16.msrb.mxu1 %v8230_v18  ;;  %v12226_v13 = vld [vmem:[#allocation6 + $0x4c] sm:$0xf]  ;;  %v8502_v16 = vld [vmem:[#allocation6 + $0x174] sm:$0xf0]  ;;  %v8321_v18 = vor.u32 %v12218_v12, %v8320_v11  ;;  %v12223_v21 = vld [vmem:[#allocation6 + $0x34] sm:$0xf] }
  0x5f   :  { %484 = vmatpush.bf16.msra.mxu2 %v8214_v30  ;;  %v12262_v15 = vld [vmem:[#allocation6 + $0x16c] sm:$0xf]  ;;  %v8361_v19 = vor.u32 %v12226_v13, %v8358_v14  ;;  %v8346_v22 = vld [vmem:[#allocation6 + $0x3c] sm:$0xf0]  ;;  %v12259_v23 = vld [vmem:[#allocation6 + $0x154] sm:$0xf] }
  0x60   :  { %459 = vmatmul.bf16.vlgmr.msra.gmra.mxu0 %v257_v39  ;;  %1027 = vmatpush.bf16.msrb.mxu3 %v8357_v52  ;;  %v8505_v20 = vor.u32 %v12262_v15, %v8502_v16  ;;  %v8349_v24 = vor.u32 %v12223_v21, %v8346_v22  ;;  %v8490_v25 = vld [vmem:[#allocation6 + $0x15c] sm:$0xf0]  ;;  %v8536_v26 = vld [vmem:[#allocation6 + $0x1b0] sm:$0xf]  ;;  %v12272_v27 = vld [vmem:[#allocation6 + $0x1b8] sm:$0xf0] }
  0x61   :  { %497 = vmatpush.bf16.msrb.mxu0 %v8310_v31  ;;  %v8493_v28 = vor.u32 %v12259_v23, %v8490_v25  ;;  %v8537_v29 = vor.u32 %v12272_v27, %v8536_v26  ;;  %v8476_v30 = vld [vmem:[#allocation6 + $0x138] sm:$0xf]  ;;  %v12257_v31 = vld [vmem:[#allocation6 + $0x140] sm:$0xf0]  ;;  %v12220_v32 = vld [vmem:[#allocation6 + $0x1c] sm:$0xf] }
  0x62   :  { %510 = vmatpush.bf16.msrb.mxu1 %v8218_v34  ;;  %485 = vmatmul.bf16.vlgmr.msra.gmra.mxu2 %v257_v39  ;;  %v8477_v33 = vor.u32 %v12257_v31, %v8476_v30  ;;  %v8334_v34 = vld [vmem:[#allocation6 + $0x24] sm:$0xf0]  ;;  %v12269_v40 = vld [vmem:[#allocation6 + $0x1a0] sm:$0xf0]  ;;  %v8464_v41 = vld [vmem:[#allocation6 + $0x120] sm:$0xf] }
  0x63   :  { %1049 = vmatpush.bf16.msrb.mxu2 %v8597_v35  ;;  %v12256_v35 = vld [vmem:[#allocation6 + $0x13c] sm:$0xf]  ;;  %v8337_v36 = vor.u32 %v12220_v32, %v8334_v34  ;;  %v12217_v45 = vld [vmem:[#allocation6 + $0x4] sm:$0xf]  ;;  %v8322_v46 = vld [vmem:[#allocation6 + $0xc] sm:$0xf0] }
  0x64   :  { %1028 = vmatpush.bf16.msrb.mxu3 %v8345_v62  ;;  %v12253_v47 = vld [vmem:[#allocation6 + $0x124] sm:$0xf]  ;;  %v8512_v50 = vld [vmem:[#allocation6 + $0x180] sm:$0xf]  ;;  %v12266_v51 = vld [vmem:[#allocation6 + $0x188] sm:$0xf0] }
  0x65   :  { %511 = vmatmul.bf16.vlgmr.msrb.gmra.mxu1 %v257_v39  ;;  %1036 = vmatpush.bf16.msra.mxu0 %v8501_v48  ;;  %v8524_v39 = vld [vmem:[#allocation6 + $0x198] sm:$0xf]  ;;  %v8325_v48 = vor.u32 %v12217_v45, %v8322_v46  ;;  %v8513_v53 = vor.u32 %v12266_v51, %v8512_v50  ;;  %v8508_v54 = vld [vmem:[#allocation6 + $0x170] sm:$0xf]  ;;  %v8452_v56 = vld [vmem:[#allocation6 + $0x108] sm:$0xf] }
  0x66   :  { %1062 = vmatpush.bf16.msra.mxu1 %v8409_v43  ;;  %v8525_v42 = vor.u32 %v12269_v40, %v8524_v39  ;;  %v12254_v43 = vld [vmem:[#allocation6 + $0x128] sm:$0xf0]  ;;  %v12251_v58 = vld [vmem:[#allocation6 + $0x110] sm:$0xf0]  ;;  %v8412_v59 = vld [vmem:[#allocation6 + $0xb0] sm:$0xf] }
  0x67   :  { %1050 = vmatpush.bf16.msrb.mxu2 %v8585_v49  ;;  %v8465_v44 = vor.u32 %v12254_v43, %v8464_v41  ;;  %v8466_v49 = vld [vmem:[#allocation6 + $0x12c] sm:$0xf0]  ;;  %v12250_v63 = vld [vmem:[#allocation6 + $0x10c] sm:$0xf]  ;;  %v8454_v0 = vld [vmem:[#allocation6 + $0x114] sm:$0xf0] }
  0x68   :  { %1029 = vmatpush.bf16.msrb.mxu3 %v8333_v7  ;;  %v8469_v52 = vor.u32 %v12253_v47, %v8466_v49  ;;  %v8457_v2 = vor.u32 %v12250_v63, %v8454_v0  ;;  %v12261_v3 = vld [vmem:[#allocation6 + $0x160] sm:$0xf0]  ;;  %v8440_v4 = vld [vmem:[#allocation6 + $0xf0] sm:$0xf]  ;;  %v12248_v5 = vld [vmem:[#allocation6 + $0xf8] sm:$0xf0] }
  0x69   :  { %1037 = vmatpush.bf16.msra.mxu0 %v8489_v60  ;;  %v12240_v60 = vld [vmem:[#allocation6 + $0xb8] sm:$0xf0]  ;;  %v8441_v7 = vor.u32 %v12248_v5, %v8440_v4  ;;  %v8400_v8 = vld [vmem:[#allocation6 + $0x98] sm:$0xf]  ;;  %v12237_v9 = vld [vmem:[#allocation6 + $0xa0] sm:$0xf0] }
  0x6a   :  { %1063 = vmatpush.bf16.msra.mxu1 %v8397_v55  ;;  %v12264_v55 = vld [vmem:[#allocation6 + $0x178] sm:$0xf0]  ;;  %v8413_v62 = vor.u32 %v12240_v60, %v8412_v59  ;;  %v12247_v11 = vld [vmem:[#allocation6 + $0xf4] sm:$0xf]  ;;  %v8442_v12 = vld [vmem:[#allocation6 + $0xfc] sm:$0xf0] }
  0x6b   :  { %1051 = vmatpush.bf16.msrb.mxu2 %v8573_v61  ;;  %v8509_v57 = vor.u32 %v12264_v55, %v8508_v54  ;;  %v8453_v61 = vor.u32 %v12251_v58, %v8452_v56  ;;  %v8445_v13 = vor.u32 %v12247_v11, %v8442_v12  ;;  %v8484_v14 = vld [vmem:[#allocation6 + $0x140] sm:$0xf]  ;;  %v12258_v15 = vld [vmem:[#allocation6 + $0x148] sm:$0xf0]  ;;  %v12244_v23 = vld [vmem:[#allocation6 + $0xdc] sm:$0xf] }
  0x6c   :  { %1030 = vmatpush.bf16.msrb.mxu3 %v8321_v18  ;;  %v8485_v16 = vor.u32 %v12258_v15, %v8484_v14  ;;  %v12245_v18 = vld [vmem:[#allocation6 + $0xe0] sm:$0xf0]  ;;  %v12234_v21 = vld [vmem:[#allocation6 + $0x88] sm:$0xf0]  ;;  %v8472_v26 = vld [vmem:[#allocation6 + $0x128] sm:$0xf] }
  0x6d   :  { %1038 = vmatpush.bf16.msra.mxu0 %v8477_v33  ;;  %v12255_v27 = vld [vmem:[#allocation6 + $0x130] sm:$0xf0]  ;;  %v12242_v30 = vld [vmem:[#allocation6 + $0xc8] sm:$0xf0]  ;;  %v8376_v31 = vld [vmem:[#allocation6 + $0x68] sm:$0xf] }
  0x6e   :  { %1064 = vmatpush.bf16.msra.mxu1 %v8385_v1  ;;  %v8496_v1 = vld [vmem:[#allocation6 + $0x158] sm:$0xf]  ;;  %v12231_v33 = vld [vmem:[#allocation6 + $0x70] sm:$0xf0]  ;;  %v12286_v34 = vld [vmem:[#allocation6 + $0x22c] sm:$0xf] }
  0x6f   :  { %1052 = vmatpush.bf16.msrb.mxu2 %v8561_v6  ;;  %v8497_v6 = vor.u32 %v12261_v3, %v8496_v1  ;;  %v8418_v39 = vld [vmem:[#allocation6 + $0xcc] sm:$0xf0]  ;;  %v12228_v46 = vld [vmem:[#allocation6 + $0x58] sm:$0xf0]  ;;  %v12283_v47 = vld [vmem:[#allocation6 + $0x214] sm:$0xf] }
  0x70   :  { %8316 = vmatmul.msk.bf16.vlgmr.msrb.gmra.mxu0 %vm447_vm0, %v13715_v37  ;;  %1075 = vmatpush.bf16.msra.mxu3 %v8505_v20  ;;  %v8478_v37 = vld [vmem:[#allocation6 + $0x144] sm:$0xf0]  ;;  %v8388_v20 = vld [vmem:[#allocation6 + $0x80] sm:$0xf]  ;;  %v8460_v41 = vld [vmem:[#allocation6 + $0x110] sm:$0xf] }
  0x71   :  { %v8481_v38 = vor.u32 %v12256_v35, %v8478_v37  ;;  %1039 = vmatpush.bf16.msra.mxu0 %v8465_v44  ;;  %v8389_v22 = vor.u32 %v12234_v21, %v8388_v20  ;;  %v8598_v35 = vld [vmem:[#allocation6 + $0x234] sm:$0xf0]  ;;  %v8377_v37 = vor.u32 %v12231_v33, %v8376_v31  ;;  %v8364_v44 = vld [vmem:[#allocation6 + $0x50] sm:$0xf]  ;;  %v12225_v55 = vld [vmem:[#allocation6 + $0x40] sm:$0xf0] }
  0x72   :  { %1065 = vmatpush.bf16.msra.mxu1 %v8373_v10  ;;  %v8401_v10 = vor.u32 %v12237_v9, %v8400_v8  ;;  %v8365_v49 = vor.u32 %v12228_v46, %v8364_v44  ;;  %v8448_v51 = vld [vmem:[#allocation6 + $0xf8] sm:$0xf]  ;;  %v8574_v58 = vld [vmem:[#allocation6 + $0x204] sm:$0xf0]  ;;  %v8436_v60 = vld [vmem:[#allocation6 + $0xe0] sm:$0xf] }
  0x73   :  { %1053 = vmatpush.bf16.msrb.mxu2 %v8549_v17  ;;  %v8428_v17 = vld [vmem:[#allocation6 + $0xd8] sm:$0xf]  ;;  %v8340_v63 = vld [vmem:[#allocation6 + $0x20] sm:$0xf]  ;;  %v12222_v0 = vld [vmem:[#allocation6 + $0x28] sm:$0xf0] }
  0x74   :  { %1076 = vmatpush.bf16.msra.mxu3 %v8493_v28  ;;  %v8473_v28 = vor.u32 %v12255_v27, %v8472_v26  ;;  %v8352_v54 = vld [vmem:[#allocation6 + $0x38] sm:$0xf]  ;;  %v12277_v3 = vld [vmem:[#allocation6 + $0x1e4] sm:$0xf]  ;;  %v8562_v4 = vld [vmem:[#allocation6 + $0x1ec] sm:$0xf0] }
  0x75   :  { %1040 = vmatpush.bf16.msra.mxu0 %v8453_v61  ;;  %v8353_v56 = vor.u32 %v12225_v55, %v8352_v54  ;;  %v12246_v61 = vld [vmem:[#allocation6 + $0xe8] sm:$0xf0]  ;;  %v8565_v5 = vor.u32 %v12277_v3, %v8562_v4  ;;  %v8328_v9 = vld [vmem:[#allocation6 + $0x8] sm:$0xf]  ;;  %v12268_v21 = vld [vmem:[#allocation6 + $0x19c] sm:$0xf] }
  0x76   :  { %1066 = vmatpush.bf16.msra.mxu1 %v8361_v19  ;;  %v8429_v19 = vor.u32 %v12245_v18, %v8428_v17  ;;  %v12274_v12 = vld [vmem:[#allocation6 + $0x1cc] sm:$0xf]  ;;  %v12271_v17 = vld [vmem:[#allocation6 + $0x1b4] sm:$0xf]  ;;  %v8538_v18 = vld [vmem:[#allocation6 + $0x1bc] sm:$0xf0] }
  0x77   :  { %1054 = vmatpush.bf16.msrb.mxu2 %v8537_v29  ;;  %v8416_v29 = vld [vmem:[#allocation6 + $0xc0] sm:$0xf]  ;;  %v8604_v33 = vld [vmem:[#allocation6 + $0x230] sm:$0xf]  ;;  %v8568_v54 = vld [vmem:[#allocation6 + $0x1e8] sm:$0xf] }
  0x78   :  { %1077 = vmatpush.bf16.msra.mxu3 %v8481_v38  ;;  %v8417_v32 = vor.u32 %v12242_v30, %v8416_v29  ;;  %v12241_v38 = vld [vmem:[#allocation6 + $0xc4] sm:$0xf]  ;;  %v8514_v30 = vld [vmem:[#allocation6 + $0x18c] sm:$0xf0]  ;;  %v12279_v55 = vld [vmem:[#allocation6 + $0x1f0] sm:$0xf0] }
  0x79   :  { %1041 = vmatpush.bf16.msra.mxu0 %v8441_v7  ;;  %v8421_v40 = vor.u32 %v12241_v38, %v8418_v39  ;;  %v12243_v7 = vld [vmem:[#allocation6 + $0xd0] sm:$0xf0]  ;;  %v12265_v29 = vld [vmem:[#allocation6 + $0x184] sm:$0xf] }
  0x7a   :  { %1067 = vmatpush.bf16.msra.mxu1 %v8349_v24  ;;  %v8430_v24 = vld [vmem:[#allocation6 + $0xe4] sm:$0xf0] }
  0x7b   :  { %1055 = vmatpush.bf16.msrb.mxu2 %v8525_v42  ;;  %v8433_v25 = vor.u32 %v12244_v23, %v8430_v24  ;;  %v12252_v42 = vld [vmem:[#allocation6 + $0x118] sm:$0xf0] }
  0x7c   :  { %1078 = vmatpush.bf16.msra.mxu3 %v8469_v52  ;;  %v8461_v43 = vor.u32 %v12252_v42, %v8460_v41  ;;  %v12249_v52 = vld [vmem:[#allocation6 + $0x100] sm:$0xf0]  ;;  %v8592_v42 = vld [vmem:[#allocation6 + $0x218] sm:$0xf] }
  0x7d   :  { %1042 = vmatpush.bf16.msra.mxu0 %v8429_v19  ;;  %v8541_v19 = vor.u32 %v12271_v17, %v8538_v18  ;;  %v8532_v18 = vld [vmem:[#allocation6 + $0x1a0] sm:$0xf] }
  0x7e   :  { %1068 = vmatpush.bf16.msra.mxu1 %v8337_v36  ;;  %v8601_v36 = vor.u32 %v12286_v34, %v8598_v35  ;;  %v12288_v34 = vld [vmem:[#allocation6 + $0x238] sm:$0xf0]  ;;  %v8517_v35 = vor.u32 %v12265_v29, %v8514_v30  ;;  %v8520_v30 = vld [vmem:[#allocation6 + $0x188] sm:$0xf] }
  0x7f   :  { %1056 = vmatpush.bf16.msrb.mxu2 %v8513_v53  ;;  %v8449_v53 = vor.u32 %v12249_v52, %v8448_v51  ;;  %v8605_v38 = vor.u32 %v12288_v34, %v8604_v33  ;;  %v12351_v33 = vld [vmem:[#allocation9 + $0x1f0] sm:$0xf0]  ;;  %v9048_v34 = vld [vmem:[#allocation9 + $0x370] sm:$0xf] }
  0x80   :  { %1079 = vmatpush.bf16.msra.mxu3 %v8457_v2  ;;  %v8341_v2 = vor.u32 %v12222_v0, %v8340_v63  ;;  %v8908_v0 = vld [vmem:[#allocation9 + $0x258] sm:$0xf] }
  0x81   :  { %1043 = vmatpush.bf16.msra.mxu0 %v8417_v32 }
  0x82   :  { %1069 = vmatpush.bf16.msra.mxu1 %v8325_v48  ;;  %v8586_v48 = vld [vmem:[#allocation6 + $0x21c] sm:$0xf0] }
  0x83   :  { %1101 = vmatpush.bf16.msra.mxu2 %v8413_v62  ;;  %v8589_v50 = vor.u32 %v12283_v47, %v8586_v48  ;;  %v8437_v62 = vor.u32 %v12246_v61, %v8436_v60  ;;  %v8569_v60 = vor.u32 %v12279_v55, %v8568_v54  ;;  %v8556_v61 = vld [vmem:[#allocation6 + $0x1d0] sm:$0xf]  ;;  %v12301_v54 = vld [vmem:[#allocation9 + $0x60] sm:$0xf0] }
  0x84   :  { %1080 = vmatpush.bf16.msra.mxu3 %v8445_v13  ;;  %v8550_v13 = vld [vmem:[#allocation6 + $0x1d4] sm:$0xf0] }
  0x85   :  { %1088 = vmatpush.bf16.msrb.mxu0 %v8601_v36  ;;  %v8553_v14 = vor.u32 %v12274_v12, %v8550_v13 }
  0x86   :  { %1114 = vmatpush.bf16.msrb.mxu1 %v8509_v57  ;;  %v12280_v57 = vld [vmem:[#allocation6 + $0x1fc] sm:$0xf] }
  0x87   :  { %1102 = vmatpush.bf16.msra.mxu2 %v8401_v10  ;;  %v8577_v59 = vor.u32 %v12280_v57, %v8574_v58  ;;  %v12219_v10 = vld [vmem:[#allocation6 + $0x10] sm:$0xf0]  ;;  %v8748_v58 = vld [vmem:[#allocation9 + $0x118] sm:$0xf] }
  0x88   :  { %1081 = vmatpush.bf16.msra.mxu3 %v8433_v25  ;;  %v8329_v11 = vor.u32 %v12219_v10, %v8328_v9  ;;  %v12273_v9 = vld [vmem:[#allocation6 + $0x1c0] sm:$0xf0]  ;;  %v8888_v10 = vld [vmem:[#allocation9 + $0x230] sm:$0xf] }
  0x89   :  { %1089 = vmatpush.bf16.msrb.mxu0 %v8589_v50  ;;  %v12282_v50 = vld [vmem:[#allocation6 + $0x208] sm:$0xf0] }
  0x8a   :  { %1115 = vmatpush.bf16.msrb.mxu1 %v8497_v6  ;;  %v8424_v6 = vld [vmem:[#allocation6 + $0xc8] sm:$0xf] }
  0x8b   :  { %1103 = vmatpush.bf16.msra.mxu2 %v8389_v22  ;;  %v8425_v8 = vor.u32 %v12243_v7, %v8424_v6  ;;  %v8526_v22 = vld [vmem:[#allocation6 + $0x1a4] sm:$0xf0] }
  0x8c   :  { %1082 = vmatpush.bf16.msra.mxu3 %v8421_v40  ;;  %v8529_v24 = vor.u32 %v12268_v21, %v8526_v22  ;;  %v12321_v6 = vld [vmem:[#allocation9 + $0x100] sm:$0xf0]  ;;  %v12356_v21 = vld [vmem:[#allocation9 + $0x218] sm:$0xf0]  ;;  %v9068_v22 = vld [vmem:[#allocation9 + $0x398] sm:$0xf] }
  0x8d   :  { %1090 = vmatpush.bf16.msrb.mxu0 %v8577_v59  ;;  %v12326_v59 = vld [vmem:[#allocation9 + $0x128] sm:$0xf0] }
  0x8e   :  { %1116 = vmatpush.bf16.msrb.mxu1 %v8485_v16  ;;  %v295_v16 = vld [vmem:[#allocation4] sm:$0x7] }
  0x8f   :  { %1104 = vmatpush.bf16.msra.mxu2 %v8377_v37  ;;  %v297_v20 = vperm.slane %v295_v16, 0  ;;  %v299_v23 = vperm.slane %v295_v16, 2  ;;  %v298_v47 = vperm.slane %v295_v16, 1  ;;  %v12316_v16 = vld [vmem:[#allocation9 + $0xd8] sm:$0xf0] }
  0x91   :  { %1091 = vmatpush.bf16.msrb.mxu0 %v8565_v5  ;;  %v8728_v5 = vld [vmem:[#allocation9 + $0xf0] sm:$0xf] }
  0x92   :  { %1117 = vmatpush.bf16.msrb.mxu1 %v8473_v28  ;;  %v8729_v13 = vor.u32 %v12321_v6, %v8728_v5  ;;  %v12309_v6 = vld [vmem:[#allocation9 + $0xa4] sm:$0xf] }
  0x93   :  { %1105 = vmatpush.bf16.msra.mxu2 %v8365_v49  ;;  %v8580_v49 = vld [vmem:[#allocation6 + $0x200] sm:$0xf] }
  0x94   :  { %v8581_v52 = vor.u32 %v12282_v50, %v8580_v49  ;;  %v12346_v50 = vld [vmem:[#allocation9 + $0x1c8] sm:$0xf0] }
  0x95   :  { %1092 = vmatpush.bf16.msrb.mxu0 %v8553_v14 }
  0x96   :  { %1118 = vmatpush.bf16.msrb.mxu1 %v8461_v43  ;;  %v12285_v43 = vld [vmem:[#allocation6 + $0x220] sm:$0xf0] }
  0x97   :  { %1106 = vmatpush.bf16.msra.mxu2 %v8353_v56  ;;  %v8593_v48 = vor.u32 %v12285_v43, %v8592_v42 }
  0x99   :  { %1093 = vmatpush.bf16.msrb.mxu0 %v8541_v19  ;;  %v12270_v19 = vld [vmem:[#allocation6 + $0x1a8] sm:$0xf0] }
  0x9a   :  { %1119 = vmatpush.bf16.msrb.mxu1 %v8449_v53  ;;  %v8533_v29 = vor.u32 %v12270_v19, %v8532_v18  ;;  %v8890_v18 = vld [vmem:[#allocation9 + $0x244] sm:$0xf0] }
  0x9b   :  { %1107 = vmatpush.bf16.msra.mxu2 %v8341_v2  ;;  %v8749_v2 = vor.u32 %v12326_v59, %v8748_v58  ;;  %v12341_v58 = vld [vmem:[#allocation9 + $0x1a0] sm:$0xf0] }
  0x9d   :  { %1094 = vmatpush.bf16.msrb.mxu0 %v8529_v24 }
  0x9e   :  { %1120 = vmatpush.bf16.msrb.mxu1 %v8437_v62  ;;  %v12276_v62 = vld [vmem:[#allocation6 + $0x1d8] sm:$0xf0] }
  0x9f   :  { %1108 = vmatpush.bf16.msra.mxu2 %v8329_v11  ;;  %v8557_v7 = vor.u32 %v12276_v62, %v8556_v61  ;;  %v12361_v11 = vld [vmem:[#allocation9 + $0x240] sm:$0xf0]  ;;  %v12391_v61 = vld [vmem:[#allocation9 + $0x330] sm:$0xf0]  ;;  %v12314_v62 = vld [vmem:[#allocation9 + $0xcc] sm:$0xf] }
  0xa0   :  { %v8889_v14 = vor.u32 %v12361_v11, %v8888_v10  ;;  %v12291_v10 = vld [vmem:[#allocation9 + $0x10] sm:$0xf0]  ;;  %v12364_v11 = vld [vmem:[#allocation9 + $0x25c] sm:$0xf] }
  0xa1   :  { %1095 = vmatpush.bf16.msrb.mxu0 %v8517_v35  ;;  %v12324_v35 = vld [vmem:[#allocation9 + $0x11c] sm:$0xf] }
  0xa2   :  { %1121 = vmatpush.bf16.msrb.mxu1 %v8425_v8  ;;  %v8544_v8 = vld [vmem:[#allocation6 + $0x1b8] sm:$0xf] }
  0xa3   :  { %v8545_v17 = vor.u32 %v12273_v9, %v8544_v8  ;;  %v8608_v9 = vld [vmem:[#allocation9] sm:$0xf] }
  0xc6   :  { %v13726_v45 = vpop.f32.mrf.mxu1 }
  0xce   :  { %v475_v1 = vpop.f32.mrf.mxu1 }
  0xcf   :  { %v12366_v1 = vld [vmem:[#allocation9 + $0x268] sm:$0xf0] }
  0xd0   :  { %v8909_v3 = vor.u32 %v12366_v1, %v8908_v0 }
  0xd2   :  { %v525_v15 = vpop.f32.mrf.mxu3 }
  0xda   :  { %v527_v27 = vpop.f32.mrf.mxu3 }
  0xdb   :  { %v12311_v27 = vld [vmem:[#allocation9 + $0xb0] sm:$0xf0] }
  0xdd   :  { %v460_v25 = vpop.f32.mrf.mxu0 }
  0xde   :  { %v461_v26 = vadd.f32 %v460_v25, %v297_v20  ;;  %v8868_v20 = vld [vmem:[#allocation9 + $0x208] sm:$0xf]  ;;  %v12406_v25 = vld [vmem:[#allocation9 + $0x3a8] sm:$0xf0] }
  0xdf   :  { %v8869_v24 = vor.u32 %v12356_v21, %v8868_v20  ;;  %v12299_v20 = vld [vmem:[#allocation9 + $0x54] sm:$0xf]  ;;  %v8650_v21 = vld [vmem:[#allocation9 + $0x64] sm:$0xf0] }
  0xe0   :  { %v474_v31 = vadd.f32 %v13726_v45, %v461_v26  ;;  %v8688_v26 = vld [vmem:[#allocation9 + $0xa0] sm:$0xf] }
  0xe2   :  { %v512_v28 = vpop.f32.mrf.mxu1  ;;  %v529_v37 = vmax.f32 %v474_v31, 0.0  ;;  %v12267_v31 = vld [vmem:[#allocation6 + $0x190] sm:$0xf0] }
  0xe3   :  { %v513_v32 = vadd.f32 %v512_v28, %v299_v23  ;;  %v9069_v28 = vor.u32 %v12406_v25, %v9068_v22  ;;  %v8521_v43 = vor.u32 %v12267_v31, %v8520_v30  ;;  %v8630_v25 = vld [vmem:[#allocation9 + $0x3c] sm:$0xf0]  ;;  %v12367_v30 = vld [vmem:[#allocation9 + $0x270] sm:$0xf0] }
  0xe4   :  { %v532_v39 = vpack.c.bf16 %v529_v37, %v529_v37  ;;  %v8750_v37 = vld [vmem:[#allocation9 + $0x12c] sm:$0xf0] }
  0xe5   :  { %v526_v36 = vadd.f32 %v525_v15, %v513_v32  ;;  %v486_v41 = vpop.f32.mrf.mxu2  ;;  %v462_v44 = vpop.f32.mrf.mxu0  ;;  %v8708_v15 = vld [vmem:[#allocation9 + $0xc8] sm:$0xf]  ;;  %v8848_v32 = vld [vmem:[#allocation9 + $0x1e0] sm:$0xf] }
  0xe6   :  { %1031 = vmatmul.bf16.vlgmr.msrb.gmra.mxu3 %v532_v39  ;;  %1070 = vmatmul.bf16.vlgmr.msra.gmra.mxu1 %v532_v39  ;;  %v487_v51 = vadd.f32 %v486_v41, %v298_v47  ;;  %v8709_v23 = vor.u32 %v12316_v16, %v8708_v15  ;;  %v12306_v41 = vld [vmem:[#allocation9 + $0x88] sm:$0xf0]  ;;  %v8753_v44 = vor.u32 %v12324_v35, %v8750_v37  ;;  %v12319_v47 = vld [vmem:[#allocation9 + $0xf4] sm:$0xf] }
  0xe7   :  { %v531_v40 = vmax.f32 %v526_v36, 0.0  ;;  %1127 = vmatpush.bf16.msrb.mxu3 %v8605_v38  ;;  %1952 = vmatpush.bf16.msra.mxu1 %v9069_v28  ;;  %v8689_v36 = vor.u32 %v12311_v27, %v8688_v26  ;;  %v8849_v38 = vor.u32 %v12351_v33, %v8848_v32  ;;  %v8609_v15 = vor.u32 %v12291_v10, %v8608_v9  ;;  %v12289_v27 = vld [vmem:[#allocation9 + $0x4] sm:$0xf]  ;;  %v8610_v28 = vld [vmem:[#allocation9 + $0x14] sm:$0xf0] }
  0xe8   :  { %v8613_v31 = vor.u32 %v12289_v27, %v8610_v28  ;;  %v8896_v33 = vld [vmem:[#allocation9 + $0x238] sm:$0xf]  ;;  %v12354_v37 = vld [vmem:[#allocation9 + $0x20c] sm:$0xf]  ;;  %v12399_v9 = vld [vmem:[#allocation9 + $0x374] sm:$0xf] }
  0xe9   :  { %v13729_v46 = vpack.c.bf16 %v531_v40, %v531_v40  ;;  %v8668_v40 = vld [vmem:[#allocation9 + $0x78] sm:$0xf]  ;;  %v9050_v10 = vld [vmem:[#allocation9 + $0x384] sm:$0xf0]  ;;  %v8790_v27 = vld [vmem:[#allocation9 + $0x17c] sm:$0xf0] }
  0xea   :  { %v514_v45 = vpop.f32.mrf.mxu1  ;;  %v8669_v49 = vor.u32 %v12306_v41, %v8668_v40  ;;  %v12336_v40 = vld [vmem:[#allocation9 + $0x178] sm:$0xf0]  ;;  %v8988_v41 = vld [vmem:[#allocation9 + $0x2f8] sm:$0xf] }
  0xeb   :  { %1057 = vmatmul.bf16.vlgmr.msrb.gmra.mxu2 %v13729_v46  ;;  %1128 = vmatpush.bf16.msrb.mxu3 %v8593_v48  ;;  %v8730_v45 = vld [vmem:[#allocation9 + $0x104] sm:$0xf0]  ;;  %v8828_v48 = vld [vmem:[#allocation9 + $0x1b8] sm:$0xf] }
  0xec   :  { %1939 = vmatpush.bf16.msrb.mxu2 %v8909_v3  ;;  %v8829_v55 = vor.u32 %v12346_v50, %v8828_v48  ;;  %v8733_v59 = vor.u32 %v12319_v47, %v8730_v45  ;;  %v12296_v3 = vld [vmem:[#allocation9 + $0x38] sm:$0xf0]  ;;  %v12357_v47 = vld [vmem:[#allocation9 + $0x220] sm:$0xf0]  ;;  %v8850_v50 = vld [vmem:[#allocation9 + $0x1f4] sm:$0xf0] }
  0xed   :  { %v488_v53 = vpop.f32.mrf.mxu2  ;;  %v499_v56 = vpop.f32.mrf.mxu0 }
  0xee   :  { %v500_v57 = vadd.f32 %v499_v56, %v487_v51  ;;  %v9028_v51 = vld [vmem:[#allocation9 + $0x348] sm:$0xf]  ;;  %v8648_v53 = vld [vmem:[#allocation9 + $0x50] sm:$0xf] }
  0xef   :  { %1129 = vmatpush.bf16.msrb.mxu3 %v8581_v52  ;;  %v12396_v52 = vld [vmem:[#allocation9 + $0x358] sm:$0xf0]  ;;  %v8649_v0 = vor.u32 %v12301_v54, %v8648_v53  ;;  %v12331_v53 = vld [vmem:[#allocation9 + $0x150] sm:$0xf0]  ;;  %v8968_v54 = vld [vmem:[#allocation9 + $0x2d0] sm:$0xf] }
  0xf0   :  { %v530_v63 = vmax.f32 %v500_v57, 0.0  ;;  %1940 = vmatpush.bf16.msrb.mxu2 %v8889_v14  ;;  %v9029_v56 = vor.u32 %v12396_v52, %v9028_v51  ;;  %v8808_v57 = vld [vmem:[#allocation9 + $0x190] sm:$0xf]  ;;  %v12304_v14 = vld [vmem:[#allocation9 + $0x7c] sm:$0xf] }
  0xf1   :  { %v8809_v1 = vor.u32 %v12341_v58, %v8808_v57  ;;  %v8768_v52 = vld [vmem:[#allocation9 + $0x140] sm:$0xf]  ;;  %v8856_v57 = vld [vmem:[#allocation9 + $0x1e8] sm:$0xf]  ;;  %v12352_v58 = vld [vmem:[#allocation9 + $0x1f8] sm:$0xf0] }
  0xf2   :  { %v533_v4 = vpack.c.bf16 %v530_v63, %v530_v63  ;;  %v8710_v63 = vld [vmem:[#allocation9 + $0xdc] sm:$0xf0] }
  0xf3   :  { %1130 = vmatpush.bf16.msrb.mxu3 %v8569_v60  ;;  %v9008_v60 = vld [vmem:[#allocation9 + $0x320] sm:$0xf]  ;;  %v8713_v5 = vor.u32 %v12314_v62, %v8710_v63  ;;  %v9070_v62 = vld [vmem:[#allocation9 + $0x3ac] sm:$0xf0] }
  0xf4   :  { %1044 = vmatmul.bf16.vlgmr.msra.gmra.mxu0 %v533_v4  ;;  %1941 = vmatpush.bf16.msrb.mxu2 %v8869_v24  ;;  %v12294_v24 = vld [vmem:[#allocation9 + $0x2c] sm:$0xf] }
  0xf5   :  { %v501_v12 = vpop.f32.mrf.mxu0  ;;  %1926 = vmatpush.bf16.msra.mxu0 %v8749_v2  ;;  %v8628_v2 = vld [vmem:[#allocation9 + $0x28] sm:$0xf]  ;;  %v8633_v26 = vor.u32 %v12294_v24, %v8630_v25  ;;  %v12327_v24 = vld [vmem:[#allocation9 + $0x130] sm:$0xf0] }
  0xf6   :  { %1083 = vmatmul.bf16.vlgmr.msra.gmra.mxu3 %v533_v4  ;;  %1122 = vmatmul.bf16.vlgmr.msrb.gmra.mxu1 %v533_v4  ;;  %v9009_v4 = vor.u32 %v12391_v61, %v9008_v60  ;;  %v8629_v8 = vor.u32 %v12296_v3, %v8628_v2  ;;  %v8910_v12 = vld [vmem:[#allocation9 + $0x26c] sm:$0xf0]  ;;  %v8857_v60 = vor.u32 %v12352_v58, %v8856_v57  ;;  %v12404_v61 = vld [vmem:[#allocation9 + $0x39c] sm:$0xf]  ;;  %v8948_v2 = vld [vmem:[#allocation9 + $0x2a8] sm:$0xf] }
  0xf7   :  { %1131 = vmatpush.bf16.msrb.mxu3 %v8557_v7  ;;  %v8690_v7 = vld [vmem:[#allocation9 + $0xb4] sm:$0xf0]  ;;  %v8913_v16 = vor.u32 %v12364_v11, %v8910_v12  ;;  %v9073_v63 = vor.u32 %v12404_v61, %v9070_v62  ;;  %v9053_v11 = vor.u32 %v12399_v9, %v9050_v10  ;;  %v12339_v12 = vld [vmem:[#allocation9 + $0x194] sm:$0xf]  ;;  %v12374_v57 = vld [vmem:[#allocation9 + $0x2ac] sm:$0xf] }
  0xf8   :  { %1942 = vmatpush.bf16.msrb.mxu2 %v8849_v38  ;;  %v8950_v58 = vld [vmem:[#allocation9 + $0x2bc] sm:$0xf0]  ;;  %v12307_v61 = vld [vmem:[#allocation9 + $0x90] sm:$0xf0]  ;;  %v13734_v10 = vld [vmem:[#allocation7] sm:$0x7] }
  0xf9   :  { %1927 = vmatpush.bf16.msra.mxu0 %v8729_v13  ;;  %v8693_v13 = vor.u32 %v12309_v6, %v8690_v7  ;;  %v12347_v6 = vld [vmem:[#allocation9 + $0x1d0] sm:$0xf0] }
  0xfb   :  { %1109 = vmatmul.bf16.vlgmr.msra.gmra.mxu2 %v532_v39  ;;  %1132 = vmatpush.bf16.msrb.mxu3 %v8545_v17  ;;  %v12401_v39 = vld [vmem:[#allocation9 + $0x380] sm:$0xf0]  ;;  %v12359_v17 = vld [vmem:[#allocation9 + $0x234] sm:$0xf] }
  0xfc   :  { %v9049_v42 = vor.u32 %v12401_v39, %v9048_v34  ;;  %1943 = vmatpush.bf16.msrb.mxu2 %v8829_v55  ;;  %v8893_v22 = vor.u32 %v12359_v17, %v8890_v18  ;;  %v12362_v34 = vld [vmem:[#allocation9 + $0x248] sm:$0xf0]  ;;  %v8788_v39 = vld [vmem:[#allocation9 + $0x168] sm:$0xf]  ;;  %v8769_v55 = vor.u32 %v12331_v53, %v8768_v52 }
  0xfd   :  { %1928 = vmatpush.bf16.msra.mxu0 %v8709_v23  ;;  %v8653_v23 = vor.u32 %v12299_v20, %v8650_v21  ;;  %v8897_v35 = vor.u32 %v12362_v34, %v8896_v33  ;;  %v12342_v18 = vld [vmem:[#allocation9 + $0x1a8] sm:$0xf0]  ;;  %v9030_v20 = vld [vmem:[#allocation9 + $0x35c] sm:$0xf0]  ;;  %v9010_v33 = vld [vmem:[#allocation9 + $0x334] sm:$0xf0] }
  0xfe   :  { %1953 = vmatpush.bf16.msra.mxu1 %v9049_v42  ;;  %v8789_v42 = vor.u32 %v12336_v40, %v8788_v39  ;;  %v8736_v34 = vld [vmem:[#allocation9 + $0xf8] sm:$0xf]  ;;  %v8970_v52 = vld [vmem:[#allocation9 + $0x2e4] sm:$0xf0] }
  0xff   :  { %1133 = vmatpush.bf16.msrb.mxu3 %v8533_v29  ;;  %v8916_v29 = vld [vmem:[#allocation9 + $0x260] sm:$0xf]  ;;  %v8770_v39 = vld [vmem:[#allocation9 + $0x154] sm:$0xf0]  ;;  %v8696_v53 = vld [vmem:[#allocation9 + $0xa8] sm:$0xf] }
 0x100   :  { %1944 = vmatpush.bf16.msrb.mxu2 %v8809_v1  ;;  %v8917_v32 = vor.u32 %v12367_v30, %v8916_v29  ;;  %v8830_v1 = vld [vmem:[#allocation9 + $0x1cc] sm:$0xf0]  ;;  %v12337_v30 = vld [vmem:[#allocation9 + $0x180] sm:$0xf0] }
 0x101   :  { %1929 = vmatpush.bf16.msra.mxu0 %v8689_v36  ;;  %v8870_v36 = vld [vmem:[#allocation9 + $0x21c] sm:$0xf0]  ;;  %v8796_v29 = vld [vmem:[#allocation9 + $0x170] sm:$0xf] }
 0x102   :  { %1954 = vmatpush.bf16.msra.mxu1 %v9029_v56  ;;  %v8873_v38 = vor.u32 %v12354_v37, %v8870_v36  ;;  %v12381_v56 = vld [vmem:[#allocation9 + $0x2e0] sm:$0xf0]  ;;  %v12322_v37 = vld [vmem:[#allocation9 + $0x108] sm:$0xf0] }
 0x103   :  { %1134 = vmatpush.bf16.msrb.mxu3 %v8521_v43  ;;  %v12386_v43 = vld [vmem:[#allocation9 + $0x308] sm:$0xf0]  ;;  %v8737_v36 = vor.u32 %v12322_v37, %v8736_v34  ;;  %v9058_v34 = vld [vmem:[#allocation9 + $0x38c] sm:$0xf0] }
 0x104   :  { %1096 = vmatmul.bf16.vlgmr.msrb.gmra.mxu0 %v13729_v46  ;;  %v8989_v45 = vor.u32 %v12386_v43, %v8988_v41  ;;  %1945 = vmatpush.bf16.msrb.mxu2 %v8789_v42  ;;  %v8776_v41 = vld [vmem:[#allocation9 + $0x148] sm:$0xf]  ;;  %v12332_v42 = vld [vmem:[#allocation9 + $0x158] sm:$0xf0] }
 0x105   :  { %1930 = vmatpush.bf16.msra.mxu0 %v8669_v49  ;;  %v12349_v49 = vld [vmem:[#allocation9 + $0x1e4] sm:$0xf]  ;;  %v8777_v43 = vor.u32 %v12332_v42, %v8776_v41  ;;  %v9036_v42 = vld [vmem:[#allocation9 + $0x350] sm:$0xf] }
 0x106   :  { %1135 = vmatmul.bf16.vlgmr.msrb.gmra.mxu3 %v13729_v46  ;;  %1955 = vmatpush.bf16.msra.mxu1 %v9009_v4  ;;  %v8670_v46 = vld [vmem:[#allocation9 + $0x8c] sm:$0xf0]  ;;  %v8853_v51 = vor.u32 %v12349_v49, %v8850_v50  ;;  %v12376_v4 = vld [vmem:[#allocation9 + $0x2b8] sm:$0xf0]  ;;  %v12317_v49 = vld [vmem:[#allocation9 + $0xe0] sm:$0xf0] }
 0x107   :  { %1965 = vmatpush.bf16.msra.mxu3 %v8753_v44  ;;  %v8673_v19 = vor.u32 %v12304_v14, %v8670_v46  ;;  %v8876_v44 = vld [vmem:[#allocation9 + $0x210] sm:$0xf]  ;;  %v8949_v7 = vor.u32 %v12376_v4, %v8948_v2  ;;  %v8928_v46 = vld [vmem:[#allocation9 + $0x280] sm:$0xf]  ;;  %v8656_v2 = vld [vmem:[#allocation9 + $0x58] sm:$0xf] }
 0x108   :  { %v8877_v48 = vor.u32 %v12357_v47, %v8876_v44  ;;  %1946 = vmatpush.bf16.msrb.mxu2 %v8769_v55  ;;  %v12384_v44 = vld [vmem:[#allocation9 + $0x2fc] sm:$0xf]  ;;  %v8990_v47 = vld [vmem:[#allocation9 + $0x30c] sm:$0xf0]  ;;  %v12302_v4 = vld [vmem:[#allocation9 + $0x68] sm:$0xf0] }
 0x109   :  { %1931 = vmatpush.bf16.msra.mxu0 %v8649_v0  ;;  %v12344_v0 = vld [vmem:[#allocation9 + $0x1bc] sm:$0xf] }
 0x10a   :  { %1956 = vmatpush.bf16.msra.mxu1 %v8989_v45  ;;  %v8833_v3 = vor.u32 %v12344_v0, %v8830_v1  ;;  %v8993_v45 = vor.u32 %v12384_v44, %v8990_v47  ;;  %v12312_v55 = vld [vmem:[#allocation9 + $0xb8] sm:$0xf0]  ;;  %v12369_v0 = vld [vmem:[#allocation9 + $0x284] sm:$0xf]  ;;  %v8930_v1 = vld [vmem:[#allocation9 + $0x294] sm:$0xf0] }
 0x10b   :  { %1966 = vmatpush.bf16.msra.mxu3 %v8733_v59  ;;  %v8969_v59 = vor.u32 %v12381_v56, %v8968_v54  ;;  %v8697_v56 = vor.u32 %v12312_v55, %v8696_v53  ;;  %v12395_v44 = vld [vmem:[#allocation9 + $0x354] sm:$0xf]  ;;  %v9038_v47 = vld [vmem:[#allocation9 + $0x364] sm:$0xf0]  ;;  %v12392_v53 = vld [vmem:[#allocation9 + $0x338] sm:$0xf0] }
 0x10c   :  { %1991 = vmatpush.bf16.msra.mxu2 %v9073_v63  ;;  %v9018_v55 = vld [vmem:[#allocation9 + $0x33c] sm:$0xf0] }
 0x10d   :  { %1932 = vmatpush.bf16.msra.mxu0 %v8629_v8 }
 0x10e   :  { %1957 = vmatpush.bf16.msra.mxu1 %v8969_v59  ;;  %v8676_v59 = vld [vmem:[#allocation9 + $0x80] sm:$0xf] }
 0x10f   :  { %1967 = vmatpush.bf16.msra.mxu3 %v8713_v5  ;;  %v8836_v5 = vld [vmem:[#allocation9 + $0x1c0] sm:$0xf]  ;;  %v8677_v63 = vor.u32 %v12307_v61, %v8676_v59  ;;  %v12325_v59 = vld [vmem:[#allocation9 + $0x124] sm:$0xf] }
 0x110   :  { %v8837_v8 = vor.u32 %v12347_v6, %v8836_v5  ;;  %1992 = vmatpush.bf16.msra.mxu2 %v9053_v11  ;;  %v8657_v5 = vor.u32 %v12302_v4, %v8656_v2  ;;  %v12385_v4 = vld [vmem:[#allocation9 + $0x304] sm:$0xf] }
 0x111   :  { %1933 = vmatpush.bf16.msra.mxu0 %v8609_v15  ;;  %v12371_v15 = vld [vmem:[#allocation9 + $0x290] sm:$0xf0] }
 0x112   :  { %1958 = vmatpush.bf16.msra.mxu1 %v8949_v7  ;;  %v8929_v17 = vor.u32 %v12371_v15, %v8928_v46  ;;  %v8636_v7 = vld [vmem:[#allocation9 + $0x30] sm:$0xf]  ;;  %v12292_v46 = vld [vmem:[#allocation9 + $0x18] sm:$0xf0] }
 0x113   :  { %1968 = vmatpush.bf16.msra.mxu3 %v8693_v13  ;;  %v8810_v13 = vld [vmem:[#allocation9 + $0x1a4] sm:$0xf0] }
 0x114   :  { %v8813_v14 = vor.u32 %v12339_v12, %v8810_v13  ;;  %v633_v13 = vperm.slane %v13734_v10, 0 }
 0x115   :  { %1978 = vmatpush.bf16.msrb.mxu0 %v8913_v16  ;;  %v8816_v16 = vld [vmem:[#allocation9 + $0x198] sm:$0xf] }
 0x116   :  { %v8817_v21 = vor.u32 %v12342_v18, %v8816_v16  ;;  %1959 = vmatpush.bf16.msra.mxu1 %v8929_v17 }
 0x117   :  { %1969 = vmatpush.bf16.msra.mxu3 %v8673_v19  ;;  %v12394_v19 = vld [vmem:[#allocation9 + $0x34c] sm:$0xf] }
 0x119   :  { %1979 = vmatpush.bf16.msrb.mxu0 %v8893_v22  ;;  %v9033_v22 = vor.u32 %v12394_v19, %v9030_v20 }
 0x11b   :  { %1970 = vmatpush.bf16.msra.mxu3 %v8653_v23  ;;  %v8756_v23 = vld [vmem:[#allocation9 + $0x120] sm:$0xf]  ;;  %1993 = vmatpush.bf16.msra.mxu2 %v9033_v22 }
 0x11c   :  { %v8757_v25 = vor.u32 %v12327_v24, %v8756_v23  ;;  %v9076_v22 = vld [vmem:[#allocation9 + $0x3a0] sm:$0xf]  ;;  %v12407_v24 = vld [vmem:[#allocation9 + $0x3b0] sm:$0xf0] }
 0x11d   :  { %1980 = vmatpush.bf16.msrb.mxu0 %v8873_v38  ;;  %v12329_v38 = vld [vmem:[#allocation9 + $0x144] sm:$0xf] }
 0x11e   :  { %2004 = vmatpush.bf16.msrb.mxu1 %v8757_v25  ;;  %v8773_v40 = vor.u32 %v12329_v38, %v8770_v39  ;;  %v12405_v25 = vld [vmem:[#allocation9 + $0x3a4] sm:$0xf] }
 0x11f   :  { %1971 = vmatpush.bf16.msra.mxu3 %v8633_v26  ;;  %v12334_v26 = vld [vmem:[#allocation9 + $0x16c] sm:$0xf] }
 0x120   :  { %v8793_v28 = vor.u32 %v12334_v26, %v8790_v27  ;;  %v9078_v26 = vld [vmem:[#allocation9 + $0x3b4] sm:$0xf0] }
 0x121   :  { %1981 = vmatpush.bf16.msrb.mxu0 %v8853_v51  ;;  %v12379_v51 = vld [vmem:[#allocation9 + $0x2d4] sm:$0xf] }
 0x122   :  { %2005 = vmatpush.bf16.msrb.mxu1 %v8737_v36  ;;  %v8973_v54 = vor.u32 %v12379_v51, %v8970_v52  ;;  %v634_v36 = vperm.slane %v13734_v10, 1  ;;  %v9016_v51 = vld [vmem:[#allocation9 + $0x328] sm:$0xf] }
 0x123   :  { %1972 = vmatpush.bf16.msra.mxu3 %v8613_v31  ;;  %v8797_v31 = vor.u32 %v12337_v30, %v8796_v29  ;;  %v9081_v29 = vor.u32 %v12405_v25, %v9078_v26  ;;  %v9056_v30 = vld [vmem:[#allocation9 + $0x378] sm:$0xf]  ;;  %v8956_v26 = vld [vmem:[#allocation9 + $0x2b0] sm:$0xf] }
 0x125   :  { %1982 = vmatpush.bf16.msrb.mxu0 %v8833_v3  ;;  %v8933_v3 = vor.u32 %v12369_v0, %v8930_v1  ;;  %v8996_v0 = vld [vmem:[#allocation9 + $0x300] sm:$0xf]  ;;  %v12387_v1 = vld [vmem:[#allocation9 + $0x310] sm:$0xf0] }
 0x127   :  { %2017 = vmatpush.bf16.msrb.mxu3 %v8917_v32  ;;  %v12389_v32 = vld [vmem:[#allocation9 + $0x324] sm:$0xf] }
 0x129   :  { %1983 = vmatpush.bf16.msrb.mxu0 %v8813_v14  ;;  %v8616_v14 = vld [vmem:[#allocation9 + $0x8] sm:$0xf] }
 0x12a   :  { %v8617_v15 = vor.u32 %v12292_v46, %v8616_v14  ;;  %v12382_v14 = vld [vmem:[#allocation9 + $0x2e8] sm:$0xf0]  ;;  %v12380_v46 = vld [vmem:[#allocation9 + $0x2dc] sm:$0xf] }
 0x12b   :  { %2018 = vmatpush.bf16.msrb.mxu3 %v8897_v35  ;;  %v9013_v35 = vor.u32 %v12389_v32, %v9010_v33  ;;  %v12402_v32 = vld [vmem:[#allocation9 + $0x388] sm:$0xf0]  ;;  %v12400_v33 = vld [vmem:[#allocation9 + $0x37c] sm:$0xf] }
 0x12c   :  { %v9061_v41 = vor.u32 %v12400_v33, %v9058_v34  ;;  %v12310_v34 = vld [vmem:[#allocation9 + $0xac] sm:$0xf] }
 0x12d   :  { %1984 = vmatpush.bf16.msrb.mxu0 %v8793_v28  ;;  %1994 = vmatpush.bf16.msra.mxu2 %v9013_v35  ;;  %v9077_v28 = vor.u32 %v12407_v24, %v9076_v22  ;;  %v8718_v22 = vld [vmem:[#allocation9 + $0xe4] sm:$0xf0]  ;;  %v8918_v24 = vld [vmem:[#allocation9 + $0x274] sm:$0xf0] }
 0x12f   :  { %2019 = vmatpush.bf16.msrb.mxu3 %v8877_v48  ;;  %v8716_v48 = vld [vmem:[#allocation9 + $0xd0] sm:$0xf] }
 0x130   :  { %v8717_v50 = vor.u32 %v12317_v49, %v8716_v48  ;;  %v635_v48 = vperm.slane %v13734_v10, 2  ;;  %v8997_v10 = vor.u32 %v12387_v1, %v8996_v0  ;;  %v12350_v0 = vld [vmem:[#allocation9 + $0x1ec] sm:$0xf]  ;;  %v8858_v1 = vld [vmem:[#allocation9 + $0x1fc] sm:$0xf0] }
 0x131   :  { %1985 = vmatpush.bf16.msrb.mxu0 %v8773_v40  ;;  %1995 = vmatpush.bf16.msra.mxu2 %v8993_v45  ;;  %v9057_v40 = vor.u32 %v12402_v32, %v9056_v30  ;;  %v8958_v30 = vld [vmem:[#allocation9 + $0x2c4] sm:$0xf0] }
 0x132   :  { %2006 = vmatpush.bf16.msrb.mxu1 %v8717_v50  ;;  %v9041_v50 = vor.u32 %v12395_v44, %v9038_v47  ;;  %v8938_v44 = vld [vmem:[#allocation9 + $0x29c] sm:$0xf0] }
 0x133   :  { %2020 = vmatpush.bf16.msrb.mxu3 %v8857_v60  ;;  %v8953_v60 = vor.u32 %v12374_v57, %v8950_v58 }
 0x135   :  { %1996 = vmatpush.bf16.msra.mxu2 %v8973_v54  ;;  %v12390_v54 = vld [vmem:[#allocation9 + $0x32c] sm:$0xf] }
 0x136   :  { %2007 = vmatpush.bf16.msrb.mxu1 %v8697_v56 }
 0x137   :  { %2021 = vmatpush.bf16.msrb.mxu3 %v8837_v8  ;;  %v12297_v8 = vld [vmem:[#allocation9 + $0x40] sm:$0xf0] }
 0x138   :  { %v8637_v9 = vor.u32 %v12297_v8, %v8636_v7  ;;  %v12320_v8 = vld [vmem:[#allocation9 + $0xfc] sm:$0xf] }
 0x139   :  { %1997 = vmatpush.bf16.msra.mxu2 %v8953_v60  ;;  %v8758_v60 = vld [vmem:[#allocation9 + $0x134] sm:$0xf0] }
 0x13a   :  { %2008 = vmatpush.bf16.msrb.mxu1 %v8677_v63  ;;  %v9021_v63 = vor.u32 %v12390_v54, %v9018_v55  ;;  %v8878_v54 = vld [vmem:[#allocation9 + $0x224] sm:$0xf0] }
 0x13b   :  { %2022 = vmatpush.bf16.msrb.mxu3 %v8817_v21 }
 0x13d   :  { %1998 = vmatpush.bf16.msra.mxu2 %v8933_v3 }
 0x13e   :  { %2009 = vmatpush.bf16.msrb.mxu1 %v8657_v5  ;;  %v8998_v5 = vld [vmem:[#allocation9 + $0x314] sm:$0xf0] }
 0x13f   :  { %2023 = vmatpush.bf16.msrb.mxu3 %v8797_v31 }
 0x142   :  { %2010 = vmatpush.bf16.msrb.mxu1 %v8637_v9  ;;  %v8738_v9 = vld [vmem:[#allocation9 + $0x10c] sm:$0xf0] }
 0x143   :  { %2024 = vmatpush.bf16.msrb.mxu3 %v8777_v43  ;;  %v12397_v43 = vld [vmem:[#allocation9 + $0x360] sm:$0xf0] }
 0x144   :  { %v9037_v49 = vor.u32 %v12397_v43, %v9036_v42  ;;  %v12372_v42 = vld [vmem:[#allocation9 + $0x298] sm:$0xf0]  ;;  %v12370_v43 = vld [vmem:[#allocation9 + $0x28c] sm:$0xf] }
 0x146   :  { %2011 = vmatpush.bf16.msrb.mxu1 %v8617_v15  ;;  %v8978_v15 = vld [vmem:[#allocation9 + $0x2ec] sm:$0xf0] }
 0x163   :  { %v1071_v62 = vpop.f32.mrf.mxu1 }
 0x164   :  { %v1072_v45 = vadd.f32 %v1071_v62, %v634_v36  ;;  %v9017_v62 = vor.u32 %v12392_v53, %v9016_v51  ;;  %v12360_v36 = vld [vmem:[#allocation9 + $0x23c] sm:$0xf]  ;;  %v12305_v51 = vld [vmem:[#allocation9 + $0x84] sm:$0xf]  ;;  %v12355_v53 = vld [vmem:[#allocation9 + $0x214] sm:$0xf] }
 0x169   :  { %v1032_v6 = vpop.f32.mrf.mxu3 }
 0x16a   :  { %v1033_v16 = vadd.f32 %v1032_v6, %v633_v13  ;;  %v8761_v6 = vor.u32 %v12325_v59, %v8758_v60  ;;  %v8881_v59 = vor.u32 %v12355_v53, %v8878_v54  ;;  %v8744_v60 = vld [vmem:[#allocation9 + $0x100] sm:$0xf]  ;;  %v12353_v53 = vld [vmem:[#allocation9 + $0x200] sm:$0xf0] }
 0x16b   :  { %v1073_v12 = vpop.f32.mrf.mxu1  ;;  %v9064_v54 = vld [vmem:[#allocation9 + $0x380] sm:$0xf] }
 0x16c   :  { %v8976_v12 = vld [vmem:[#allocation9 + $0x2d8] sm:$0xf] }
 0x16d   :  { %v8977_v25 = vor.u32 %v12382_v14, %v8976_v12 }
 0x16e   :  { %v1058_v11 = vpop.f32.mrf.mxu2 }
 0x171   :  { %v1034_v17 = vpop.f32.mrf.mxu3  ;;  %v1045_v18 = vpop.f32.mrf.mxu0 }
 0x172   :  { %v1046_v19 = vadd.f32 %v1045_v18, %v1033_v16  ;;  %v8741_v18 = vor.u32 %v12320_v8, %v8738_v9  ;;  %v12295_v8 = vld [vmem:[#allocation9 + $0x34] sm:$0xf]  ;;  %v8638_v9 = vld [vmem:[#allocation9 + $0x44] sm:$0xf0] }
 0x173   :  { %v13737_v21 = vpop.f32.mrf.mxu1 }
 0x174   :  { %v1059_v23 = vadd.f32 %v1058_v11, %v1046_v19  ;;  %v9001_v11 = vor.u32 %v12385_v4, %v8998_v5  ;;  %v12315_v19 = vld [vmem:[#allocation9 + $0xd4] sm:$0xf]  ;;  %v8861_v4 = vor.u32 %v12350_v0, %v8858_v1  ;;  %v8724_v5 = vld [vmem:[#allocation9 + $0xd8] sm:$0xf]  ;;  %v12348_v0 = vld [vmem:[#allocation9 + $0x1d8] sm:$0xf0] }
 0x175   :  { %v8721_v32 = vor.u32 %v12315_v19, %v8718_v22  ;;  %v8818_v19 = vld [vmem:[#allocation9 + $0x1ac] sm:$0xf0]  ;;  %v12368_v22 = vld [vmem:[#allocation9 + $0x278] sm:$0xf0]  ;;  %v9044_v1 = vld [vmem:[#allocation9 + $0x358] sm:$0xf] }
 0x176   :  { %v1060_v20 = vpop.f32.mrf.mxu2  ;;  %v1140_v27 = vmax.f32 %v1059_v23, 0.0  ;;  %v12365_v23 = vld [vmem:[#allocation9 + $0x264] sm:$0xf] }
 0x177   :  { %v8921_v33 = vor.u32 %v12365_v23, %v8918_v24 }
 0x178   :  { %v13739_v31 = vpack.c.bf16 %v1140_v27, %v1140_v27  ;;  %v12377_v27 = vld [vmem:[#allocation9 + $0x2c0] sm:$0xf0] }
 0x179   :  { %v1047_v35 = vpop.f32.mrf.mxu0  ;;  %v1084_v37 = vpop.f32.mrf.mxu3 }
 0x17a   :  { %1934 = vmatmul.bf16.vlgmr.msra.gmra.mxu0 %v13739_v31  ;;  %1973 = vmatmul.bf16.vlgmr.msra.gmra.mxu3 %v13739_v31  ;;  %v1085_v52 = vadd.f32 %v1084_v37, %v1072_v45  ;;  %v8698_v37 = vld [vmem:[#allocation9 + $0xbc] sm:$0xf0] }
 0x17b   :  { %2030 = vmatpush.bf16.msra.mxu0 %v9077_v28  ;;  %v1125_v39 = vpop.f32.mrf.mxu1  ;;  %2069 = vmatpush.bf16.msra.mxu3 %v9081_v29  ;;  %v12375_v29 = vld [vmem:[#allocation9 + $0x2b4] sm:$0xf]  ;;  %v8701_v45 = vor.u32 %v12310_v34, %v8698_v37  ;;  %v8664_v37 = vld [vmem:[#allocation9 + $0x60] sm:$0xf] }
 0x17c   :  { %v8957_v39 = vor.u32 %v12377_v27, %v8956_v26  ;;  %v12308_v26 = vld [vmem:[#allocation9 + $0x98] sm:$0xf0] }
 0x17e   :  { %v1110_v38 = vpop.f32.mrf.mxu2 }
 0x17f   :  { %2031 = vmatpush.bf16.msra.mxu0 %v9057_v40  ;;  %2070 = vmatpush.bf16.msra.mxu3 %v9061_v41  ;;  %v1111_v2 = vadd.f32 %v1110_v38, %v635_v48  ;;  %v8898_v38 = vld [vmem:[#allocation9 + $0x24c] sm:$0xf0]  ;;  %v8961_v40 = vor.u32 %v12375_v29, %v8958_v30  ;;  %v8936_v41 = vld [vmem:[#allocation9 + $0x288] sm:$0xf]  ;;  %v8904_v30 = vld [vmem:[#allocation9 + $0x240] sm:$0xf] }
 0x180   :  { %v8901_v48 = vor.u32 %v12360_v36, %v8898_v38  ;;  %v8937_v55 = vor.u32 %v12372_v42, %v8936_v41  ;;  %v8798_v29 = vld [vmem:[#allocation9 + $0x184] sm:$0xf0]  ;;  %v12303_v36 = vld [vmem:[#allocation9 + $0x70] sm:$0xf0]  ;;  %v8884_v41 = vld [vmem:[#allocation9 + $0x218] sm:$0xf] }
 0x181   :  { %v1086_v56 = vpop.f32.mrf.mxu3  ;;  %v1097_v57 = vpop.f32.mrf.mxu0  ;;  %v1124_v13 = vadd.f32 %v13737_v21, %v1111_v2  ;;  %v8981_v21 = vor.u32 %v12380_v46, %v8978_v15  ;;  %v8704_v46 = vld [vmem:[#allocation9 + $0xb0] sm:$0xf]  ;;  %v12313_v15 = vld [vmem:[#allocation9 + $0xc0] sm:$0xf0]  ;;  %v12358_v42 = vld [vmem:[#allocation9 + $0x228] sm:$0xf0] }
 0x182   :  { %v1098_v58 = vadd.f32 %v1097_v57, %v1085_v52  ;;  %v8678_v52 = vld [vmem:[#allocation9 + $0x94] sm:$0xf0]  ;;  %v8941_v56 = vor.u32 %v12370_v43, %v8938_v44  ;;  %v8705_v23 = vor.u32 %v12313_v15, %v8704_v46  ;;  %v9084_v43 = vld [vmem:[#allocation9 + $0x3a8] sm:$0xf]  ;;  %v12408_v44 = vld [vmem:[#allocation9 + $0x3b8] sm:$0xf0] }
 0x183   :  { %2032 = vmatpush.bf16.msra.mxu0 %v9037_v49  ;;  %2071 = vmatpush.bf16.msra.mxu3 %v9041_v50  ;;  %v8764_v49 = vld [vmem:[#allocation9 + $0x128] sm:$0xf]  ;;  %v12328_v50 = vld [vmem:[#allocation9 + $0x138] sm:$0xf0]  ;;  %v9024_v46 = vld [vmem:[#allocation9 + $0x330] sm:$0xf] }
 0x184   :  { %v1141_v3 = vmax.f32 %v1098_v58, 0.0  ;;  %v8765_v57 = vor.u32 %v12328_v50, %v8764_v49  ;;  %v8681_v58 = vor.u32 %v12305_v51, %v8678_v52  ;;  %v12298_v49 = vld [vmem:[#allocation9 + $0x48] sm:$0xf0]  ;;  %v8885_v50 = vor.u32 %v12358_v42, %v8884_v41  ;;  %v8864_v52 = vld [vmem:[#allocation9 + $0x1f0] sm:$0xf] }
 0x185   :  { %v9085_v51 = vor.u32 %v12408_v44, %v9084_v43  ;;  %v12393_v15 = vld [vmem:[#allocation9 + $0x340] sm:$0xf0]  ;;  %v12378_v41 = vld [vmem:[#allocation9 + $0x2c8] sm:$0xf0] }
 0x186   :  { %v1112_v61 = vpop.f32.mrf.mxu2  ;;  %v13745_v7 = vpack.c.bf16 %v1141_v3, %v1141_v3  ;;  %v10672_v43 = vld [vmem:[#allocation12 + $0xc60] sm:$0xf]  ;;  %v12814_v44 = vld [vmem:[#allocation12 + $0xca4] sm:$0xf0] }
 0x187   :  { %2033 = vmatpush.bf16.msra.mxu0 %v9017_v62  ;;  %2072 = vmatpush.bf16.msra.mxu3 %v9021_v63  ;;  %v12323_v61 = vld [vmem:[#allocation9 + $0x110] sm:$0xf0]  ;;  %v12300_v62 = vld [vmem:[#allocation9 + $0x5c] sm:$0xf]  ;;  %v8658_v63 = vld [vmem:[#allocation9 + $0x6c] sm:$0xf0] }
 0x188   :  { %1947 = vmatmul.bf16.vlgmr.msrb.gmra.mxu2 %v13745_v7  ;;  %v8745_v2 = vor.u32 %v12323_v61, %v8744_v60  ;;  %v8661_v3 = vor.u32 %v12300_v62, %v8658_v63  ;;  %v8844_v61 = vld [vmem:[#allocation9 + $0x1c8] sm:$0xf]  ;;  %v10168_v62 = vld [vmem:[#allocation12 + $0x870] sm:$0xf]  ;;  %v12688_v63 = vld [vmem:[#allocation12 + $0x8b4] sm:$0xf0] }
 0x189   :  { %2043 = vmatpush.bf16.msrb.mxu2 %v8761_v6  ;;  %v1099_v16 = vpop.f32.mrf.mxu0  ;;  %v1136_v17 = vpop.f32.mrf.mxu3  ;;  %v12318_v6 = vld [vmem:[#allocation9 + $0xe8] sm:$0xf0] }
 0x18a   :  { %v1137_v20 = vadd.f32 %v1136_v17, %v1124_v13  ;;  %1986 = vmatmul.bf16.vlgmr.msrb.gmra.mxu0 %v13745_v7  ;;  %2025 = vmatmul.bf16.vlgmr.msrb.gmra.mxu3 %v13745_v7  ;;  %v8725_v12 = vor.u32 %v12318_v6, %v8724_v5  ;;  %v8641_v13 = vor.u32 %v12295_v8, %v8638_v9  ;;  %v12290_v16 = vld [vmem:[#allocation9 + $0xc] sm:$0xf]  ;;  %v8618_v17 = vld [vmem:[#allocation9 + $0x1c] sm:$0xf0]  ;;  %v9592_v5 = vld [vmem:[#allocation12 + $0x3f0] sm:$0xf] }
 0x18b   :  { %2034 = vmatpush.bf16.msra.mxu0 %v8997_v10  ;;  %2073 = vmatpush.bf16.msra.mxu3 %v9001_v11  ;;  %v12345_v10 = vld [vmem:[#allocation9 + $0x1c4] sm:$0xf]  ;;  %v8838_v11 = vld [vmem:[#allocation9 + $0x1d4] sm:$0xf0]  ;;  %v8621_v24 = vor.u32 %v12290_v16, %v8618_v17  ;;  %v12544_v6 = vld [vmem:[#allocation12 + $0x434] sm:$0xf0]  ;;  %v8845_v8 = vor.u32 %v12348_v0, %v8844_v61 }
 0x18c   :  { %v1142_v28 = vmax.f32 %v1137_v20, 0.0  ;;  %v8841_v14 = vor.u32 %v12345_v10, %v8838_v11  ;;  %v8924_v20 = vld [vmem:[#allocation9 + $0x268] sm:$0xf]  ;;  %v8824_v10 = vld [vmem:[#allocation9 + $0x1a0] sm:$0xf] }
 0x18d   :  { %2044 = vmatpush.bf16.msrb.mxu2 %v8741_v18  ;;  %v12340_v18 = vld [vmem:[#allocation9 + $0x19c] sm:$0xf]  ;;  %v8925_v27 = vor.u32 %v12368_v22, %v8924_v20  ;;  %v10096_v11 = vld [vmem:[#allocation12 + $0x7e0] sm:$0xf]  ;;  %v10024_v20 = vld [vmem:[#allocation12 + $0x750] sm:$0xf] }
 0x18e   :  { %v13751_v35 = vpack.c.bf16 %v1142_v28, %v1142_v28  ;;  %v12335_v28 = vld [vmem:[#allocation9 + $0x174] sm:$0xf]  ;;  %v12652_v22 = vld [vmem:[#allocation12 + $0x794] sm:$0xf0]  ;;  %v12778_v61 = vld [vmem:[#allocation12 + $0xb84] sm:$0xf0] }
 0x18f   :  { %2035 = vmatpush.bf16.msra.mxu0 %v8977_v25  ;;  %2074 = vmatpush.bf16.msra.mxu3 %v8981_v21  ;;  %v8821_v25 = vor.u32 %v12340_v18, %v8818_v19  ;;  %v8684_v21 = vld [vmem:[#allocation9 + $0x88] sm:$0xf]  ;;  %v8801_v34 = vor.u32 %v12335_v28, %v8798_v29  ;;  %v9025_v18 = vor.u32 %v12393_v15, %v9024_v46  ;;  %v8804_v19 = vld [vmem:[#allocation9 + $0x178] sm:$0xf]  ;;  %v8784_v28 = vld [vmem:[#allocation9 + $0x150] sm:$0xf] }
 0x190   :  { %1960 = vmatmul.bf16.vlgmr.msra.gmra.mxu1 %v13751_v35  ;;  %v9952_v29 = vld [vmem:[#allocation12 + $0x6c0] sm:$0xf]  ;;  %v11320_v0 = vld [vmem:[#allocation12 + $0x1170] sm:$0xf]  ;;  %v12490_v15 = vld [vmem:[#allocation12 + $0x284] sm:$0xf0] }
 0x191   :  { %2045 = vmatpush.bf16.msrb.mxu2 %v8721_v32  ;;  %2056 = vmatpush.bf16.msra.mxu1 %v8921_v33  ;;  %v1138_v47 = vpop.f32.mrf.mxu3  ;;  %v12363_v32 = vld [vmem:[#allocation9 + $0x250] sm:$0xf0]  ;;  %v8685_v33 = vor.u32 %v12308_v26, %v8684_v21  ;;  %v10025_v21 = vor.u32 %v12652_v22, %v10024_v20  ;;  %v9376_v46 = vld [vmem:[#allocation12 + $0x240] sm:$0xf] }
 0x192   :  { %v8905_v38 = vor.u32 %v12363_v32, %v8904_v30  ;;  %v8665_v47 = vor.u32 %v12303_v36, %v8664_v37  ;;  %v12634_v30 = vld [vmem:[#allocation12 + $0x704] sm:$0xf0]  ;;  %v12333_v32 = vld [vmem:[#allocation9 + $0x160] sm:$0xf0]  ;;  %v10744_v37 = vld [vmem:[#allocation12 + $0xcf0] sm:$0xf] }
 0x193   :  { %2036 = vmatpush.bf16.msra.mxu0 %v8957_v39  ;;  %2075 = vmatpush.bf16.msra.mxu3 %v8961_v40  ;;  %v12330_v39 = vld [vmem:[#allocation9 + $0x14c] sm:$0xf]  ;;  %v8778_v40 = vld [vmem:[#allocation9 + $0x15c] sm:$0xf0]  ;;  %v9664_v20 = vld [vmem:[#allocation12 + $0x480] sm:$0xf] }
 0x194   :  { %v12832_v36 = vld [vmem:[#allocation12 + $0xd34] sm:$0xf0] }
 0x195   :  { %2046 = vmatpush.bf16.msrb.mxu2 %v8701_v45  ;;  %2057 = vmatpush.bf16.msra.mxu1 %v8901_v48  ;;  %v8781_v45 = vor.u32 %v12330_v39, %v8778_v40  ;;  %v8644_v48 = vld [vmem:[#allocation9 + $0x38] sm:$0xf]  ;;  %v10745_v42 = vor.u32 %v12832_v36, %v10744_v37 }
 0x196   :  { %v8964_v40 = vld [vmem:[#allocation9 + $0x2b8] sm:$0xf] }
 0x197   :  { %2037 = vmatpush.bf16.msra.mxu0 %v8937_v55  ;;  %2076 = vmatpush.bf16.msra.mxu3 %v8941_v56  ;;  %v12403_v55 = vld [vmem:[#allocation9 + $0x390] sm:$0xf0]  ;;  %v8645_v56 = vor.u32 %v12298_v49, %v8644_v48  ;;  %v12373_v48 = vld [vmem:[#allocation9 + $0x2a0] sm:$0xf0]  ;;  %v10673_v49 = vor.u32 %v12814_v44, %v10672_v43 }
 0x198   :  { %1999 = vmatmul.bf16.vlgmr.msra.gmra.mxu2 %v13751_v35  ;;  %v9065_v60 = vor.u32 %v12403_v55, %v9064_v54  ;;  %v9880_v54 = vld [vmem:[#allocation12 + $0x630] sm:$0xf]  ;;  %v12616_v55 = vld [vmem:[#allocation12 + $0x674] sm:$0xf0]  ;;  %v9522_v44 = vld [vmem:[#allocation12 + $0x3a8] sm:$0xf0] }
 0x199   :  { %2047 = vmatpush.bf16.msrb.mxu2 %v8681_v58  ;;  %2058 = vmatpush.bf16.msra.mxu1 %v8881_v59  ;;  %v12293_v58 = vld [vmem:[#allocation9 + $0x20] sm:$0xf0]  ;;  %v8865_v59 = vor.u32 %v12353_v53, %v8864_v52 }
 0x19a   :  { %2038 = vmatmul.bf16.vlgmr.msra.gmra.mxu0 %v13751_v35  ;;  %2077 = vmatmul.bf16.vlgmr.msra.gmra.mxu3 %v13751_v35 }
 0x19b   :  { %2082 = vmatpush.bf16.msrb.mxu0 %v8765_v57  ;;  %v8624_v57 = vld [vmem:[#allocation9 + $0x10] sm:$0xf] }
 0x19d   :  { %2048 = vmatpush.bf16.msrb.mxu2 %v8661_v3  ;;  %2059 = vmatpush.bf16.msra.mxu1 %v8861_v4  ;;  %v8625_v3 = vor.u32 %v12293_v58, %v8624_v57  ;;  %v10169_v4 = vor.u32 %v12688_v63, %v10168_v62  ;;  %v9520_v57 = vld [vmem:[#allocation12 + $0x360] sm:$0xf]  ;;  %v12526_v58 = vld [vmem:[#allocation12 + $0x3a4] sm:$0xf0] }
 0x19e   :  { %v9808_v62 = vld [vmem:[#allocation12 + $0x5a0] sm:$0xf] }
 0x19f   :  { %2083 = vmatpush.bf16.msrb.mxu0 %v8745_v2  ;;  %v12398_v2 = vld [vmem:[#allocation9 + $0x368] sm:$0xf0] }
 0x1a0   :  { %2012 = vmatmul.bf16.vlgmr.msrb.gmra.mxu1 %v13739_v31  ;;  %v9045_v9 = vor.u32 %v12398_v2, %v9044_v1  ;;  %v12976_v1 = vld [vmem:[#allocation12 + $0x11b4] sm:$0xf0] }
 0x1a1   :  { %2049 = vmatpush.bf16.msrb.mxu2 %v8641_v13  ;;  %2060 = vmatpush.bf16.msra.mxu1 %v8841_v14  ;;  %v9593_v13 = vor.u32 %v12544_v6, %v9592_v5  ;;  %v12343_v14 = vld [vmem:[#allocation9 + $0x1b0] sm:$0xf0] }
 0x1a2   :  { %v8825_v17 = vor.u32 %v12343_v14, %v8824_v10  ;;  %v10456_v6 = vld [vmem:[#allocation12 + $0xab0] sm:$0xf]  ;;  %v12958_v14 = vld [vmem:[#allocation12 + $0x1124] sm:$0xf0] }
 0x1a3   :  { %2084 = vmatpush.bf16.msrb.mxu0 %v8725_v12  ;;  %v12670_v12 = vld [vmem:[#allocation12 + $0x824] sm:$0xf0]  ;;  %6493 = vmatpush.bf16.msrb.mxu3 %v9593_v13  ;;  %v9736_v10 = vld [vmem:[#allocation12 + $0x510] sm:$0xf] }
 0x1a4   :  { %v10097_v16 = vor.u32 %v12670_v12, %v10096_v11  ;;  %v12580_v11 = vld [vmem:[#allocation12 + $0x554] sm:$0xf0]  ;;  %v11248_v12 = vld [vmem:[#allocation12 + $0x10e0] sm:$0xf] }
 0x1a5   :  { %2050 = vmatpush.bf16.msrb.mxu2 %v8621_v24  ;;  %2061 = vmatpush.bf16.msra.mxu1 %v8821_v25  ;;  %v9004_v24 = vld [vmem:[#allocation9 + $0x308] sm:$0xf]  ;;  %v12388_v25 = vld [vmem:[#allocation9 + $0x318] sm:$0xf0]  ;;  %v9737_v13 = vor.u32 %v12580_v11, %v9736_v10  ;;  %v10026_v10 = vld [vmem:[#allocation12 + $0x798] sm:$0xf0] }
 0x1a7   :  { %2085 = vmatpush.bf16.msrb.mxu0 %v8705_v23  ;;  %v12338_v23 = vld [vmem:[#allocation9 + $0x188] sm:$0xf0] }
 0x1a8   :  { %2051 = vmatmul.bf16.vlgmr.msrb.gmra.mxu2 %v13739_v31  ;;  %v8805_v26 = vor.u32 %v12338_v23, %v8804_v19  ;;  %v12742_v19 = vld [vmem:[#allocation12 + $0xa64] sm:$0xf0] }
 0x1a9   :  { %2095 = vmatpush.bf16.msra.mxu2 %v8925_v27  ;;  %2062 = vmatpush.bf16.msra.mxu1 %v8801_v34  ;;  %v9005_v27 = vor.u32 %v12388_v25, %v9004_v24  ;;  %v12383_v34 = vld [vmem:[#allocation9 + $0x2f0] sm:$0xf0]  ;;  %v12562_v23 = vld [vmem:[#allocation12 + $0x4c4] sm:$0xf0]  ;;  %v12940_v25 = vld [vmem:[#allocation12 + $0x1094] sm:$0xf0] }
 0x1aa   :  { %v11176_v24 = vld [vmem:[#allocation12 + $0x1050] sm:$0xf] }
 0x1ab   :  { %2086 = vmatpush.bf16.msrb.mxu0 %v8685_v33  ;;  %v8984_v33 = vld [vmem:[#allocation9 + $0x2e0] sm:$0xf] }
 0x1ac   :  { %v8985_v39 = vor.u32 %v12383_v34, %v8984_v33  ;;  %v10312_v33 = vld [vmem:[#allocation12 + $0x990] sm:$0xf]  ;;  %v12724_v34 = vld [vmem:[#allocation12 + $0x9d4] sm:$0xf0] }
 0x1ad   :  { %2096 = vmatpush.bf16.msra.mxu2 %v8905_v38  ;;  %2063 = vmatpush.bf16.msra.mxu1 %v8781_v45  ;;  %v9953_v38 = vor.u32 %v12634_v30, %v9952_v29  ;;  %v8944_v45 = vld [vmem:[#allocation9 + $0x290] sm:$0xf]  ;;  %v12535_v29 = vld [vmem:[#allocation12 + $0x3f4] sm:$0xf]  ;;  %v10313_v36 = vor.u32 %v12724_v34, %v10312_v33  ;;  %v11824_v33 = vld [vmem:[#allocation12 + $0x1560] sm:$0xf] }
 0x1ae   :  { %v8945_v52 = vor.u32 %v12373_v48, %v8944_v45  ;;  %v12706_v45 = vld [vmem:[#allocation12 + $0x944] sm:$0xf0] }
 0x1af   :  { %2087 = vmatpush.bf16.msrb.mxu0 %v8665_v47  ;;  %v8965_v47 = vor.u32 %v12378_v41, %v8964_v40  ;;  %v9232_v40 = vld [vmem:[#allocation12 + $0x120] sm:$0xf]  ;;  %v12454_v41 = vld [vmem:[#allocation12 + $0x164] sm:$0xf0] }
 0x1b0   :  { %2064 = vmatmul.bf16.vlgmr.msra.gmra.mxu1 %v13745_v7  ;;  %v9233_v43 = vor.u32 %v12454_v41, %v9232_v40  ;;  %v13102_v34 = vld [vmem:[#allocation12 + $0x15a4] sm:$0xf0]  ;;  %v12427_v40 = vld [vmem:[#allocation12 + $0x94] sm:$0xf]  ;;  %v9162_v41 = vld [vmem:[#allocation12 + $0xd8] sm:$0xf0] }
 0x1b1   :  { %2097 = vmatpush.bf16.msra.mxu2 %v8885_v50  ;;  %2108 = vmatpush.bf16.msrb.mxu1 %v9085_v51  ;;  %v10600_v50 = vld [vmem:[#allocation12 + $0xbd0] sm:$0xf]  ;;  %v12796_v51 = vld [vmem:[#allocation12 + $0xc14] sm:$0xf0] }
 0x1b2   :  { %v10601_v53 = vor.u32 %v12796_v51, %v10600_v50  ;;  %v12679_v50 = vld [vmem:[#allocation12 + $0x874] sm:$0xf]  ;;  %v10170_v51 = vld [vmem:[#allocation12 + $0x8b8] sm:$0xf0] }
 0x1b3   :  { %2088 = vmatpush.bf16.msrb.mxu0 %v8645_v56  ;;  %v9881_v56 = vor.u32 %v12616_v55, %v9880_v54  ;;  %v12904_v54 = vld [vmem:[#allocation12 + $0xf74] sm:$0xf0] }
 0x1b5   :  { %2098 = vmatpush.bf16.msra.mxu2 %v8865_v59  ;;  %2109 = vmatpush.bf16.msrb.mxu1 %v9065_v60  ;;  %v9521_v59 = vor.u32 %v12526_v58, %v9520_v57  ;;  %v10528_v60 = vld [vmem:[#allocation12 + $0xb40] sm:$0xf]  ;;  %v12436_v57 = vld [vmem:[#allocation12 + $0xd4] sm:$0xf0]  ;;  %v12499_v58 = vld [vmem:[#allocation12 + $0x2d4] sm:$0xf] }
 0x1b6   :  { %v10529_v63 = vor.u32 %v12778_v61, %v10528_v60  ;;  %v9450_v60 = vld [vmem:[#allocation12 + $0x318] sm:$0xf0] }
 0x1b7   :  { %2089 = vmatpush.bf16.msrb.mxu0 %v8625_v3  ;;  %6494 = vmatpush.bf16.msrb.mxu3 %v9521_v59  ;;  %v11321_v3 = vor.u32 %v12976_v1, %v11320_v0  ;;  %v9453_v61 = vor.u32 %v12499_v58, %v9450_v60  ;;  %v10960_v0 = vld [vmem:[#allocation12 + $0xea0] sm:$0xf]  ;;  %v12886_v1 = vld [vmem:[#allocation12 + $0xee4] sm:$0xf0] }
 0x1b8   :  { %v11680_v60 = vld [vmem:[#allocation12 + $0x1440] sm:$0xf] }
 0x1b9   :  { %2099 = vmatpush.bf16.msra.mxu2 %v8845_v8  ;;  %2110 = vmatpush.bf16.msrb.mxu1 %v9045_v9  ;;  %v12760_v8 = vld [vmem:[#allocation12 + $0xaf4] sm:$0xf0] }
 0x1ba   :  { %2090 = vmatmul.bf16.vlgmr.msrb.gmra.mxu0 %v13739_v31  ;;  %v8785_v31 = vor.u32 %v12333_v32, %v8784_v28  ;;  %v10457_v9 = vor.u32 %v12760_v8, %v10456_v6  ;;  %v12472_v28 = vld [vmem:[#allocation12 + $0x1f4] sm:$0xf0]  ;;  %v9594_v32 = vld [vmem:[#allocation12 + $0x438] sm:$0xf0]  ;;  %v9378_v6 = vld [vmem:[#allocation12 + $0x288] sm:$0xf0] }
 0x1bb   :  { %6506 = vmatpush.bf16.msra.mxu0 %v10169_v4  ;;  %v9448_v4 = vld [vmem:[#allocation12 + $0x2d0] sm:$0xf]  ;;  %v9597_v37 = vor.u32 %v12535_v29, %v9594_v32  ;;  %v12823_v29 = vld [vmem:[#allocation12 + $0xcf4] sm:$0xf]  ;;  %v10746_v32 = vld [vmem:[#allocation12 + $0xd38] sm:$0xf0] }
 0x1bd   :  { %2100 = vmatpush.bf16.msra.mxu2 %v8825_v17  ;;  %2111 = vmatpush.bf16.msrb.mxu1 %v9025_v18  ;;  %v9377_v17 = vor.u32 %v12490_v15, %v9376_v46  ;;  %v10384_v18 = vld [vmem:[#allocation12 + $0xa20] sm:$0xf]  ;;  %v12463_v46 = vld [vmem:[#allocation12 + $0x1b4] sm:$0xf]  ;;  %v9306_v15 = vld [vmem:[#allocation12 + $0x1f8] sm:$0xf0] }
 0x1be   :  { %v10385_v22 = vor.u32 %v12742_v19, %v10384_v18  ;;  %v13120_v18 = vld [vmem:[#allocation12 + $0x1634] sm:$0xf0] }
 0x1bf   :  { %6507 = vmatpush.bf16.msra.mxu0 %v10097_v16  ;;  %v11249_v16 = vor.u32 %v12958_v14, %v11248_v12  ;;  %v10888_v12 = vld [vmem:[#allocation12 + $0xe10] sm:$0xf] }
 0x1c1   :  { %2101 = vmatpush.bf16.msra.mxu2 %v8805_v26  ;;  %2112 = vmatpush.bf16.msrb.mxu1 %v9005_v27  ;;  %v11177_v26 = vor.u32 %v12940_v25, %v11176_v24  ;;  %v9304_v27 = vld [vmem:[#allocation12 + $0x1b0] sm:$0xf]  ;;  %v10816_v24 = vld [vmem:[#allocation12 + $0xd80] sm:$0xf]  ;;  %v12850_v25 = vld [vmem:[#allocation12 + $0xdc4] sm:$0xf0] }
 0x1c2   :  { %v9305_v30 = vor.u32 %v12472_v28, %v9304_v27  ;;  %v12445_v27 = vld [vmem:[#allocation12 + $0x124] sm:$0xf]  ;;  %v9234_v28 = vld [vmem:[#allocation12 + $0x168] sm:$0xf0] }
 0x1c3   :  { %6508 = vmatpush.bf16.msra.mxu0 %v10025_v21  ;;  %v9665_v21 = vor.u32 %v12562_v23, %v9664_v20  ;;  %v12625_v20 = vld [vmem:[#allocation12 + $0x6c4] sm:$0xf] }
 0x1c5   :  { %2102 = vmatpush.bf16.msra.mxu2 %v8785_v31  ;;  %2113 = vmatpush.bf16.msrb.mxu1 %v8985_v39  ;;  %v12922_v31 = vld [vmem:[#allocation12 + $0x1004] sm:$0xf0] }
 0x1c7   :  { %6509 = vmatpush.bf16.msra.mxu0 %v9953_v38  ;;  %v11104_v38 = vld [vmem:[#allocation12 + $0xfc0] sm:$0xf] }
 0x1c8   :  { %2103 = vmatmul.bf16.vlgmr.msra.gmra.mxu2 %v13745_v7  ;;  %v12598_v7 = vld [vmem:[#allocation12 + $0x5e4] sm:$0xf0]  ;;  %v11105_v39 = vor.u32 %v12922_v31, %v11104_v38  ;;  %v12607_v38 = vld [vmem:[#allocation12 + $0x634] sm:$0xf]  ;;  %v9882_v31 = vld [vmem:[#allocation12 + $0x678] sm:$0xf0] }
 0x1c9   :  { %6519 = vmatpush.bf16.msrb.mxu2 %v10745_v42  ;;  %2114 = vmatpush.bf16.msrb.mxu1 %v8965_v47  ;;  %v9809_v2 = vor.u32 %v12598_v7, %v9808_v62  ;;  %v12517_v42 = vld [vmem:[#allocation12 + $0x364] sm:$0xf]  ;;  %v10240_v47 = vld [vmem:[#allocation12 + $0x900] sm:$0xf] }
 0x1ca   :  { %v9525_v48 = vor.u32 %v12517_v42, %v9522_v44  ;;  %v12661_v62 = vld [vmem:[#allocation12 + $0x7e4] sm:$0xf]  ;;  %v10674_v44 = vld [vmem:[#allocation12 + $0xca8] sm:$0xf0] }
 0x1cb   :  { %6510 = vmatpush.bf16.msra.mxu0 %v9881_v56  ;;  %v9160_v56 = vld [vmem:[#allocation12 + $0x90] sm:$0xf]  ;;  %v12805_v42 = vld [vmem:[#allocation12 + $0xc64] sm:$0xf] }
 0x1cc   :  { %v9161_v59 = vor.u32 %v12436_v57, %v9160_v56  ;;  %v9090_v56 = vld [vmem:[#allocation12 + $0x48] sm:$0xf0]  ;;  %v12787_v57 = vld [vmem:[#allocation12 + $0xbd4] sm:$0xf] }
 0x1cd   :  { %6520 = vmatpush.bf16.msrb.mxu2 %v10673_v49  ;;  %2115 = vmatpush.bf16.msrb.mxu1 %v8945_v52  ;;  %v10241_v49 = vor.u32 %v12706_v45, %v10240_v47  ;;  %v10173_v52 = vor.u32 %v12679_v50, %v10170_v51  ;;  %v11752_v47 = vld [vmem:[#allocation12 + $0x14d0] sm:$0xf]  ;;  %v13084_v45 = vld [vmem:[#allocation12 + $0x1514] sm:$0xf0]  ;;  %v12589_v51 = vld [vmem:[#allocation12 + $0x5a4] sm:$0xf] }
 0x1ce   :  { %v11753_v50 = vor.u32 %v13084_v45, %v11752_v47  ;;  %v12697_v45 = vld [vmem:[#allocation12 + $0x904] sm:$0xf] }
 0x1cf   :  { %6511 = vmatpush.bf16.msra.mxu0 %v9809_v2  ;;  %v10961_v2 = vor.u32 %v12886_v1, %v10960_v0  ;;  %v9738_v0 = vld [vmem:[#allocation12 + $0x558] sm:$0xf0] }
 0x1d0   :  { %2116 = vmatmul.bf16.vlgmr.msrb.gmra.mxu1 %v13751_v35  ;;  %v12508_v35 = vld [vmem:[#allocation12 + $0x314] sm:$0xf0] }
 0x1d1   :  { %6521 = vmatpush.bf16.msrb.mxu2 %v10601_v53  ;;  %6532 = vmatpush.bf16.msra.mxu1 %v11321_v3  ;;  %v9449_v5 = vor.u32 %v12508_v35, %v9448_v4  ;;  %v11032_v53 = vld [vmem:[#allocation12 + $0xf30] sm:$0xf]  ;;  %v9088_v3 = vld [vmem:[#allocation12] sm:$0xf]  ;;  %v12418_v4 = vld [vmem:[#allocation12 + $0x44] sm:$0xf0] }
 0x1d2   :  { %v11033_v55 = vor.u32 %v12904_v54, %v11032_v53  ;;  %v12481_v35 = vld [vmem:[#allocation12 + $0x244] sm:$0xf]  ;;  %v13767_v1 = vld [vmem:[#allocation10] sm:$0x1f] }
 0x1d3   :  { %6495 = vmatpush.bf16.msrb.mxu3 %v9449_v5  ;;  %6512 = vmatpush.bf16.msra.mxu0 %v9737_v13  ;;  %v9089_v5 = vor.u32 %v12418_v4, %v9088_v3  ;;  %v9381_v8 = vor.u32 %v12481_v35, %v9378_v6  ;;  %v12868_v13 = vld [vmem:[#allocation12 + $0xe54] sm:$0xf0]  ;;  %v12769_v3 = vld [vmem:[#allocation12 + $0xb44] sm:$0xf]  ;;  %v10530_v4 = vld [vmem:[#allocation12 + $0xb88] sm:$0xf0] }
 0x1d4   :  { %v10889_v14 = vor.u32 %v12868_v13, %v10888_v12  ;;  %v10533_v35 = vor.u32 %v12769_v3, %v10530_v4  ;;  %v13048_v6 = vld [vmem:[#allocation12 + $0x13f4] sm:$0xf0]  ;;  %v1292_v12 = vperm.slane %v13767_v1, 0  ;;  %v11898_v3 = vld [vmem:[#allocation12 + $0x1638] sm:$0xf0] }
 0x1d5   :  { %6522 = vmatpush.bf16.msrb.mxu2 %v10529_v63  ;;  %6533 = vmatpush.bf16.msra.mxu1 %v11249_v16  ;;  %v10098_v63 = vld [vmem:[#allocation12 + $0x828] sm:$0xf0]  ;;  %v9309_v16 = vor.u32 %v12463_v46, %v9306_v15  ;;  %v12751_v46 = vld [vmem:[#allocation12 + $0xab4] sm:$0xf]  ;;  %v10458_v15 = vld [vmem:[#allocation12 + $0xaf8] sm:$0xf0] }
 0x1d6   :  { %v10101_v7 = vor.u32 %v12661_v62, %v10098_v63 }
 0x1d7   :  { %6496 = vmatpush.bf16.msrb.mxu3 %v9377_v17  ;;  %6513 = vmatpush.bf16.msra.mxu0 %v9665_v21  ;;  %v11896_v17 = vld [vmem:[#allocation12 + $0x15f0] sm:$0xf] }
 0x1d8   :  { %v11897_v19 = vor.u32 %v13120_v18, %v11896_v17  ;;  %v11536_v17 = vld [vmem:[#allocation12 + $0x1320] sm:$0xf]  ;;  %v13030_v18 = vld [vmem:[#allocation12 + $0x1364] sm:$0xf0] }
 0x1d9   :  { %6523 = vmatpush.bf16.msrb.mxu2 %v10457_v9  ;;  %6534 = vmatpush.bf16.msra.mxu1 %v11177_v26  ;;  %v12643_v9 = vld [vmem:[#allocation12 + $0x754] sm:$0xf]  ;;  %v10817_v26 = vor.u32 %v12850_v25, %v10816_v24  ;;  %v10386_v24 = vld [vmem:[#allocation12 + $0xa68] sm:$0xf0] }
 0x1da   :  { %v10029_v11 = vor.u32 %v12643_v9, %v10026_v10  ;;  %v12553_v10 = vld [vmem:[#allocation12 + $0x484] sm:$0xf] }
 0x1db   :  { %6497 = vmatpush.bf16.msrb.mxu3 %v9305_v30  ;;  %6558 = vmatpush.bf16.msrb.mxu0 %v9597_v37  ;;  %v9237_v30 = vor.u32 %v12445_v27, %v9234_v28  ;;  %v10749_v37 = vor.u32 %v12823_v29, %v10746_v32  ;;  %v11464_v27 = vld [vmem:[#allocation12 + $0x1290] sm:$0xf]  ;;  %v13012_v28 = vld [vmem:[#allocation12 + $0x12d4] sm:$0xf0] }
 0x1dc   :  { %v11465_v32 = vor.u32 %v13012_v28, %v11464_v27 }
 0x1dd   :  { %6524 = vmatpush.bf16.msrb.mxu2 %v10385_v22  ;;  %6535 = vmatpush.bf16.msra.mxu1 %v11105_v39  ;;  %v9954_v22 = vld [vmem:[#allocation12 + $0x708] sm:$0xf0]  ;;  %v9885_v39 = vor.u32 %v12607_v38, %v9882_v31  ;;  %v11392_v31 = vld [vmem:[#allocation12 + $0x1200] sm:$0xf] }
 0x1de   :  { %v9957_v23 = vor.u32 %v12625_v20, %v9954_v22 }
 0x1df   :  { %6498 = vmatpush.bf16.msrb.mxu3 %v9233_v43  ;;  %6559 = vmatpush.bf16.msrb.mxu0 %v9525_v48  ;;  %v9165_v43 = vor.u32 %v12427_v40, %v9162_v41  ;;  %v12967_v41 = vld [vmem:[#allocation12 + $0x1174] sm:$0xf] }
 0x1e1   :  { %6525 = vmatpush.bf16.msrb.mxu2 %v10313_v36  ;;  %6536 = vmatpush.bf16.msra.mxu1 %v11033_v55  ;;  %v11825_v36 = vor.u32 %v13102_v34, %v11824_v33  ;;  %v12409_v55 = vld [vmem:[#allocation12 + $0x4] sm:$0xf] }
 0x1e2   :  { %v9093_v58 = vor.u32 %v12409_v55, %v9090_v56  ;;  %v11250_v55 = vld [vmem:[#allocation12 + $0x1128] sm:$0xf0] }
 0x1e3   :  { %6499 = vmatpush.bf16.msrb.mxu3 %v9161_v59  ;;  %6560 = vmatpush.bf16.msrb.mxu0 %v9453_v61  ;;  %v10602_v59 = vld [vmem:[#allocation12 + $0xc18] sm:$0xf0]  ;;  %v13066_v61 = vld [vmem:[#allocation12 + $0x1484] sm:$0xf0] }
 0x1e4   :  { %v10605_v62 = vor.u32 %v12787_v57, %v10602_v59  ;;  %v11681_v63 = vor.u32 %v13066_v61, %v11680_v60  ;;  %v12931_v59 = vld [vmem:[#allocation12 + $0x1054] sm:$0xf]  ;;  %v11178_v60 = vld [vmem:[#allocation12 + $0x1098] sm:$0xf0] }
 0x1e5   :  { %6526 = vmatpush.bf16.msrb.mxu2 %v10241_v49  ;;  %6537 = vmatpush.bf16.msra.mxu1 %v10961_v2  ;;  %v10677_v49 = vor.u32 %v12805_v42, %v10674_v44 }
 0x1e7   :  { %6500 = vmatpush.bf16.msrb.mxu3 %v9089_v5  ;;  %6561 = vmatpush.bf16.msrb.mxu0 %v9381_v8  ;;  %v11608_v5 = vld [vmem:[#allocation12 + $0x13b0] sm:$0xf] }
 0x1e8   :  { %v11609_v9 = vor.u32 %v13048_v6, %v11608_v5  ;;  %v12913_v5 = vld [vmem:[#allocation12 + $0xfc4] sm:$0xf]  ;;  %v11106_v6 = vld [vmem:[#allocation12 + $0x1008] sm:$0xf0] }
 0x1e9   :  { %6571 = vmatpush.bf16.msra.mxu2 %v10173_v52  ;;  %6538 = vmatpush.bf16.msra.mxu1 %v10889_v14  ;;  %v9810_v52 = vld [vmem:[#allocation12 + $0x5e8] sm:$0xf0] }
 0x1ea   :  { %v9813_v53 = vor.u32 %v12589_v51, %v9810_v52 }
 0x1eb   :  { %6562 = vmatpush.bf16.msrb.mxu0 %v9309_v16  ;;  %6545 = vmatpush.bf16.msra.mxu3 %v11897_v19  ;;  %v10461_v16 = vor.u32 %v12751_v46, %v10458_v15  ;;  %v11537_v19 = vor.u32 %v13030_v18, %v11536_v17  ;;  %v11826_v46 = vld [vmem:[#allocation12 + $0x15a8] sm:$0xf0]  ;;  %v12895_v15 = vld [vmem:[#allocation12 + $0xf34] sm:$0xf]  ;;  %v9600_v18 = vld [vmem:[#allocation12 + $0x3f8] sm:$0xf] }
 0x1ed   :  { %6572 = vmatpush.bf16.msra.mxu2 %v10101_v7  ;;  %6539 = vmatpush.bf16.msra.mxu1 %v10817_v26  ;;  %v12571_v7 = vld [vmem:[#allocation12 + $0x514] sm:$0xf] }
 0x1ee   :  { %v9741_v2 = vor.u32 %v12571_v7, %v9738_v0 }
 0x1ef   :  { %6563 = vmatpush.bf16.msrb.mxu0 %v9237_v30  ;;  %6546 = vmatpush.bf16.msra.mxu3 %v11825_v36  ;;  %v10314_v36 = vld [vmem:[#allocation12 + $0x9d8] sm:$0xf0] }
 0x1f1   :  { %6573 = vmatpush.bf16.msra.mxu2 %v10029_v11  ;;  %6584 = vmatpush.bf16.msrb.mxu1 %v10749_v37  ;;  %v9666_v11 = vld [vmem:[#allocation12 + $0x4c8] sm:$0xf0]  ;;  %v12715_v37 = vld [vmem:[#allocation12 + $0x994] sm:$0xf] }
 0x1f2   :  { %v9669_v13 = vor.u32 %v12553_v10, %v9666_v11 }
 0x1f3   :  { %6564 = vmatpush.bf16.msrb.mxu0 %v9165_v43  ;;  %6547 = vmatpush.bf16.msra.mxu3 %v11753_v50  ;;  %v11322_v43 = vld [vmem:[#allocation12 + $0x11b8] sm:$0xf0]  ;;  %v1293_v50 = vperm.slane %v13767_v1, 1 }
 0x1f4   :  { %v11325_v47 = vor.u32 %v12967_v41, %v11322_v43  ;;  %v12859_v41 = vld [vmem:[#allocation12 + $0xe14] sm:$0xf]  ;;  %v10890_v43 = vld [vmem:[#allocation12 + $0xe58] sm:$0xf0] }
 0x1f5   :  { %6574 = vmatpush.bf16.msra.mxu2 %v9957_v23  ;;  %6585 = vmatpush.bf16.msrb.mxu1 %v10677_v49  ;;  %v12733_v23 = vld [vmem:[#allocation12 + $0xa24] sm:$0xf]  ;;  %v10242_v49 = vld [vmem:[#allocation12 + $0x948] sm:$0xf0] }
 0x1f6   :  { %v10389_v26 = vor.u32 %v12733_v23, %v10386_v24  ;;  %v10245_v51 = vor.u32 %v12697_v45, %v10242_v49  ;;  %v10893_v45 = vor.u32 %v12859_v41, %v10890_v43  ;;  %v12959_v41 = vld [vmem:[#allocation12 + $0x112c] sm:$0xf0]  ;;  %v9096_v43 = vld [vmem:[#allocation12 + $0x8] sm:$0xf] }
 0x1f7   :  { %v13763_v21 = vpop.f32.mrf.mxu0  ;;  %6565 = vmatpush.bf16.msrb.mxu0 %v9093_v58  ;;  %6548 = vmatpush.bf16.msra.mxu3 %v11681_v63  ;;  %v11181_v63 = vor.u32 %v12931_v59, %v11178_v60  ;;  %v9384_v59 = vld [vmem:[#allocation12 + $0x248] sm:$0xf]  ;;  %v12491_v60 = vld [vmem:[#allocation12 + $0x28c] sm:$0xf0] }
 0x1f8   :  { %v1936_v20 = vadd.f32 %v13763_v21, %v1292_v12  ;;  %v10317_v21 = vor.u32 %v12715_v37, %v10314_v36  ;;  %v12527_v37 = vld [vmem:[#allocation12 + $0x3ac] sm:$0xf0] }
 0x1f9   :  { %6575 = vmatpush.bf16.msra.mxu2 %v9885_v39  ;;  %6586 = vmatpush.bf16.msrb.mxu1 %v10605_v62  ;;  %v12994_v39 = vld [vmem:[#allocation12 + $0x1244] sm:$0xf0]  ;;  %v1294_v62 = vperm.slane %v13767_v1, 2 }
 0x1fa   :  { %v11393_v40 = vor.u32 %v12994_v39, %v11392_v31  ;;  %v13057_v31 = vld [vmem:[#allocation12 + $0x1444] sm:$0xf]  ;;  %v11682_v39 = vld [vmem:[#allocation12 + $0x1488] sm:$0xf0] }
 0x1fb   :  { %6549 = vmatpush.bf16.msra.mxu3 %v11609_v9 }
 0x1fd   :  { %v13765_v48 = vpop.f32.mrf.mxu3  ;;  %6576 = vmatpush.bf16.msra.mxu2 %v9813_v53  ;;  %6587 = vmatpush.bf16.msrb.mxu1 %v10533_v35 }
 0x1fe   :  { %v1975_v58 = vadd.f32 %v13765_v48, %v1293_v50  ;;  %v11109_v48 = vor.u32 %v12913_v5, %v11106_v6  ;;  %v11685_v50 = vor.u32 %v13057_v31, %v11682_v39  ;;  %v9312_v6 = vld [vmem:[#allocation12 + $0x1b8] sm:$0xf]  ;;  %v12635_v31 = vld [vmem:[#allocation12 + $0x70c] sm:$0xf0] }
 0x1ff   :  { %v1937_v54 = vpop.f32.mrf.mxu0  ;;  %6550 = vmatpush.bf16.msra.mxu3 %v11537_v19  ;;  %v12545_v19 = vld [vmem:[#allocation12 + $0x43c] sm:$0xf0] }
 0x200   :  { %v12949_v54 = vld [vmem:[#allocation12 + $0x10e4] sm:$0xf] }
 0x201   :  { %6577 = vmatpush.bf16.msra.mxu2 %v9741_v2  ;;  %6588 = vmatpush.bf16.msrb.mxu1 %v10461_v16  ;;  %v11253_v56 = vor.u32 %v12949_v54, %v11250_v55  ;;  %v13111_v2 = vld [vmem:[#allocation12 + $0x15f4] sm:$0xf]  ;;  %v11034_v16 = vld [vmem:[#allocation12 + $0xf78] sm:$0xf0] }
 0x202   :  { %v11901_v11 = vor.u32 %v13111_v2, %v11898_v3  ;;  %v10176_v2 = vld [vmem:[#allocation12 + $0x878] sm:$0xf]  ;;  %v12689_v3 = vld [vmem:[#allocation12 + $0x8bc] sm:$0xf0] }
 0x203   :  { %6551 = vmatpush.bf16.msra.mxu3 %v11465_v32  ;;  %v10962_v32 = vld [vmem:[#allocation12 + $0xee8] sm:$0xf0] }
 0x205   :  { %v1976_v8 = vpop.f32.mrf.mxu3  ;;  %6578 = vmatpush.bf16.msra.mxu2 %v9669_v13  ;;  %6589 = vmatpush.bf16.msrb.mxu1 %v10389_v26  ;;  %v11754_v26 = vld [vmem:[#allocation12 + $0x1518] sm:$0xf0] }
 0x207   :  { %v1987_v14 = vpop.f32.mrf.mxu0  ;;  %6552 = vmatpush.bf16.msra.mxu3 %v11393_v40 }
 0x208   :  { %v1988_v61 = vadd.f32 %v1987_v14, %v1975_v58  ;;  %v13093_v14 = vld [vmem:[#allocation12 + $0x1564] sm:$0xf] }
 0x209   :  { %6590 = vmatpush.bf16.msrb.mxu1 %v10317_v21  ;;  %v11829_v23 = vor.u32 %v13093_v14, %v11826_v46  ;;  %v1295_v21 = vperm.slane %v13767_v1, 3  ;;  %v10104_v46 = vld [vmem:[#allocation12 + $0x7e8] sm:$0xf] }
 0x20b   :  { %v1948_v22 = vpop.f32.mrf.mxu2 }
 0x20c   :  { %v1949_v25 = vadd.f32 %v1948_v22, %v1936_v20  ;;  %v11037_v20 = vor.u32 %v12895_v15, %v11034_v16  ;;  %v12671_v15 = vld [vmem:[#allocation12 + $0x82c] sm:$0xf0] }
 0x20d   :  { %v1961_v29 = vpop.f32.mrf.mxu1  ;;  %v2026_v30 = vpop.f32.mrf.mxu3  ;;  %6591 = vmatpush.bf16.msrb.mxu1 %v10245_v51 }
 0x20e   :  { %v1962_v33 = vadd.f32 %v1961_v29, %v1949_v25  ;;  %v13075_v25 = vld [vmem:[#allocation12 + $0x14d4] sm:$0xf]  ;;  %v9601_v29 = vor.u32 %v12545_v19, %v9600_v18  ;;  %v9240_v18 = vld [vmem:[#allocation12 + $0x128] sm:$0xf]  ;;  %v12455_v19 = vld [vmem:[#allocation12 + $0x16c] sm:$0xf0] }
 0x20f   :  { %v1989_v34 = vpop.f32.mrf.mxu0 }
 0x210   :  { %v2121_v38 = vmax.f32 %v1962_v33, 0.0  ;;  %v9528_v34 = vld [vmem:[#allocation12 + $0x368] sm:$0xf] }
 0x211   :  { %v9529_v40 = vor.u32 %v12527_v37, %v9528_v34 }
 0x212   :  { %v13771_v42 = vpack.c.bf16 %v2121_v38, %v2121_v38  ;;  %v11757_v38 = vor.u32 %v13075_v25, %v11754_v26  ;;  %v10032_v25 = vld [vmem:[#allocation12 + $0x758] sm:$0xf]  ;;  %v12653_v26 = vld [vmem:[#allocation12 + $0x79c] sm:$0xf0] }
 0x213   :  { %v1950_v44 = vpop.f32.mrf.mxu2  ;;  %v10033_v37 = vor.u32 %v12653_v26, %v10032_v25  ;;  %v10968_v25 = vld [vmem:[#allocation12 + $0xea8] sm:$0xf]  ;;  %v12887_v26 = vld [vmem:[#allocation12 + $0xeec] sm:$0xf0] }
 0x214   :  { %6501 = vmatmul.bf16.vlgmr.msrb.gmra.mxu3 %v13771_v42  ;;  %v9456_v44 = vld [vmem:[#allocation12 + $0x2d8] sm:$0xf] }
 0x215   :  { %v1963_v52 = vpop.f32.mrf.mxu1  ;;  %v2028_v53 = vpop.f32.mrf.mxu3  ;;  %6597 = vmatpush.bf16.msrb.mxu3 %v11325_v47  ;;  %v12509_v47 = vld [vmem:[#allocation12 + $0x31c] sm:$0xf0] }
 0x216   :  { %v13039_v52 = vld [vmem:[#allocation12 + $0x13b4] sm:$0xf]  ;;  %v11610_v53 = vld [vmem:[#allocation12 + $0x13f8] sm:$0xf0]  ;;  %v9457_v55 = vor.u32 %v12509_v47, %v9456_v44  ;;  %v12419_v44 = vld [vmem:[#allocation12 + $0x4c] sm:$0xf0] }
 0x217   :  { %v2039_v57 = vpop.f32.mrf.mxu0 }
 0x219   :  { %6598 = vmatpush.bf16.msrb.mxu3 %v11253_v56  ;;  %v12841_v56 = vld [vmem:[#allocation12 + $0xd84] sm:$0xf] }
 0x21b   :  { %v2000_v7 = vpop.f32.mrf.mxu2 }
 0x21c   :  { %v2001_v0 = vadd.f32 %v2000_v7, %v1988_v61 }
 0x21d   :  { %v2013_v4 = vpop.f32.mrf.mxu1  ;;  %v13777_v35 = vpop.f32.mrf.mxu3  ;;  %6599 = vmatpush.bf16.msrb.mxu3 %v11181_v63  ;;  %v13021_v63 = vld [vmem:[#allocation12 + $0x1324] sm:$0xf] }
 0x21e   :  { %v2122_v8 = vmax.f32 %v2001_v0, 0.0  ;;  %v2014_v9 = vadd.f32 %v2013_v4, %v1294_v62  ;;  %v11613_v62 = vor.u32 %v13039_v52, %v11610_v53  ;;  %v11538_v0 = vld [vmem:[#allocation12 + $0x1368] sm:$0xf0]  ;;  %v9385_v4 = vor.u32 %v12491_v60, %v9384_v59  ;;  %v12617_v52 = vld [vmem:[#allocation12 + $0x67c] sm:$0xf0] }
 0x21f   :  { %v2041_v10 = vpop.f32.mrf.mxu0  ;;  %v9097_v53 = vor.u32 %v12419_v44, %v9096_v43  ;;  %v11832_v59 = vld [vmem:[#allocation12 + $0x1568] sm:$0xf]  ;;  %v13103_v60 = vld [vmem:[#allocation12 + $0x15ac] sm:$0xf0]  ;;  %v10896_v43 = vld [vmem:[#allocation12 + $0xe18] sm:$0xf] }
 0x220   :  { %v13779_v12 = vpack.c.bf16 %v2122_v8, %v2122_v8  ;;  %v2027_v13 = vadd.f32 %v2026_v30, %v2014_v9  ;;  %v12877_v30 = vld [vmem:[#allocation12 + $0xea4] sm:$0xf]  ;;  %v12473_v8 = vld [vmem:[#allocation12 + $0x1fc] sm:$0xf0]  ;;  %v10177_v10 = vor.u32 %v12689_v3, %v10176_v2  ;;  %v11833_v2 = vor.u32 %v13103_v60, %v11832_v59  ;;  %v12851_v59 = vld [vmem:[#allocation12 + $0xdcc] sm:$0xf0] }
 0x221   :  { %6600 = vmatpush.bf16.msrb.mxu3 %v11109_v48  ;;  %v10965_v36 = vor.u32 %v12877_v30, %v10962_v32  ;;  %v11541_v48 = vor.u32 %v13021_v63, %v11538_v0  ;;  %v9168_v30 = vld [vmem:[#allocation12 + $0x98] sm:$0xf]  ;;  %v12437_v32 = vld [vmem:[#allocation12 + $0xdc] sm:$0xf0]  ;;  %v12599_v63 = vld [vmem:[#allocation12 + $0x5ec] sm:$0xf0] }
 0x222   :  { %v2040_v17 = vadd.f32 %v2039_v57, %v2027_v13  ;;  %6514 = vmatmul.bf16.vlgmr.msra.gmra.mxu0 %v13779_v12  ;;  %v10818_v57 = vld [vmem:[#allocation12 + $0xdc8] sm:$0xf0]  ;;  %v9169_v39 = vor.u32 %v12437_v32, %v9168_v30  ;;  %v12923_v0 = vld [vmem:[#allocation12 + $0x100c] sm:$0xf0]  ;;  %v12869_v44 = vld [vmem:[#allocation12 + $0xe5c] sm:$0xf0] }
 0x223   :  { %6610 = vmatpush.bf16.msra.mxu0 %v11901_v11  ;;  %v2002_v22 = vpop.f32.mrf.mxu2  ;;  %v10821_v61 = vor.u32 %v12841_v56, %v10818_v57  ;;  %v13003_v11 = vld [vmem:[#allocation12 + $0x1294] sm:$0xf]  ;;  %v1296_v57 = vperm.slane %v13767_v1, 4  ;;  %v11760_v1 = vld [vmem:[#allocation12 + $0x14d8] sm:$0xf] }
 0x224   :  { %v2123_v24 = vmax.f32 %v2040_v17, 0.0  ;;  %v9313_v17 = vor.u32 %v12473_v8, %v9312_v6  ;;  %v10105_v22 = vor.u32 %v12671_v15, %v10104_v46  ;;  %v12500_v60 = vld [vmem:[#allocation12 + $0x2dc] sm:$0xf] }
 0x225   :  { %v2015_v27 = vpop.f32.mrf.mxu1  ;;  %v2080_v28 = vpop.f32.mrf.mxu3  ;;  %6601 = vmatpush.bf16.msrb.mxu3 %v11037_v20 }
 0x226   :  { %v13782_v33 = vpack.c.bf16 %v2123_v24, %v2123_v24  ;;  %v11394_v24 = vld [vmem:[#allocation12 + $0x1248] sm:$0xf0]  ;;  %v9241_v27 = vor.u32 %v12455_v19, %v9240_v18  ;;  %v11328_v28 = vld [vmem:[#allocation12 + $0x1178] sm:$0xf]  ;;  %v11688_v19 = vld [vmem:[#allocation12 + $0x1448] sm:$0xf] }
 0x227   :  { %6611 = vmatpush.bf16.msra.mxu0 %v11829_v23  ;;  %v12985_v23 = vld [vmem:[#allocation12 + $0x1204] sm:$0xf] }
 0x228   :  { %6527 = vmatmul.bf16.vlgmr.msrb.gmra.mxu2 %v13782_v33  ;;  %v11397_v34 = vor.u32 %v12985_v23, %v11394_v24  ;;  %v12563_v24 = vld [vmem:[#allocation12 + $0x4cc] sm:$0xf0] }
 0x229   :  { %6623 = vmatpush.bf16.msrb.mxu2 %v9601_v29  ;;  %6602 = vmatpush.bf16.msrb.mxu3 %v10965_v36  ;;  %v12977_v29 = vld [vmem:[#allocation12 + $0x11bc] sm:$0xf0] }
 0x22b   :  { %6612 = vmatpush.bf16.msra.mxu0 %v11757_v38  ;;  %v2052_v49 = vpop.f32.mrf.mxu2  ;;  %v11329_v38 = vor.u32 %v12977_v29, %v11328_v28  ;;  %v12536_v28 = vld [vmem:[#allocation12 + $0x3fc] sm:$0xf]  ;;  %v9602_v29 = vld [vmem:[#allocation12 + $0x440] sm:$0xf0] }
 0x22c   :  { %v2053_v51 = vadd.f32 %v2052_v49, %v1295_v21  ;;  %v9960_v21 = vld [vmem:[#allocation12 + $0x6c8] sm:$0xf]  ;;  %v13121_v49 = vld [vmem:[#allocation12 + $0x163c] sm:$0xf0] }
 0x22d   :  { %6624 = vmatpush.bf16.msrb.mxu2 %v9529_v40  ;;  %v2065_v54 = vpop.f32.mrf.mxu1  ;;  %6603 = vmatpush.bf16.msrb.mxu3 %v10893_v45  ;;  %v11256_v40 = vld [vmem:[#allocation12 + $0x10e8] sm:$0xf]  ;;  %v9961_v47 = vor.u32 %v12635_v31, %v9960_v21  ;;  %v11904_v45 = vld [vmem:[#allocation12 + $0x15f8] sm:$0xf]  ;;  %v13049_v31 = vld [vmem:[#allocation12 + $0x13fc] sm:$0xf0] }
 0x22e   :  { %v2066_v58 = vadd.f32 %v2065_v54, %v2053_v51  ;;  %v9888_v51 = vld [vmem:[#allocation12 + $0x638] sm:$0xf]  ;;  %v11905_v56 = vor.u32 %v13121_v49, %v11904_v45  ;;  %v9530_v45 = vld [vmem:[#allocation12 + $0x3b0] sm:$0xf0] }
 0x22f   :  { %6613 = vmatpush.bf16.msra.mxu0 %v11685_v50  ;;  %v11257_v50 = vor.u32 %v12959_v41, %v11256_v40  ;;  %v11184_v54 = vld [vmem:[#allocation12 + $0x1058] sm:$0xf]  ;;  %v10969_v40 = vor.u32 %v12887_v26, %v10968_v25  ;;  %v9605_v41 = vor.u32 %v12536_v28, %v9602_v29  ;;  %v12743_v28 = vld [vmem:[#allocation12 + $0xa6c] sm:$0xf0] }
 0x230   :  { %v2079_v7 = vadd.f32 %v13777_v35, %v2066_v58  ;;  %v11466_v35 = vld [vmem:[#allocation12 + $0x12d8] sm:$0xf0]  ;;  %v9889_v58 = vor.u32 %v12617_v52, %v9888_v51  ;;  %v11616_v21 = vld [vmem:[#allocation12 + $0x13b8] sm:$0xf] }
 0x231   :  { %6625 = vmatpush.bf16.msrb.mxu2 %v9457_v55  ;;  %6604 = vmatpush.bf16.msrb.mxu3 %v10821_v61  ;;  %v11469_v20 = vor.u32 %v13003_v11, %v11466_v35  ;;  %v12941_v55 = vld [vmem:[#allocation12 + $0x109c] sm:$0xf0]  ;;  %v11040_v11 = vld [vmem:[#allocation12 + $0xf38] sm:$0xf]  ;;  %v11617_v51 = vor.u32 %v13049_v31, %v11616_v21  ;;  %v12446_v21 = vld [vmem:[#allocation12 + $0x12c] sm:$0xf] }
 0x232   :  { %v2124_v5 = vmax.f32 %v2079_v7, 0.0  ;;  %6566 = vmatmul.bf16.vlgmr.msrb.gmra.mxu0 %v13771_v42  ;;  %v11185_v61 = vor.u32 %v12941_v55, %v11184_v54  ;;  %v11112_v7 = vld [vmem:[#allocation12 + $0xfc8] sm:$0xf]  ;;  %v12905_v35 = vld [vmem:[#allocation12 + $0xf7c] sm:$0xf0] }
 0x233   :  { %6614 = vmatpush.bf16.msra.mxu0 %v11613_v62  ;;  %v2054_v9 = vpop.f32.mrf.mxu2  ;;  %v9816_v62 = vld [vmem:[#allocation12 + $0x5a8] sm:$0xf]  ;;  %v11113_v8 = vor.u32 %v12923_v0, %v11112_v7  ;;  %v11041_v23 = vor.u32 %v12905_v35, %v11040_v11  ;;  %v10608_v52 = vld [vmem:[#allocation12 + $0xbd8] sm:$0xf]  ;;  %v13031_v55 = vld [vmem:[#allocation12 + $0x136c] sm:$0xf0] }
 0x234   :  { %v13788_v13 = vpack.c.bf16 %v2124_v5, %v2124_v5  ;;  %v13085_v5 = vld [vmem:[#allocation12 + $0x151c] sm:$0xf0]  ;;  %v9744_v9 = vld [vmem:[#allocation12 + $0x518] sm:$0xf]  ;;  %v11544_v54 = vld [vmem:[#allocation12 + $0x1328] sm:$0xf] }
 0x235   :  { %6626 = vmatpush.bf16.msrb.mxu2 %v9385_v4  ;;  %v2067_v16 = vpop.f32.mrf.mxu1  ;;  %v9817_v4 = vor.u32 %v12599_v63, %v9816_v62  ;;  %v11761_v15 = vor.u32 %v13085_v5, %v11760_v1  ;;  %v11545_v63 = vor.u32 %v13031_v55, %v11544_v54  ;;  %v10536_v7 = vld [vmem:[#allocation12 + $0xb48] sm:$0xf]  ;;  %v12824_v0 = vld [vmem:[#allocation12 + $0xcfc] sm:$0xf]  ;;  %v13013_v1 = vld [vmem:[#allocation12 + $0x12dc] sm:$0xf0] }
 0x236   :  { %6540 = vmatmul.bf16.vlgmr.msra.gmra.mxu1 %v13788_v13  ;;  %v10752_v16 = vld [vmem:[#allocation12 + $0xcf8] sm:$0xf]  ;;  %v9242_v31 = vld [vmem:[#allocation12 + $0x170] sm:$0xf0]  ;;  %v10248_v55 = vld [vmem:[#allocation12 + $0x908] sm:$0xf] }
 0x237   :  { %v13790_v14 = vpop.f32.mrf.mxu0  ;;  %6615 = vmatpush.bf16.msra.mxu0 %v11541_v48  ;;  %6636 = vmatpush.bf16.msra.mxu1 %v10177_v10  ;;  %v12581_v48 = vld [vmem:[#allocation12 + $0x55c] sm:$0xf0]  ;;  %v10464_v35 = vld [vmem:[#allocation12 + $0xab8] sm:$0xf] }
 0x238   :  { %6579 = vmatmul.bf16.vlgmr.msra.gmra.mxu2 %v13779_v12  ;;  %v2092_v3 = vadd.f32 %v13790_v14, %v1296_v57  ;;  %v9745_v18 = vor.u32 %v12581_v48, %v9744_v9  ;;  %v12482_v9 = vld [vmem:[#allocation12 + $0x24c] sm:$0xf]  ;;  %v9386_v48 = vld [vmem:[#allocation12 + $0x290] sm:$0xf0] }
 0x239   :  { %6627 = vmatpush.bf16.msrb.mxu2 %v9313_v17  ;;  %v12833_v17 = vld [vmem:[#allocation12 + $0xd3c] sm:$0xf0] }
 0x23a   :  { %v10753_v30 = vor.u32 %v12833_v17, %v10752_v16  ;;  %v10682_v16 = vld [vmem:[#allocation12 + $0xcb0] sm:$0xf0]  ;;  %v9389_v17 = vor.u32 %v12482_v9, %v9386_v48  ;;  %v12734_v9 = vld [vmem:[#allocation12 + $0xa2c] sm:$0xf] }
 0x23b   :  { %6616 = vmatpush.bf16.msra.mxu0 %v11469_v20  ;;  %6637 = vmatpush.bf16.msra.mxu1 %v10105_v22  ;;  %v13067_v20 = vld [vmem:[#allocation12 + $0x148c] sm:$0xf0]  ;;  %v9672_v22 = vld [vmem:[#allocation12 + $0x488] sm:$0xf] }
 0x23c   :  { %v11689_v32 = vor.u32 %v13067_v20, %v11688_v19  ;;  %v12968_v19 = vld [vmem:[#allocation12 + $0x117c] sm:$0xf]  ;;  %v11330_v20 = vld [vmem:[#allocation12 + $0x11c0] sm:$0xf0] }
 0x23d   :  { %6628 = vmatpush.bf16.msrb.mxu2 %v9241_v27  ;;  %v11333_v29 = vor.u32 %v12968_v19, %v11330_v20 }
 0x23f   :  { %v2093_v36 = vpop.f32.mrf.mxu0  ;;  %6617 = vmatpush.bf16.msra.mxu0 %v11397_v34  ;;  %6638 = vmatpush.bf16.msra.mxu1 %v10033_v37  ;;  %v10680_v34 = vld [vmem:[#allocation12 + $0xc68] sm:$0xf] }
 0x240   :  { %v9673_v36 = vor.u32 %v12563_v24, %v9672_v22  ;;  %v12464_v22 = vld [vmem:[#allocation12 + $0x1bc] sm:$0xf] }
 0x241   :  { %6629 = vmatpush.bf16.msrb.mxu2 %v9169_v39 }
 0x243   :  { %6662 = vmatpush.bf16.msrb.mxu0 %v11329_v38  ;;  %6639 = vmatpush.bf16.msra.mxu1 %v9961_v47  ;;  %v12815_v38 = vld [vmem:[#allocation12 + $0xcac] sm:$0xf0]  ;;  %v12518_v47 = vld [vmem:[#allocation12 + $0x36c] sm:$0xf] }
 0x244   :  { %v9533_v57 = vor.u32 %v12518_v47, %v9530_v45  ;;  %v9245_v47 = vor.u32 %v12446_v21, %v9242_v31  ;;  %v12770_v45 = vld [vmem:[#allocation12 + $0xb4c] sm:$0xf]  ;;  %v10250_v21 = vld [vmem:[#allocation12 + $0x950] sm:$0xf0] }
 0x245   :  { %6630 = vmatpush.bf16.msrb.mxu2 %v9097_v53  ;;  %v12797_v53 = vld [vmem:[#allocation12 + $0xc1c] sm:$0xf0] }
 0x246   :  { %6592 = vmatmul.bf16.vlgmr.msrb.gmra.mxu1 %v13782_v33  ;;  %v10609_v62 = vor.u32 %v12797_v53, %v10608_v52  ;;  %v12428_v52 = vld [vmem:[#allocation12 + $0x9c] sm:$0xf]  ;;  %v9170_v53 = vld [vmem:[#allocation12 + $0xe0] sm:$0xf0] }
 0x247   :  { %6663 = vmatpush.bf16.msrb.mxu0 %v11257_v50  ;;  %6640 = vmatpush.bf16.msra.mxu1 %v9889_v58  ;;  %v10681_v50 = vor.u32 %v12815_v38, %v10680_v34  ;;  %v10824_v58 = vld [vmem:[#allocation12 + $0xd88] sm:$0xf]  ;;  %v10610_v34 = vld [vmem:[#allocation12 + $0xc20] sm:$0xf0]  ;;  %v11258_v38 = vld [vmem:[#allocation12 + $0x1130] sm:$0xf0] }
 0x248   :  { %6631 = vmatmul.bf16.vlgmr.msrb.gmra.mxu2 %v13771_v42  ;;  %v10825_v5 = vor.u32 %v12851_v59, %v10824_v58  ;;  %v12752_v58 = vld [vmem:[#allocation12 + $0xabc] sm:$0xf]  ;;  %v10466_v59 = vld [vmem:[#allocation12 + $0xb00] sm:$0xf0] }
 0x249   :  { %6675 = vmatpush.bf16.msra.mxu2 %v11905_v56  ;;  %v10897_v56 = vor.u32 %v12869_v44, %v10896_v43  ;;  %v12725_v43 = vld [vmem:[#allocation12 + $0x9dc] sm:$0xf0] }
 0x24b   :  { %v2104_v6 = vpop.f32.mrf.mxu2  ;;  %6664 = vmatpush.bf16.msrb.mxu0 %v11185_v61  ;;  %6641 = vmatpush.bf16.msra.mxu1 %v9817_v4  ;;  %v9458_v61 = vld [vmem:[#allocation12 + $0x320] sm:$0xf0]  ;;  %v11472_v4 = vld [vmem:[#allocation12 + $0x1298] sm:$0xf] }
 0x24c   :  { %v2105_v10 = vadd.f32 %v2104_v6, %v2092_v3  ;;  %v12779_v3 = vld [vmem:[#allocation12 + $0xb8c] sm:$0xf0]  ;;  %v9461_v6 = vor.u32 %v12500_v60, %v9458_v61  ;;  %v11473_v11 = vor.u32 %v13013_v1, %v11472_v4  ;;  %v9173_v61 = vor.u32 %v12428_v52, %v9170_v53  ;;  %v13112_v1 = vld [vmem:[#allocation12 + $0x15fc] sm:$0xf] }
 0x24d   :  { %v2117_v46 = vpop.f32.mrf.mxu1  ;;  %6676 = vmatpush.bf16.msra.mxu2 %v11833_v2  ;;  %v10754_v2 = vld [vmem:[#allocation12 + $0xd40] sm:$0xf0]  ;;  %v12608_v53 = vld [vmem:[#allocation12 + $0x63c] sm:$0xf] }
 0x24e   :  { %v2118_v14 = vadd.f32 %v2117_v46, %v2105_v10  ;;  %v10537_v10 = vor.u32 %v12779_v3, %v10536_v7  ;;  %v12761_v46 = vld [vmem:[#allocation12 + $0xafc] sm:$0xf0]  ;;  %v12914_v7 = vld [vmem:[#allocation12 + $0xfcc] sm:$0xf]  ;;  %v9098_v3 = vld [vmem:[#allocation12 + $0x50] sm:$0xf0] }
 0x24f   :  { %6665 = vmatpush.bf16.msrb.mxu0 %v11113_v8  ;;  %6642 = vmatpush.bf16.msra.mxu1 %v9745_v18  ;;  %v10757_v8 = vor.u32 %v12824_v0, %v10754_v2  ;;  %v12995_v18 = vld [vmem:[#allocation12 + $0x124c] sm:$0xf0]  ;;  %v10465_v24 = vor.u32 %v12761_v46, %v10464_v35  ;;  %v11114_v0 = vld [vmem:[#allocation12 + $0x1010] sm:$0xf0]  ;;  %v12410_v2 = vld [vmem:[#allocation12 + $0xc] sm:$0xf] }
 0x250   :  { %v2125_v27 = vmax.f32 %v2118_v14, 0.0  ;;  %v11400_v14 = vld [vmem:[#allocation12 + $0x1208] sm:$0xf]  ;;  %v11117_v48 = vor.u32 %v12914_v7, %v11114_v0  ;;  %v12662_v35 = vld [vmem:[#allocation12 + $0x7ec] sm:$0xf] }
 0x251   :  { %6677 = vmatpush.bf16.msra.mxu2 %v11761_v15  ;;  %v12806_v15 = vld [vmem:[#allocation12 + $0xc6c] sm:$0xf]  ;;  %v11401_v26 = vor.u32 %v12995_v18, %v11400_v14  ;;  %v10106_v46 = vld [vmem:[#allocation12 + $0x830] sm:$0xf0]  ;;  %v13040_v7 = vld [vmem:[#allocation12 + $0x13bc] sm:$0xf] }
 0x252   :  { %v13798_v37 = vpack.c.bf16 %v2125_v27, %v2125_v27  ;;  %v10685_v25 = vor.u32 %v12806_v15, %v10682_v16  ;;  %v10392_v27 = vld [vmem:[#allocation12 + $0xa28] sm:$0xf]  ;;  %v12896_v16 = vld [vmem:[#allocation12 + $0xf3c] sm:$0xf]  ;;  %v13094_v14 = vld [vmem:[#allocation12 + $0x156c] sm:$0xf]  ;;  %v10109_v20 = vor.u32 %v12662_v35, %v10106_v46 }
 0x253   :  { %v2106_v39 = vpop.f32.mrf.mxu2  ;;  %6666 = vmatpush.bf16.msrb.mxu0 %v11041_v23  ;;  %6643 = vmatpush.bf16.msra.mxu1 %v9673_v36  ;;  %v9314_v23 = vld [vmem:[#allocation12 + $0x200] sm:$0xf0]  ;;  %v12950_v36 = vld [vmem:[#allocation12 + $0x10ec] sm:$0xf]  ;;  %v11834_v18 = vld [vmem:[#allocation12 + $0x15b0] sm:$0xf0] }
 0x254   :  { %6553 = vmatmul.bf16.vlgmr.msra.gmra.mxu3 %v13798_v37  ;;  %6618 = vmatmul.bf16.vlgmr.msra.gmra.mxu0 %v13798_v37  ;;  %v10393_v39 = vor.u32 %v12743_v28, %v10392_v27  ;;  %v11261_v44 = vor.u32 %v12950_v36, %v11258_v38  ;;  %v11837_v27 = vor.u32 %v13094_v14, %v11834_v18  ;;  %v12878_v28 = vld [vmem:[#allocation12 + $0xeac] sm:$0xf]  ;;  %v11618_v0 = vld [vmem:[#allocation12 + $0x1400] sm:$0xf0]  ;;  %v11546_v46 = vld [vmem:[#allocation12 + $0x1370] sm:$0xf0] }
 0x255   :  { %6649 = vmatpush.bf16.msra.mxu3 %v10753_v30  ;;  %v2119_v49 = vpop.f32.mrf.mxu1  ;;  %6678 = vmatpush.bf16.msra.mxu2 %v11689_v32  ;;  %v9317_v30 = vor.u32 %v12464_v22, %v9314_v23  ;;  %v12788_v32 = vld [vmem:[#allocation12 + $0xbdc] sm:$0xf]  ;;  %v12698_v38 = vld [vmem:[#allocation12 + $0x90c] sm:$0xf]  ;;  %v9746_v14 = vld [vmem:[#allocation12 + $0x560] sm:$0xf0] }
 0x256   :  { %6644 = vmatmul.bf16.vlgmr.msra.gmra.mxu1 %v13779_v12  ;;  %v10538_v49 = vld [vmem:[#allocation12 + $0xb90] sm:$0xf0]  ;;  %v12716_v22 = vld [vmem:[#allocation12 + $0x99c] sm:$0xf]  ;;  %v13022_v35 = vld [vmem:[#allocation12 + $0x132c] sm:$0xf] }
 0x257   :  { %6667 = vmatpush.bf16.msrb.mxu0 %v10969_v40  ;;  %6688 = vmatpush.bf16.msrb.mxu1 %v9605_v41  ;;  %v10613_v40 = vor.u32 %v12788_v32, %v10610_v34  ;;  %v10320_v41 = vld [vmem:[#allocation12 + $0x998] sm:$0xf]  ;;  %v11762_v32 = vld [vmem:[#allocation12 + $0x1520] sm:$0xf0] }
 0x258   :  { %v10321_v54 = vor.u32 %v12725_v43, %v10320_v41  ;;  %v10184_v41 = vld [vmem:[#allocation12 + $0x880] sm:$0xf] }
 0x259   :  { %6650 = vmatpush.bf16.msra.mxu3 %v10681_v50  ;;  %6679 = vmatpush.bf16.msra.mxu2 %v11617_v51  ;;  %v12932_v50 = vld [vmem:[#allocation12 + $0x105c] sm:$0xf]  ;;  %v11186_v51 = vld [vmem:[#allocation12 + $0x10a0] sm:$0xf0] }
 0x25a   :  { %v11189_v60 = vor.u32 %v12932_v50, %v11186_v51  ;;  %v11690_v50 = vld [vmem:[#allocation12 + $0x1490] sm:$0xf0]  ;;  %v10253_v51 = vor.u32 %v12698_v38, %v10250_v21  ;;  %v9608_v21 = vld [vmem:[#allocation12 + $0x400] sm:$0xf] }
 0x25b   :  { %6668 = vmatpush.bf16.msrb.mxu0 %v10897_v56  ;;  %6689 = vmatpush.bf16.msrb.mxu1 %v9533_v57  ;;  %v10541_v56 = vor.u32 %v12770_v45, %v10538_v49  ;;  %v12707_v57 = vld [vmem:[#allocation12 + $0x94c] sm:$0xf0]  ;;  %v10898_v45 = vld [vmem:[#allocation12 + $0xe60] sm:$0xf0]  ;;  %v13058_v49 = vld [vmem:[#allocation12 + $0x144c] sm:$0xf] }
 0x25c   :  { %v10249_v4 = vor.u32 %v12707_v57, %v10248_v55  ;;  %v10112_v57 = vld [vmem:[#allocation12 + $0x7f0] sm:$0xf] }
 0x25d   :  { %6651 = vmatpush.bf16.msra.mxu3 %v10609_v62  ;;  %6680 = vmatpush.bf16.msra.mxu2 %v11545_v63  ;;  %v12680_v62 = vld [vmem:[#allocation12 + $0x87c] sm:$0xf]  ;;  %v10178_v63 = vld [vmem:[#allocation12 + $0x8c0] sm:$0xf0] }
 0x25f   :  { %6669 = vmatpush.bf16.msrb.mxu0 %v10825_v5  ;;  %6690 = vmatpush.bf16.msrb.mxu1 %v9461_v6  ;;  %v11906_v5 = vld [vmem:[#allocation12 + $0x1640] sm:$0xf0]  ;;  %v10469_v6 = vor.u32 %v12752_v58, %v10466_v59  ;;  %v12672_v58 = vld [vmem:[#allocation12 + $0x834] sm:$0xf0]  ;;  %v11693_v59 = vor.u32 %v13058_v49, %v11690_v50 }
 0x260   :  { %v11909_v15 = vor.u32 %v13112_v1, %v11906_v5  ;;  %v12590_v1 = vld [vmem:[#allocation12 + $0x5ac] sm:$0xf]  ;;  %v9818_v5 = vld [vmem:[#allocation12 + $0x5f0] sm:$0xf0] }
 0x261   :  { %6652 = vmatpush.bf16.msra.mxu3 %v10537_v10  ;;  %6681 = vmatpush.bf16.msra.mxu2 %v11473_v11  ;;  %v9101_v10 = vor.u32 %v12410_v2, %v9098_v3  ;;  %v10394_v11 = vld [vmem:[#allocation12 + $0xa70] sm:$0xf0]  ;;  %v10113_v3 = vor.u32 %v12672_v58, %v10112_v57  ;;  %v10472_v58 = vld [vmem:[#allocation12 + $0xac0] sm:$0xf] }
 0x262   :  { %v10397_v19 = vor.u32 %v12734_v9, %v10394_v11  ;;  %v10040_v9 = vld [vmem:[#allocation12 + $0x760] sm:$0xf]  ;;  %v12816_v11 = vld [vmem:[#allocation12 + $0xcb4] sm:$0xf0] }
 0x263   :  { %6714 = vmatpush.bf16.msra.mxu0 %v10757_v8  ;;  %6691 = vmatpush.bf16.msrb.mxu1 %v9389_v17  ;;  %v10181_v8 = vor.u32 %v12680_v62, %v10178_v63  ;;  %v11042_v17 = vld [vmem:[#allocation12 + $0xf80] sm:$0xf0]  ;;  %v10760_v62 = vld [vmem:[#allocation12 + $0xd00] sm:$0xf]  ;;  %v12834_v63 = vld [vmem:[#allocation12 + $0xd44] sm:$0xf0] }
 0x264   :  { %6605 = vmatmul.bf16.vlgmr.msrb.gmra.mxu3 %v13788_v13  ;;  %6670 = vmatmul.bf16.vlgmr.msrb.gmra.mxu0 %v13788_v13  ;;  %v11045_v23 = vor.u32 %v12896_v16, %v11042_v17  ;;  %v12572_v17 = vld [vmem:[#allocation12 + $0x51c] sm:$0xf] }
 0x265   :  { %6653 = vmatpush.bf16.msra.mxu3 %v10465_v24  ;;  %6682 = vmatpush.bf16.msra.mxu2 %v11401_v26  ;;  %v10322_v24 = vld [vmem:[#allocation12 + $0x9e0] sm:$0xf0] }
 0x266   :  { %v10034_v26 = vld [vmem:[#allocation12 + $0x7a0] sm:$0xf0]  ;;  %v10325_v34 = vor.u32 %v12716_v22, %v10322_v24  ;;  %v12636_v22 = vld [vmem:[#allocation12 + $0x714] sm:$0xf0]  ;;  %v12798_v24 = vld [vmem:[#allocation12 + $0xc24] sm:$0xf0] }
 0x267   :  { %6715 = vmatpush.bf16.msra.mxu0 %v10685_v25  ;;  %6692 = vmatpush.bf16.msrb.mxu1 %v9317_v30  ;;  %v12644_v25 = vld [vmem:[#allocation12 + $0x75c] sm:$0xf] }
 0x268   :  { %6683 = vmatmul.bf16.vlgmr.msra.gmra.mxu2 %v13798_v37  ;;  %v13076_v30 = vld [vmem:[#allocation12 + $0x14dc] sm:$0xf]  ;;  %v10037_v36 = vor.u32 %v12644_v25, %v10034_v26  ;;  %v11474_v26 = vld [vmem:[#allocation12 + $0x12e0] sm:$0xf0] }
 0x269   :  { %6727 = vmatpush.bf16.msrb.mxu2 %v11333_v29  ;;  %6654 = vmatpush.bf16.msra.mxu3 %v10393_v39  ;;  %v10970_v29 = vld [vmem:[#allocation12 + $0xef0] sm:$0xf0]  ;;  %v12626_v39 = vld [vmem:[#allocation12 + $0x6cc] sm:$0xf]  ;;  %v11765_v43 = vor.u32 %v13076_v30, %v11762_v32  ;;  %v13004_v25 = vld [vmem:[#allocation12 + $0x129c] sm:$0xf] }
 0x26a   :  { %v10973_v31 = vor.u32 %v12878_v28, %v10970_v29  ;;  %v12554_v28 = vld [vmem:[#allocation12 + $0x48c] sm:$0xf]  ;;  %v9674_v30 = vld [vmem:[#allocation12 + $0x4d0] sm:$0xf0]  ;;  %v9896_v32 = vld [vmem:[#allocation12 + $0x640] sm:$0xf]  ;;  %v11477_v38 = vor.u32 %v13004_v25, %v11474_v26 }
 0x26b   :  { %6716 = vmatpush.bf16.msra.mxu0 %v10613_v40  ;;  %6693 = vmatpush.bf16.msrb.mxu1 %v9245_v47  ;;  %v9962_v40 = vld [vmem:[#allocation12 + $0x710] sm:$0xf0]  ;;  %v12860_v47 = vld [vmem:[#allocation12 + $0xe1c] sm:$0xf]  ;;  %v13812_v26 = vld [vmem:[#allocation13] sm:$0xff] }
 0x26c   :  { %v9965_v52 = vor.u32 %v12626_v39, %v9962_v40  ;;  %v10901_v55 = vor.u32 %v12860_v47, %v10898_v45  ;;  %v10544_v39 = vld [vmem:[#allocation12 + $0xb50] sm:$0xf]  ;;  %v12780_v40 = vld [vmem:[#allocation12 + $0xb94] sm:$0xf0]  ;;  %v11336_v47 = vld [vmem:[#allocation12 + $0x1180] sm:$0xf] }
 0x26d   :  { %6728 = vmatpush.bf16.msrb.mxu2 %v11261_v44  ;;  %6655 = vmatpush.bf16.msra.mxu3 %v10321_v54  ;;  %v12690_v44 = vld [vmem:[#allocation12 + $0x8c4] sm:$0xf0] }
 0x26e   :  { %v10185_v54 = vor.u32 %v12690_v44, %v10184_v41  ;;  %v12986_v41 = vld [vmem:[#allocation12 + $0x120c] sm:$0xf]  ;;  %v9677_v44 = vor.u32 %v12554_v28, %v9674_v30  ;;  %v12978_v45 = vld [vmem:[#allocation12 + $0x11c4] sm:$0xf0] }
 0x26f   :  { %6717 = vmatpush.bf16.msra.mxu0 %v10541_v56  ;;  %6694 = vmatpush.bf16.msrb.mxu1 %v9173_v61  ;;  %v9890_v56 = vld [vmem:[#allocation12 + $0x680] sm:$0xf0]  ;;  %v10826_v61 = vld [vmem:[#allocation12 + $0xdd0] sm:$0xf0]  ;;  %v11337_v57 = vor.u32 %v12978_v45, %v11336_v47  ;;  %v12474_v30 = vld [vmem:[#allocation12 + $0x204] sm:$0xf0] }
 0x270   :  { %v9893_v2 = vor.u32 %v12608_v53, %v9890_v56  ;;  %v12528_v56 = vld [vmem:[#allocation12 + $0x3b4] sm:$0xf0]  ;;  %v2857_v47 = vperm.slane %v13812_v26, 0 }
 0x271   :  { %6729 = vmatpush.bf16.msrb.mxu2 %v11189_v60  ;;  %6656 = vmatpush.bf16.msra.mxu3 %v10249_v4  ;;  %v12842_v60 = vld [vmem:[#allocation12 + $0xd8c] sm:$0xf] }
 0x272   :  { %v10829_v4 = vor.u32 %v12842_v60, %v10826_v61  ;;  %v11264_v60 = vld [vmem:[#allocation12 + $0x10f0] sm:$0xf]  ;;  %v12960_v61 = vld [vmem:[#allocation12 + $0x1134] sm:$0xf0] }
 0x273   :  { %6718 = vmatpush.bf16.msra.mxu0 %v10469_v6  ;;  %6695 = vmatpush.bf16.msrb.mxu1 %v9101_v10  ;;  %v10761_v6 = vor.u32 %v12834_v63, %v10760_v62  ;;  %v10688_v10 = vld [vmem:[#allocation12 + $0xc70] sm:$0xf] }
 0x274   :  { %6657 = vmatmul.bf16.vlgmr.msra.gmra.mxu3 %v13782_v33  ;;  %v10689_v18 = vor.u32 %v12816_v11, %v10688_v10  ;;  %v9680_v11 = vld [vmem:[#allocation12 + $0x490] sm:$0xf] }
 0x275   :  { %6701 = vmatpush.bf16.msrb.mxu3 %v10181_v8  ;;  %6730 = vmatpush.bf16.msrb.mxu2 %v11117_v48  ;;  %v11621_v8 = vor.u32 %v13040_v7, %v11618_v0  ;;  %v12654_v48 = vld [vmem:[#allocation12 + $0x7a4] sm:$0xf0]  ;;  %v9752_v7 = vld [vmem:[#allocation12 + $0x520] sm:$0xf] }
 0x276   :  { %6696 = vmatmul.bf16.vlgmr.msrb.gmra.mxu1 %v13771_v42  ;;  %v10041_v16 = vor.u32 %v12654_v48, %v10040_v9  ;;  %v12942_v9 = vld [vmem:[#allocation12 + $0x10a4] sm:$0xf0] }
 0x277   :  { %6740 = vmatpush.bf16.msra.mxu1 %v11909_v15  ;;  %6719 = vmatpush.bf16.msra.mxu0 %v10397_v19  ;;  %v9821_v15 = vor.u32 %v12590_v1, %v9818_v5  ;;  %v11549_v19 = vor.u32 %v13022_v35, %v11546_v46  ;;  %v11265_v1 = vor.u32 %v12960_v61, %v11264_v60  ;;  %v10400_v5 = vld [vmem:[#allocation12 + $0xa30] sm:$0xf]  ;;  %v12564_v35 = vld [vmem:[#allocation12 + $0x4d4] sm:$0xf0] }
 0x279   :  { %6702 = vmatpush.bf16.msrb.mxu3 %v10109_v20  ;;  %6731 = vmatpush.bf16.msrb.mxu2 %v11045_v23  ;;  %v9968_v20 = vld [vmem:[#allocation12 + $0x6d0] sm:$0xf]  ;;  %v10616_v23 = vld [vmem:[#allocation12 + $0xbe0] sm:$0xf] }
 0x27a   :  { %v9969_v29 = vor.u32 %v12636_v22, %v9968_v20  ;;  %v12726_v20 = vld [vmem:[#allocation12 + $0x9e4] sm:$0xf0]  ;;  %v11120_v22 = vld [vmem:[#allocation12 + $0xfd0] sm:$0xf] }
 0x27b   :  { %6741 = vmatpush.bf16.msra.mxu1 %v11837_v27  ;;  %6720 = vmatpush.bf16.msra.mxu0 %v10325_v34  ;;  %v9749_v27 = vor.u32 %v12572_v17, %v9746_v14  ;;  %v12618_v34 = vld [vmem:[#allocation12 + $0x684] sm:$0xf0]  ;;  %v12537_v17 = vld [vmem:[#allocation12 + $0x404] sm:$0xf] }
 0x27c   :  { %v9897_v49 = vor.u32 %v12618_v34, %v9896_v32  ;;  %v12519_v32 = vld [vmem:[#allocation12 + $0x374] sm:$0xf]  ;;  %v9538_v34 = vld [vmem:[#allocation12 + $0x3b8] sm:$0xf0] }
 0x27d   :  { %6703 = vmatpush.bf16.msrb.mxu3 %v10037_v36  ;;  %6732 = vmatpush.bf16.msrb.mxu2 %v10973_v31  ;;  %v10617_v36 = vor.u32 %v12798_v24, %v10616_v23  ;;  %v12546_v31 = vld [vmem:[#allocation12 + $0x444] sm:$0xf0]  ;;  %v12924_v23 = vld [vmem:[#allocation12 + $0x1014] sm:$0xf0]  ;;  %v9681_v24 = vor.u32 %v12564_v35, %v9680_v11  ;;  %v9541_v45 = vor.u32 %v12519_v32, %v9538_v34  ;;  %v9104_v35 = vld [vmem:[#allocation12 + $0x10] sm:$0xf] }
 0x27e   :  { %v9609_v50 = vor.u32 %v12546_v31, %v9608_v21  ;;  %v12708_v21 = vld [vmem:[#allocation12 + $0x954] sm:$0xf0]  ;;  %v12681_v31 = vld [vmem:[#allocation12 + $0x884] sm:$0xf]  ;;  %v12447_v34 = vld [vmem:[#allocation12 + $0x134] sm:$0xf] }
 0x27f   :  { %6742 = vmatpush.bf16.msra.mxu1 %v11765_v43  ;;  %6721 = vmatpush.bf16.msra.mxu0 %v10253_v51  ;;  %v11402_v43 = vld [vmem:[#allocation12 + $0x1250] sm:$0xf0]  ;;  %v9824_v51 = vld [vmem:[#allocation12 + $0x5b0] sm:$0xf] }
 0x280   :  { %v11405_v53 = vor.u32 %v12986_v41, %v11402_v43  ;;  %v11048_v41 = vld [vmem:[#allocation12 + $0xf40] sm:$0xf]  ;;  %v12906_v43 = vld [vmem:[#allocation12 + $0xf84] sm:$0xf0] }
 0x281   :  { %6704 = vmatpush.bf16.msrb.mxu3 %v9965_v52  ;;  %6733 = vmatpush.bf16.msrb.mxu2 %v10901_v55  ;;  %v10545_v52 = vor.u32 %v12780_v40, %v10544_v39  ;;  %v9536_v55 = vld [vmem:[#allocation12 + $0x370] sm:$0xf]  ;;  %v10186_v40 = vld [vmem:[#allocation12 + $0x8c8] sm:$0xf0] }
 0x282   :  { %6722 = vmatmul.bf16.vlgmr.msra.gmra.mxu0 %v13782_v33  ;;  %v9537_v63 = vor.u32 %v12528_v56, %v9536_v55  ;;  %v9466_v55 = vld [vmem:[#allocation12 + $0x328] sm:$0xf0]  ;;  %v12663_v56 = vld [vmem:[#allocation12 + $0x7f4] sm:$0xf] }
 0x283   :  { %6766 = vmatpush.bf16.msrb.mxu0 %v10185_v54  ;;  %6743 = vmatpush.bf16.msra.mxu1 %v11693_v59  ;;  %v12600_v54 = vld [vmem:[#allocation12 + $0x5f4] sm:$0xf0]  ;;  %v12762_v59 = vld [vmem:[#allocation12 + $0xb04] sm:$0xf0] }
 0x284   :  { %v9825_v62 = vor.u32 %v12600_v54, %v9824_v51  ;;  %v10473_v0 = vor.u32 %v12762_v59, %v10472_v58  ;;  %v12456_v51 = vld [vmem:[#allocation12 + $0x174] sm:$0xf0]  ;;  %v12501_v54 = vld [vmem:[#allocation12 + $0x2e4] sm:$0xf]  ;;  %v10976_v58 = vld [vmem:[#allocation12 + $0xeb0] sm:$0xf] }
 0x285   :  { %6705 = vmatpush.bf16.msrb.mxu3 %v9893_v2  ;;  %6734 = vmatpush.bf16.msrb.mxu2 %v10829_v4  ;;  %v12582_v2 = vld [vmem:[#allocation12 + $0x564] sm:$0xf0]  ;;  %v12888_v59 = vld [vmem:[#allocation12 + $0xef4] sm:$0xf0]  ;;  %v9469_v61 = vor.u32 %v12501_v54, %v9466_v55  ;;  %v11768_v54 = vld [vmem:[#allocation12 + $0x14e0] sm:$0xf] }
 0x286   :  { %v12510_v4 = vld [vmem:[#allocation12 + $0x324] sm:$0xf0]  ;;  %v9753_v48 = vor.u32 %v12582_v2, %v9752_v7  ;;  %v10977_v2 = vor.u32 %v12888_v59, %v10976_v58  ;;  %v12591_v58 = vld [vmem:[#allocation12 + $0x5b4] sm:$0xf]  ;;  %v9826_v59 = vld [vmem:[#allocation12 + $0x5f8] sm:$0xf0] }
 0x287   :  { %6767 = vmatpush.bf16.msrb.mxu0 %v10113_v3  ;;  %6744 = vmatpush.bf16.msra.mxu1 %v11621_v8  ;;  %v9464_v3 = vld [vmem:[#allocation12 + $0x2e0] sm:$0xf]  ;;  %v13086_v55 = vld [vmem:[#allocation12 + $0x1524] sm:$0xf0] }
 0x288   :  { %6735 = vmatmul.bf16.vlgmr.msrb.gmra.mxu2 %v13788_v13  ;;  %v11192_v8 = vld [vmem:[#allocation12 + $0x1060] sm:$0xf]  ;;  %v9465_v10 = vor.u32 %v12510_v4, %v9464_v3  ;;  %v12483_v3 = vld [vmem:[#allocation12 + $0x254] sm:$0xf]  ;;  %v9394_v4 = vld [vmem:[#allocation12 + $0x298] sm:$0xf0] }
 0x289   :  { %6779 = vmatpush.bf16.msra.mxu2 %v10761_v6  ;;  %6706 = vmatpush.bf16.msrb.mxu3 %v9821_v15  ;;  %v12744_v6 = vld [vmem:[#allocation12 + $0xa74] sm:$0xf0]  ;;  %v9392_v15 = vld [vmem:[#allocation12 + $0x250] sm:$0xf]  ;;  %v11193_v14 = vor.u32 %v12942_v9, %v11192_v8  ;;  %v10042_v8 = vld [vmem:[#allocation12 + $0x7a8] sm:$0xf0] }
 0x28a   :  { %v10401_v46 = vor.u32 %v12744_v6, %v10400_v5  ;;  %v10904_v9 = vld [vmem:[#allocation12 + $0xe20] sm:$0xf] }
 0x28b   :  { %6768 = vmatpush.bf16.msrb.mxu0 %v10041_v16  ;;  %6745 = vmatpush.bf16.msra.mxu1 %v11549_v19  ;;  %v12492_v16 = vld [vmem:[#allocation12 + $0x294] sm:$0xf0]  ;;  %v10328_v19 = vld [vmem:[#allocation12 + $0x9a0] sm:$0xf] }
 0x28c   :  { %v9393_v25 = vor.u32 %v12492_v16, %v9392_v15  ;;  %v12420_v15 = vld [vmem:[#allocation12 + $0x54] sm:$0xf0]  ;;  %v12465_v16 = vld [vmem:[#allocation12 + $0x1c4] sm:$0xf] }
 0x28d   :  { %6780 = vmatpush.bf16.msra.mxu2 %v10689_v18  ;;  %6707 = vmatpush.bf16.msrb.mxu3 %v9749_v27  ;;  %v9610_v18 = vld [vmem:[#allocation12 + $0x448] sm:$0xf0]  ;;  %v9320_v27 = vld [vmem:[#allocation12 + $0x1c0] sm:$0xf] }
 0x28e   :  { %v9613_v28 = vor.u32 %v12537_v17, %v9610_v18  ;;  %v9322_v17 = vld [vmem:[#allocation12 + $0x208] sm:$0xf0] }
 0x28f   :  { %6769 = vmatpush.bf16.msrb.mxu0 %v9969_v29  ;;  %6746 = vmatpush.bf16.msra.mxu1 %v11477_v38  ;;  %v10329_v29 = vor.u32 %v12726_v20, %v10328_v19  ;;  %v10256_v38 = vld [vmem:[#allocation12 + $0x910] sm:$0xf]  ;;  %v11912_v19 = vld [vmem:[#allocation12 + $0x1600] sm:$0xf]  ;;  %v13122_v20 = vld [vmem:[#allocation12 + $0x1644] sm:$0xf0] }
 0x290   :  { %v11913_v32 = vor.u32 %v13122_v20, %v11912_v19  ;;  %v13095_v19 = vld [vmem:[#allocation12 + $0x1574] sm:$0xf]  ;;  %v11842_v20 = vld [vmem:[#allocation12 + $0x15b8] sm:$0xf0] }
 0x291   :  { %6781 = vmatpush.bf16.msra.mxu2 %v10617_v36  ;;  %6708 = vmatpush.bf16.msrb.mxu3 %v9677_v44  ;;  %v11121_v36 = vor.u32 %v12924_v23, %v11120_v22  ;;  %v9321_v44 = vor.u32 %v12474_v30, %v9320_v27  ;;  %v12627_v22 = vld [vmem:[#allocation12 + $0x6d4] sm:$0xf]  ;;  %v9970_v23 = vld [vmem:[#allocation12 + $0x718] sm:$0xf0]  ;;  %v9105_v27 = vor.u32 %v12420_v15, %v9104_v35 }
 0x292   :  { %v9325_v30 = vor.u32 %v12465_v16, %v9322_v17  ;;  %v10546_v35 = vld [vmem:[#allocation12 + $0xb98] sm:$0xf0]  ;;  %v11624_v16 = vld [vmem:[#allocation12 + $0x13c0] sm:$0xf] }
 0x293   :  { %6770 = vmatpush.bf16.msrb.mxu0 %v9897_v49  ;;  %6747 = vmatpush.bf16.msra.mxu1 %v11405_v53  ;;  %v10257_v49 = vor.u32 %v12708_v21, %v10256_v38  ;;  %v11049_v53 = vor.u32 %v12906_v43, %v11048_v41  ;;  %v9250_v21 = vld [vmem:[#allocation12 + $0x178] sm:$0xf0]  ;;  %v12609_v43 = vld [vmem:[#allocation12 + $0x644] sm:$0xf] }
 0x294   :  { %6709 = vmatmul.bf16.vlgmr.msrb.gmra.mxu3 %v13779_v12 }
 0x295   :  { %6753 = vmatpush.bf16.msra.mxu3 %v9609_v50  ;;  %6782 = vmatpush.bf16.msra.mxu2 %v10545_v52  ;;  %v9248_v50 = vld [vmem:[#allocation12 + $0x130] sm:$0xf]  ;;  %v10189_v52 = vor.u32 %v12681_v31, %v10186_v40 }
 0x296   :  { %6748 = vmatmul.bf16.vlgmr.msra.gmra.mxu1 %v13798_v37  ;;  %v9249_v60 = vor.u32 %v12456_v51, %v9248_v50  ;;  %v11840_v31 = vld [vmem:[#allocation12 + $0x1570] sm:$0xf]  ;;  %v12429_v51 = vld [vmem:[#allocation12 + $0xa4] sm:$0xf] }
 0x297   :  { %6792 = vmatpush.bf16.msrb.mxu1 %v11337_v57  ;;  %6771 = vmatpush.bf16.msrb.mxu0 %v9825_v62  ;;  %v6502_v39 = vpop.f32.mrf.mxu3  ;;  %v10114_v57 = vld [vmem:[#allocation12 + $0x838] sm:$0xf0]  ;;  %v9176_v62 = vld [vmem:[#allocation12 + $0xa0] sm:$0xf] }
 0x298   :  { %v6503_v7 = vadd.f32 %v6502_v39, %v2857_v47  ;;  %v13104_v39 = vld [vmem:[#allocation12 + $0x15b4] sm:$0xf0]  ;;  %v12807_v47 = vld [vmem:[#allocation12 + $0xc74] sm:$0xf] }
 0x299   :  { %6754 = vmatpush.bf16.msra.mxu3 %v9537_v63  ;;  %6783 = vmatpush.bf16.msra.mxu2 %v10473_v0  ;;  %v12438_v63 = vld [vmem:[#allocation12 + $0xe4] sm:$0xf0]  ;;  %v10117_v0 = vor.u32 %v12663_v56, %v10114_v57  ;;  %v11841_v50 = vor.u32 %v13104_v39, %v11840_v31  ;;  %v11552_v39 = vld [vmem:[#allocation12 + $0x1330] sm:$0xf] }
 0x29a   :  { %v9177_v11 = vor.u32 %v12438_v63, %v9176_v62  ;;  %v10618_v62 = vld [vmem:[#allocation12 + $0xc28] sm:$0xf0] }
 0x29b   :  { %6793 = vmatpush.bf16.msrb.mxu1 %v11265_v1  ;;  %6772 = vmatpush.bf16.msrb.mxu0 %v9753_v48  ;;  %v12645_v1 = vld [vmem:[#allocation12 + $0x764] sm:$0xf]  ;;  %v12870_v48 = vld [vmem:[#allocation12 + $0xe64] sm:$0xf0] }
 0x29c   :  { %v10905_v18 = vor.u32 %v12870_v48, %v10904_v9  ;;  %v11914_v9 = vld [vmem:[#allocation12 + $0x1648] sm:$0xf0]  ;;  %v12573_v48 = vld [vmem:[#allocation12 + $0x524] sm:$0xf] }
 0x29d   :  { %6755 = vmatpush.bf16.msra.mxu3 %v9465_v10  ;;  %6784 = vmatpush.bf16.msra.mxu2 %v10401_v46  ;;  %v9397_v46 = vor.u32 %v12483_v3, %v9394_v4  ;;  %v9829_v3 = vor.u32 %v12591_v58, %v9826_v59  ;;  %v11696_v4 = vld [vmem:[#allocation12 + $0x1450] sm:$0xf] }
 0x29f   :  { %6794 = vmatpush.bf16.msrb.mxu1 %v11193_v14  ;;  %6773 = vmatpush.bf16.msrb.mxu0 %v9681_v24  ;;  %v6504_v5 = vpop.f32.mrf.mxu3  ;;  %v6515_v6 = vpop.f32.mrf.mxu0  ;;  %v10045_v14 = vor.u32 %v12645_v1, %v10042_v8  ;;  %v10832_v24 = vld [vmem:[#allocation12 + $0xd90] sm:$0xf]  ;;  %v13068_v1 = vld [vmem:[#allocation12 + $0x1494] sm:$0xf0] }
 0x2a0   :  { %v6516_v10 = vadd.f32 %v6515_v6, %v6503_v7  ;;  %v11769_v7 = vor.u32 %v13086_v55, %v11768_v54  ;;  %v13113_v5 = vld [vmem:[#allocation12 + $0x1604] sm:$0xf]  ;;  %v11697_v15 = vor.u32 %v13068_v1, %v11696_v4  ;;  %v10330_v4 = vld [vmem:[#allocation12 + $0x9e8] sm:$0xf0] }
 0x2a1   :  { %6756 = vmatpush.bf16.msra.mxu3 %v9393_v25  ;;  %6785 = vmatpush.bf16.msra.mxu2 %v10329_v29  ;;  %v12852_v25 = vld [vmem:[#allocation12 + $0xdd4] sm:$0xf0]  ;;  %v10762_v29 = vld [vmem:[#allocation12 + $0xd48] sm:$0xf0]  ;;  %v11917_v17 = vor.u32 %v13113_v5, %v11914_v9  ;;  %v11408_v5 = vld [vmem:[#allocation12 + $0x1210] sm:$0xf] }
 0x2a2   :  { %6774 = vmatmul.bf16.vlgmr.msrb.gmra.mxu0 %v13779_v12  ;;  %v10833_v38 = vor.u32 %v12852_v25, %v10832_v24  ;;  %v12555_v25 = vld [vmem:[#allocation12 + $0x494] sm:$0xf]  ;;  %v13041_v9 = vld [vmem:[#allocation12 + $0x13c4] sm:$0xf] }
 0x2a3   :  { %6818 = vmatpush.bf16.msra.mxu0 %v9613_v28  ;;  %6795 = vmatpush.bf16.msrb.mxu1 %v11121_v36  ;;  %v12825_v28 = vld [vmem:[#allocation12 + $0xd04] sm:$0xf]  ;;  %v9973_v36 = vor.u32 %v12627_v22, %v9970_v23 }
 0x2a4   :  { %v10765_v41 = vor.u32 %v12825_v28, %v10762_v29  ;;  %v9616_v28 = vld [vmem:[#allocation12 + $0x408] sm:$0xf] }
 0x2a5   :  { %6757 = vmatpush.bf16.msra.mxu3 %v9321_v44  ;;  %6786 = vmatpush.bf16.msra.mxu2 %v10257_v49  ;;  %v9898_v44 = vld [vmem:[#allocation12 + $0x688] sm:$0xf0]  ;;  %v9253_v49 = vor.u32 %v12447_v34, %v9250_v21  ;;  %v11845_v21 = vor.u32 %v13095_v19, %v11842_v20  ;;  %v10192_v19 = vld [vmem:[#allocation12 + $0x888] sm:$0xf]  ;;  %v12691_v20 = vld [vmem:[#allocation12 + $0x8cc] sm:$0xf0] }
 0x2a6   :  { %v10474_v34 = vld [vmem:[#allocation12 + $0xb08] sm:$0xf0] }
 0x2a7   :  { %6819 = vmatpush.bf16.msra.mxu0 %v9541_v45  ;;  %6796 = vmatpush.bf16.msrb.mxu1 %v11049_v53  ;;  %v6517_v40 = vpop.f32.mrf.mxu0  ;;  %v10690_v45 = vld [vmem:[#allocation12 + $0xcb8] sm:$0xf0]  ;;  %v9178_v53 = vld [vmem:[#allocation12 + $0xe8] sm:$0xf0] }
 0x2a8   :  { %6787 = vmatmul.bf16.vlgmr.msra.gmra.mxu2 %v13782_v33  ;;  %v10693_v57 = vor.u32 %v12807_v47, %v10690_v45  ;;  %v9181_v63 = vor.u32 %v12429_v51, %v9178_v53  ;;  %v13032_v40 = vld [vmem:[#allocation12 + $0x1374] sm:$0xf0]  ;;  %v13077_v47 = vld [vmem:[#allocation12 + $0x14e4] sm:$0xf]  ;;  %v11770_v45 = vld [vmem:[#allocation12 + $0x1528] sm:$0xf0] }
 0x2a9   :  { %6831 = vmatpush.bf16.msrb.mxu2 %v10189_v52  ;;  %6758 = vmatpush.bf16.msra.mxu3 %v9249_v60  ;;  %v9901_v52 = vor.u32 %v12609_v43, %v9898_v44  ;;  %v12735_v51 = vld [vmem:[#allocation12 + $0xa34] sm:$0xf]  ;;  %v11553_v53 = vor.u32 %v13032_v40, %v11552_v39  ;;  %v11773_v55 = vor.u32 %v13077_v47, %v11770_v45  ;;  %v12475_v39 = vld [vmem:[#allocation12 + $0x20c] sm:$0xf0]  ;;  %v10120_v40 = vld [vmem:[#allocation12 + $0x7f8] sm:$0xf] }
 0x2aa   :  { %v13005_v47 = vld [vmem:[#allocation12 + $0x12a4] sm:$0xf] }
 0x2ab   :  { %6820 = vmatpush.bf16.msra.mxu0 %v9469_v61  ;;  %6797 = vmatpush.bf16.msrb.mxu1 %v10977_v2  ;;  %v6528_v56 = vpop.f32.mrf.mxu2  ;;  %v12789_v61 = vld [vmem:[#allocation12 + $0xbe4] sm:$0xf]  ;;  %v9106_v2 = vld [vmem:[#allocation12 + $0x58] sm:$0xf0] }
 0x2ac   :  { %v6529_v60 = vadd.f32 %v6528_v56, %v6516_v10  ;;  %v10621_v8 = vor.u32 %v12789_v61, %v10618_v62  ;;  %v9754_v10 = vld [vmem:[#allocation12 + $0x568] sm:$0xf0]  ;;  %v11480_v56 = vld [vmem:[#allocation12 + $0x12a0] sm:$0xf]  ;;  %v13059_v62 = vld [vmem:[#allocation12 + $0x1454] sm:$0xf] }
 0x2ad   :  { %6832 = vmatpush.bf16.msrb.mxu2 %v10117_v0  ;;  %6759 = vmatpush.bf16.msra.mxu3 %v9177_v11  ;;  %v12411_v0 = vld [vmem:[#allocation12 + $0x14] sm:$0xf] }
 0x2ae   :  { %v12771_v11 = vld [vmem:[#allocation12 + $0xb54] sm:$0xf] }
 0x2af   :  { %6821 = vmatpush.bf16.msra.mxu0 %v9397_v46  ;;  %6798 = vmatpush.bf16.msrb.mxu1 %v10905_v18  ;;  %v6567_v6 = vpop.f32.mrf.mxu0  ;;  %v9109_v46 = vor.u32 %v12411_v0, %v9106_v2  ;;  %v13050_v18 = vld [vmem:[#allocation12 + $0x1404] sm:$0xf0]  ;;  %v10549_v24 = vor.u32 %v12771_v11, %v10546_v35  ;;  %v12511_v2 = vld [vmem:[#allocation12 + $0x32c] sm:$0xf0]  ;;  %v12969_v35 = vld [vmem:[#allocation12 + $0x1184] sm:$0xf] }
 0x2b1   :  { %6833 = vmatpush.bf16.msrb.mxu2 %v10045_v14  ;;  %6760 = vmatpush.bf16.msra.mxu3 %v9105_v27  ;;  %v9757_v14 = vor.u32 %v12573_v48, %v9754_v10  ;;  %v9682_v27 = vld [vmem:[#allocation12 + $0x4d8] sm:$0xf0]  ;;  %v11626_v48 = vld [vmem:[#allocation12 + $0x1408] sm:$0xf0] }
 0x2b2   :  { %v9685_v31 = vor.u32 %v12555_v25, %v9682_v27 }
 0x2b3   :  { %6822 = vmatpush.bf16.msra.mxu0 %v9325_v30  ;;  %6799 = vmatpush.bf16.msrb.mxu1 %v10833_v38  ;;  %v6530_v22 = vpop.f32.mrf.mxu2  ;;  %v6541_v23 = vpop.f32.mrf.mxu1  ;;  %v12547_v30 = vld [vmem:[#allocation12 + $0x44c] sm:$0xf0]  ;;  %v2858_v38 = vperm.slane %v13812_v26, 1 }
 0x2b4   :  { %6761 = vmatmul.bf16.vlgmr.msra.gmra.mxu3 %v13771_v42  ;;  %v13819_v29 = vadd.f32 %v6541_v23, %v6529_v60  ;;  %v9617_v43 = vor.u32 %v12547_v30, %v9616_v28  ;;  %v11629_v22 = vor.u32 %v13041_v9, %v11626_v48  ;;  %v2859_v9 = vperm.slane %v13812_v26, 2  ;;  %v9904_v26 = vld [vmem:[#allocation12 + $0x648] sm:$0xf] }
 0x2b5   :  { %6805 = vmatpush.bf16.msrb.mxu3 %v11913_v32  ;;  %6834 = vmatpush.bf16.msrb.mxu2 %v9973_v36  ;;  %v12753_v32 = vld [vmem:[#allocation12 + $0xac4] sm:$0xf]  ;;  %v11625_v36 = vor.u32 %v13050_v18, %v11624_v16  ;;  %v6568_v54 = vadd.f32 %v6567_v6, %v2858_v38  ;;  %v12493_v16 = vld [vmem:[#allocation12 + $0x29c] sm:$0xf0] }
 0x2b6   :  { %6800 = vmatmul.bf16.vlgmr.msrb.gmra.mxu1 %v13788_v13  ;;  %v10477_v44 = vor.u32 %v12753_v32, %v10474_v34  ;;  %v11554_v32 = vld [vmem:[#allocation12 + $0x1378] sm:$0xf0]  ;;  %v12951_v34 = vld [vmem:[#allocation12 + $0x10f4] sm:$0xf] }
 0x2b7   :  { %6844 = vmatpush.bf16.msra.mxu1 %v10765_v41  ;;  %6823 = vmatpush.bf16.msra.mxu0 %v9253_v49  ;;  %v6569_v41 = vpop.f32.mrf.mxu0  ;;  %v9544_v49 = vld [vmem:[#allocation12 + $0x378] sm:$0xf] }
 0x2b8   :  { %v12673_v41 = vld [vmem:[#allocation12 + $0x83c] sm:$0xf0] }
 0x2b9   :  { %6806 = vmatpush.bf16.msrb.mxu3 %v11841_v50  ;;  %6835 = vmatpush.bf16.msrb.mxu2 %v9901_v52  ;;  %v12529_v50 = vld [vmem:[#allocation12 + $0x3bc] sm:$0xf0]  ;;  %v10402_v52 = vld [vmem:[#allocation12 + $0xa78] sm:$0xf0] }
 0x2ba   :  { %v9545_v60 = vor.u32 %v12529_v50, %v9544_v49  ;;  %v10405_v61 = vor.u32 %v12735_v51, %v10402_v52  ;;  %v11482_v49 = vld [vmem:[#allocation12 + $0x12e8] sm:$0xf0]  ;;  %v12933_v50 = vld [vmem:[#allocation12 + $0x1064] sm:$0xf]  ;;  %v10121_v52 = vor.u32 %v12673_v41, %v10120_v40  ;;  %v11200_v41 = vld [vmem:[#allocation12 + $0x1068] sm:$0xf] }
 0x2bb   :  { %6845 = vmatpush.bf16.msra.mxu1 %v10693_v57  ;;  %6824 = vmatpush.bf16.msra.mxu0 %v9181_v63  ;;  %v13014_v57 = vld [vmem:[#allocation12 + $0x12e4] sm:$0xf0]  ;;  %v6543_v58 = vpop.f32.mrf.mxu1  ;;  %v6580_v59 = vpop.f32.mrf.mxu2  ;;  %v11698_v63 = vld [vmem:[#allocation12 + $0x1498] sm:$0xf0]  ;;  %v11194_v51 = vld [vmem:[#allocation12 + $0x10a8] sm:$0xf0] }
 0x2bc   :  { %v6581_v0 = vadd.f32 %v6580_v59, %v6568_v54  ;;  %v11481_v1 = vor.u32 %v13014_v57, %v11480_v56  ;;  %v11701_v6 = vor.u32 %v13059_v62, %v11698_v63  ;;  %v12457_v54 = vld [vmem:[#allocation12 + $0x17c] sm:$0xf0]  ;;  %v12655_v56 = vld [vmem:[#allocation12 + $0x7ac] sm:$0xf0]  ;;  %v11485_v57 = vor.u32 %v13005_v47, %v11482_v49  ;;  %v12987_v59 = vld [vmem:[#allocation12 + $0x1214] sm:$0xf] }
 0x2bd   :  { %6807 = vmatpush.bf16.msrb.mxu3 %v11769_v7  ;;  %6836 = vmatpush.bf16.msrb.mxu2 %v9829_v3  ;;  %v9472_v7 = vld [vmem:[#allocation12 + $0x2e8] sm:$0xf]  ;;  %v12717_v3 = vld [vmem:[#allocation12 + $0x9a4] sm:$0xf]  ;;  %v11197_v58 = vor.u32 %v12933_v50, %v11194_v51  ;;  %v13105_v49 = vld [vmem:[#allocation12 + $0x15bc] sm:$0xf0] }
 0x2be   :  { %v9473_v10 = vor.u32 %v12511_v2, %v9472_v7  ;;  %v10333_v11 = vor.u32 %v12717_v3, %v10330_v4  ;;  %v12915_v7 = vld [vmem:[#allocation12 + $0xfd4] sm:$0xf]  ;;  %v11344_v2 = vld [vmem:[#allocation12 + $0x1188] sm:$0xf]  ;;  %v12979_v4 = vld [vmem:[#allocation12 + $0x11cc] sm:$0xf0] }
 0x2bf   :  { %6846 = vmatpush.bf16.msra.mxu1 %v10621_v8  ;;  %6825 = vmatpush.bf16.msra.mxu0 %v9109_v46  ;;  %v12996_v8 = vld [vmem:[#allocation12 + $0x1254] sm:$0xf0]  ;;  %v11338_v46 = vld [vmem:[#allocation12 + $0x11c8] sm:$0xf0]  ;;  %v12601_v51 = vld [vmem:[#allocation12 + $0x5fc] sm:$0xf0] }
 0x2c0   :  { %v11409_v18 = vor.u32 %v12996_v8, %v11408_v5  ;;  %v11341_v23 = vor.u32 %v12969_v35, %v11338_v46  ;;  %v12439_v5 = vld [vmem:[#allocation12 + $0xec] sm:$0xf0]  ;;  %v12637_v8 = vld [vmem:[#allocation12 + $0x71c] sm:$0xf0]  ;;  %v12897_v35 = vld [vmem:[#allocation12 + $0xf44] sm:$0xf]  ;;  %v11345_v46 = vor.u32 %v12979_v4, %v11344_v2 }
 0x2c1   :  { %6808 = vmatpush.bf16.msrb.mxu3 %v11697_v15  ;;  %6837 = vmatpush.bf16.msrb.mxu2 %v9757_v14  ;;  %v9400_v15 = vld [vmem:[#allocation12 + $0x258] sm:$0xf]  ;;  %v10258_v14 = vld [vmem:[#allocation12 + $0x958] sm:$0xf0]  ;;  %v11056_v4 = vld [vmem:[#allocation12 + $0xf48] sm:$0xf] }
 0x2c2   :  { %6826 = vmatmul.bf16.vlgmr.msra.gmra.mxu0 %v13771_v42  ;;  %v9401_v28 = vor.u32 %v12493_v16, %v9400_v15  ;;  %v11050_v16 = vld [vmem:[#allocation12 + $0xf88] sm:$0xf0]  ;;  %v9832_v50 = vld [vmem:[#allocation12 + $0x5b8] sm:$0xf] }
 0x2c3   :  { %6870 = vmatpush.bf16.msrb.mxu0 %v11917_v17  ;;  %6847 = vmatpush.bf16.msra.mxu1 %v10549_v24  ;;  %v12699_v17 = vld [vmem:[#allocation12 + $0x914] sm:$0xf]  ;;  %v6582_v25 = vpop.f32.mrf.mxu2  ;;  %v6593_v27 = vpop.f32.mrf.mxu1 }
 0x2c4   :  { %v13023_v24 = vld [vmem:[#allocation12 + $0x1334] sm:$0xf]  ;;  %v10261_v30 = vor.u32 %v12699_v17, %v10258_v14  ;;  %v13824_v38 = vadd.f32 %v6593_v27, %v6581_v0  ;;  %v11122_v0 = vld [vmem:[#allocation12 + $0x1018] sm:$0xf0]  ;;  %v11272_v17 = vld [vmem:[#allocation12 + $0x10f8] sm:$0xf]  ;;  %v11053_v25 = vor.u32 %v12897_v35, %v11050_v16 }
 0x2c5   :  { %6809 = vmatpush.bf16.msrb.mxu3 %v11625_v36  ;;  %6838 = vmatpush.bf16.msrb.mxu2 %v9685_v31  ;;  %v11266_v36 = vld [vmem:[#allocation12 + $0x1138] sm:$0xf0]  ;;  %v9328_v31 = vld [vmem:[#allocation12 + $0x1c8] sm:$0xf]  ;;  %v12961_v14 = vld [vmem:[#allocation12 + $0x113c] sm:$0xf0] }
 0x2c6   :  { %v9329_v45 = vor.u32 %v12475_v39, %v9328_v31  ;;  %v11704_v35 = vld [vmem:[#allocation12 + $0x1458] sm:$0xf]  ;;  %v12565_v16 = vld [vmem:[#allocation12 + $0x4dc] sm:$0xf0] }
 0x2c7   :  { %6871 = vmatpush.bf16.msrb.mxu0 %v11845_v21  ;;  %6848 = vmatpush.bf16.msra.mxu1 %v10477_v44  ;;  %v10193_v21 = vor.u32 %v12691_v20, %v10192_v19  ;;  %v11269_v44 = vor.u32 %v12951_v34, %v11266_v36  ;;  %v9112_v19 = vld [vmem:[#allocation12 + $0x18] sm:$0xf]  ;;  %v12421_v20 = vld [vmem:[#allocation12 + $0x5c] sm:$0xf0]  ;;  %v12879_v34 = vld [vmem:[#allocation12 + $0xeb4] sm:$0xf] }
 0x2c8   :  { %6839 = vmatmul.bf16.vlgmr.msrb.gmra.mxu2 %v13779_v12  ;;  %v10978_v36 = vld [vmem:[#allocation12 + $0xef8] sm:$0xf0] }
 0x2c9   :  { %6883 = vmatpush.bf16.msra.mxu2 %v9617_v43  ;;  %6810 = vmatpush.bf16.msrb.mxu3 %v11553_v53  ;;  %v11557_v43 = vor.u32 %v13023_v24, %v11554_v32  ;;  %v9256_v53 = vld [vmem:[#allocation12 + $0x138] sm:$0xf]  ;;  %v12619_v24 = vld [vmem:[#allocation12 + $0x68c] sm:$0xf0]  ;;  %v9113_v32 = vor.u32 %v12421_v20, %v9112_v19  ;;  %v9618_v19 = vld [vmem:[#allocation12 + $0x450] sm:$0xf0] }
 0x2ca   :  { %v9257_v63 = vor.u32 %v12457_v54, %v9256_v53  ;;  %v9905_v40 = vor.u32 %v12619_v24, %v9904_v26  ;;  %v10981_v53 = vor.u32 %v12879_v34, %v10978_v36  ;;  %v13051_v34 = vld [vmem:[#allocation12 + $0x140c] sm:$0xf0]  ;;  %v12520_v36 = vld [vmem:[#allocation12 + $0x37c] sm:$0xf] }
 0x2cb   :  { %6872 = vmatpush.bf16.msrb.mxu0 %v11773_v55  ;;  %6849 = vmatpush.bf16.msra.mxu1 %v10405_v61  ;;  %v10048_v55 = vld [vmem:[#allocation12 + $0x768] sm:$0xf]  ;;  %v6595_v61 = vpop.f32.mrf.mxu1  ;;  %v6632_v62 = vpop.f32.mrf.mxu2 }
 0x2cc   :  { %v10049_v3 = vor.u32 %v12655_v56, %v10048_v55  ;;  %v6633_v27 = vadd.f32 %v6632_v62, %v2859_v9  ;;  %v12861_v55 = vld [vmem:[#allocation12 + $0xe24] sm:$0xf]  ;;  %v10906_v56 = vld [vmem:[#allocation12 + $0xe68] sm:$0xf0]  ;;  %v13087_v61 = vld [vmem:[#allocation12 + $0x152c] sm:$0xf0] }
 0x2cd   :  { %6884 = vmatpush.bf16.msra.mxu2 %v9545_v60  ;;  %6811 = vmatpush.bf16.msrb.mxu3 %v11481_v1  ;;  %v11410_v60 = vld [vmem:[#allocation12 + $0x1258] sm:$0xf0]  ;;  %v9184_v1 = vld [vmem:[#allocation12 + $0xa8] sm:$0xf] }
 0x2ce   :  { %v9185_v15 = vor.u32 %v12439_v5, %v9184_v1  ;;  %v9760_v62 = vld [vmem:[#allocation12 + $0x528] sm:$0xf]  ;;  %v12907_v1 = vld [vmem:[#allocation12 + $0xf8c] sm:$0xf0] }
 0x2cf   :  { %6873 = vmatpush.bf16.msrb.mxu0 %v11701_v6  ;;  %6850 = vmatpush.bf16.msra.mxu1 %v10333_v11  ;;  %v9976_v6 = vld [vmem:[#allocation12 + $0x6d8] sm:$0xf]  ;;  %v11125_v11 = vor.u32 %v12915_v7, %v11122_v0  ;;  %v10909_v7 = vor.u32 %v12861_v55, %v10906_v56  ;;  %v12843_v0 = vld [vmem:[#allocation12 + $0xd94] sm:$0xf]  ;;  %v11057_v20 = vor.u32 %v12907_v1, %v11056_v4  ;;  %v12502_v56 = vld [vmem:[#allocation12 + $0x2ec] sm:$0xf] }
 0x2d0   :  { %v13015_v4 = vld [vmem:[#allocation12 + $0x12ec] sm:$0xf0]  ;;  %v12484_v1 = vld [vmem:[#allocation12 + $0x25c] sm:$0xf] }
 0x2d1   :  { %6885 = vmatpush.bf16.msra.mxu2 %v9473_v10  ;;  %6812 = vmatpush.bf16.msrb.mxu3 %v11409_v18  ;;  %v13829_v48 = vpop.f32.mrf.mxu0  ;;  %v11413_v10 = vor.u32 %v12987_v59, %v11410_v60  ;;  %v9977_v18 = vor.u32 %v12637_v8, %v9976_v6  ;;  %v11128_v59 = vld [vmem:[#allocation12 + $0xfd8] sm:$0xf]  ;;  %v11776_v60 = vld [vmem:[#allocation12 + $0x14e8] sm:$0xf] }
 0x2d2   :  { %v11777_v8 = vor.u32 %v13087_v61, %v11776_v60  ;;  %v10840_v60 = vld [vmem:[#allocation12 + $0xd98] sm:$0xf]  ;;  %v12853_v61 = vld [vmem:[#allocation12 + $0xddc] sm:$0xf0] }
 0x2d3   :  { %6874 = vmatpush.bf16.msrb.mxu0 %v11629_v22  ;;  %6851 = vmatpush.bf16.msra.mxu1 %v10261_v30  ;;  %v11920_v22 = vld [vmem:[#allocation12 + $0x1608] sm:$0xf]  ;;  %v11273_v30 = vor.u32 %v12961_v14, %v11272_v17  ;;  %v6645_v31 = vpop.f32.mrf.mxu1 }
 0x2d4   :  { %6813 = vmatmul.bf16.vlgmr.msrb.gmra.mxu3 %v13798_v37 }
 0x2d5   :  { %6857 = vmatpush.bf16.msra.mxu3 %v11341_v23  ;;  %6886 = vmatpush.bf16.msra.mxu2 %v9401_v28  ;;  %v13123_v23 = vld [vmem:[#allocation12 + $0x164c] sm:$0xf0]  ;;  %v6634_v28 = vpop.f32.mrf.mxu2 }
 0x2d6   :  { %6852 = vmatmul.bf16.vlgmr.msra.gmra.mxu1 %v13782_v33  ;;  %v11921_v39 = vor.u32 %v13123_v23, %v11920_v22  ;;  %v10984_v23 = vld [vmem:[#allocation12 + $0xeb8] sm:$0xf]  ;;  %v12817_v28 = vld [vmem:[#allocation12 + $0xcbc] sm:$0xf0] }
 0x2d7   :  { %6896 = vmatpush.bf16.msrb.mxu1 %v10193_v21  ;;  %6875 = vmatpush.bf16.msrb.mxu0 %v11557_v43  ;;  %v6554_v21 = vpop.f32.mrf.mxu3  ;;  %v12943_v43 = vld [vmem:[#allocation12 + $0x10ac] sm:$0xf0] }
 0x2d8   :  { %v13833_v47 = vadd.f32 %v6554_v21, %v13819_v29  ;;  %v11201_v54 = vor.u32 %v12943_v43, %v11200_v41  ;;  %v12925_v29 = vld [vmem:[#allocation12 + $0x101c] sm:$0xf0]  ;;  %v9546_v21 = vld [vmem:[#allocation12 + $0x3c0] sm:$0xf0] }
 0x2d9   :  { %6858 = vmatpush.bf16.msra.mxu3 %v11269_v44  ;;  %6887 = vmatpush.bf16.msra.mxu2 %v9329_v45  ;;  %v11848_v44 = vld [vmem:[#allocation12 + $0x1578] sm:$0xf]  ;;  %v13835_v45 = vadd.f32 %v6645_v31, %v6633_v27  ;;  %v11129_v2 = vor.u32 %v12925_v29, %v11128_v59 }
 0x2da   :  { %v10696_v27 = vld [vmem:[#allocation12 + $0xc78] sm:$0xf] }
 0x2db   :  { %6897 = vmatpush.bf16.msrb.mxu1 %v10121_v52  ;;  %6876 = vmatpush.bf16.msrb.mxu0 %v11485_v57  ;;  %v6621_v52 = vpop.f32.mrf.mxu0  ;;  %v11849_v57 = vor.u32 %v13105_v49, %v11848_v44  ;;  %v6647_v6 = vpop.f32.mrf.mxu1  ;;  %v12871_v44 = vld [vmem:[#allocation12 + $0xe6c] sm:$0xf0]  ;;  %v10624_v49 = vld [vmem:[#allocation12 + $0xbe8] sm:$0xf] }
 0x2dc   :  { %v9549_v52 = vor.u32 %v12520_v36, %v9546_v21  ;;  %v10841_v6 = vor.u32 %v12853_v61, %v10840_v60  ;;  %v11202_v60 = vld [vmem:[#allocation12 + $0x10b0] sm:$0xf0]  ;;  %v12430_v61 = vld [vmem:[#allocation12 + $0xac] sm:$0xf] }
 0x2dd   :  { %6859 = vmatpush.bf16.msra.mxu3 %v11197_v58  ;;  %6888 = vmatpush.bf16.msra.mxu2 %v9257_v63  ;;  %v9833_v58 = vor.u32 %v12601_v51, %v9832_v50  ;;  %v12583_v63 = vld [vmem:[#allocation12 + $0x56c] sm:$0xf0] }
 0x2de   :  { %v9761_v9 = vor.u32 %v12583_v63, %v9760_v62  ;;  %v12799_v50 = vld [vmem:[#allocation12 + $0xc2c] sm:$0xf0]  ;;  %v10552_v62 = vld [vmem:[#allocation12 + $0xb58] sm:$0xf]  ;;  %v12781_v63 = vld [vmem:[#allocation12 + $0xb9c] sm:$0xf0] }
 0x2df   :  { %6898 = vmatpush.bf16.msrb.mxu1 %v10049_v3  ;;  %6877 = vmatpush.bf16.msrb.mxu0 %v11413_v10  ;;  %v10834_v3 = vld [vmem:[#allocation12 + $0xdd8] sm:$0xf0]  ;;  %v6556_v5 = vpop.f32.mrf.mxu3  ;;  %v10768_v10 = vld [vmem:[#allocation12 + $0xd08] sm:$0xf]  ;;  %v10625_v29 = vor.u32 %v12799_v50, %v10624_v49 }
 0x2e0   :  { %v10837_v14 = vor.u32 %v12843_v0, %v10834_v3  ;;  %v10770_v3 = vld [vmem:[#allocation12 + $0xd50] sm:$0xf0]  ;;  %v9402_v5 = vld [vmem:[#allocation12 + $0x2a0] sm:$0xf0] }
 0x2e1   :  { %6860 = vmatpush.bf16.msra.mxu3 %v11125_v11  ;;  %6889 = vmatpush.bf16.msra.mxu2 %v9185_v15  ;;  %v12835_v11 = vld [vmem:[#allocation12 + $0xd4c] sm:$0xf0]  ;;  %v9688_v15 = vld [vmem:[#allocation12 + $0x498] sm:$0xf] }
 0x2e2   :  { %6878 = vmatmul.bf16.vlgmr.msrb.gmra.mxu0 %v13798_v37  ;;  %v10769_v22 = vor.u32 %v12835_v11, %v10768_v10  ;;  %v9689_v24 = vor.u32 %v12565_v16, %v9688_v15  ;;  %v12808_v15 = vld [vmem:[#allocation12 + $0xc7c] sm:$0xf]  ;;  %v10698_v16 = vld [vmem:[#allocation12 + $0xcc0] sm:$0xf0] }
 0x2e3   :  { %6922 = vmatpush.bf16.msra.mxu0 %v11345_v46  ;;  %6899 = vmatpush.bf16.msrb.mxu1 %v9977_v18  ;;  %v13069_v46 = vld [vmem:[#allocation12 + $0x149c] sm:$0xf0]  ;;  %v13838_v17 = vpop.f32.mrf.mxu0  ;;  %v12538_v18 = vld [vmem:[#allocation12 + $0x40c] sm:$0xf] }
 0x2e4   :  { %v11705_v26 = vor.u32 %v13069_v46, %v11704_v35  ;;  %v12763_v46 = vld [vmem:[#allocation12 + $0xb0c] sm:$0xf0] }
 0x2e5   :  { %6861 = vmatpush.bf16.msra.mxu3 %v11053_v25  ;;  %6890 = vmatpush.bf16.msra.mxu2 %v9113_v32  ;;  %v12889_v25 = vld [vmem:[#allocation12 + $0xefc] sm:$0xf0]  ;;  %v11632_v32 = vld [vmem:[#allocation12 + $0x13c8] sm:$0xf] }
 0x2e6   :  { %v10985_v31 = vor.u32 %v12889_v25, %v10984_v23  ;;  %v11633_v43 = vor.u32 %v13051_v34, %v11632_v32  ;;  %v12466_v23 = vld [vmem:[#allocation12 + $0x1cc] sm:$0xf]  ;;  %v10701_v25 = vor.u32 %v12808_v15, %v10698_v16 }
 0x2e7   :  { %6923 = vmatpush.bf16.msra.mxu0 %v11273_v30  ;;  %6900 = vmatpush.bf16.msrb.mxu1 %v9905_v40  ;;  %v9621_v30 = vor.u32 %v12538_v18, %v9618_v19  ;;  %v10912_v40 = vld [vmem:[#allocation12 + $0xe28] sm:$0xf]  ;;  %v6606_v41 = vpop.f32.mrf.mxu3  ;;  %v11416_v18 = vld [vmem:[#allocation12 + $0x1218] sm:$0xf]  ;;  %v12997_v19 = vld [vmem:[#allocation12 + $0x125c] sm:$0xf0] }
 0x2e8   :  { %6891 = vmatmul.bf16.vlgmr.msra.gmra.mxu2 %v13771_v42  ;;  %v6607_v51 = vadd.f32 %v6606_v41, %v13824_v38  ;;  %v10913_v59 = vor.u32 %v12871_v44, %v10912_v40  ;;  %v12952_v40 = vld [vmem:[#allocation12 + $0x10fc] sm:$0xf]  ;;  %v11274_v41 = vld [vmem:[#allocation12 + $0x1140] sm:$0xf0] }
 0x2e9   :  { %6935 = vmatpush.bf16.msrb.mxu2 %v11921_v39  ;;  %6862 = vmatpush.bf16.msra.mxu3 %v10981_v53  ;;  %v10697_v39 = vor.u32 %v12817_v28, %v10696_v27  ;;  %v11560_v53 = vld [vmem:[#allocation12 + $0x1338] sm:$0xf]  ;;  %v11417_v27 = vor.u32 %v12997_v19, %v11416_v18  ;;  %v9258_v44 = vld [vmem:[#allocation12 + $0x180] sm:$0xf0]  ;;  %v13114_v18 = vld [vmem:[#allocation12 + $0x160c] sm:$0xf] }
 0x2ea   :  { %v10408_v28 = vld [vmem:[#allocation12 + $0xa38] sm:$0xf] }
 0x2eb   :  { %6924 = vmatpush.bf16.msra.mxu0 %v11201_v54  ;;  %6901 = vmatpush.bf16.msrb.mxu1 %v9833_v58  ;;  %v13033_v54 = vld [vmem:[#allocation12 + $0x137c] sm:$0xf0]  ;;  %v6673_v55 = vpop.f32.mrf.mxu0  ;;  %v13843_v58 = vadd.f32 %v13829_v48, %v6607_v51  ;;  %v13846_v0 = vpop.f32.mrf.mxu2  ;;  %v11488_v48 = vld [vmem:[#allocation12 + $0x12a8] sm:$0xf] }
 0x2ec   :  { %v11561_v38 = vor.u32 %v13033_v54, %v11560_v53  ;;  %v11489_v35 = vor.u32 %v13015_v4, %v11488_v48  ;;  %v12727_v53 = vld [vmem:[#allocation12 + $0x9ec] sm:$0xf0]  ;;  %v11277_v55 = vor.u32 %v12952_v40, %v11274_v41  ;;  %v10482_v48 = vld [vmem:[#allocation12 + $0xb10] sm:$0xf0]  ;;  %v12718_v41 = vld [vmem:[#allocation12 + $0x9ac] sm:$0xf] }
 0x2ed   :  { %6936 = vmatpush.bf16.msrb.mxu2 %v11849_v57  ;;  %6863 = vmatpush.bf16.msra.mxu3 %v10909_v7  ;;  %v9474_v57 = vld [vmem:[#allocation12 + $0x330] sm:$0xf0]  ;;  %v12826_v7 = vld [vmem:[#allocation12 + $0xd0c] sm:$0xf] }
 0x2ee   :  { %v10773_v11 = vor.u32 %v12826_v7, %v10770_v3  ;;  %v10264_v7 = vld [vmem:[#allocation12 + $0x918] sm:$0xf]  ;;  %v12754_v3 = vld [vmem:[#allocation12 + $0xacc] sm:$0xf] }
 0x2ef   :  { %6925 = vmatpush.bf16.msra.mxu0 %v11129_v2  ;;  %6902 = vmatpush.bf16.msrb.mxu1 %v9761_v9  ;;  %v9477_v2 = vor.u32 %v12502_v56, %v9474_v57  ;;  %v10480_v9 = vld [vmem:[#allocation12 + $0xac8] sm:$0xf]  ;;  %v6608_v10 = vpop.f32.mrf.mxu3  ;;  %v12772_v57 = vld [vmem:[#allocation12 + $0xb5c] sm:$0xf] }
 0x2f0   :  { %v11130_v10 = vld [vmem:[#allocation12 + $0x1020] sm:$0xf0] }
 0x2f1   :  { %6937 = vmatpush.bf16.msrb.mxu2 %v11777_v8  ;;  %6864 = vmatpush.bf16.msra.mxu3 %v10837_v14  ;;  %v10553_v8 = vor.u32 %v12781_v63, %v10552_v62  ;;  %v9405_v14 = vor.u32 %v12484_v1, %v9402_v5 }
 0x2f3   :  { %6926 = vmatpush.bf16.msra.mxu0 %v11057_v20  ;;  %6903 = vmatpush.bf16.msrb.mxu1 %v9689_v24  ;;  %v12970_v20 = vld [vmem:[#allocation12 + $0x118c] sm:$0xf]  ;;  %v10481_v24 = vor.u32 %v12763_v46, %v10480_v9  ;;  %v6686_v32 = vpop.f32.mrf.mxu2  ;;  %v13848_v34 = vpop.f32.mrf.mxu1  ;;  %v10194_v9 = vld [vmem:[#allocation12 + $0x8d0] sm:$0xf0]  ;;  %v7663_v46 = vmax.f32 %v13833_v47, 0.0 }
 0x2f4   :  { %6865 = vmatmul.bf16.vlgmr.msra.gmra.mxu3 %v13788_v13  ;;  %v12898_v32 = vld [vmem:[#allocation12 + $0xf4c] sm:$0xf] }
 0x2f5   :  { %6909 = vmatpush.bf16.msrb.mxu3 %v10769_v22  ;;  %6938 = vmatpush.bf16.msrb.mxu2 %v11705_v26  ;;  %v11346_v22 = vld [vmem:[#allocation12 + $0x11d0] sm:$0xf0] }
 0x2f6   :  { %6904 = vmatmul.bf16.vlgmr.msrb.gmra.mxu1 %v13779_v12  ;;  %v9330_v26 = vld [vmem:[#allocation12 + $0x210] sm:$0xf0]  ;;  %v11349_v36 = vor.u32 %v12970_v20, %v11346_v22  ;;  %v10485_v20 = vor.u32 %v12754_v3, %v10482_v48  ;;  %v12862_v3 = vld [vmem:[#allocation12 + $0xe2c] sm:$0xf] }
 0x2f7   :  { %6948 = vmatpush.bf16.msra.mxu1 %v9621_v30  ;;  %6927 = vmatpush.bf16.msra.mxu0 %v10985_v31  ;;  %v12745_v30 = vld [vmem:[#allocation12 + $0xa7c] sm:$0xf0]  ;;  %v9333_v21 = vor.u32 %v12466_v23, %v9330_v26  ;;  %v12790_v31 = vld [vmem:[#allocation12 + $0xbec] sm:$0xf]  ;;  %v6658_v50 = vpop.f32.mrf.mxu3  ;;  %v12736_v23 = vld [vmem:[#allocation12 + $0xa3c] sm:$0xf] }
 0x2f8   :  { %v10409_v49 = vor.u32 %v12745_v30, %v10408_v28  ;;  %v6659_v54 = vadd.f32 %v6658_v50, %v13835_v45  ;;  %v12709_v45 = vld [vmem:[#allocation12 + $0x95c] sm:$0xf0]  ;;  %v10122_v28 = vld [vmem:[#allocation12 + $0x840] sm:$0xf0]  ;;  %v10050_v50 = vld [vmem:[#allocation12 + $0x7b0] sm:$0xf0] }
 0x2f9   :  { %6910 = vmatpush.bf16.msrb.mxu3 %v10697_v39  ;;  %6939 = vmatpush.bf16.msrb.mxu2 %v11633_v43  ;;  %v10626_v39 = vld [vmem:[#allocation12 + $0xc30] sm:$0xf0]  ;;  %v12448_v43 = vld [vmem:[#allocation12 + $0x13c] sm:$0xf] }
 0x2fa   :  { %v10629_v51 = vor.u32 %v12790_v31, %v10626_v39  ;;  %v9261_v56 = vor.u32 %v12448_v43, %v9258_v44  ;;  %v6672_v62 = vadd.f32 %v13838_v17, %v6659_v54  ;;  %v12916_v17 = vld [vmem:[#allocation12 + $0xfdc] sm:$0xf]  ;;  %v11850_v31 = vld [vmem:[#allocation12 + $0x15c0] sm:$0xf0]  ;;  %v10338_v44 = vld [vmem:[#allocation12 + $0x9f0] sm:$0xf0] }
 0x2fb   :  { %6949 = vmatpush.bf16.msra.mxu1 %v9549_v52  ;;  %6928 = vmatpush.bf16.msra.mxu0 %v10913_v59  ;;  %v10336_v52 = vld [vmem:[#allocation12 + $0x9a8] sm:$0xf]  ;;  %v10554_v59 = vld [vmem:[#allocation12 + $0xba0] sm:$0xf0]  ;;  %v6699_v1 = vpop.f32.mrf.mxu1  ;;  %v11133_v26 = vor.u32 %v12916_v17, %v11130_v10  ;;  %v10914_v48 = vld [vmem:[#allocation12 + $0xe70] sm:$0xf0] }
 0x2fc   :  { %v10337_v63 = vor.u32 %v12727_v53, %v10336_v52  ;;  %v6685_v4 = vadd.f32 %v13846_v0, %v6672_v62  ;;  %v11922_v0 = vld [vmem:[#allocation12 + $0x1650] sm:$0xf0]  ;;  %v12880_v52 = vld [vmem:[#allocation12 + $0xebc] sm:$0xf]  ;;  %v10986_v53 = vld [vmem:[#allocation12 + $0xf00] sm:$0xf0]  ;;  %v10917_v17 = vor.u32 %v12862_v3, %v10914_v48 }
 0x2fd   :  { %6911 = vmatpush.bf16.msrb.mxu3 %v10625_v29  ;;  %6940 = vmatpush.bf16.msrb.mxu2 %v11561_v38  ;;  %v12934_v29 = vld [vmem:[#allocation12 + $0x106c] sm:$0xf]  ;;  %v9186_v38 = vld [vmem:[#allocation12 + $0xf0] sm:$0xf0]  ;;  %v11925_v30 = vor.u32 %v13114_v18, %v11922_v0  ;;  %v9978_v62 = vld [vmem:[#allocation12 + $0x720] sm:$0xf0] }
 0x2fe   :  { %v11205_v5 = vor.u32 %v12934_v29, %v11202_v60  ;;  %v7665_v15 = vmax.f32 %v6685_v4, 0.0  ;;  %v12700_v29 = vld [vmem:[#allocation12 + $0x91c] sm:$0xf]  ;;  %v10266_v60 = vld [vmem:[#allocation12 + $0x960] sm:$0xf0] }
 0x2ff   :  { %6950 = vmatpush.bf16.msra.mxu1 %v9477_v2  ;;  %6929 = vmatpush.bf16.msra.mxu0 %v10841_v6  ;;  %v10557_v2 = vor.u32 %v12772_v57, %v10554_v59  ;;  %v9189_v6 = vor.u32 %v12430_v61, %v9186_v38  ;;  %v13856_v16 = vpop.f32.mrf.mxu0  ;;  %v6660_v19 = vpop.f32.mrf.mxu3  ;;  %v10341_v57 = vor.u32 %v12718_v41, %v10338_v44  ;;  %v12628_v38 = vld [vmem:[#allocation12 + $0x6dc] sm:$0xf]  ;;  %v11706_v1 = vld [vmem:[#allocation12 + $0x14a0] sm:$0xf0]  ;;  %v9906_v10 = vld [vmem:[#allocation12 + $0x690] sm:$0xf0] }
 0x300   :  { %v13858_v47 = vmax.f32 %v7663_v46, %v7665_v15  ;;  %v10989_v61 = vor.u32 %v12880_v52, %v10986_v53  ;;  %v13060_v4 = vld [vmem:[#allocation12 + $0x145c] sm:$0xf]  ;;  %v10776_v18 = vld [vmem:[#allocation12 + $0xd10] sm:$0xf]  ;;  %v12836_v0 = vld [vmem:[#allocation12 + $0xd54] sm:$0xf0] }
 0x301   :  { %6912 = vmatpush.bf16.msrb.mxu3 %v10553_v8  ;;  %6941 = vmatpush.bf16.msrb.mxu2 %v11489_v35  ;;  %v12682_v8 = vld [vmem:[#allocation12 + $0x88c] sm:$0xf]  ;;  %v9114_v35 = vld [vmem:[#allocation12 + $0x60] sm:$0xf0]  ;;  %v11709_v46 = vor.u32 %v13060_v4, %v11706_v1  ;;  %v12844_v15 = vld [vmem:[#allocation12 + $0xd9c] sm:$0xf] }
 0x302   :  { %6930 = vmatmul.bf16.vlgmr.msra.gmra.mxu0 %v13788_v13  ;;  %v10197_v22 = vor.u32 %v12682_v8, %v10194_v9  ;;  %v12610_v8 = vld [vmem:[#allocation12 + $0x64c] sm:$0xf]  ;;  %v12818_v41 = vld [vmem:[#allocation12 + $0xcc4] sm:$0xf0]  ;;  %v11562_v44 = vld [vmem:[#allocation12 + $0x1380] sm:$0xf0] }
 0x303   :  { %6974 = vmatpush.bf16.msrb.mxu0 %v10773_v11  ;;  %6951 = vmatpush.bf16.msra.mxu1 %v9405_v14  ;;  %v12412_v11 = vld [vmem:[#allocation12 + $0x1c] sm:$0xf]  ;;  %v10265_v14 = vor.u32 %v12709_v45, %v10264_v7  ;;  %v12692_v45 = vld [vmem:[#allocation12 + $0x8d4] sm:$0xf0]  ;;  %v13042_v19 = vld [vmem:[#allocation12 + $0x13cc] sm:$0xf] }
 0x304   :  { %v12574_v53 = vld [vmem:[#allocation12 + $0x52c] sm:$0xf]  ;;  %v9690_v3 = vld [vmem:[#allocation12 + $0x4e0] sm:$0xf0]  ;;  %v9912_v48 = vld [vmem:[#allocation12 + $0x650] sm:$0xf] }
 0x305   :  { %6913 = vmatpush.bf16.msrb.mxu3 %v10481_v24  ;;  %6942 = vmatpush.bf16.msrb.mxu2 %v11417_v27  ;;  %v9117_v24 = vor.u32 %v12412_v11, %v9114_v35  ;;  %v12664_v27 = vld [vmem:[#allocation12 + $0x7fc] sm:$0xf]  ;;  %v10128_v11 = vld [vmem:[#allocation12 + $0x800] sm:$0xf]  ;;  %v12674_v35 = vld [vmem:[#allocation12 + $0x844] sm:$0xf0] }
 0x306   :  { %v10125_v40 = vor.u32 %v12664_v27, %v10122_v28  ;;  %v12592_v27 = vld [vmem:[#allocation12 + $0x5bc] sm:$0xf]  ;;  %v9834_v28 = vld [vmem:[#allocation12 + $0x600] sm:$0xf0]  ;;  %v12620_v4 = vld [vmem:[#allocation12 + $0x694] sm:$0xf0] }
 0x307   :  { %6975 = vmatpush.bf16.msrb.mxu0 %v10701_v25  ;;  %6952 = vmatpush.bf16.msra.mxu1 %v9333_v21  ;;  %v10410_v25 = vld [vmem:[#allocation12 + $0xa80] sm:$0xf0]  ;;  %v13096_v21 = vld [vmem:[#allocation12 + $0x157c] sm:$0xf]  ;;  %v6725_v54 = vpop.f32.mrf.mxu0 }
 0x308   :  { %6943 = vmatmul.bf16.vlgmr.msrb.gmra.mxu2 %v13798_v37  ;;  %v10413_v39 = vor.u32 %v12736_v23, %v10410_v25  ;;  %v9762_v54 = vld [vmem:[#allocation12 + $0x570] sm:$0xf0] }
 0x309   :  { %6987 = vmatpush.bf16.msra.mxu2 %v11349_v36  ;;  %6914 = vmatpush.bf16.msrb.mxu3 %v10409_v49  ;;  %v11058_v36 = vld [vmem:[#allocation12 + $0xf90] sm:$0xf0]  ;;  %v12646_v49 = vld [vmem:[#allocation12 + $0x76c] sm:$0xf] }
 0x30a   :  { %v11061_v43 = vor.u32 %v12898_v32, %v11058_v36  ;;  %v10053_v59 = vor.u32 %v12646_v49, %v10050_v50  ;;  %v10777_v36 = vor.u32 %v12836_v0, %v10776_v18  ;;  %v9837_v50 = vor.u32 %v12592_v27, %v9834_v28  ;;  %v11352_v18 = vld [vmem:[#allocation12 + $0x1190] sm:$0xf]  ;;  %v12980_v0 = vld [vmem:[#allocation12 + $0x11d4] sm:$0xf0] }
 0x30b   :  { %6976 = vmatpush.bf16.msrb.mxu0 %v10629_v51  ;;  %6953 = vmatpush.bf16.msra.mxu1 %v9261_v56  ;;  %v11853_v51 = vor.u32 %v13096_v21, %v11850_v31  ;;  %v11778_v56 = vld [vmem:[#allocation12 + $0x1530] sm:$0xf0]  ;;  %v13862_v7 = vpop.f32.mrf.mxu2  ;;  %v10056_v31 = vld [vmem:[#allocation12 + $0x770] sm:$0xf] }
 0x30d   :  { %6988 = vmatpush.bf16.msra.mxu2 %v11277_v55  ;;  %6915 = vmatpush.bf16.msrb.mxu3 %v10337_v63  ;;  %v13078_v55 = vld [vmem:[#allocation12 + $0x14ec] sm:$0xf]  ;;  %v10200_v63 = vld [vmem:[#allocation12 + $0x890] sm:$0xf] }
 0x30e   :  { %v10201_v9 = vor.u32 %v12692_v45, %v10200_v63  ;;  %v9765_v63 = vor.u32 %v12574_v53, %v9762_v54  ;;  %v10416_v54 = vld [vmem:[#allocation12 + $0xa40] sm:$0xf] }
 0x30f   :  { %6977 = vmatpush.bf16.msrb.mxu0 %v10557_v2  ;;  %6954 = vmatpush.bf16.msra.mxu1 %v9189_v6  ;;  %v11781_v2 = vor.u32 %v13078_v55, %v11778_v56  ;;  %v9981_v6 = vor.u32 %v12628_v38, %v9978_v62  ;;  %v13006_v38 = vld [vmem:[#allocation12 + $0x12ac] sm:$0xf]  ;;  %v11490_v62 = vld [vmem:[#allocation12 + $0x12f0] sm:$0xf0] }
 0x311   :  { %6989 = vmatpush.bf16.msra.mxu2 %v11205_v5  ;;  %6916 = vmatpush.bf16.msrb.mxu3 %v10265_v14  ;;  %v10269_v5 = vor.u32 %v12700_v29, %v10266_v60  ;;  %v10842_v14 = vld [vmem:[#allocation12 + $0xde0] sm:$0xf0]  ;;  %v12638_v29 = vld [vmem:[#allocation12 + $0x724] sm:$0xf0]  ;;  %v10632_v60 = vld [vmem:[#allocation12 + $0xbf0] sm:$0xf] }
 0x312   :  { %v10845_v25 = vor.u32 %v12844_v15, %v10842_v14 }
 0x313   :  { %6978 = vmatpush.bf16.msrb.mxu0 %v10485_v20  ;;  %6955 = vmatpush.bf16.msra.mxu1 %v9117_v24  ;;  %v11634_v20 = vld [vmem:[#allocation12 + $0x1410] sm:$0xf0]  ;;  %v10129_v24 = vor.u32 %v12674_v35, %v10128_v11  ;;  %v6749_v32 = vpop.f32.mrf.mxu1  ;;  %v12988_v11 = vld [vmem:[#allocation12 + $0x121c] sm:$0xf]  ;;  %v11418_v35 = vld [vmem:[#allocation12 + $0x1260] sm:$0xf0] }
 0x314   :  { %6917 = vmatmul.bf16.vlgmr.msrb.gmra.mxu3 %v13782_v33  ;;  %v11637_v21 = vor.u32 %v13042_v19, %v11634_v20  ;;  %v9913_v19 = vor.u32 %v12620_v4, %v9912_v48  ;;  %v11421_v28 = vor.u32 %v12988_v11, %v11418_v35  ;;  %v9626_v48 = vld [vmem:[#allocation12 + $0x458] sm:$0xf0]  ;;  %v10344_v4 = vld [vmem:[#allocation12 + $0x9b0] sm:$0xf]  ;;  %v12476_v11 = vld [vmem:[#allocation12 + $0x214] sm:$0xf0] }
 0x315   :  { %6961 = vmatpush.bf16.msra.mxu3 %v10197_v22  ;;  %6990 = vmatpush.bf16.msra.mxu2 %v11133_v26  ;;  %v13864_v22 = vld [vmem:[#allocation13] sm:$0xff]  ;;  %v9909_v26 = vor.u32 %v12610_v8, %v9906_v10  ;;  %v11493_v8 = vor.u32 %v13006_v38, %v11490_v62  ;;  %v12782_v10 = vld [vmem:[#allocation12 + $0xba4] sm:$0xf0] }
 0x316   :  { %6956 = vmatmul.bf16.vlgmr.msra.gmra.mxu1 %v13771_v42  ;;  %v2860_v23 = vperm.slane %v13864_v22, 3  ;;  %v12566_v38 = vld [vmem:[#allocation12 + $0x4e4] sm:$0xf0]  ;;  %v12521_v35 = vld [vmem:[#allocation12 + $0x384] sm:$0xf] }
 0x317   :  { %7000 = vmatpush.bf16.msrb.mxu1 %v11925_v30  ;;  %6979 = vmatpush.bf16.msrb.mxu0 %v10413_v39  ;;  %v6738_v30 = vpop.f32.mrf.mxu2  ;;  %v12656_v39 = vld [vmem:[#allocation12 + $0x7b4] sm:$0xf0] }
 0x318   :  { %v6698_v49 = vadd.f32 %v13848_v34, %v2860_v23  ;;  %v10057_v52 = vor.u32 %v12656_v39, %v10056_v31  ;;  %v9840_v23 = vld [vmem:[#allocation12 + $0x5c0] sm:$0xf]  ;;  %v12764_v31 = vld [vmem:[#allocation12 + $0xb14] sm:$0xf0] }
 0x319   :  { %6962 = vmatpush.bf16.msra.mxu3 %v10125_v40  ;;  %6991 = vmatpush.bf16.msra.mxu2 %v11061_v43  ;;  %v10704_v40 = vld [vmem:[#allocation12 + $0xc80] sm:$0xf]  ;;  %v13024_v43 = vld [vmem:[#allocation12 + $0x133c] sm:$0xf] }
 0x31a   :  { %v10705_v56 = vor.u32 %v12818_v41, %v10704_v40  ;;  %v9552_v30 = vld [vmem:[#allocation12 + $0x380] sm:$0xf]  ;;  %v12962_v40 = vld [vmem:[#allocation12 + $0x1144] sm:$0xf0] }
 0x31b   :  { %7001 = vmatpush.bf16.msrb.mxu1 %v11853_v51  ;;  %6980 = vmatpush.bf16.msrb.mxu0 %v10341_v57  ;;  %v6710_v51 = vpop.f32.mrf.mxu3  ;;  %v11565_v57 = vor.u32 %v13024_v43, %v11562_v44  ;;  %v11280_v39 = vld [vmem:[#allocation12 + $0x1100] sm:$0xf] }
 0x31c   :  { %v6711_v55 = vadd.f32 %v6710_v51, %v6698_v49  ;;  %v9480_v51 = vld [vmem:[#allocation12 + $0x2f0] sm:$0xf]  ;;  %v11281_v53 = vor.u32 %v12962_v40, %v11280_v39  ;;  %v12503_v39 = vld [vmem:[#allocation12 + $0x2f4] sm:$0xf]  ;;  %v9482_v40 = vld [vmem:[#allocation12 + $0x338] sm:$0xf0] }
 0x31d   :  { %6963 = vmatpush.bf16.msra.mxu3 %v10053_v59  ;;  %6992 = vmatpush.bf16.msra.mxu2 %v10989_v61  ;;  %v9984_v59 = vld [vmem:[#allocation12 + $0x6e0] sm:$0xf]  ;;  %v12800_v61 = vld [vmem:[#allocation12 + $0xc34] sm:$0xf0] }
 0x31e   :  { %v6724_v34 = vadd.f32 %v13856_v16, %v6711_v55  ;;  %v9985_v45 = vor.u32 %v12638_v29, %v9984_v59  ;;  %v10560_v16 = vld [vmem:[#allocation12 + $0xb60] sm:$0xf]  ;;  %v12746_v55 = vld [vmem:[#allocation12 + $0xa84] sm:$0xf0]  ;;  %v12944_v59 = vld [vmem:[#allocation12 + $0x10b4] sm:$0xf0] }
 0x31f   :  { %7002 = vmatpush.bf16.msrb.mxu1 %v11781_v2  ;;  %6981 = vmatpush.bf16.msrb.mxu0 %v10269_v5  ;;  %v12556_v2 = vld [vmem:[#allocation12 + $0x49c] sm:$0xf]  ;;  %v6751_v5 = vpop.f32.mrf.mxu1  ;;  %v13872_v15 = vpop.f32.mrf.mxu0  ;;  %v10561_v27 = vor.u32 %v12782_v10, %v10560_v16  ;;  %v10417_v62 = vor.u32 %v12746_v55, %v10416_v54  ;;  %v12440_v54 = vld [vmem:[#allocation12 + $0xf4] sm:$0xf0] }
 0x320   :  { %v6737_v1 = vadd.f32 %v13862_v7, %v6724_v34  ;;  %v9693_v14 = vor.u32 %v12556_v2, %v9690_v3  ;;  %v9408_v34 = vld [vmem:[#allocation12 + $0x260] sm:$0xf]  ;;  %v12539_v2 = vld [vmem:[#allocation12 + $0x414] sm:$0xf] }
 0x321   :  { %6964 = vmatpush.bf16.msra.mxu3 %v9981_v6  ;;  %6993 = vmatpush.bf16.msra.mxu2 %v10917_v17  ;;  %v10633_v6 = vor.u32 %v12800_v61, %v10632_v60  ;;  %v12548_v17 = vld [vmem:[#allocation12 + $0x454] sm:$0xf0]  ;;  %v9696_v61 = vld [vmem:[#allocation12 + $0x4a0] sm:$0xf]  ;;  %v9629_v16 = vor.u32 %v12539_v2, %v9626_v48  ;;  %v12422_v48 = vld [vmem:[#allocation12 + $0x64] sm:$0xf0] }
 0x322   :  { %6982 = vmatmul.bf16.vlgmr.msrb.gmra.mxu0 %v13782_v33  ;;  %v11136_v5 = vld [vmem:[#allocation12 + $0xfe0] sm:$0xf] }
 0x323   :  { %7026 = vmatpush.bf16.msra.mxu0 %v10201_v9  ;;  %7003 = vmatpush.bf16.msrb.mxu1 %v11709_v46  ;;  %v9624_v9 = vld [vmem:[#allocation12 + $0x410] sm:$0xf]  ;;  %v6750_v46 = vadd.f32 %v6749_v32, %v6737_v1  ;;  %v6712_v7 = vpop.f32.mrf.mxu3  ;;  %v12530_v32 = vld [vmem:[#allocation12 + $0x3c4] sm:$0xf0]  ;;  %v12728_v1 = vld [vmem:[#allocation12 + $0x9f4] sm:$0xf0] }
 0x324   :  { %v9625_v20 = vor.u32 %v12548_v17, %v9624_v9  ;;  %v9553_v44 = vor.u32 %v12530_v32, %v9552_v30  ;;  %v9336_v17 = vld [vmem:[#allocation12 + $0x1d0] sm:$0xf]  ;;  %v10345_v10 = vor.u32 %v12728_v1, %v10344_v4  ;;  %v12683_v7 = vld [vmem:[#allocation12 + $0x894] sm:$0xf]  ;;  %v12458_v30 = vld [vmem:[#allocation12 + $0x184] sm:$0xf0] }
 0x325   :  { %6965 = vmatpush.bf16.msra.mxu3 %v9909_v26  ;;  %6994 = vmatpush.bf16.msra.mxu2 %v10845_v25  ;;  %v12602_v26 = vld [vmem:[#allocation12 + $0x604] sm:$0xf0]  ;;  %v7666_v25 = vmax.f32 %v6750_v46, 0.0  ;;  %v9554_v46 = vld [vmem:[#allocation12 + $0x3c8] sm:$0xf0] }
 0x326   :  { %v9841_v43 = vor.u32 %v12602_v26, %v9840_v23  ;;  %v12908_v23 = vld [vmem:[#allocation12 + $0xf94] sm:$0xf0]  ;;  %v9337_v26 = vor.u32 %v12476_v11, %v9336_v17  ;;  %v9120_v2 = vld [vmem:[#allocation12 + $0x20] sm:$0xf]  ;;  %v12467_v4 = vld [vmem:[#allocation12 + $0x1d4] sm:$0xf] }
 0x327   :  { %7027 = vmatpush.bf16.msra.mxu0 %v10129_v24  ;;  %7004 = vmatpush.bf16.msrb.mxu1 %v11637_v21  ;;  %v7664_v24 = vmax.f32 %v13843_v58, 0.0  ;;  %v10488_v21 = vld [vmem:[#allocation12 + $0xad0] sm:$0xf]  ;;  %v9338_v1 = vld [vmem:[#allocation12 + $0x218] sm:$0xf0] }
 0x328   :  { %6995 = vmatmul.bf16.vlgmr.msra.gmra.mxu2 %v13788_v13  ;;  %v9768_v58 = vld [vmem:[#allocation12 + $0x530] sm:$0xf]  ;;  %v10489_v49 = vor.u32 %v12764_v31, %v10488_v21  ;;  %v13124_v17 = vld [vmem:[#allocation12 + $0x1654] sm:$0xf0]  ;;  %v10848_v11 = vld [vmem:[#allocation12 + $0xda0] sm:$0xf] }
 0x329   :  { %7039 = vmatpush.bf16.msrb.mxu2 %v10777_v36  ;;  %6966 = vmatpush.bf16.msra.mxu3 %v9837_v50  ;;  %v11353_v36 = vor.u32 %v12980_v0, %v11352_v18  ;;  %v13875_v41 = vmax.f32 %v7664_v24, %v7666_v25  ;;  %v12584_v50 = vld [vmem:[#allocation12 + $0x574] sm:$0xf0]  ;;  %v10272_v18 = vld [vmem:[#allocation12 + $0x920] sm:$0xf]  ;;  %v12710_v0 = vld [vmem:[#allocation12 + $0x964] sm:$0xf0]  ;;  %v9557_v24 = vor.u32 %v12521_v35, %v9554_v46 }
 0x32a   :  { %v9769_v29 = vor.u32 %v12584_v50, %v9768_v58  ;;  %v2861_v25 = vperm.slane %v13864_v22, 4  ;;  %v10992_v58 = vld [vmem:[#allocation12 + $0xec0] sm:$0xf]  ;;  %v12854_v35 = vld [vmem:[#allocation12 + $0xde4] sm:$0xf0] }
 0x32b   :  { %7028 = vmatpush.bf16.msra.mxu0 %v10057_v52  ;;  %7005 = vmatpush.bf16.msrb.mxu1 %v11565_v57  ;;  %v12512_v52 = vld [vmem:[#allocation12 + $0x334] sm:$0xf0]  ;;  %v11208_v57 = vld [vmem:[#allocation12 + $0x1070] sm:$0xf] }
 0x32c   :  { %v9481_v60 = vor.u32 %v12512_v52, %v9480_v51  ;;  %v11209_v3 = vor.u32 %v12944_v59, %v11208_v57  ;;  %v9485_v52 = vor.u32 %v12503_v39, %v9482_v40  ;;  %v12485_v59 = vld [vmem:[#allocation12 + $0x264] sm:$0xf]  ;;  %v10706_v39 = vld [vmem:[#allocation12 + $0xcc8] sm:$0xf0] }
 0x32d   :  { %7040 = vmatpush.bf16.msrb.mxu2 %v10705_v56  ;;  %6967 = vmatpush.bf16.msra.mxu3 %v9765_v63  ;;  %v6777_v56 = vpop.f32.mrf.mxu0  ;;  %v12494_v63 = vld [vmem:[#allocation12 + $0x2a4] sm:$0xf0] }
 0x32e   :  { %v9409_v9 = vor.u32 %v12494_v63, %v9408_v34 }
 0x32f   :  { %7029 = vmatpush.bf16.msra.mxu0 %v9985_v45  ;;  %7006 = vmatpush.bf16.msrb.mxu1 %v11493_v8  ;;  %v13879_v45 = vpop.f32.mrf.mxu2  ;;  %v9697_v8 = vor.u32 %v12566_v38, %v9696_v61  ;;  %v10058_v61 = vld [vmem:[#allocation12 + $0x7b8] sm:$0xf0]  ;;  %v10920_v38 = vld [vmem:[#allocation12 + $0xe30] sm:$0xf] }
 0x331   :  { %7041 = vmatpush.bf16.msrb.mxu2 %v10633_v6  ;;  %6968 = vmatpush.bf16.msra.mxu3 %v9693_v14  ;;  %v12926_v6 = vld [vmem:[#allocation12 + $0x1024] sm:$0xf0] }
 0x332   :  { %v11137_v14 = vor.u32 %v12926_v6, %v11136_v5 }
 0x333   :  { %7030 = vmatpush.bf16.msra.mxu0 %v9913_v19  ;;  %7007 = vmatpush.bf16.msrb.mxu1 %v11421_v28  ;;  %v10202_v19 = vld [vmem:[#allocation12 + $0x8d8] sm:$0xf0]  ;;  %v9264_v28 = vld [vmem:[#allocation12 + $0x140] sm:$0xf] }
 0x334   :  { %6969 = vmatmul.bf16.vlgmr.msra.gmra.mxu3 %v13779_v12  ;;  %v10205_v21 = vor.u32 %v12683_v7, %v10202_v19  ;;  %v9265_v50 = vor.u32 %v12458_v30, %v9264_v28  ;;  %v13106_v28 = vld [vmem:[#allocation12 + $0x15c4] sm:$0xf0] }
 0x335   :  { %7013 = vmatpush.bf16.msrb.mxu3 %v9625_v20  ;;  %7042 = vmatpush.bf16.msrb.mxu2 %v10561_v27  ;;  %v11064_v20 = vld [vmem:[#allocation12 + $0xf50] sm:$0xf]  ;;  %v10273_v27 = vor.u32 %v12710_v0, %v10272_v18  ;;  %v12827_v18 = vld [vmem:[#allocation12 + $0xd14] sm:$0xf]  ;;  %v10778_v0 = vld [vmem:[#allocation12 + $0xd58] sm:$0xf0] }
 0x336   :  { %7008 = vmatmul.bf16.vlgmr.msrb.gmra.mxu1 %v13798_v37  ;;  %v11065_v31 = vor.u32 %v12908_v23, %v11064_v20  ;;  %v9341_v20 = vor.u32 %v12467_v4, %v9338_v1  ;;  %v10781_v30 = vor.u32 %v12827_v18, %v10778_v0  ;;  %v11930_v4 = vld [vmem:[#allocation12 + $0x1658] sm:$0xf0]  ;;  %v12575_v1 = vld [vmem:[#allocation12 + $0x534] sm:$0xf]  ;;  %v12557_v0 = vld [vmem:[#allocation12 + $0x4a4] sm:$0xf] }
 0x337   :  { %7052 = vmatpush.bf16.msra.mxu1 %v11353_v36  ;;  %7031 = vmatpush.bf16.msra.mxu0 %v9841_v43  ;;  %v6790_v32 = vpop.f32.mrf.mxu2  ;;  %v6801_v36 = vpop.f32.mrf.mxu1  ;;  %v12665_v43 = vld [vmem:[#allocation12 + $0x804] sm:$0xf] }
 0x338   :  { %v6762_v51 = vpop.f32.mrf.mxu3  ;;  %v12611_v32 = vld [vmem:[#allocation12 + $0x654] sm:$0xf] }
 0x339   :  { %7014 = vmatpush.bf16.msrb.mxu3 %v9553_v44  ;;  %7043 = vmatpush.bf16.msrb.mxu2 %v10489_v49  ;;  %v10130_v44 = vld [vmem:[#allocation12 + $0x848] sm:$0xf0]  ;;  %v12890_v49 = vld [vmem:[#allocation12 + $0xf04] sm:$0xf0]  ;;  %v6763_v55 = vadd.f32 %v6762_v51, %v2861_v25  ;;  %v10849_v25 = vor.u32 %v12854_v35, %v10848_v11  ;;  %v13088_v51 = vld [vmem:[#allocation12 + $0x1534] sm:$0xf0] }
 0x33a   :  { %v10133_v56 = vor.u32 %v12665_v43, %v10130_v44  ;;  %v10993_v57 = vor.u32 %v12890_v49, %v10992_v58  ;;  %v12431_v44 = vld [vmem:[#allocation12 + $0xb4] sm:$0xf]  ;;  %v9194_v49 = vld [vmem:[#allocation12 + $0xf8] sm:$0xf0]  ;;  %v13052_v35 = vld [vmem:[#allocation12 + $0x1414] sm:$0xf0] }
 0x33b   :  { %7053 = vmatpush.bf16.msra.mxu1 %v11281_v53  ;;  %7032 = vmatpush.bf16.msra.mxu0 %v9769_v29  ;;  %v9192_v53 = vld [vmem:[#allocation12 + $0xb0] sm:$0xf]  ;;  %v9410_v29 = vld [vmem:[#allocation12 + $0x2a8] sm:$0xf0]  ;;  %v6776_v34 = vadd.f32 %v13872_v15, %v6763_v55 }
 0x33c   :  { %v9193_v63 = vor.u32 %v12440_v54, %v9192_v53  ;;  %v12593_v53 = vld [vmem:[#allocation12 + $0x5c4] sm:$0xf]  ;;  %v9842_v54 = vld [vmem:[#allocation12 + $0x608] sm:$0xf0] }
 0x33d   :  { %7015 = vmatpush.bf16.msrb.mxu3 %v9481_v60  ;;  %7044 = vmatpush.bf16.msrb.mxu2 %v10417_v62  ;;  %v12647_v60 = vld [vmem:[#allocation12 + $0x774] sm:$0xf]  ;;  %v12872_v62 = vld [vmem:[#allocation12 + $0xe74] sm:$0xf0]  ;;  %v6789_v15 = vadd.f32 %v13879_v45, %v6776_v34  ;;  %v9266_v45 = vld [vmem:[#allocation12 + $0x188] sm:$0xf0] }
 0x33e   :  { %v10061_v6 = vor.u32 %v12647_v60, %v10058_v61  ;;  %v12413_v60 = vld [vmem:[#allocation12 + $0x24] sm:$0xf]  ;;  %v9122_v61 = vld [vmem:[#allocation12 + $0x68] sm:$0xf0]  ;;  %v11712_v34 = vld [vmem:[#allocation12 + $0x1460] sm:$0xf] }
 0x33f   :  { %7054 = vmatpush.bf16.msra.mxu1 %v11209_v3  ;;  %7033 = vmatpush.bf16.msra.mxu0 %v9697_v8  ;;  %v9413_v3 = vor.u32 %v12485_v59, %v9410_v29  ;;  %v6803_v5 = vpop.f32.mrf.mxu1  ;;  %v10921_v8 = vor.u32 %v12872_v62, %v10920_v38  ;;  %v6827_v46 = vpop.f32.mrf.mxu0  ;;  %v13886_v7 = vadd.f32 %v6801_v36, %v6789_v15  ;;  %v2862_v36 = vperm.slane %v13864_v22, 5  ;;  %v11640_v15 = vld [vmem:[#allocation12 + $0x13d0] sm:$0xf] }
 0x340   :  { %v6764_v19 = vpop.f32.mrf.mxu3  ;;  %v9197_v59 = vor.u32 %v12431_v44, %v9194_v49  ;;  %v9845_v62 = vor.u32 %v12593_v53, %v9842_v54  ;;  %v9770_v5 = vld [vmem:[#allocation12 + $0x578] sm:$0xf0]  ;;  %v12737_v49 = vld [vmem:[#allocation12 + $0xa44] sm:$0xf]  ;;  %v11496_v54 = vld [vmem:[#allocation12 + $0x12b0] sm:$0xf] }
 0x341   :  { %7016 = vmatpush.bf16.msrb.mxu3 %v9409_v9  ;;  %7045 = vmatpush.bf16.msrb.mxu2 %v10345_v10  ;;  %v11928_v9 = vld [vmem:[#allocation12 + $0x1610] sm:$0xf]  ;;  %v9986_v10 = vld [vmem:[#allocation12 + $0x728] sm:$0xf0]  ;;  %v6828_v38 = vadd.f32 %v6827_v46, %v2862_v36  ;;  %v9773_v11 = vor.u32 %v12575_v1, %v9770_v5  ;;  %v13097_v46 = vld [vmem:[#allocation12 + $0x1584] sm:$0xf] }
 0x342   :  { %7034 = vmatmul.bf16.vlgmr.msra.gmra.mxu0 %v13779_v12  ;;  %v11929_v23 = vor.u32 %v13124_v17, %v11928_v9  ;;  %v10562_v9 = vld [vmem:[#allocation12 + $0xba8] sm:$0xf0]  ;;  %v9125_v17 = vor.u32 %v12413_v60, %v9122_v61  ;;  %v13079_v36 = vld [vmem:[#allocation12 + $0x14f4] sm:$0xf]  ;;  %v9488_v61 = vld [vmem:[#allocation12 + $0x2f8] sm:$0xf] }
 0x343   :  { %7078 = vmatpush.bf16.msrb.mxu0 %v9629_v16  ;;  %7055 = vmatpush.bf16.msra.mxu1 %v11137_v14  ;;  %v12629_v16 = vld [vmem:[#allocation12 + $0x6e4] sm:$0xf]  ;;  %v9121_v14 = vor.u32 %v12422_v48, %v9120_v2  ;;  %v13115_v2 = vld [vmem:[#allocation12 + $0x1614] sm:$0xf]  ;;  %v9698_v19 = vld [vmem:[#allocation12 + $0x4e8] sm:$0xf0] }
 0x344   :  { %v11714_v60 = vld [vmem:[#allocation12 + $0x14a8] sm:$0xf0]  ;;  %v11642_v1 = vld [vmem:[#allocation12 + $0x1418] sm:$0xf0] }
 0x345   :  { %7017 = vmatpush.bf16.msrb.mxu3 %v9337_v26  ;;  %7046 = vmatpush.bf16.msrb.mxu2 %v10273_v27  ;;  %v12449_v26 = vld [vmem:[#allocation12 + $0x144] sm:$0xf]  ;;  %v11856_v27 = vld [vmem:[#allocation12 + $0x1580] sm:$0xf] }
 0x346   :  { %v9269_v40 = vor.u32 %v12449_v26, %v9266_v45  ;;  %v11857_v43 = vor.u32 %v13106_v28, %v11856_v27  ;;  %v12755_v26 = vld [vmem:[#allocation12 + $0xad4] sm:$0xf]  ;;  %v9701_v27 = vor.u32 %v12557_v0, %v9698_v19  ;;  %v11568_v28 = vld [vmem:[#allocation12 + $0x1340] sm:$0xf] }
 0x347   :  { %7079 = vmatpush.bf16.msrb.mxu0 %v9557_v24  ;;  %7056 = vmatpush.bf16.msra.mxu1 %v11065_v31  ;;  %v9989_v24 = vor.u32 %v12629_v16, %v9986_v10  ;;  %v12809_v31 = vld [vmem:[#allocation12 + $0xc84] sm:$0xf]  ;;  %v6829_v55 = vpop.f32.mrf.mxu0  ;;  %v11933_v10 = vor.u32 %v13115_v2, %v11930_v4  ;;  %v12998_v4 = vld [vmem:[#allocation12 + $0x1264] sm:$0xf0]  ;;  %v12693_v0 = vld [vmem:[#allocation12 + $0x8dc] sm:$0xf0] }
 0x348   :  { %7047 = vmatmul.bf16.vlgmr.msrb.gmra.mxu2 %v13782_v33  ;;  %v13016_v55 = vld [vmem:[#allocation12 + $0x12f4] sm:$0xf0] }
 0x349   :  { %7091 = vmatpush.bf16.msra.mxu2 %v10205_v21  ;;  %7018 = vmatpush.bf16.msrb.mxu3 %v9265_v50  ;;  %v9914_v21 = vld [vmem:[#allocation12 + $0x698] sm:$0xf0]  ;;  %v11784_v50 = vld [vmem:[#allocation12 + $0x14f0] sm:$0xf]  ;;  %v11497_v2 = vor.u32 %v13016_v55, %v11496_v54  ;;  %v10064_v55 = vld [vmem:[#allocation12 + $0x778] sm:$0xf] }
 0x34a   :  { %v9917_v58 = vor.u32 %v12611_v32, %v9914_v21  ;;  %v11785_v29 = vor.u32 %v13088_v51, %v11784_v50  ;;  %v10418_v50 = vld [vmem:[#allocation12 + $0xa88] sm:$0xf0] }
 0x34b   :  { %7080 = vmatpush.bf16.msrb.mxu0 %v9485_v52  ;;  %7057 = vmatpush.bf16.msra.mxu1 %v10993_v57  ;;  %v10709_v52 = vor.u32 %v12809_v31, %v10706_v39  ;;  %v10634_v57 = vld [vmem:[#allocation12 + $0xc38] sm:$0xf0] }
 0x34d   :  { %7092 = vmatpush.bf16.msra.mxu2 %v10133_v56  ;;  %7019 = vmatpush.bf16.msrb.mxu3 %v9193_v63  ;;  %v12791_v56 = vld [vmem:[#allocation12 + $0xbf4] sm:$0xf]  ;;  %v13070_v63 = vld [vmem:[#allocation12 + $0x14a4] sm:$0xf0] }
 0x34e   :  { %v10637_v48 = vor.u32 %v12791_v56, %v10634_v57  ;;  %v11713_v16 = vor.u32 %v13070_v63, %v11712_v34  ;;  %v10346_v34 = vld [vmem:[#allocation12 + $0x9f8] sm:$0xf0] }
 0x34f   :  { %7081 = vmatpush.bf16.msrb.mxu0 %v9413_v3  ;;  %7058 = vmatpush.bf16.msra.mxu1 %v10921_v8  ;;  %v6840_v3 = vpop.f32.mrf.mxu2  ;;  %v12773_v8 = vld [vmem:[#allocation12 + $0xb64] sm:$0xf] }
 0x350   :  { %v10565_v18 = vor.u32 %v12773_v8, %v10562_v9 }
 0x351   :  { %7093 = vmatpush.bf16.msra.mxu2 %v10061_v6  ;;  %7020 = vmatpush.bf16.msrb.mxu3 %v9121_v14  ;;  %v6841_v6 = vadd.f32 %v6840_v3, %v6828_v38  ;;  %v11858_v14 = vld [vmem:[#allocation12 + $0x15c8] sm:$0xf0]  ;;  %v12513_v38 = vld [vmem:[#allocation12 + $0x33c] sm:$0xf0] }
 0x352   :  { %v11861_v45 = vor.u32 %v13097_v46, %v11858_v14  ;;  %v11424_v3 = vld [vmem:[#allocation12 + $0x1220] sm:$0xf]  ;;  %v9489_v8 = vor.u32 %v12513_v38, %v9488_v61  ;;  %v12917_v38 = vld [vmem:[#allocation12 + $0xfe4] sm:$0xf] }
 0x353   :  { %7082 = vmatpush.bf16.msrb.mxu0 %v9341_v20  ;;  %7059 = vmatpush.bf16.msra.mxu1 %v10849_v25  ;;  %v9632_v20 = vld [vmem:[#allocation12 + $0x418] sm:$0xf]  ;;  %v11641_v25 = vor.u32 %v13052_v35, %v11640_v15  ;;  %v6853_v21 = vpop.f32.mrf.mxu1  ;;  %v9416_v15 = vld [vmem:[#allocation12 + $0x268] sm:$0xf]  ;;  %v10274_v35 = vld [vmem:[#allocation12 + $0x968] sm:$0xf0]  ;;  %v11425_v14 = vor.u32 %v12998_v4, %v11424_v3 }
 0x354   :  { %7021 = vmatmul.bf16.vlgmr.msrb.gmra.mxu3 %v13771_v42  ;;  %v13891_v44 = vadd.f32 %v6853_v21, %v6841_v6  ;;  %v10136_v21 = vld [vmem:[#allocation12 + $0x808] sm:$0xf]  ;;  %v12981_v3 = vld [vmem:[#allocation12 + $0x11dc] sm:$0xf0] }
 0x355   :  { %7065 = vmatpush.bf16.msra.mxu3 %v11929_v23  ;;  %7094 = vmatpush.bf16.msra.mxu2 %v9989_v24  ;;  %v12549_v23 = vld [vmem:[#allocation12 + $0x45c] sm:$0xf0]  ;;  %v10490_v24 = vld [vmem:[#allocation12 + $0xb18] sm:$0xf0] }
 0x356   :  { %7060 = vmatmul.bf16.vlgmr.msra.gmra.mxu1 %v13788_v13  ;;  %v9633_v31 = vor.u32 %v12549_v23, %v9632_v20  ;;  %v10493_v39 = vor.u32 %v12755_v26, %v10490_v24  ;;  %v13025_v23 = vld [vmem:[#allocation12 + $0x1344] sm:$0xf]  ;;  %v12441_v4 = vld [vmem:[#allocation12 + $0xfc] sm:$0xf0] }
 0x357   :  { %7104 = vmatpush.bf16.msrb.mxu1 %v10781_v30  ;;  %7083 = vmatpush.bf16.msrb.mxu0 %v9269_v40  ;;  %v13034_v30 = vld [vmem:[#allocation12 + $0x1384] sm:$0xf0]  ;;  %v6842_v32 = vpop.f32.mrf.mxu2  ;;  %v11786_v40 = vld [vmem:[#allocation12 + $0x1538] sm:$0xf0] }
 0x358   :  { %v11569_v51 = vor.u32 %v13034_v30, %v11568_v28  ;;  %v11789_v53 = vor.u32 %v13079_v36, %v11786_v40  ;;  %v9344_v30 = vld [vmem:[#allocation12 + $0x1d8] sm:$0xf]  ;;  %v12477_v32 = vld [vmem:[#allocation12 + $0x21c] sm:$0xf0]  ;;  %v13007_v40 = vld [vmem:[#allocation12 + $0x12b4] sm:$0xf] }
 0x359   :  { %7066 = vmatpush.bf16.msra.mxu3 %v11857_v43  ;;  %7095 = vmatpush.bf16.msra.mxu2 %v9917_v58  ;;  %v9560_v43 = vld [vmem:[#allocation12 + $0x388] sm:$0xf]  ;;  %v12531_v58 = vld [vmem:[#allocation12 + $0x3cc] sm:$0xf0] }
 0x35a   :  { %v9561_v57 = vor.u32 %v12531_v58, %v9560_v43  ;;  %v9345_v43 = vor.u32 %v12477_v32, %v9344_v30  ;;  %v11498_v58 = vld [vmem:[#allocation12 + $0x12f8] sm:$0xf0] }
 0x35b   :  { %7105 = vmatpush.bf16.msrb.mxu1 %v10709_v52  ;;  %7084 = vmatpush.bf16.msrb.mxu0 %v9197_v59  ;;  %v6814_v52 = vpop.f32.mrf.mxu3  ;;  %v10421_v59 = vor.u32 %v12737_v49, %v10418_v50  ;;  %v6855_v6 = vpop.f32.mrf.mxu1  ;;  %v12935_v49 = vld [vmem:[#allocation12 + $0x1074] sm:$0xf]  ;;  %v11210_v50 = vld [vmem:[#allocation12 + $0x10b8] sm:$0xf0] }
 0x35c   :  { %v6815_v56 = vadd.f32 %v6814_v52, %v13886_v7  ;;  %v13043_v7 = vld [vmem:[#allocation12 + $0x13d4] sm:$0xf]  ;;  %v9272_v52 = vld [vmem:[#allocation12 + $0x148] sm:$0xf]  ;;  %v2863_v6 = vperm.slane %v13864_v22, 6 }
 0x35d   :  { %7067 = vmatpush.bf16.msra.mxu3 %v11785_v29  ;;  %7096 = vmatpush.bf16.msra.mxu2 %v9845_v62  ;;  %v13061_v29 = vld [vmem:[#allocation12 + $0x1464] sm:$0xf]  ;;  %v12719_v62 = vld [vmem:[#allocation12 + $0x9b4] sm:$0xf]  ;;  %v11645_v19 = vor.u32 %v13043_v7, %v11642_v1  ;;  %v9992_v7 = vld [vmem:[#allocation12 + $0x6e8] sm:$0xf] }
 0x35e   :  { %v7667_v63 = vmax.f32 %v6815_v56, 0.0  ;;  %v10349_v9 = vor.u32 %v12719_v62, %v10346_v34  ;;  %v12657_v56 = vld [vmem:[#allocation12 + $0x7bc] sm:$0xf0]  ;;  %v11138_v62 = vld [vmem:[#allocation12 + $0x1028] sm:$0xf0] }
 0x35f   :  { %7106 = vmatpush.bf16.msrb.mxu1 %v10637_v48  ;;  %7085 = vmatpush.bf16.msrb.mxu0 %v9125_v17  ;;  %v11717_v48 = vor.u32 %v13061_v29, %v11714_v60  ;;  %v12971_v17 = vld [vmem:[#allocation12 + $0x1194] sm:$0xf]  ;;  %v13899_v46 = vpop.f32.mrf.mxu0  ;;  %v12989_v29 = vld [vmem:[#allocation12 + $0x1224] sm:$0xf]  ;;  %v11426_v60 = vld [vmem:[#allocation12 + $0x1268] sm:$0xf0] }
 0x360   :  { %v13897_v5 = vmax.f32 %v13858_v47, %v7667_v63  ;;  %v11360_v34 = vld [vmem:[#allocation12 + $0x1198] sm:$0xf]  ;;  %v12639_v1 = vld [vmem:[#allocation12 + $0x72c] sm:$0xf0] }
 0x361   :  { %7068 = vmatpush.bf16.msra.mxu3 %v11713_v16  ;;  %7097 = vmatpush.bf16.msra.mxu2 %v9773_v11  ;;  %v11354_v16 = vld [vmem:[#allocation12 + $0x11d8] sm:$0xf0]  ;;  %v12701_v11 = vld [vmem:[#allocation12 + $0x924] sm:$0xf] }
 0x362   :  { %7086 = vmatmul.bf16.vlgmr.msrb.gmra.mxu0 %v13771_v42  ;;  %v11357_v20 = vor.u32 %v12971_v17, %v11354_v16  ;;  %v10277_v24 = vor.u32 %v12701_v11, %v10274_v35  ;;  %v12899_v17 = vld [vmem:[#allocation12 + $0xf54] sm:$0xf]  ;;  %v11361_v16 = vor.u32 %v12981_v3, %v11360_v34  ;;  %v11288_v11 = vld [vmem:[#allocation12 + $0x1108] sm:$0xf]  ;;  %v12963_v35 = vld [vmem:[#allocation12 + $0x114c] sm:$0xf0] }
 0x363   :  { %7130 = vmatpush.bf16.msra.mxu0 %v11933_v10  ;;  %7107 = vmatpush.bf16.msrb.mxu1 %v10565_v18  ;;  %v12495_v10 = vld [vmem:[#allocation12 + $0x2ac] sm:$0xf0]  ;;  %v10208_v18 = vld [vmem:[#allocation12 + $0x898] sm:$0xf]  ;;  %v6816_v47 = vpop.f32.mrf.mxu3  ;;  %v10850_v3 = vld [vmem:[#allocation12 + $0xde8] sm:$0xf0] }
 0x364   :  { %v9417_v26 = vor.u32 %v12495_v10, %v9416_v15  ;;  %v10209_v28 = vor.u32 %v12693_v0, %v10208_v18  ;;  %v11066_v10 = vld [vmem:[#allocation12 + $0xf98] sm:$0xf0]  ;;  %v9128_v18 = vld [vmem:[#allocation12 + $0x28] sm:$0xf]  ;;  %v12423_v0 = vld [vmem:[#allocation12 + $0x6c] sm:$0xf0] }
 0x365   :  { %7069 = vmatpush.bf16.msra.mxu3 %v11641_v25  ;;  %7098 = vmatpush.bf16.msra.mxu2 %v9701_v27  ;;  %v11570_v25 = vld [vmem:[#allocation12 + $0x1388] sm:$0xf0]  ;;  %v11936_v47 = vld [vmem:[#allocation12 + $0x1618] sm:$0xf]  ;;  %v11069_v22 = vor.u32 %v12899_v17, %v11066_v10  ;;  %v12837_v17 = vld [vmem:[#allocation12 + $0xd5c] sm:$0xf0] }
 0x366   :  { %v11282_v27 = vld [vmem:[#allocation12 + $0x1148] sm:$0xf0]  ;;  %v12567_v10 = vld [vmem:[#allocation12 + $0x4ec] sm:$0xf0] }
 0x367   :  { %7131 = vmatpush.bf16.msra.mxu0 %v11861_v45  ;;  %7108 = vmatpush.bf16.msrb.mxu1 %v10493_v39  ;;  %v12953_v45 = vld [vmem:[#allocation12 + $0x1104] sm:$0xf]  ;;  %v11573_v39 = vor.u32 %v13025_v23, %v11570_v25  ;;  %v6881_v54 = vpop.f32.mrf.mxu0  ;;  %v12621_v23 = vld [vmem:[#allocation12 + $0x69c] sm:$0xf0]  ;;  %v9129_v25 = vor.u32 %v12423_v0, %v9128_v18  ;;  %v12540_v18 = vld [vmem:[#allocation12 + $0x41c] sm:$0xf] }
 0x368   :  { %7099 = vmatmul.bf16.vlgmr.msra.gmra.mxu2 %v13779_v12  ;;  %v11285_v36 = vor.u32 %v12953_v45, %v11282_v27  ;;  %v12881_v45 = vld [vmem:[#allocation12 + $0xec4] sm:$0xf]  ;;  %v10994_v27 = vld [vmem:[#allocation12 + $0xf08] sm:$0xf0]  ;;  %v10922_v54 = vld [vmem:[#allocation12 + $0xe78] sm:$0xf0] }
 0x369   :  { %7143 = vmatpush.bf16.msrb.mxu2 %v9633_v31  ;;  %7070 = vmatpush.bf16.msra.mxu3 %v11569_v51  ;;  %v12675_v31 = vld [vmem:[#allocation12 + $0x84c] sm:$0xf0]  ;;  %v9634_v0 = vld [vmem:[#allocation12 + $0x460] sm:$0xf0] }
 0x36a   :  { %v10137_v51 = vor.u32 %v12675_v31, %v10136_v21  ;;  %v11216_v31 = vld [vmem:[#allocation12 + $0x1078] sm:$0xf] }
 0x36b   :  { %7132 = vmatpush.bf16.msra.mxu0 %v11789_v53  ;;  %7109 = vmatpush.bf16.msrb.mxu1 %v10421_v59  ;;  %v12459_v53 = vld [vmem:[#allocation12 + $0x18c] sm:$0xf0]  ;;  %v11213_v59 = vor.u32 %v12935_v49, %v11210_v50  ;;  %v6892_v63 = vpop.f32.mrf.mxu2  ;;  %v10997_v50 = vor.u32 %v12881_v45, %v10994_v27  ;;  %v11648_v27 = vld [vmem:[#allocation12 + $0x13d8] sm:$0xf] }
 0x36c   :  { %v9273_v61 = vor.u32 %v12459_v53, %v9272_v52  ;;  %v12603_v49 = vld [vmem:[#allocation12 + $0x60c] sm:$0xf0]  ;;  %v12863_v53 = vld [vmem:[#allocation12 + $0xe34] sm:$0xf] }
 0x36d   :  { %7144 = vmatpush.bf16.msrb.mxu2 %v9561_v57  ;;  %7071 = vmatpush.bf16.msra.mxu3 %v11497_v2  ;;  %v11501_v57 = vor.u32 %v13007_v40, %v11498_v58  ;;  %v10065_v2 = vor.u32 %v12657_v56, %v10064_v55  ;;  %v9848_v58 = vld [vmem:[#allocation12 + $0x5c8] sm:$0xf]  ;;  %v12819_v45 = vld [vmem:[#allocation12 + $0xccc] sm:$0xf0] }
 0x36f   :  { %7133 = vmatpush.bf16.msra.mxu0 %v11717_v48  ;;  %7110 = vmatpush.bf16.msrb.mxu1 %v10349_v9  ;;  %v9200_v48 = vld [vmem:[#allocation12 + $0xb8] sm:$0xf]  ;;  %v11141_v9 = vor.u32 %v12917_v38, %v11138_v62  ;;  %v12585_v62 = vld [vmem:[#allocation12 + $0x57c] sm:$0xf0] }
 0x370   :  { %v9201_v15 = vor.u32 %v12441_v4, %v9200_v48  ;;  %v9776_v38 = vld [vmem:[#allocation12 + $0x538] sm:$0xf]  ;;  %v12909_v4 = vld [vmem:[#allocation12 + $0xf9c] sm:$0xf0] }
 0x371   :  { %7145 = vmatpush.bf16.msrb.mxu2 %v9489_v8  ;;  %7072 = vmatpush.bf16.msra.mxu3 %v11425_v14  ;;  %v11429_v8 = vor.u32 %v12989_v29, %v11426_v60  ;;  %v9993_v14 = vor.u32 %v12639_v1, %v9992_v7  ;;  %v12927_v29 = vld [vmem:[#allocation12 + $0x102c] sm:$0xf0]  ;;  %v11792_v60 = vld [vmem:[#allocation12 + $0x14f8] sm:$0xf] }
 0x372   :  { %v11072_v48 = vld [vmem:[#allocation12 + $0xf58] sm:$0xf] }
 0x373   :  { %7134 = vmatpush.bf16.msra.mxu0 %v11645_v19  ;;  %7111 = vmatpush.bf16.msrb.mxu1 %v10277_v24  ;;  %v13125_v19 = vld [vmem:[#allocation12 + $0x165c] sm:$0xf0]  ;;  %v11289_v24 = vor.u32 %v12963_v35, %v11288_v11  ;;  %v6905_v30 = vpop.f32.mrf.mxu1  ;;  %v10784_v7 = vld [vmem:[#allocation12 + $0xd18] sm:$0xf] }
 0x374   :  { %7073 = vmatmul.bf16.vlgmr.msra.gmra.mxu3 %v13798_v37  ;;  %v11937_v32 = vor.u32 %v13125_v19, %v11936_v47  ;;  %v11073_v19 = vor.u32 %v12909_v4, %v11072_v48  ;;  %v12486_v48 = vld [vmem:[#allocation12 + $0x26c] sm:$0xf]  ;;  %v9418_v4 = vld [vmem:[#allocation12 + $0x2b0] sm:$0xf0] }
 0x375   :  { %7117 = vmatpush.bf16.msrb.mxu3 %v11357_v20  ;;  %7146 = vmatpush.bf16.msrb.mxu2 %v9417_v26  ;;  %v9920_v20 = vld [vmem:[#allocation12 + $0x658] sm:$0xf]  ;;  %v6893_v26 = vadd.f32 %v6892_v63, %v2863_v6  ;;  %v10925_v63 = vor.u32 %v12863_v53, %v10922_v54  ;;  %v12504_v54 = vld [vmem:[#allocation12 + $0x2fc] sm:$0xf] }
 0x376   :  { %7112 = vmatmul.bf16.vlgmr.msrb.gmra.mxu1 %v13782_v33  ;;  %v9921_v21 = vor.u32 %v12621_v23, %v9920_v20  ;;  %v10785_v20 = vor.u32 %v12837_v17, %v10784_v7  ;;  %v11000_v23 = vld [vmem:[#allocation12 + $0xec8] sm:$0xf]  ;;  %v12765_v17 = vld [vmem:[#allocation12 + $0xb1c] sm:$0xf0] }
 0x377   :  { %7156 = vmatpush.bf16.msra.mxu1 %v10209_v28  ;;  %7135 = vmatpush.bf16.msra.mxu0 %v11573_v39  ;;  %v6894_v28 = vpop.f32.mrf.mxu2  ;;  %v12945_v39 = vld [vmem:[#allocation12 + $0x10bc] sm:$0xf0]  ;;  %v13904_v40 = vadd.f32 %v6905_v30, %v6893_v26  ;;  %v12522_v30 = vld [vmem:[#allocation12 + $0x38c] sm:$0xf] }
 0x378   :  { %v11217_v52 = vor.u32 %v12945_v39, %v11216_v31  ;;  %v13053_v28 = vld [vmem:[#allocation12 + $0x141c] sm:$0xf0]  ;;  %v10928_v39 = vld [vmem:[#allocation12 + $0xe38] sm:$0xf] }
 0x379   :  { %7118 = vmatpush.bf16.msrb.mxu3 %v11285_v36  ;;  %7147 = vmatpush.bf16.msrb.mxu2 %v9345_v43  ;;  %v11864_v36 = vld [vmem:[#allocation12 + $0x1588] sm:$0xf]  ;;  %v13107_v43 = vld [vmem:[#allocation12 + $0x15cc] sm:$0xf0] }
 0x37a   :  { %v11865_v56 = vor.u32 %v13107_v43, %v11864_v36  ;;  %v11649_v36 = vor.u32 %v13053_v28, %v11648_v27  ;;  %v12873_v43 = vld [vmem:[#allocation12 + $0xe7c] sm:$0xf0]  ;;  %v12792_v28 = vld [vmem:[#allocation12 + $0xbfc] sm:$0xf] }
 0x37b   :  { %7157 = vmatpush.bf16.msra.mxu1 %v10137_v51  ;;  %7136 = vmatpush.bf16.msra.mxu0 %v11501_v57  ;;  %v6866_v51 = vpop.f32.mrf.mxu3  ;;  %v9849_v57 = vor.u32 %v12603_v49, %v9848_v58  ;;  %v6907_v6 = vpop.f32.mrf.mxu1  ;;  %v10640_v58 = vld [vmem:[#allocation12 + $0xbf8] sm:$0xf]  ;;  %v12801_v49 = vld [vmem:[#allocation12 + $0xc3c] sm:$0xf0] }
 0x37c   :  { %v6867_v55 = vadd.f32 %v6866_v51, %v13891_v44  ;;  %v11576_v51 = vld [vmem:[#allocation12 + $0x1348] sm:$0xf]  ;;  %v10496_v6 = vld [vmem:[#allocation12 + $0xad8] sm:$0xf] }
 0x37d   :  { %7119 = vmatpush.bf16.msrb.mxu3 %v11213_v59  ;;  %7148 = vmatpush.bf16.msrb.mxu2 %v9273_v61  ;;  %v11144_v59 = vld [vmem:[#allocation12 + $0xfe8] sm:$0xf]  ;;  %v13089_v61 = vld [vmem:[#allocation12 + $0x153c] sm:$0xf0] }
 0x37e   :  { %v6880_v34 = vadd.f32 %v13899_v46, %v6867_v55  ;;  %v11145_v44 = vor.u32 %v12927_v29, %v11144_v59  ;;  %v13071_v46 = vld [vmem:[#allocation12 + $0x14ac] sm:$0xf0]  ;;  %v9490_v55 = vld [vmem:[#allocation12 + $0x340] sm:$0xf0]  ;;  %v10856_v59 = vld [vmem:[#allocation12 + $0xda8] sm:$0xf] }
 0x37f   :  { %7158 = vmatpush.bf16.msra.mxu1 %v10065_v2  ;;  %7137 = vmatpush.bf16.msra.mxu0 %v11429_v8  ;;  %v12845_v2 = vld [vmem:[#allocation12 + $0xda4] sm:$0xf]  ;;  %v11793_v8 = vor.u32 %v13089_v61, %v11792_v60  ;;  %v13913_v35 = vpop.f32.mrf.mxu0  ;;  %v12855_v29 = vld [vmem:[#allocation12 + $0xdec] sm:$0xf0]  ;;  %v10568_v61 = vld [vmem:[#allocation12 + $0xb68] sm:$0xf] }
 0x380   :  { %v7668_v1 = vmax.f32 %v6880_v34, 0.0  ;;  %v10857_v7 = vor.u32 %v12855_v29, %v10856_v59  ;;  %v12432_v59 = vld [vmem:[#allocation12 + $0xbc] sm:$0xf]  ;;  %v9202_v29 = vld [vmem:[#allocation12 + $0x100] sm:$0xf0] }
 0x381   :  { %7120 = vmatpush.bf16.msrb.mxu3 %v11141_v9  ;;  %7149 = vmatpush.bf16.msrb.mxu2 %v9201_v15  ;;  %v9777_v9 = vor.u32 %v12585_v62, %v9776_v38  ;;  %v9704_v15 = vld [vmem:[#allocation12 + $0x4a8] sm:$0xf]  ;;  %v12783_v38 = vld [vmem:[#allocation12 + $0xbac] sm:$0xf0]  ;;  %v12828_v62 = vld [vmem:[#allocation12 + $0xd1c] sm:$0xf] }
 0x382   :  { %7138 = vmatmul.bf16.vlgmr.msra.gmra.mxu0 %v13798_v37  ;;  %v13911_v11 = vmax.f32 %v13875_v41, %v7668_v1  ;;  %v9705_v26 = vor.u32 %v12567_v10, %v9704_v15  ;;  %v9637_v41 = vor.u32 %v12540_v18, %v9634_v0  ;;  %v10569_v1 = vor.u32 %v12783_v38, %v10568_v61  ;;  %v11432_v10 = vld [vmem:[#allocation12 + $0x1228] sm:$0xf]  ;;  %v12972_v18 = vld [vmem:[#allocation12 + $0x119c] sm:$0xf]  ;;  %v11362_v0 = vld [vmem:[#allocation12 + $0x11e0] sm:$0xf0] }
 0x383   :  { %7182 = vmatpush.bf16.msrb.mxu0 %v11361_v16  ;;  %7159 = vmatpush.bf16.msra.mxu1 %v9993_v14  ;;  %v11720_v16 = vld [vmem:[#allocation12 + $0x1468] sm:$0xf]  ;;  %v10853_v14 = vor.u32 %v12845_v2, %v10850_v3  ;;  %v6868_v47 = vpop.f32.mrf.mxu3  ;;  %v10786_v2 = vld [vmem:[#allocation12 + $0xd60] sm:$0xf0]  ;;  %v11504_v3 = vld [vmem:[#allocation12 + $0x12b8] sm:$0xf]  ;;  %v9421_v15 = vor.u32 %v12486_v48, %v9418_v4  ;;  %v9205_v4 = vor.u32 %v12432_v59, %v9202_v29 }
 0x384   :  { %v12468_v47 = vld [vmem:[#allocation12 + $0x1dc] sm:$0xf]  ;;  %v10280_v38 = vld [vmem:[#allocation12 + $0x928] sm:$0xf]  ;;  %v12630_v59 = vld [vmem:[#allocation12 + $0x6ec] sm:$0xf] }
 0x385   :  { %7121 = vmatpush.bf16.msrb.mxu3 %v11069_v22  ;;  %7150 = vmatpush.bf16.msrb.mxu2 %v9129_v25  ;;  %v11721_v22 = vor.u32 %v13071_v46, %v11720_v16  ;;  %v10712_v25 = vld [vmem:[#allocation12 + $0xc88] sm:$0xf]  ;;  %v12810_v16 = vld [vmem:[#allocation12 + $0xc8c] sm:$0xf]  ;;  %v10714_v46 = vld [vmem:[#allocation12 + $0xcd0] sm:$0xf0] }
 0x386   :  { %v10713_v31 = vor.u32 %v12819_v45, %v10712_v25  ;;  %v9994_v29 = vld [vmem:[#allocation12 + $0x730] sm:$0xf0] }
 0x387   :  { %7183 = vmatpush.bf16.msrb.mxu0 %v11289_v24  ;;  %7160 = vmatpush.bf16.msra.mxu1 %v9921_v21  ;;  %v12891_v24 = vld [vmem:[#allocation12 + $0xf0c] sm:$0xf0]  ;;  %v6933_v53 = vpop.f32.mrf.mxu0 }
 0x388   :  { %7151 = vmatmul.bf16.vlgmr.msrb.gmra.mxu2 %v13771_v42  ;;  %v11001_v21 = vor.u32 %v12891_v24, %v11000_v23  ;;  %v10717_v23 = vor.u32 %v12810_v16, %v10714_v46  ;;  %v12747_v24 = vld [vmem:[#allocation12 + $0xa8c] sm:$0xf0] }
 0x389   :  { %7195 = vmatpush.bf16.msra.mxu2 %v11937_v32  ;;  %7122 = vmatpush.bf16.msrb.mxu3 %v10997_v50  ;;  %v9562_v32 = vld [vmem:[#allocation12 + $0x3d0] sm:$0xf0] }
 0x38a   :  { %v9565_v50 = vor.u32 %v12522_v30, %v9562_v32  ;;  %v10642_v30 = vld [vmem:[#allocation12 + $0xc40] sm:$0xf0]  ;;  %v12954_v32 = vld [vmem:[#allocation12 + $0x110c] sm:$0xf] }
 0x38b   :  { %7184 = vmatpush.bf16.msrb.mxu0 %v11217_v52  ;;  %7161 = vmatpush.bf16.msra.mxu1 %v9849_v57  ;;  %v13035_v52 = vld [vmem:[#allocation12 + $0x138c] sm:$0xf0]  ;;  %v10641_v57 = vor.u32 %v12801_v49, %v10640_v58  ;;  %v13917_v34 = vpop.f32.mrf.mxu2  ;;  %v10645_v58 = vor.u32 %v12792_v28, %v10642_v30  ;;  %v10352_v49 = vld [vmem:[#allocation12 + $0x9b8] sm:$0xf]  ;;  %v11866_v28 = vld [vmem:[#allocation12 + $0x15d0] sm:$0xf0] }
 0x38c   :  { %v11577_v60 = vor.u32 %v13035_v52, %v11576_v51 }
 0x38d   :  { %7196 = vmatpush.bf16.msra.mxu2 %v11865_v56  ;;  %7123 = vmatpush.bf16.msrb.mxu3 %v10925_v63  ;;  %v10929_v56 = vor.u32 %v12873_v43, %v10928_v39  ;;  %v9493_v63 = vor.u32 %v12504_v54, %v9490_v55  ;;  %v9274_v39 = vld [vmem:[#allocation12 + $0x190] sm:$0xf0]  ;;  %v12774_v54 = vld [vmem:[#allocation12 + $0xb6c] sm:$0xf] }
 0x38e   :  { %v10570_v55 = vld [vmem:[#allocation12 + $0xbb0] sm:$0xf0] }
 0x38f   :  { %7185 = vmatpush.bf16.msrb.mxu0 %v11145_v44  ;;  %7162 = vmatpush.bf16.msra.mxu1 %v9777_v9  ;;  %v13017_v44 = vld [vmem:[#allocation12 + $0x12fc] sm:$0xf0] }
 0x390   :  { %v11505_v9 = vor.u32 %v13017_v44, %v11504_v3 }
 0x391   :  { %7197 = vmatpush.bf16.msra.mxu2 %v11793_v8  ;;  %7124 = vmatpush.bf16.msrb.mxu3 %v10853_v14  ;;  %v10789_v8 = vor.u32 %v12828_v62, %v10786_v2  ;;  %v12999_v14 = vld [vmem:[#allocation12 + $0x126c] sm:$0xf0]  ;;  %v10573_v62 = vor.u32 %v12774_v54, %v10570_v55  ;;  %v10498_v2 = vld [vmem:[#allocation12 + $0xb20] sm:$0xf0]  ;;  %v12702_v55 = vld [vmem:[#allocation12 + $0x92c] sm:$0xf] }
 0x393   :  { %7186 = vmatpush.bf16.msrb.mxu0 %v11073_v19  ;;  %7163 = vmatpush.bf16.msra.mxu1 %v9705_v26  ;;  %v9346_v19 = vld [vmem:[#allocation12 + $0x220] sm:$0xf0]  ;;  %v10424_v26 = vld [vmem:[#allocation12 + $0xa48] sm:$0xf]  ;;  %v6946_v25 = vpop.f32.mrf.mxu2  ;;  %v13919_v45 = vpop.f32.mrf.mxu1 }
 0x394   :  { %7125 = vmatmul.bf16.vlgmr.msrb.gmra.mxu3 %v13788_v13  ;;  %v9349_v27 = vor.u32 %v12468_v47, %v9346_v19  ;;  %v12900_v25 = vld [vmem:[#allocation12 + $0xf5c] sm:$0xf] }
 0x395   :  { %7169 = vmatpush.bf16.msra.mxu3 %v10785_v20  ;;  %7198 = vmatpush.bf16.msra.mxu2 %v11721_v22  ;;  %v10497_v20 = vor.u32 %v12765_v17, %v10496_v6  ;;  %v11433_v22 = vor.u32 %v12999_v14, %v11432_v10  ;;  %v11146_v6 = vld [vmem:[#allocation12 + $0x1030] sm:$0xf0]  ;;  %v11938_v10 = vld [vmem:[#allocation12 + $0x1660] sm:$0xf0] }
 0x396   :  { %7164 = vmatmul.bf16.vlgmr.msra.gmra.mxu1 %v13779_v12 }
 0x397   :  { %7208 = vmatpush.bf16.msrb.mxu1 %v9637_v41  ;;  %7187 = vmatpush.bf16.msrb.mxu0 %v11001_v21  ;;  %v11365_v41 = vor.u32 %v12972_v18, %v11362_v0  ;;  %v11290_v21 = vld [vmem:[#allocation12 + $0x1150] sm:$0xf0]  ;;  %v6918_v43 = vpop.f32.mrf.mxu3  ;;  %v12738_v0 = vld [vmem:[#allocation12 + $0xa4c] sm:$0xf] }
 0x398   :  { %v6919_v51 = vadd.f32 %v6918_v43, %v13904_v40  ;;  %v11293_v52 = vor.u32 %v12954_v32, %v11290_v21  ;;  %v12711_v40 = vld [vmem:[#allocation12 + $0x96c] sm:$0xf0]  ;;  %v12720_v21 = vld [vmem:[#allocation12 + $0x9bc] sm:$0xf]  ;;  %v10066_v43 = vld [vmem:[#allocation12 + $0x7c0] sm:$0xf0] }
 0x399   :  { %7170 = vmatpush.bf16.msra.mxu3 %v10713_v31  ;;  %7199 = vmatpush.bf16.msra.mxu2 %v11649_v36  ;;  %v12450_v31 = vld [vmem:[#allocation12 + $0x14c] sm:$0xf]  ;;  %v10425_v36 = vor.u32 %v12747_v24, %v10424_v26  ;;  %v10281_v46 = vor.u32 %v12711_v40, %v10280_v38  ;;  %v12864_v40 = vld [vmem:[#allocation12 + $0xe3c] sm:$0xf] }
 0x39a   :  { %v9277_v53 = vor.u32 %v12450_v31, %v9274_v39  ;;  %v10354_v39 = vld [vmem:[#allocation12 + $0xa00] sm:$0xf0] }
 0x39b   :  { %7209 = vmatpush.bf16.msrb.mxu1 %v9565_v50  ;;  %7188 = vmatpush.bf16.msrb.mxu0 %v10929_v56  ;;  %v12729_v50 = vld [vmem:[#allocation12 + $0x9fc] sm:$0xf0]  ;;  %v12936_v56 = vld [vmem:[#allocation12 + $0x107c] sm:$0xf]  ;;  %v6959_v44 = vpop.f32.mrf.mxu1 }
 0x39c   :  { %v10353_v61 = vor.u32 %v12729_v50, %v10352_v49  ;;  %v11002_v49 = vld [vmem:[#allocation12 + $0xf10] sm:$0xf0] }
 0x39d   :  { %7171 = vmatpush.bf16.msra.mxu3 %v10641_v57  ;;  %7200 = vmatpush.bf16.msra.mxu2 %v11577_v60  ;;  %v11218_v57 = vld [vmem:[#allocation12 + $0x10c0] sm:$0xf0]  ;;  %v6932_v60 = vadd.f32 %v13913_v35, %v6919_v51  ;;  %v12918_v35 = vld [vmem:[#allocation12 + $0xfec] sm:$0xf]  ;;  %v13080_v51 = vld [vmem:[#allocation12 + $0x14fc] sm:$0xf] }
 0x39e   :  { %v11221_v48 = vor.u32 %v12936_v56, %v11218_v57  ;;  %v11149_v47 = vor.u32 %v12918_v35, %v11146_v6  ;;  %v10282_v56 = vld [vmem:[#allocation12 + $0x970] sm:$0xf0]  ;;  %v9922_v35 = vld [vmem:[#allocation12 + $0x6a0] sm:$0xf0]  ;;  %v10144_v6 = vld [vmem:[#allocation12 + $0x810] sm:$0xf] }
 0x39f   :  { %7210 = vmatpush.bf16.msrb.mxu1 %v9493_v63  ;;  %7189 = vmatpush.bf16.msrb.mxu0 %v10857_v7  ;;  %v12756_v63 = vld [vmem:[#allocation12 + $0xadc] sm:$0xf]  ;;  %v6945_v3 = vadd.f32 %v13917_v34, %v6932_v60  ;;  %v13926_v16 = vpop.f32.mrf.mxu0  ;;  %v6920_v34 = vpop.f32.mrf.mxu3  ;;  %v10216_v60 = vld [vmem:[#allocation12 + $0x8a0] sm:$0xf]  ;;  %v10285_v44 = vor.u32 %v12702_v55, %v10282_v56  ;;  %v12640_v55 = vld [vmem:[#allocation12 + $0x734] sm:$0xf0] }
 0x3a0   :  { %v12684_v7 = vld [vmem:[#allocation12 + $0x89c] sm:$0xf]  ;;  %v10501_v14 = vor.u32 %v12756_v63, %v10498_v2  ;;  %v10930_v63 = vld [vmem:[#allocation12 + $0xe80] sm:$0xf0]  ;;  %v13062_v2 = vld [vmem:[#allocation12 + $0x146c] sm:$0xf] }
 0x3a1   :  { %7172 = vmatpush.bf16.msra.mxu3 %v10569_v1  ;;  %7201 = vmatpush.bf16.msra.mxu2 %v11505_v9  ;;  %v10210_v1 = vld [vmem:[#allocation12 + $0x8e0] sm:$0xf0]  ;;  %v9130_v9 = vld [vmem:[#allocation12 + $0x70] sm:$0xf0]  ;;  %v7669_v17 = vmax.f32 %v6945_v3, 0.0 }
 0x3a2   :  { %7190 = vmatmul.bf16.vlgmr.msrb.gmra.mxu0 %v13788_v13  ;;  %v10213_v18 = vor.u32 %v12684_v7, %v10210_v1  ;;  %v11722_v3 = vld [vmem:[#allocation12 + $0x14b0] sm:$0xf0]  ;;  %v10933_v1 = vor.u32 %v12864_v40, %v10930_v63  ;;  %v13044_v34 = vld [vmem:[#allocation12 + $0x13dc] sm:$0xf]  ;;  %v10648_v56 = vld [vmem:[#allocation12 + $0xc00] sm:$0xf] }
 0x3a3   :  { %7234 = vmatpush.bf16.msra.mxu0 %v10789_v8  ;;  %7211 = vmatpush.bf16.msrb.mxu1 %v9421_v15  ;;  %v12414_v8 = vld [vmem:[#allocation12 + $0x2c] sm:$0xf]  ;;  %v13116_v15 = vld [vmem:[#allocation12 + $0x161c] sm:$0xf]  ;;  %v13929_v26 = vmax.f32 %v13897_v5, %v7669_v17  ;;  %v9706_v40 = vld [vmem:[#allocation12 + $0x4f0] sm:$0xf0] }
 0x3a4   :  { %v9133_v19 = vor.u32 %v12414_v8, %v9130_v9  ;;  %v11941_v24 = vor.u32 %v13116_v15, %v11938_v10  ;;  %v12676_v8 = vld [vmem:[#allocation12 + $0x854] sm:$0xf0]  ;;  %v11725_v9 = vor.u32 %v13062_v2, %v11722_v3  ;;  %v12846_v17 = vld [vmem:[#allocation12 + $0xdac] sm:$0xf]  ;;  %v10792_v15 = vld [vmem:[#allocation12 + $0xd20] sm:$0xf] }
 0x3a5   :  { %7173 = vmatpush.bf16.msra.mxu3 %v10497_v20  ;;  %7202 = vmatpush.bf16.msra.mxu2 %v11433_v22  ;;  %v10426_v20 = vld [vmem:[#allocation12 + $0xa90] sm:$0xf0]  ;;  %v12838_v10 = vld [vmem:[#allocation12 + $0xd64] sm:$0xf0]  ;;  %v9928_v63 = vld [vmem:[#allocation12 + $0x660] sm:$0xf] }
 0x3a6   :  { %v10138_v22 = vld [vmem:[#allocation12 + $0x850] sm:$0xf0]  ;;  %v10429_v30 = vor.u32 %v12738_v0, %v10426_v20  ;;  %v12622_v2 = vld [vmem:[#allocation12 + $0x6a4] sm:$0xf0] }
 0x3a7   :  { %7235 = vmatpush.bf16.msra.mxu0 %v10717_v23  ;;  %7212 = vmatpush.bf16.msrb.mxu1 %v9349_v27  ;;  %v12666_v23 = vld [vmem:[#allocation12 + $0x80c] sm:$0xf]  ;;  %v6985_v50 = vpop.f32.mrf.mxu0 }
 0x3a8   :  { %7203 = vmatmul.bf16.vlgmr.msra.gmra.mxu2 %v13798_v37  ;;  %v13098_v27 = vld [vmem:[#allocation12 + $0x158c] sm:$0xf]  ;;  %v10141_v32 = vor.u32 %v12666_v23, %v10138_v22  ;;  %v9850_v22 = vld [vmem:[#allocation12 + $0x610] sm:$0xf0]  ;;  %v9778_v50 = vld [vmem:[#allocation12 + $0x580] sm:$0xf0] }
 0x3a9   :  { %7247 = vmatpush.bf16.msrb.mxu2 %v11365_v41  ;;  %7174 = vmatpush.bf16.msra.mxu3 %v10425_v36  ;;  %v11074_v41 = vld [vmem:[#allocation12 + $0xfa0] sm:$0xf0]  ;;  %v12648_v36 = vld [vmem:[#allocation12 + $0x77c] sm:$0xf]  ;;  %v11869_v5 = vor.u32 %v13098_v27, %v11866_v28  ;;  %v12594_v23 = vld [vmem:[#allocation12 + $0x5cc] sm:$0xf] }
 0x3aa   :  { %v11077_v31 = vor.u32 %v12900_v25, %v11074_v41  ;;  %v10069_v54 = vor.u32 %v12648_v36, %v10066_v43  ;;  %v10793_v41 = vor.u32 %v12838_v10, %v10792_v15  ;;  %v10072_v28 = vld [vmem:[#allocation12 + $0x780] sm:$0xf]  ;;  %v9853_v43 = vor.u32 %v12594_v23, %v9850_v22  ;;  %v12982_v10 = vld [vmem:[#allocation12 + $0x11e4] sm:$0xf0]  ;;  %v9568_v23 = vld [vmem:[#allocation12 + $0x390] sm:$0xf] }
 0x3ab   :  { %7236 = vmatpush.bf16.msra.mxu0 %v10645_v58  ;;  %7213 = vmatpush.bf16.msrb.mxu1 %v9277_v53  ;;  %v12882_v58 = vld [vmem:[#allocation12 + $0xecc] sm:$0xf]  ;;  %v10357_v53 = vor.u32 %v12720_v21, %v10354_v39  ;;  %v12820_v21 = vld [vmem:[#allocation12 + $0xcd4] sm:$0xf0]  ;;  %v11578_v39 = vld [vmem:[#allocation12 + $0x1390] sm:$0xf0] }
 0x3ac   :  { %v11005_v57 = vor.u32 %v12882_v58, %v11002_v49  ;;  %v12576_v49 = vld [vmem:[#allocation12 + $0x53c] sm:$0xf]  ;;  %v11368_v15 = vld [vmem:[#allocation12 + $0x11a0] sm:$0xf]  ;;  %v12532_v22 = vld [vmem:[#allocation12 + $0x3d4] sm:$0xf0] }
 0x3ad   :  { %7248 = vmatpush.bf16.msrb.mxu2 %v11293_v52  ;;  %7175 = vmatpush.bf16.msra.mxu3 %v10353_v61  ;;  %v11794_v52 = vld [vmem:[#allocation12 + $0x1540] sm:$0xf0]  ;;  %v13933_v61 = vpop.f32.mrf.mxu2 }
 0x3ae   :  { %v11797_v38 = vor.u32 %v13080_v51, %v11794_v52 }
 0x3af   :  { %7237 = vmatpush.bf16.msra.mxu0 %v10573_v62  ;;  %7214 = vmatpush.bf16.msrb.mxu1 %v9205_v4  ;;  %v12694_v62 = vld [vmem:[#allocation12 + $0x8e4] sm:$0xf0]  ;;  %v12612_v4 = vld [vmem:[#allocation12 + $0x65c] sm:$0xf] }
 0x3b0   :  { %v10217_v7 = vor.u32 %v12694_v62, %v10216_v60  ;;  %v9781_v60 = vor.u32 %v12576_v49, %v9778_v50  ;;  %v10432_v49 = vld [vmem:[#allocation12 + $0xa50] sm:$0xf]  ;;  %v12748_v50 = vld [vmem:[#allocation12 + $0xa94] sm:$0xf0] }
 0x3b1   :  { %7249 = vmatpush.bf16.msrb.mxu2 %v11221_v48  ;;  %7176 = vmatpush.bf16.msra.mxu3 %v10281_v46  ;;  %v9997_v48 = vor.u32 %v12630_v59, %v9994_v29  ;;  %v10858_v46 = vld [vmem:[#allocation12 + $0xdf0] sm:$0xf0]  ;;  %v13008_v59 = vld [vmem:[#allocation12 + $0x12bc] sm:$0xf]  ;;  %v11506_v29 = vld [vmem:[#allocation12 + $0x1300] sm:$0xf0] }
 0x3b2   :  { %v10861_v20 = vor.u32 %v12846_v17, %v10858_v46 }
 0x3b3   :  { %7238 = vmatpush.bf16.msra.mxu0 %v10501_v14  ;;  %7215 = vmatpush.bf16.msrb.mxu1 %v9133_v19  ;;  %v11650_v14 = vld [vmem:[#allocation12 + $0x1420] sm:$0xf0]  ;;  %v10145_v19 = vor.u32 %v12676_v8, %v10144_v6  ;;  %v7009_v25 = vpop.f32.mrf.mxu1  ;;  %v12990_v6 = vld [vmem:[#allocation12 + $0x122c] sm:$0xf]  ;;  %v11434_v8 = vld [vmem:[#allocation12 + $0x1270] sm:$0xf0] }
 0x3b4   :  { %7177 = vmatmul.bf16.vlgmr.msra.gmra.mxu3 %v13782_v33  ;;  %v11653_v27 = vor.u32 %v13044_v34, %v11650_v14  ;;  %v9929_v34 = vor.u32 %v12622_v2, %v9928_v63  ;;  %v12730_v63 = vld [vmem:[#allocation12 + $0xa04] sm:$0xf0]  ;;  %v11152_v2 = vld [vmem:[#allocation12 + $0xff0] sm:$0xf] }
 0x3b5   :  { %7221 = vmatpush.bf16.msrb.mxu3 %v10213_v18  ;;  %7250 = vmatpush.bf16.msrb.mxu2 %v11149_v47  ;;  %v13212_v18 = vld [vmem:[#allocation13] sm:$0xff]  ;;  %v9925_v47 = vor.u32 %v12612_v4, %v9922_v35  ;;  %v11509_v4 = vor.u32 %v13008_v59, %v11506_v29  ;;  %v12784_v35 = vld [vmem:[#allocation12 + $0xbb4] sm:$0xf0]  ;;  %v9424_v59 = vld [vmem:[#allocation12 + $0x270] sm:$0xf] }
 0x3b6   :  { %7216 = vmatmul.bf16.vlgmr.msrb.gmra.mxu1 %v13771_v42  ;;  %v2864_v0 = vperm.slane %v13212_v18, 7  ;;  %v9856_v18 = vld [vmem:[#allocation12 + $0x5d0] sm:$0xf]  ;;  %v12496_v29 = vld [vmem:[#allocation12 + $0x2b4] sm:$0xf0] }
 0x3b7   :  { %7260 = vmatpush.bf16.msra.mxu1 %v11941_v24  ;;  %7239 = vmatpush.bf16.msra.mxu0 %v10429_v30  ;;  %v6998_v24 = vpop.f32.mrf.mxu2  ;;  %v12658_v30 = vld [vmem:[#allocation12 + $0x7c4] sm:$0xf0] }
 0x3b8   :  { %v6958_v36 = vadd.f32 %v13919_v45, %v2864_v0  ;;  %v10073_v58 = vor.u32 %v12658_v30, %v10072_v28  ;;  %v12604_v0 = vld [vmem:[#allocation12 + $0x614] sm:$0xf0]  ;;  %v11369_v24 = vor.u32 %v12982_v10, %v11368_v15  ;;  %v12685_v10 = vld [vmem:[#allocation12 + $0x8a4] sm:$0xf] }
 0x3b9   :  { %7222 = vmatpush.bf16.msrb.mxu3 %v10141_v32  ;;  %7251 = vmatpush.bf16.msrb.mxu2 %v11077_v31  ;;  %v10720_v32 = vld [vmem:[#allocation12 + $0xc90] sm:$0xf]  ;;  %v13026_v31 = vld [vmem:[#allocation12 + $0x134c] sm:$0xf]  ;;  %v12964_v28 = vld [vmem:[#allocation12 + $0x1154] sm:$0xf0] }
 0x3ba   :  { %v10721_v52 = vor.u32 %v12820_v21, %v10720_v32  ;;  %v9857_v32 = vor.u32 %v12604_v0, %v9856_v18  ;;  %v9569_v21 = vor.u32 %v12532_v22, %v9568_v23  ;;  %v12712_v15 = vld [vmem:[#allocation12 + $0x974] sm:$0xf0] }
 0x3bb   :  { %7261 = vmatpush.bf16.msra.mxu1 %v11869_v5  ;;  %7240 = vmatpush.bf16.msra.mxu0 %v10357_v53  ;;  %v6970_v5 = vpop.f32.mrf.mxu3  ;;  %v11581_v53 = vor.u32 %v13026_v31, %v11578_v39  ;;  %v9784_v31 = vld [vmem:[#allocation12 + $0x540] sm:$0xf]  ;;  %v12460_v23 = vld [vmem:[#allocation12 + $0x194] sm:$0xf0] }
 0x3bc   :  { %v6971_v51 = vadd.f32 %v6970_v5, %v6958_v36  ;;  %v12586_v36 = vld [vmem:[#allocation12 + $0x584] sm:$0xf0] }
 0x3bd   :  { %7223 = vmatpush.bf16.msrb.mxu3 %v10069_v54  ;;  %7252 = vmatpush.bf16.msrb.mxu2 %v11005_v57  ;;  %v10000_v54 = vld [vmem:[#allocation12 + $0x6f0] sm:$0xf]  ;;  %v12802_v57 = vld [vmem:[#allocation12 + $0xc44] sm:$0xf0] }
 0x3be   :  { %v6984_v45 = vadd.f32 %v13926_v16, %v6971_v51  ;;  %v10001_v62 = vor.u32 %v12640_v55, %v10000_v54  ;;  %v10576_v16 = vld [vmem:[#allocation12 + $0xb70] sm:$0xf]  ;;  %v12514_v5 = vld [vmem:[#allocation12 + $0x344] sm:$0xf0] }
 0x3bf   :  { %7262 = vmatpush.bf16.msra.mxu1 %v11797_v38  ;;  %7241 = vmatpush.bf16.msra.mxu0 %v10285_v44  ;;  %v12558_v38 = vld [vmem:[#allocation12 + $0x4ac] sm:$0xf]  ;;  %v7011_v44 = vpop.f32.mrf.mxu1  ;;  %v13940_v17 = vpop.f32.mrf.mxu0  ;;  %v9712_v55 = vld [vmem:[#allocation12 + $0x4b0] sm:$0xf] }
 0x3c0   :  { %v6997_v3 = vadd.f32 %v13933_v61, %v6984_v45  ;;  %v9709_v46 = vor.u32 %v12558_v38, %v9706_v40  ;;  %v12541_v45 = vld [vmem:[#allocation12 + $0x424] sm:$0xf]  ;;  %v10360_v40 = vld [vmem:[#allocation12 + $0x9c0] sm:$0xf] }
 0x3c1   :  { %7224 = vmatpush.bf16.msrb.mxu3 %v9997_v48  ;;  %7253 = vmatpush.bf16.msrb.mxu2 %v10933_v1  ;;  %v10649_v48 = vor.u32 %v12802_v57, %v10648_v56  ;;  %v12550_v1 = vld [vmem:[#allocation12 + $0x464] sm:$0xf0]  ;;  %v12568_v56 = vld [vmem:[#allocation12 + $0x4f4] sm:$0xf0]  ;;  %v10433_v57 = vor.u32 %v12748_v50, %v10432_v49 }
 0x3c2   :  { %7242 = vmatmul.bf16.vlgmr.msra.gmra.mxu0 %v13782_v33  ;;  %v9713_v44 = vor.u32 %v12568_v56, %v9712_v55  ;;  %v12442_v49 = vld [vmem:[#allocation12 + $0x104] sm:$0xf0]  ;;  %v10074_v55 = vld [vmem:[#allocation12 + $0x7c8] sm:$0xf0]  ;;  %v10936_v56 = vld [vmem:[#allocation12 + $0xe40] sm:$0xf] }
 0x3c3   :  { %7286 = vmatpush.bf16.msrb.mxu0 %v10217_v7  ;;  %7263 = vmatpush.bf16.msra.mxu1 %v11725_v9  ;;  %v9640_v7 = vld [vmem:[#allocation12 + $0x420] sm:$0xf]  ;;  %v7010_v9 = vadd.f32 %v7009_v25, %v6997_v3  ;;  %v6972_v61 = vpop.f32.mrf.mxu3  ;;  %v12928_v3 = vld [vmem:[#allocation12 + $0x1034] sm:$0xf0] }
 0x3c4   :  { %v9641_v14 = vor.u32 %v12550_v1, %v9640_v7  ;;  %v10504_v25 = vld [vmem:[#allocation12 + $0xae0] sm:$0xf]  ;;  %v12478_v7 = vld [vmem:[#allocation12 + $0x224] sm:$0xf0]  ;;  %v10218_v61 = vld [vmem:[#allocation12 + $0x8e8] sm:$0xf0] }
 0x3c5   :  { %7225 = vmatpush.bf16.msrb.mxu3 %v9925_v47  ;;  %7254 = vmatpush.bf16.msrb.mxu2 %v10861_v20  ;;  %v7670_v47 = vmax.f32 %v7010_v9, 0.0  ;;  %v11437_v20 = vor.u32 %v12990_v6, %v11434_v8  ;;  %v9570_v6 = vld [vmem:[#allocation12 + $0x3d8] sm:$0xf0]  ;;  %v10288_v8 = vld [vmem:[#allocation12 + $0x930] sm:$0xf]  ;;  %v11153_v9 = vor.u32 %v12928_v3, %v11152_v2 }
 0x3c7   :  { %7287 = vmatpush.bf16.msrb.mxu0 %v10145_v19  ;;  %7264 = vmatpush.bf16.msra.mxu1 %v11653_v27  ;;  %v10577_v19 = vor.u32 %v12784_v35, %v10576_v16  ;;  %v11296_v27 = vld [vmem:[#allocation12 + $0x1110] sm:$0xf]  ;;  %v13943_v30 = vmax.f32 %v13911_v11, %v7670_v47  ;;  %v7037_v51 = vpop.f32.mrf.mxu0  ;;  %v11224_v11 = vld [vmem:[#allocation12 + $0x1080] sm:$0xf]  ;;  %v10361_v16 = vor.u32 %v12730_v63, %v10360_v40  ;;  %v12523_v35 = vld [vmem:[#allocation12 + $0x394] sm:$0xf] }
 0x3c8   :  { %7255 = vmatmul.bf16.vlgmr.msrb.gmra.mxu2 %v13788_v13  ;;  %v9573_v0 = vor.u32 %v12523_v35, %v9570_v6  ;;  %v12469_v40 = vld [vmem:[#allocation12 + $0x1e4] sm:$0xf]  ;;  %v9354_v63 = vld [vmem:[#allocation12 + $0x228] sm:$0xf0]  ;;  %v12856_v35 = vld [vmem:[#allocation12 + $0xdf4] sm:$0xf0] }
 0x3c9   :  { %7299 = vmatpush.bf16.msra.mxu2 %v10793_v41  ;;  %7226 = vmatpush.bf16.msrb.mxu3 %v9853_v43  ;;  %v12766_v41 = vld [vmem:[#allocation12 + $0xb24] sm:$0xf0]  ;;  %v9496_v43 = vld [vmem:[#allocation12 + $0x300] sm:$0xf] }
 0x3ca   :  { %v10505_v39 = vor.u32 %v12766_v41, %v10504_v25  ;;  %v9497_v54 = vor.u32 %v12514_v5, %v9496_v43  ;;  %v10221_v25 = vor.u32 %v12685_v10, %v10218_v61 }
 0x3cb   :  { %7288 = vmatpush.bf16.msrb.mxu0 %v10073_v58  ;;  %7265 = vmatpush.bf16.msra.mxu1 %v11581_v53  ;;  %v11297_v58 = vor.u32 %v12964_v28, %v11296_v27  ;;  %v9785_v53 = vor.u32 %v12586_v36, %v9784_v31  ;;  %v12505_v27 = vld [vmem:[#allocation12 + $0x304] sm:$0xf]  ;;  %v9498_v28 = vld [vmem:[#allocation12 + $0x348] sm:$0xf0]  ;;  %v11008_v31 = vld [vmem:[#allocation12 + $0xed0] sm:$0xf] }
 0x3cc   :  { %v9501_v5 = vor.u32 %v12505_v27, %v9498_v28  ;;  %v10722_v27 = vld [vmem:[#allocation12 + $0xcd8] sm:$0xf0] }
 0x3cd   :  { %7300 = vmatpush.bf16.msra.mxu2 %v10721_v52  ;;  %7227 = vmatpush.bf16.msrb.mxu3 %v9781_v60  ;;  %v12946_v52 = vld [vmem:[#allocation12 + $0x10c4] sm:$0xf0]  ;;  %v13947_v60 = vpop.f32.mrf.mxu2 }
 0x3ce   :  { %v11225_v38 = vor.u32 %v12946_v52, %v11224_v11  ;;  %v12487_v52 = vld [vmem:[#allocation12 + $0x274] sm:$0xf] }
 0x3cf   :  { %7289 = vmatpush.bf16.msrb.mxu0 %v10001_v62  ;;  %7266 = vmatpush.bf16.msra.mxu1 %v11509_v4  ;;  %v9642_v62 = vld [vmem:[#allocation12 + $0x468] sm:$0xf0]  ;;  %v9352_v4 = vld [vmem:[#allocation12 + $0x1e0] sm:$0xf] }
 0x3d0   :  { %v9645_v1 = vor.u32 %v12541_v45, %v9642_v62  ;;  %v9353_v18 = vor.u32 %v12478_v7, %v9352_v4  ;;  %v9136_v45 = vld [vmem:[#allocation12 + $0x30] sm:$0xf]  ;;  %v12424_v62 = vld [vmem:[#allocation12 + $0x74] sm:$0xf0]  ;;  %v13126_v4 = vld [vmem:[#allocation12 + $0x1664] sm:$0xf0] }
 0x3d1   :  { %7301 = vmatpush.bf16.msra.mxu2 %v10649_v48  ;;  %7228 = vmatpush.bf16.msrb.mxu3 %v9709_v46  ;;  %v9425_v48 = vor.u32 %v12496_v29, %v9424_v59  ;;  %v13949_v46 = vld [vmem:[#allocation13 + $0x8] sm:$0xff]  ;;  %v12631_v7 = vld [vmem:[#allocation12 + $0x6f4] sm:$0xf] }
 0x3d2   :  { %v2865_v47 = vperm.slane %v13949_v46, 0 }
 0x3d3   :  { %7290 = vmatpush.bf16.msrb.mxu0 %v9929_v34  ;;  %7267 = vmatpush.bf16.msra.mxu1 %v11437_v20  ;;  %v11080_v34 = vld [vmem:[#allocation12 + $0xf60] sm:$0xf]  ;;  %v9280_v20 = vld [vmem:[#allocation12 + $0x150] sm:$0xf] }
 0x3d4   :  { %7229 = vmatmul.bf16.vlgmr.msrb.gmra.mxu3 %v13779_v12  ;;  %v9281_v36 = vor.u32 %v12460_v23, %v9280_v20  ;;  %v13108_v20 = vld [vmem:[#allocation12 + $0x15d4] sm:$0xf0] }
 0x3d5   :  { %7273 = vmatpush.bf16.msra.mxu3 %v9641_v14  ;;  %7302 = vmatpush.bf16.msra.mxu2 %v10577_v19  ;;  %v12910_v14 = vld [vmem:[#allocation12 + $0xfa4] sm:$0xf0]  ;;  %v10289_v19 = vor.u32 %v12712_v15, %v10288_v8  ;;  %v7050_v22 = vpop.f32.mrf.mxu2  ;;  %v9137_v8 = vor.u32 %v12424_v62, %v9136_v45  ;;  %v10794_v15 = vld [vmem:[#allocation12 + $0xd68] sm:$0xf0]  ;;  %v13117_v45 = vld [vmem:[#allocation12 + $0x1624] sm:$0xf] }
 0x3d6   :  { %7268 = vmatmul.bf16.vlgmr.msra.gmra.mxu1 %v13798_v37  ;;  %v11081_v41 = vor.u32 %v12910_v14, %v11080_v34  ;;  %v9357_v34 = vor.u32 %v12469_v40, %v9354_v63  ;;  %v12613_v22 = vld [vmem:[#allocation12 + $0x664] sm:$0xf]  ;;  %v11946_v40 = vld [vmem:[#allocation12 + $0x1668] sm:$0xf0] }
 0x3d7   :  { %7312 = vmatpush.bf16.msrb.mxu1 %v11369_v24  ;;  %7291 = vmatpush.bf16.msrb.mxu0 %v9857_v32  ;;  %v7061_v24 = vpop.f32.mrf.mxu1  ;;  %v12667_v32 = vld [vmem:[#allocation12 + $0x814] sm:$0xf]  ;;  %v7022_v43 = vpop.f32.mrf.mxu3  ;;  %v12577_v63 = vld [vmem:[#allocation12 + $0x544] sm:$0xf] }
 0x3d8   :  { %v7023_v50 = vadd.f32 %v7022_v43, %v2865_v47  ;;  %v13090_v43 = vld [vmem:[#allocation12 + $0x1544] sm:$0xf0] }
 0x3d9   :  { %7274 = vmatpush.bf16.msra.mxu3 %v9569_v21  ;;  %7303 = vmatpush.bf16.msra.mxu2 %v10505_v39  ;;  %v10146_v21 = vld [vmem:[#allocation12 + $0x858] sm:$0xf0]  ;;  %v12892_v39 = vld [vmem:[#allocation12 + $0xf14] sm:$0xf0] }
 0x3da   :  { %v10149_v51 = vor.u32 %v12667_v32, %v10146_v21  ;;  %v11009_v11 = vor.u32 %v12892_v39, %v11008_v31  ;;  %v7036_v59 = vadd.f32 %v13940_v17, %v7023_v50  ;;  %v12433_v21 = vld [vmem:[#allocation12 + $0xc4] sm:$0xf]  ;;  %v9210_v39 = vld [vmem:[#allocation12 + $0x108] sm:$0xf0] }
 0x3db   :  { %7313 = vmatpush.bf16.msrb.mxu1 %v11297_v58  ;;  %7292 = vmatpush.bf16.msrb.mxu0 %v9785_v53  ;;  %v9208_v58 = vld [vmem:[#allocation12 + $0xc0] sm:$0xf]  ;;  %v9426_v53 = vld [vmem:[#allocation12 + $0x2b8] sm:$0xf0] }
 0x3dc   :  { %v9209_v29 = vor.u32 %v12442_v49, %v9208_v58  ;;  %v7049_v17 = vadd.f32 %v13947_v60, %v7036_v59  ;;  %v9282_v60 = vld [vmem:[#allocation12 + $0x198] sm:$0xf0]  ;;  %v12595_v58 = vld [vmem:[#allocation12 + $0x5d4] sm:$0xf]  ;;  %v11728_v59 = vld [vmem:[#allocation12 + $0x1470] sm:$0xf] }
 0x3dd   :  { %7275 = vmatpush.bf16.msra.mxu3 %v9497_v54  ;;  %7304 = vmatpush.bf16.msra.mxu2 %v10433_v57  ;;  %v12649_v54 = vld [vmem:[#allocation12 + $0x784] sm:$0xf]  ;;  %v12874_v57 = vld [vmem:[#allocation12 + $0xe84] sm:$0xf0]  ;;  %v9858_v49 = vld [vmem:[#allocation12 + $0x618] sm:$0xf0] }
 0x3de   :  { %v10077_v3 = vor.u32 %v12649_v54, %v10074_v55  ;;  %v13956_v10 = vadd.f32 %v7061_v24, %v7049_v17  ;;  %v2866_v24 = vperm.slane %v13949_v46, 1  ;;  %v12415_v54 = vld [vmem:[#allocation12 + $0x34] sm:$0xf]  ;;  %v9138_v55 = vld [vmem:[#allocation12 + $0x78] sm:$0xf0] }
 0x3df   :  { %7314 = vmatpush.bf16.msrb.mxu1 %v11225_v38  ;;  %7293 = vmatpush.bf16.msrb.mxu0 %v9713_v44  ;;  %v9429_v38 = vor.u32 %v12487_v52, %v9426_v53  ;;  %v7063_v2 = vpop.f32.mrf.mxu1  ;;  %v10937_v44 = vor.u32 %v12874_v57, %v10936_v56  ;;  %v7087_v6 = vpop.f32.mrf.mxu0  ;;  %v9213_v52 = vor.u32 %v12433_v21, %v9210_v39  ;;  %v11656_v17 = vld [vmem:[#allocation12 + $0x13e0] sm:$0xf]  ;;  %v12739_v39 = vld [vmem:[#allocation12 + $0xa54] sm:$0xf] }
 0x3e0   :  { %v7024_v61 = vpop.f32.mrf.mxu3  ;;  %v7088_v56 = vadd.f32 %v7087_v6, %v2866_v24  ;;  %v9861_v57 = vor.u32 %v12595_v58, %v9858_v49  ;;  %v9786_v2 = vld [vmem:[#allocation12 + $0x588] sm:$0xf0]  ;;  %v13099_v6 = vld [vmem:[#allocation12 + $0x1594] sm:$0xf]  ;;  %v13081_v24 = vld [vmem:[#allocation12 + $0x1504] sm:$0xf] }
 0x3e1   :  { %7276 = vmatpush.bf16.msra.mxu3 %v9425_v48  ;;  %7305 = vmatpush.bf16.msra.mxu2 %v10361_v16  ;;  %v11944_v48 = vld [vmem:[#allocation12 + $0x1620] sm:$0xf]  ;;  %v10864_v16 = vld [vmem:[#allocation12 + $0xdb0] sm:$0xf]  ;;  %v9714_v61 = vld [vmem:[#allocation12 + $0x4f8] sm:$0xf0] }
 0x3e2   :  { %7294 = vmatmul.bf16.vlgmr.msrb.gmra.mxu0 %v13779_v12  ;;  %v11945_v14 = vor.u32 %v13126_v4, %v11944_v48  ;;  %v10865_v47 = vor.u32 %v12856_v35, %v10864_v16  ;;  %v10578_v48 = vld [vmem:[#allocation12 + $0xbb8] sm:$0xf0]  ;;  %v9141_v4 = vor.u32 %v12415_v54, %v9138_v55  ;;  %v9789_v16 = vor.u32 %v12577_v63, %v9786_v2  ;;  %v13054_v35 = vld [vmem:[#allocation12 + $0x1424] sm:$0xf0]  ;;  %v11512_v49 = vld [vmem:[#allocation12 + $0x12c0] sm:$0xf] }
 0x3e3   :  { %7338 = vmatpush.bf16.msra.mxu0 %v9645_v1  ;;  %7315 = vmatpush.bf16.msrb.mxu1 %v11153_v9  ;;  %v10002_v1 = vld [vmem:[#allocation12 + $0x738] sm:$0xf0]  ;;  %v12829_v9 = vld [vmem:[#allocation12 + $0xd24] sm:$0xf]  ;;  %v9504_v55 = vld [vmem:[#allocation12 + $0x308] sm:$0xf] }
 0x3e4   :  { %v10797_v23 = vor.u32 %v12829_v9, %v10794_v15  ;;  %v12559_v15 = vld [vmem:[#allocation12 + $0x4b4] sm:$0xf]  ;;  %v11730_v54 = vld [vmem:[#allocation12 + $0x14b8] sm:$0xf0]  ;;  %v11658_v63 = vld [vmem:[#allocation12 + $0x1428] sm:$0xf0] }
 0x3e5   :  { %7277 = vmatpush.bf16.msra.mxu3 %v9353_v18  ;;  %7306 = vmatpush.bf16.msra.mxu2 %v10289_v19  ;;  %v12451_v18 = vld [vmem:[#allocation12 + $0x154] sm:$0xf]  ;;  %v11872_v19 = vld [vmem:[#allocation12 + $0x1590] sm:$0xf] }
 0x3e6   :  { %v9285_v28 = vor.u32 %v12451_v18, %v9282_v60  ;;  %v11873_v32 = vor.u32 %v13108_v20, %v11872_v19  ;;  %v12757_v18 = vld [vmem:[#allocation12 + $0xae4] sm:$0xf]  ;;  %v9717_v19 = vor.u32 %v12559_v15, %v9714_v61  ;;  %v11584_v20 = vld [vmem:[#allocation12 + $0x1350] sm:$0xf] }
 0x3e7   :  { %7339 = vmatpush.bf16.msra.mxu0 %v9573_v0  ;;  %7316 = vmatpush.bf16.msrb.mxu1 %v11081_v41  ;;  %v10005_v0 = vor.u32 %v12631_v7, %v10002_v1  ;;  %v12811_v41 = vld [vmem:[#allocation12 + $0xc94] sm:$0xf]  ;;  %v7089_v50 = vpop.f32.mrf.mxu0  ;;  %v11949_v1 = vor.u32 %v13117_v45, %v11946_v40  ;;  %v13000_v40 = vld [vmem:[#allocation12 + $0x1274] sm:$0xf0]  ;;  %v12695_v15 = vld [vmem:[#allocation12 + $0x8ec] sm:$0xf0] }
 0x3e8   :  { %7307 = vmatmul.bf16.vlgmr.msra.gmra.mxu2 %v13782_v33  ;;  %v13018_v50 = vld [vmem:[#allocation12 + $0x1304] sm:$0xf0] }
 0x3e9   :  { %7351 = vmatpush.bf16.msrb.mxu2 %v10221_v25  ;;  %7278 = vmatpush.bf16.msra.mxu3 %v9281_v36  ;;  %v9930_v25 = vld [vmem:[#allocation12 + $0x6a8] sm:$0xf0]  ;;  %v11800_v36 = vld [vmem:[#allocation12 + $0x1500] sm:$0xf]  ;;  %v11513_v45 = vor.u32 %v13018_v50, %v11512_v49  ;;  %v10080_v50 = vld [vmem:[#allocation12 + $0x788] sm:$0xf] }
 0x3ea   :  { %v9933_v31 = vor.u32 %v12613_v22, %v9930_v25  ;;  %v11801_v53 = vor.u32 %v13090_v43, %v11800_v36  ;;  %v10434_v36 = vld [vmem:[#allocation12 + $0xa98] sm:$0xf0] }
 0x3eb   :  { %7340 = vmatpush.bf16.msra.mxu0 %v9501_v5  ;;  %7317 = vmatpush.bf16.msrb.mxu1 %v11009_v11  ;;  %v10725_v5 = vor.u32 %v12811_v41, %v10722_v27  ;;  %v10650_v11 = vld [vmem:[#allocation12 + $0xc48] sm:$0xf0] }
 0x3ed   :  { %7352 = vmatpush.bf16.msrb.mxu2 %v10149_v51  ;;  %7279 = vmatpush.bf16.msra.mxu3 %v9209_v29  ;;  %v12793_v51 = vld [vmem:[#allocation12 + $0xc04] sm:$0xf]  ;;  %v13072_v29 = vld [vmem:[#allocation12 + $0x14b4] sm:$0xf0] }
 0x3ee   :  { %v10653_v62 = vor.u32 %v12793_v51, %v10650_v11  ;;  %v11729_v7 = vor.u32 %v13072_v29, %v11728_v59  ;;  %v10362_v59 = vld [vmem:[#allocation12 + $0xa08] sm:$0xf0] }
 0x3ef   :  { %7341 = vmatpush.bf16.msra.mxu0 %v9429_v38  ;;  %7318 = vmatpush.bf16.msrb.mxu1 %v10937_v44  ;;  %v7100_v38 = vpop.f32.mrf.mxu2  ;;  %v12775_v44 = vld [vmem:[#allocation12 + $0xb74] sm:$0xf] }
 0x3f0   :  { %v10581_v9 = vor.u32 %v12775_v44, %v10578_v48 }
 0x3f1   :  { %7353 = vmatpush.bf16.msrb.mxu2 %v10077_v3  ;;  %7280 = vmatpush.bf16.msra.mxu3 %v9137_v8  ;;  %v7101_v3 = vadd.f32 %v7100_v38, %v7088_v56  ;;  %v11874_v8 = vld [vmem:[#allocation12 + $0x15d8] sm:$0xf0]  ;;  %v12515_v56 = vld [vmem:[#allocation12 + $0x34c] sm:$0xf0] }
 0x3f2   :  { %v11877_v60 = vor.u32 %v13099_v6, %v11874_v8  ;;  %v11440_v38 = vld [vmem:[#allocation12 + $0x1230] sm:$0xf]  ;;  %v9505_v44 = vor.u32 %v12515_v56, %v9504_v55  ;;  %v12919_v56 = vld [vmem:[#allocation12 + $0xff4] sm:$0xf] }
 0x3f3   :  { %7342 = vmatpush.bf16.msra.mxu0 %v9357_v34  ;;  %7319 = vmatpush.bf16.msrb.mxu1 %v10865_v47  ;;  %v9648_v34 = vld [vmem:[#allocation12 + $0x428] sm:$0xf]  ;;  %v11657_v47 = vor.u32 %v13054_v35, %v11656_v17  ;;  %v7113_v25 = vpop.f32.mrf.mxu1  ;;  %v9432_v17 = vld [vmem:[#allocation12 + $0x278] sm:$0xf]  ;;  %v10290_v35 = vld [vmem:[#allocation12 + $0x978] sm:$0xf0]  ;;  %v11441_v8 = vor.u32 %v13000_v40, %v11440_v38 }
 0x3f4   :  { %7281 = vmatmul.bf16.vlgmr.msra.gmra.mxu3 %v13771_v42  ;;  %v13961_v21 = vadd.f32 %v7113_v25, %v7101_v3  ;;  %v10152_v25 = vld [vmem:[#allocation12 + $0x818] sm:$0xf]  ;;  %v12983_v38 = vld [vmem:[#allocation12 + $0x11ec] sm:$0xf0] }
 0x3f5   :  { %7325 = vmatpush.bf16.msrb.mxu3 %v11945_v14  ;;  %7354 = vmatpush.bf16.msrb.mxu2 %v10005_v0  ;;  %v12551_v14 = vld [vmem:[#allocation12 + $0x46c] sm:$0xf0]  ;;  %v10506_v0 = vld [vmem:[#allocation12 + $0xb28] sm:$0xf0] }
 0x3f6   :  { %7320 = vmatmul.bf16.vlgmr.msrb.gmra.mxu1 %v13788_v13  ;;  %v9649_v41 = vor.u32 %v12551_v14, %v9648_v34  ;;  %v10509_v27 = vor.u32 %v12757_v18, %v10506_v0  ;;  %v13027_v14 = vld [vmem:[#allocation12 + $0x1354] sm:$0xf]  ;;  %v12443_v40 = vld [vmem:[#allocation12 + $0x10c] sm:$0xf0] }
 0x3f7   :  { %7364 = vmatpush.bf16.msra.mxu1 %v10797_v23  ;;  %7343 = vmatpush.bf16.msra.mxu0 %v9285_v28  ;;  %v13036_v23 = vld [vmem:[#allocation12 + $0x1394] sm:$0xf0]  ;;  %v7102_v22 = vpop.f32.mrf.mxu2  ;;  %v11802_v28 = vld [vmem:[#allocation12 + $0x1548] sm:$0xf0] }
 0x3f8   :  { %v11585_v43 = vor.u32 %v13036_v23, %v11584_v20  ;;  %v11805_v58 = vor.u32 %v13081_v24, %v11802_v28  ;;  %v9360_v23 = vld [vmem:[#allocation12 + $0x1e8] sm:$0xf]  ;;  %v12479_v22 = vld [vmem:[#allocation12 + $0x22c] sm:$0xf0]  ;;  %v13009_v28 = vld [vmem:[#allocation12 + $0x12c4] sm:$0xf] }
 0x3f9   :  { %7326 = vmatpush.bf16.msrb.mxu3 %v11873_v32  ;;  %7355 = vmatpush.bf16.msrb.mxu2 %v9933_v31  ;;  %v9576_v32 = vld [vmem:[#allocation12 + $0x398] sm:$0xf]  ;;  %v12533_v31 = vld [vmem:[#allocation12 + $0x3dc] sm:$0xf0] }
 0x3fa   :  { %v9577_v11 = vor.u32 %v12533_v31, %v9576_v32  ;;  %v9361_v32 = vor.u32 %v12479_v22, %v9360_v23  ;;  %v11514_v31 = vld [vmem:[#allocation12 + $0x1308] sm:$0xf0] }
 0x3fb   :  { %7365 = vmatpush.bf16.msra.mxu1 %v10725_v5  ;;  %7344 = vmatpush.bf16.msra.mxu0 %v9213_v52  ;;  %v7074_v5 = vpop.f32.mrf.mxu3  ;;  %v10437_v52 = vor.u32 %v12739_v39, %v10434_v36  ;;  %v7115_v3 = vpop.f32.mrf.mxu1  ;;  %v12937_v39 = vld [vmem:[#allocation12 + $0x1084] sm:$0xf]  ;;  %v11226_v36 = vld [vmem:[#allocation12 + $0x10c8] sm:$0xf0] }
 0x3fc   :  { %v7075_v51 = vadd.f32 %v7074_v5, %v13956_v10  ;;  %v13045_v10 = vld [vmem:[#allocation12 + $0x13e4] sm:$0xf]  ;;  %v9288_v5 = vld [vmem:[#allocation12 + $0x158] sm:$0xf]  ;;  %v2867_v3 = vperm.slane %v13949_v46, 2 }
 0x3fd   :  { %7327 = vmatpush.bf16.msrb.mxu3 %v11801_v53  ;;  %7356 = vmatpush.bf16.msrb.mxu2 %v9861_v57  ;;  %v13063_v53 = vld [vmem:[#allocation12 + $0x1474] sm:$0xf]  ;;  %v12721_v57 = vld [vmem:[#allocation12 + $0x9c4] sm:$0xf]  ;;  %v11661_v61 = vor.u32 %v13045_v10, %v11658_v63  ;;  %v10008_v10 = vld [vmem:[#allocation12 + $0x6f8] sm:$0xf] }
 0x3fe   :  { %v7671_v29 = vmax.f32 %v7075_v51, 0.0  ;;  %v10365_v48 = vor.u32 %v12721_v57, %v10362_v59  ;;  %v12659_v51 = vld [vmem:[#allocation12 + $0x7cc] sm:$0xf0]  ;;  %v11154_v57 = vld [vmem:[#allocation12 + $0x1038] sm:$0xf0] }
 0x3ff   :  { %7366 = vmatpush.bf16.msra.mxu1 %v10653_v62  ;;  %7345 = vmatpush.bf16.msra.mxu0 %v9141_v4  ;;  %v11733_v62 = vor.u32 %v13063_v53, %v11730_v54  ;;  %v12973_v4 = vld [vmem:[#allocation12 + $0x11a4] sm:$0xf]  ;;  %v13969_v6 = vpop.f32.mrf.mxu0  ;;  %v12991_v53 = vld [vmem:[#allocation12 + $0x1234] sm:$0xf]  ;;  %v11442_v54 = vld [vmem:[#allocation12 + $0x1278] sm:$0xf0] }
 0x400   :  { %v13967_v2 = vmax.f32 %v13929_v26, %v7671_v29  ;;  %v11376_v59 = vld [vmem:[#allocation12 + $0x11a8] sm:$0xf]  ;;  %v12641_v63 = vld [vmem:[#allocation12 + $0x73c] sm:$0xf0] }
 0x401   :  { %7328 = vmatpush.bf16.msrb.mxu3 %v11729_v7  ;;  %7357 = vmatpush.bf16.msrb.mxu2 %v9789_v16  ;;  %v11370_v7 = vld [vmem:[#allocation12 + $0x11e8] sm:$0xf0]  ;;  %v12703_v16 = vld [vmem:[#allocation12 + $0x934] sm:$0xf] }
 0x402   :  { %7346 = vmatmul.bf16.vlgmr.msra.gmra.mxu0 %v13771_v42  ;;  %v11373_v34 = vor.u32 %v12973_v4, %v11370_v7  ;;  %v10293_v0 = vor.u32 %v12703_v16, %v10290_v35  ;;  %v12901_v4 = vld [vmem:[#allocation12 + $0xf64] sm:$0xf]  ;;  %v11377_v7 = vor.u32 %v12983_v38, %v11376_v59  ;;  %v11304_v16 = vld [vmem:[#allocation12 + $0x1118] sm:$0xf]  ;;  %v12965_v35 = vld [vmem:[#allocation12 + $0x115c] sm:$0xf0] }
 0x403   :  { %7390 = vmatpush.bf16.msrb.mxu0 %v11949_v1  ;;  %7367 = vmatpush.bf16.msra.mxu1 %v10581_v9  ;;  %v12497_v1 = vld [vmem:[#allocation12 + $0x2bc] sm:$0xf0]  ;;  %v10224_v9 = vld [vmem:[#allocation12 + $0x8a8] sm:$0xf]  ;;  %v7076_v26 = vpop.f32.mrf.mxu3  ;;  %v10866_v38 = vld [vmem:[#allocation12 + $0xdf8] sm:$0xf0] }
 0x404   :  { %v9433_v18 = vor.u32 %v12497_v1, %v9432_v17  ;;  %v10225_v20 = vor.u32 %v12695_v15, %v10224_v9  ;;  %v11082_v1 = vld [vmem:[#allocation12 + $0xfa8] sm:$0xf0]  ;;  %v9144_v9 = vld [vmem:[#allocation12 + $0x38] sm:$0xf]  ;;  %v12425_v15 = vld [vmem:[#allocation12 + $0x7c] sm:$0xf0] }
 0x405   :  { %7329 = vmatpush.bf16.msrb.mxu3 %v11657_v47  ;;  %7358 = vmatpush.bf16.msrb.mxu2 %v9717_v19  ;;  %v11586_v47 = vld [vmem:[#allocation12 + $0x1398] sm:$0xf0]  ;;  %v11952_v26 = vld [vmem:[#allocation12 + $0x1628] sm:$0xf]  ;;  %v11085_v46 = vor.u32 %v12901_v4, %v11082_v1  ;;  %v12839_v4 = vld [vmem:[#allocation12 + $0xd6c] sm:$0xf0] }
 0x406   :  { %v11298_v19 = vld [vmem:[#allocation12 + $0x1158] sm:$0xf0]  ;;  %v12569_v1 = vld [vmem:[#allocation12 + $0x4fc] sm:$0xf0] }
 0x407   :  { %7391 = vmatpush.bf16.msrb.mxu0 %v11877_v60  ;;  %7368 = vmatpush.bf16.msra.mxu1 %v10509_v27  ;;  %v12955_v60 = vld [vmem:[#allocation12 + $0x1114] sm:$0xf]  ;;  %v11589_v27 = vor.u32 %v13027_v14, %v11586_v47  ;;  %v7141_v49 = vpop.f32.mrf.mxu0  ;;  %v12623_v14 = vld [vmem:[#allocation12 + $0x6ac] sm:$0xf0]  ;;  %v9145_v47 = vor.u32 %v12425_v15, %v9144_v9  ;;  %v12542_v9 = vld [vmem:[#allocation12 + $0x42c] sm:$0xf] }
 0x408   :  { %7359 = vmatmul.bf16.vlgmr.msrb.gmra.mxu2 %v13779_v12  ;;  %v11301_v24 = vor.u32 %v12955_v60, %v11298_v19  ;;  %v12883_v60 = vld [vmem:[#allocation12 + $0xed4] sm:$0xf]  ;;  %v11010_v19 = vld [vmem:[#allocation12 + $0xf18] sm:$0xf0]  ;;  %v10938_v49 = vld [vmem:[#allocation12 + $0xe88] sm:$0xf0] }
 0x409   :  { %7403 = vmatpush.bf16.msra.mxu2 %v9649_v41  ;;  %7330 = vmatpush.bf16.msrb.mxu3 %v11585_v43  ;;  %v12677_v41 = vld [vmem:[#allocation12 + $0x85c] sm:$0xf0]  ;;  %v9650_v15 = vld [vmem:[#allocation12 + $0x470] sm:$0xf0] }
 0x40a   :  { %v10153_v43 = vor.u32 %v12677_v41, %v10152_v25  ;;  %v11232_v41 = vld [vmem:[#allocation12 + $0x1088] sm:$0xf] }
 0x40b   :  { %7392 = vmatpush.bf16.msrb.mxu0 %v11805_v58  ;;  %7369 = vmatpush.bf16.msra.mxu1 %v10437_v52  ;;  %v12461_v58 = vld [vmem:[#allocation12 + $0x19c] sm:$0xf0]  ;;  %v11229_v52 = vor.u32 %v12937_v39, %v11226_v36  ;;  %v7152_v29 = vpop.f32.mrf.mxu2  ;;  %v11013_v36 = vor.u32 %v12883_v60, %v11010_v19  ;;  %v11664_v19 = vld [vmem:[#allocation12 + $0x13e8] sm:$0xf] }
 0x40c   :  { %v9289_v55 = vor.u32 %v12461_v58, %v9288_v5  ;;  %v12605_v39 = vld [vmem:[#allocation12 + $0x61c] sm:$0xf0]  ;;  %v12865_v58 = vld [vmem:[#allocation12 + $0xe44] sm:$0xf] }
 0x40d   :  { %7404 = vmatpush.bf16.msra.mxu2 %v9577_v11  ;;  %7331 = vmatpush.bf16.msrb.mxu3 %v11513_v45  ;;  %v11517_v11 = vor.u32 %v13009_v28, %v11514_v31  ;;  %v10081_v45 = vor.u32 %v12659_v51, %v10080_v50  ;;  %v9864_v31 = vld [vmem:[#allocation12 + $0x5d8] sm:$0xf]  ;;  %v12821_v60 = vld [vmem:[#allocation12 + $0xcdc] sm:$0xf0] }
 0x40f   :  { %7393 = vmatpush.bf16.msrb.mxu0 %v11733_v62  ;;  %7370 = vmatpush.bf16.msra.mxu1 %v10365_v48  ;;  %v9216_v62 = vld [vmem:[#allocation12 + $0xc8] sm:$0xf]  ;;  %v11157_v48 = vor.u32 %v12919_v56, %v11154_v57  ;;  %v12587_v57 = vld [vmem:[#allocation12 + $0x58c] sm:$0xf0] }
 0x410   :  { %v9217_v17 = vor.u32 %v12443_v40, %v9216_v62  ;;  %v9792_v56 = vld [vmem:[#allocation12 + $0x548] sm:$0xf]  ;;  %v12911_v40 = vld [vmem:[#allocation12 + $0xfac] sm:$0xf0] }
 0x411   :  { %7405 = vmatpush.bf16.msra.mxu2 %v9505_v44  ;;  %7332 = vmatpush.bf16.msrb.mxu3 %v11441_v8  ;;  %v11445_v44 = vor.u32 %v12991_v53, %v11442_v54  ;;  %v10009_v8 = vor.u32 %v12641_v63, %v10008_v10  ;;  %v12929_v53 = vld [vmem:[#allocation12 + $0x103c] sm:$0xf0]  ;;  %v11808_v54 = vld [vmem:[#allocation12 + $0x1508] sm:$0xf] }
 0x412   :  { %v11088_v62 = vld [vmem:[#allocation12 + $0xf68] sm:$0xf] }
 0x413   :  { %7394 = vmatpush.bf16.msrb.mxu0 %v11661_v61  ;;  %7371 = vmatpush.bf16.msra.mxu1 %v10293_v0  ;;  %v13127_v61 = vld [vmem:[#allocation12 + $0x166c] sm:$0xf0]  ;;  %v11305_v0 = vor.u32 %v12965_v35, %v11304_v16  ;;  %v7165_v23 = vpop.f32.mrf.mxu1  ;;  %v10800_v10 = vld [vmem:[#allocation12 + $0xd28] sm:$0xf] }
 0x414   :  { %7333 = vmatmul.bf16.vlgmr.msrb.gmra.mxu3 %v13798_v37  ;;  %v11953_v22 = vor.u32 %v13127_v61, %v11952_v26  ;;  %v11089_v61 = vor.u32 %v12911_v40, %v11088_v62  ;;  %v12488_v62 = vld [vmem:[#allocation12 + $0x27c] sm:$0xf]  ;;  %v9434_v40 = vld [vmem:[#allocation12 + $0x2c0] sm:$0xf0] }
 0x415   :  { %7377 = vmatpush.bf16.msra.mxu3 %v11373_v34  ;;  %7406 = vmatpush.bf16.msra.mxu2 %v9433_v18  ;;  %v9936_v34 = vld [vmem:[#allocation12 + $0x668] sm:$0xf]  ;;  %v7153_v18 = vadd.f32 %v7152_v29, %v2867_v3  ;;  %v10941_v29 = vor.u32 %v12865_v58, %v10938_v49  ;;  %v12506_v49 = vld [vmem:[#allocation12 + $0x30c] sm:$0xf] }
 0x416   :  { %7372 = vmatmul.bf16.vlgmr.msra.gmra.mxu1 %v13782_v33  ;;  %v9937_v25 = vor.u32 %v12623_v14, %v9936_v34  ;;  %v10801_v34 = vor.u32 %v12839_v4, %v10800_v10  ;;  %v11016_v14 = vld [vmem:[#allocation12 + $0xed8] sm:$0xf]  ;;  %v12767_v4 = vld [vmem:[#allocation12 + $0xb2c] sm:$0xf0] }
 0x417   :  { %7416 = vmatpush.bf16.msrb.mxu1 %v10225_v20  ;;  %7395 = vmatpush.bf16.msrb.mxu0 %v11589_v27  ;;  %v7154_v20 = vpop.f32.mrf.mxu2  ;;  %v12947_v27 = vld [vmem:[#allocation12 + $0x10cc] sm:$0xf0]  ;;  %v13974_v28 = vadd.f32 %v7165_v23, %v7153_v18  ;;  %v12524_v23 = vld [vmem:[#allocation12 + $0x39c] sm:$0xf] }
 0x418   :  { %v11233_v5 = vor.u32 %v12947_v27, %v11232_v41  ;;  %v13055_v20 = vld [vmem:[#allocation12 + $0x142c] sm:$0xf0]  ;;  %v10944_v27 = vld [vmem:[#allocation12 + $0xe48] sm:$0xf] }
 0x419   :  { %7378 = vmatpush.bf16.msra.mxu3 %v11301_v24  ;;  %7407 = vmatpush.bf16.msra.mxu2 %v9361_v32  ;;  %v11880_v24 = vld [vmem:[#allocation12 + $0x1598] sm:$0xf]  ;;  %v13109_v32 = vld [vmem:[#allocation12 + $0x15dc] sm:$0xf0] }
 0x41a   :  { %v11881_v51 = vor.u32 %v13109_v32, %v11880_v24  ;;  %v11665_v24 = vor.u32 %v13055_v20, %v11664_v19  ;;  %v12875_v32 = vld [vmem:[#allocation12 + $0xe8c] sm:$0xf0]  ;;  %v12794_v20 = vld [vmem:[#allocation12 + $0xc0c] sm:$0xf] }
 0x41b   :  { %7417 = vmatpush.bf16.msrb.mxu1 %v10153_v43  ;;  %7396 = vmatpush.bf16.msrb.mxu0 %v11517_v11  ;;  %v7126_v43 = vpop.f32.mrf.mxu3  ;;  %v9865_v11 = vor.u32 %v12605_v39, %v9864_v31  ;;  %v7167_v3 = vpop.f32.mrf.mxu1  ;;  %v10656_v31 = vld [vmem:[#allocation12 + $0xc08] sm:$0xf]  ;;  %v12803_v39 = vld [vmem:[#allocation12 + $0xc4c] sm:$0xf0] }
 0x41c   :  { %v7127_v50 = vadd.f32 %v7126_v43, %v13961_v21  ;;  %v11592_v43 = vld [vmem:[#allocation12 + $0x1358] sm:$0xf]  ;;  %v10512_v3 = vld [vmem:[#allocation12 + $0xae8] sm:$0xf] }
 0x41d   :  { %7379 = vmatpush.bf16.msra.mxu3 %v11229_v52  ;;  %7408 = vmatpush.bf16.msra.mxu2 %v9289_v55  ;;  %v11160_v52 = vld [vmem:[#allocation12 + $0xff8] sm:$0xf]  ;;  %v13091_v55 = vld [vmem:[#allocation12 + $0x154c] sm:$0xf0] }
 0x41e   :  { %v7140_v59 = vadd.f32 %v13969_v6, %v7127_v50  ;;  %v11161_v21 = vor.u32 %v12929_v53, %v11160_v52  ;;  %v13073_v6 = vld [vmem:[#allocation12 + $0x14bc] sm:$0xf0]  ;;  %v9506_v50 = vld [vmem:[#allocation12 + $0x350] sm:$0xf0]  ;;  %v10872_v52 = vld [vmem:[#allocation12 + $0xdb8] sm:$0xf] }
 0x41f   :  { %7418 = vmatpush.bf16.msrb.mxu1 %v10081_v45  ;;  %7397 = vmatpush.bf16.msrb.mxu0 %v11445_v44  ;;  %v12847_v45 = vld [vmem:[#allocation12 + $0xdb4] sm:$0xf]  ;;  %v11809_v44 = vor.u32 %v13091_v55, %v11808_v54  ;;  %v13983_v35 = vpop.f32.mrf.mxu0  ;;  %v12857_v53 = vld [vmem:[#allocation12 + $0xdfc] sm:$0xf0]  ;;  %v10584_v55 = vld [vmem:[#allocation12 + $0xb78] sm:$0xf] }
 0x420   :  { %v7672_v63 = vmax.f32 %v7140_v59, 0.0  ;;  %v10873_v10 = vor.u32 %v12857_v53, %v10872_v52  ;;  %v12434_v52 = vld [vmem:[#allocation12 + $0xcc] sm:$0xf]  ;;  %v9218_v53 = vld [vmem:[#allocation12 + $0x110] sm:$0xf0] }
 0x421   :  { %7380 = vmatpush.bf16.msra.mxu3 %v11157_v48  ;;  %7409 = vmatpush.bf16.msra.mxu2 %v9217_v17  ;;  %v9793_v48 = vor.u32 %v12587_v57, %v9792_v56  ;;  %v9720_v17 = vld [vmem:[#allocation12 + $0x4b8] sm:$0xf]  ;;  %v12785_v56 = vld [vmem:[#allocation12 + $0xbbc] sm:$0xf0]  ;;  %v12830_v57 = vld [vmem:[#allocation12 + $0xd2c] sm:$0xf] }
 0x422   :  { %7398 = vmatmul.bf16.vlgmr.msrb.gmra.mxu0 %v13798_v37  ;;  %v13981_v16 = vmax.f32 %v13943_v30, %v7672_v63  ;;  %v9721_v18 = vor.u32 %v12569_v1, %v9720_v17  ;;  %v9653_v30 = vor.u32 %v12542_v9, %v9650_v15  ;;  %v10585_v63 = vor.u32 %v12785_v56, %v10584_v55  ;;  %v11448_v1 = vld [vmem:[#allocation12 + $0x1238] sm:$0xf]  ;;  %v12974_v9 = vld [vmem:[#allocation12 + $0x11ac] sm:$0xf]  ;;  %v11378_v15 = vld [vmem:[#allocation12 + $0x11f0] sm:$0xf0] }
 0x423   :  { %7442 = vmatpush.bf16.msra.mxu0 %v11377_v7  ;;  %7419 = vmatpush.bf16.msrb.mxu1 %v10009_v8  ;;  %v11736_v7 = vld [vmem:[#allocation12 + $0x1478] sm:$0xf]  ;;  %v10869_v8 = vor.u32 %v12847_v45, %v10866_v38  ;;  %v7128_v26 = vpop.f32.mrf.mxu3  ;;  %v10802_v45 = vld [vmem:[#allocation12 + $0xd70] sm:$0xf0]  ;;  %v11520_v38 = vld [vmem:[#allocation12 + $0x12c8] sm:$0xf]  ;;  %v9437_v17 = vor.u32 %v12488_v62, %v9434_v40  ;;  %v9221_v40 = vor.u32 %v12434_v52, %v9218_v53 }
 0x424   :  { %v12470_v26 = vld [vmem:[#allocation12 + $0x1ec] sm:$0xf]  ;;  %v10296_v56 = vld [vmem:[#allocation12 + $0x938] sm:$0xf]  ;;  %v12632_v52 = vld [vmem:[#allocation12 + $0x6fc] sm:$0xf] }
 0x425   :  { %7381 = vmatpush.bf16.msra.mxu3 %v11085_v46  ;;  %7410 = vmatpush.bf16.msra.mxu2 %v9145_v47  ;;  %v11737_v46 = vor.u32 %v13073_v6, %v11736_v7  ;;  %v10728_v47 = vld [vmem:[#allocation12 + $0xc98] sm:$0xf]  ;;  %v12812_v7 = vld [vmem:[#allocation12 + $0xc9c] sm:$0xf]  ;;  %v10730_v6 = vld [vmem:[#allocation12 + $0xce0] sm:$0xf0] }
 0x426   :  { %v10729_v41 = vor.u32 %v12821_v60, %v10728_v47  ;;  %v10010_v53 = vld [vmem:[#allocation12 + $0x740] sm:$0xf0] }
 0x427   :  { %7443 = vmatpush.bf16.msra.mxu0 %v11305_v0  ;;  %7420 = vmatpush.bf16.msrb.mxu1 %v9937_v25  ;;  %v12893_v0 = vld [vmem:[#allocation12 + $0xf1c] sm:$0xf0]  ;;  %v7193_v58 = vpop.f32.mrf.mxu0 }
 0x428   :  { %7411 = vmatmul.bf16.vlgmr.msra.gmra.mxu2 %v13771_v42  ;;  %v11017_v25 = vor.u32 %v12893_v0, %v11016_v14  ;;  %v10733_v14 = vor.u32 %v12812_v7, %v10730_v6  ;;  %v12749_v0 = vld [vmem:[#allocation12 + $0xa9c] sm:$0xf0] }
 0x429   :  { %7455 = vmatpush.bf16.msrb.mxu2 %v11953_v22  ;;  %7382 = vmatpush.bf16.msra.mxu3 %v11013_v36  ;;  %v9578_v22 = vld [vmem:[#allocation12 + $0x3e0] sm:$0xf0] }
 0x42a   :  { %v9581_v36 = vor.u32 %v12524_v23, %v9578_v22  ;;  %v10658_v23 = vld [vmem:[#allocation12 + $0xc50] sm:$0xf0]  ;;  %v12956_v22 = vld [vmem:[#allocation12 + $0x111c] sm:$0xf] }
 0x42b   :  { %7444 = vmatpush.bf16.msra.mxu0 %v11233_v5  ;;  %7421 = vmatpush.bf16.msrb.mxu1 %v9865_v11  ;;  %v13037_v5 = vld [vmem:[#allocation12 + $0x139c] sm:$0xf0]  ;;  %v10657_v11 = vor.u32 %v12803_v39, %v10656_v31  ;;  %v13987_v59 = vpop.f32.mrf.mxu2  ;;  %v10661_v31 = vor.u32 %v12794_v20, %v10658_v23  ;;  %v10368_v39 = vld [vmem:[#allocation12 + $0x9c8] sm:$0xf]  ;;  %v11882_v20 = vld [vmem:[#allocation12 + $0x15e0] sm:$0xf0] }
 0x42c   :  { %v11593_v54 = vor.u32 %v13037_v5, %v11592_v43 }
 0x42d   :  { %7456 = vmatpush.bf16.msrb.mxu2 %v11881_v51  ;;  %7383 = vmatpush.bf16.msra.mxu3 %v10941_v29  ;;  %v10945_v51 = vor.u32 %v12875_v32, %v10944_v27  ;;  %v9509_v29 = vor.u32 %v12506_v49, %v9506_v50  ;;  %v9290_v27 = vld [vmem:[#allocation12 + $0x1a0] sm:$0xf0]  ;;  %v12776_v49 = vld [vmem:[#allocation12 + $0xb7c] sm:$0xf] }
 0x42e   :  { %v10586_v50 = vld [vmem:[#allocation12 + $0xbc0] sm:$0xf0] }
 0x42f   :  { %7445 = vmatpush.bf16.msra.mxu0 %v11161_v21  ;;  %7422 = vmatpush.bf16.msrb.mxu1 %v9793_v48  ;;  %v13019_v21 = vld [vmem:[#allocation12 + $0x130c] sm:$0xf0] }
 0x430   :  { %v11521_v48 = vor.u32 %v13019_v21, %v11520_v38 }
 0x431   :  { %7457 = vmatpush.bf16.msrb.mxu2 %v11809_v44  ;;  %7384 = vmatpush.bf16.msra.mxu3 %v10869_v8  ;;  %v10805_v44 = vor.u32 %v12830_v57, %v10802_v45  ;;  %v13001_v8 = vld [vmem:[#allocation12 + $0x127c] sm:$0xf0]  ;;  %v10589_v57 = vor.u32 %v12776_v49, %v10586_v50  ;;  %v10514_v45 = vld [vmem:[#allocation12 + $0xb30] sm:$0xf0]  ;;  %v12704_v50 = vld [vmem:[#allocation12 + $0x93c] sm:$0xf] }
 0x433   :  { %7446 = vmatpush.bf16.msra.mxu0 %v11089_v61  ;;  %7423 = vmatpush.bf16.msrb.mxu1 %v9721_v18  ;;  %v9362_v61 = vld [vmem:[#allocation12 + $0x230] sm:$0xf0]  ;;  %v10440_v18 = vld [vmem:[#allocation12 + $0xa58] sm:$0xf]  ;;  %v7206_v47 = vpop.f32.mrf.mxu2  ;;  %v13989_v60 = vpop.f32.mrf.mxu1 }
 0x434   :  { %7385 = vmatmul.bf16.vlgmr.msra.gmra.mxu3 %v13788_v13  ;;  %v9365_v19 = vor.u32 %v12470_v26, %v9362_v61  ;;  %v12902_v47 = vld [vmem:[#allocation12 + $0xf6c] sm:$0xf] }
 0x435   :  { %7429 = vmatpush.bf16.msrb.mxu3 %v10801_v34  ;;  %7458 = vmatpush.bf16.msrb.mxu2 %v11737_v46  ;;  %v10513_v34 = vor.u32 %v12767_v4, %v10512_v3  ;;  %v11449_v46 = vor.u32 %v13001_v8, %v11448_v1  ;;  %v11162_v3 = vld [vmem:[#allocation12 + $0x1040] sm:$0xf0]  ;;  %v11954_v1 = vld [vmem:[#allocation12 + $0x1670] sm:$0xf0] }
 0x436   :  { %7424 = vmatmul.bf16.vlgmr.msrb.gmra.mxu1 %v13779_v12 }
 0x437   :  { %7468 = vmatpush.bf16.msra.mxu1 %v9653_v30  ;;  %7447 = vmatpush.bf16.msra.mxu0 %v11017_v25  ;;  %v11381_v30 = vor.u32 %v12974_v9, %v11378_v15  ;;  %v11306_v25 = vld [vmem:[#allocation12 + $0x1160] sm:$0xf0]  ;;  %v7178_v32 = vpop.f32.mrf.mxu3  ;;  %v12740_v15 = vld [vmem:[#allocation12 + $0xa5c] sm:$0xf] }
 0x438   :  { %v7179_v43 = vadd.f32 %v7178_v32, %v13974_v28  ;;  %v11309_v5 = vor.u32 %v12956_v22, %v11306_v25  ;;  %v12713_v28 = vld [vmem:[#allocation12 + $0x97c] sm:$0xf0]  ;;  %v12722_v25 = vld [vmem:[#allocation12 + $0x9cc] sm:$0xf]  ;;  %v10082_v32 = vld [vmem:[#allocation12 + $0x7d0] sm:$0xf0] }
 0x439   :  { %7430 = vmatpush.bf16.msrb.mxu3 %v10729_v41  ;;  %7459 = vmatpush.bf16.msrb.mxu2 %v11665_v24  ;;  %v12452_v41 = vld [vmem:[#allocation12 + $0x15c] sm:$0xf]  ;;  %v10441_v24 = vor.u32 %v12749_v0, %v10440_v18  ;;  %v10297_v6 = vor.u32 %v12713_v28, %v10296_v56  ;;  %v12866_v28 = vld [vmem:[#allocation12 + $0xe4c] sm:$0xf] }
 0x43a   :  { %v9293_v58 = vor.u32 %v12452_v41, %v9290_v27  ;;  %v10370_v27 = vld [vmem:[#allocation12 + $0xa10] sm:$0xf0] }
 0x43b   :  { %7469 = vmatpush.bf16.msra.mxu1 %v9581_v36  ;;  %7448 = vmatpush.bf16.msra.mxu0 %v10945_v51  ;;  %v12731_v36 = vld [vmem:[#allocation12 + $0xa0c] sm:$0xf0]  ;;  %v12938_v51 = vld [vmem:[#allocation12 + $0x108c] sm:$0xf]  ;;  %v7219_v21 = vpop.f32.mrf.mxu1 }
 0x43c   :  { %v10369_v55 = vor.u32 %v12731_v36, %v10368_v39  ;;  %v11018_v39 = vld [vmem:[#allocation12 + $0xf20] sm:$0xf0] }
 0x43d   :  { %7431 = vmatpush.bf16.msrb.mxu3 %v10657_v11  ;;  %7460 = vmatpush.bf16.msrb.mxu2 %v11593_v54  ;;  %v11234_v11 = vld [vmem:[#allocation12 + $0x10d0] sm:$0xf0]  ;;  %v7192_v54 = vadd.f32 %v13983_v35, %v7179_v43  ;;  %v12920_v35 = vld [vmem:[#allocation12 + $0xffc] sm:$0xf]  ;;  %v13082_v43 = vld [vmem:[#allocation12 + $0x150c] sm:$0xf] }
 0x43e   :  { %v11237_v62 = vor.u32 %v12938_v51, %v11234_v11  ;;  %v11165_v26 = vor.u32 %v12920_v35, %v11162_v3  ;;  %v10298_v51 = vld [vmem:[#allocation12 + $0x980] sm:$0xf0]  ;;  %v9938_v35 = vld [vmem:[#allocation12 + $0x6b0] sm:$0xf0]  ;;  %v10160_v3 = vld [vmem:[#allocation12 + $0x820] sm:$0xf] }
 0x43f   :  { %7470 = vmatpush.bf16.msra.mxu1 %v9509_v29  ;;  %7449 = vmatpush.bf16.msra.mxu0 %v10873_v10  ;;  %v12758_v29 = vld [vmem:[#allocation12 + $0xaec] sm:$0xf]  ;;  %v7205_v38 = vadd.f32 %v13987_v59, %v7192_v54  ;;  %v13996_v7 = vpop.f32.mrf.mxu0  ;;  %v7180_v59 = vpop.f32.mrf.mxu3  ;;  %v10232_v54 = vld [vmem:[#allocation12 + $0x8b0] sm:$0xf]  ;;  %v10301_v21 = vor.u32 %v12704_v50, %v10298_v51  ;;  %v12642_v50 = vld [vmem:[#allocation12 + $0x744] sm:$0xf0] }
 0x440   :  { %v12686_v10 = vld [vmem:[#allocation12 + $0x8ac] sm:$0xf]  ;;  %v10517_v8 = vor.u32 %v12758_v29, %v10514_v45  ;;  %v10946_v29 = vld [vmem:[#allocation12 + $0xe90] sm:$0xf0]  ;;  %v13064_v45 = vld [vmem:[#allocation12 + $0x147c] sm:$0xf] }
 0x441   :  { %7432 = vmatpush.bf16.msrb.mxu3 %v10585_v63  ;;  %7461 = vmatpush.bf16.msrb.mxu2 %v11521_v48  ;;  %v10226_v63 = vld [vmem:[#allocation12 + $0x8f0] sm:$0xf0]  ;;  %v9146_v48 = vld [vmem:[#allocation12 + $0x80] sm:$0xf0]  ;;  %v7673_v4 = vmax.f32 %v7205_v38, 0.0 }
 0x442   :  { %7450 = vmatmul.bf16.vlgmr.msra.gmra.mxu0 %v13788_v13  ;;  %v10229_v9 = vor.u32 %v12686_v10, %v10226_v63  ;;  %v11738_v38 = vld [vmem:[#allocation12 + $0x14c0] sm:$0xf0]  ;;  %v10949_v63 = vor.u32 %v12866_v28, %v10946_v29  ;;  %v13046_v59 = vld [vmem:[#allocation12 + $0x13ec] sm:$0xf]  ;;  %v10664_v51 = vld [vmem:[#allocation12 + $0xc10] sm:$0xf] }
 0x443   :  { %7494 = vmatpush.bf16.msrb.mxu0 %v10805_v44  ;;  %7471 = vmatpush.bf16.msra.mxu1 %v9437_v17  ;;  %v12416_v44 = vld [vmem:[#allocation12 + $0x3c] sm:$0xf]  ;;  %v13118_v17 = vld [vmem:[#allocation12 + $0x162c] sm:$0xf]  ;;  %v13999_v18 = vmax.f32 %v13967_v2, %v7673_v4  ;;  %v9722_v28 = vld [vmem:[#allocation12 + $0x500] sm:$0xf0] }
 0x444   :  { %v9149_v61 = vor.u32 %v12416_v44, %v9146_v48  ;;  %v11957_v0 = vor.u32 %v13118_v17, %v11954_v1  ;;  %v12678_v44 = vld [vmem:[#allocation12 + $0x864] sm:$0xf0]  ;;  %v11741_v48 = vor.u32 %v13064_v45, %v11738_v38  ;;  %v12848_v4 = vld [vmem:[#allocation12 + $0xdbc] sm:$0xf]  ;;  %v10808_v17 = vld [vmem:[#allocation12 + $0xd30] sm:$0xf] }
 0x445   :  { %7433 = vmatpush.bf16.msrb.mxu3 %v10513_v34  ;;  %7462 = vmatpush.bf16.msrb.mxu2 %v11449_v46  ;;  %v10442_v34 = vld [vmem:[#allocation12 + $0xaa0] sm:$0xf0]  ;;  %v12840_v1 = vld [vmem:[#allocation12 + $0xd74] sm:$0xf0]  ;;  %v9944_v29 = vld [vmem:[#allocation12 + $0x670] sm:$0xf] }
 0x446   :  { %v10154_v46 = vld [vmem:[#allocation12 + $0x860] sm:$0xf0]  ;;  %v10445_v23 = vor.u32 %v12740_v15, %v10442_v34  ;;  %v12624_v45 = vld [vmem:[#allocation12 + $0x6b4] sm:$0xf0] }
 0x447   :  { %7495 = vmatpush.bf16.msrb.mxu0 %v10733_v14  ;;  %7472 = vmatpush.bf16.msra.mxu1 %v9365_v19  ;;  %v12668_v14 = vld [vmem:[#allocation12 + $0x81c] sm:$0xf]  ;;  %v7245_v36 = vpop.f32.mrf.mxu0 }
 0x448   :  { %7463 = vmatmul.bf16.vlgmr.msrb.gmra.mxu2 %v13798_v37  ;;  %v13100_v19 = vld [vmem:[#allocation12 + $0x159c] sm:$0xf]  ;;  %v10157_v22 = vor.u32 %v12668_v14, %v10154_v46  ;;  %v9866_v46 = vld [vmem:[#allocation12 + $0x620] sm:$0xf0]  ;;  %v9794_v36 = vld [vmem:[#allocation12 + $0x590] sm:$0xf0] }
 0x449   :  { %7507 = vmatpush.bf16.msra.mxu2 %v11381_v30  ;;  %7434 = vmatpush.bf16.msrb.mxu3 %v10441_v24  ;;  %v11090_v30 = vld [vmem:[#allocation12 + $0xfb0] sm:$0xf0]  ;;  %v12650_v24 = vld [vmem:[#allocation12 + $0x78c] sm:$0xf]  ;;  %v11885_v2 = vor.u32 %v13100_v19, %v11882_v20  ;;  %v12596_v14 = vld [vmem:[#allocation12 + $0x5dc] sm:$0xf] }
 0x44a   :  { %v11093_v41 = vor.u32 %v12902_v47, %v11090_v30  ;;  %v10085_v49 = vor.u32 %v12650_v24, %v10082_v32  ;;  %v10809_v30 = vor.u32 %v12840_v1, %v10808_v17  ;;  %v10088_v20 = vld [vmem:[#allocation12 + $0x790] sm:$0xf]  ;;  %v9869_v32 = vor.u32 %v12596_v14, %v9866_v46  ;;  %v12984_v1 = vld [vmem:[#allocation12 + $0x11f4] sm:$0xf0]  ;;  %v9584_v46 = vld [vmem:[#allocation12 + $0x3a0] sm:$0xf] }
 0x44b   :  { %7496 = vmatpush.bf16.msrb.mxu0 %v10661_v31  ;;  %7473 = vmatpush.bf16.msra.mxu1 %v9293_v58  ;;  %v12884_v31 = vld [vmem:[#allocation12 + $0xedc] sm:$0xf]  ;;  %v10373_v58 = vor.u32 %v12722_v25, %v10370_v27  ;;  %v12822_v25 = vld [vmem:[#allocation12 + $0xce4] sm:$0xf0]  ;;  %v11594_v27 = vld [vmem:[#allocation12 + $0x13a0] sm:$0xf0] }
 0x44c   :  { %v11021_v11 = vor.u32 %v12884_v31, %v11018_v39  ;;  %v12578_v39 = vld [vmem:[#allocation12 + $0x54c] sm:$0xf]  ;;  %v11384_v17 = vld [vmem:[#allocation12 + $0x11b0] sm:$0xf] }
 0x44d   :  { %7508 = vmatpush.bf16.msra.mxu2 %v11309_v5  ;;  %7435 = vmatpush.bf16.msrb.mxu3 %v10369_v55  ;;  %v11810_v5 = vld [vmem:[#allocation12 + $0x1550] sm:$0xf0]  ;;  %v14003_v55 = vpop.f32.mrf.mxu2 }
 0x44e   :  { %v11813_v56 = vor.u32 %v13082_v43, %v11810_v5 }
 0x44f   :  { %7497 = vmatpush.bf16.msrb.mxu0 %v10589_v57  ;;  %7474 = vmatpush.bf16.msra.mxu1 %v9221_v40  ;;  %v12696_v57 = vld [vmem:[#allocation12 + $0x8f4] sm:$0xf0]  ;;  %v12614_v40 = vld [vmem:[#allocation12 + $0x66c] sm:$0xf] }
 0x450   :  { %v10233_v10 = vor.u32 %v12696_v57, %v10232_v54  ;;  %v9797_v54 = vor.u32 %v12578_v39, %v9794_v36  ;;  %v10448_v36 = vld [vmem:[#allocation12 + $0xa60] sm:$0xf] }
 0x451   :  { %7509 = vmatpush.bf16.msra.mxu2 %v11237_v62  ;;  %7436 = vmatpush.bf16.msrb.mxu3 %v10297_v6  ;;  %v10013_v62 = vor.u32 %v12632_v52, %v10010_v53  ;;  %v10874_v6 = vld [vmem:[#allocation12 + $0xe00] sm:$0xf0]  ;;  %v13010_v52 = vld [vmem:[#allocation12 + $0x12cc] sm:$0xf]  ;;  %v11522_v53 = vld [vmem:[#allocation12 + $0x1310] sm:$0xf0] }
 0x452   :  { %v10877_v34 = vor.u32 %v12848_v4, %v10874_v6 }
 0x453   :  { %7498 = vmatpush.bf16.msrb.mxu0 %v10517_v8  ;;  %7475 = vmatpush.bf16.msra.mxu1 %v9149_v61  ;;  %v11666_v8 = vld [vmem:[#allocation12 + $0x1430] sm:$0xf0]  ;;  %v10161_v61 = vor.u32 %v12678_v44, %v10160_v3  ;;  %v7269_v47 = vpop.f32.mrf.mxu1  ;;  %v12992_v3 = vld [vmem:[#allocation12 + $0x123c] sm:$0xf]  ;;  %v11450_v44 = vld [vmem:[#allocation12 + $0x1280] sm:$0xf0] }
 0x454   :  { %7437 = vmatmul.bf16.vlgmr.msrb.gmra.mxu3 %v13782_v33  ;;  %v11669_v19 = vor.u32 %v13046_v59, %v11666_v8  ;;  %v9945_v59 = vor.u32 %v12624_v45, %v9944_v29  ;;  %v11453_v14 = vor.u32 %v12992_v3, %v11450_v44  ;;  %v10376_v29 = vld [vmem:[#allocation12 + $0x9d0] sm:$0xf]  ;;  %v12732_v45 = vld [vmem:[#allocation12 + $0xa14] sm:$0xf0]  ;;  %v12525_v3 = vld [vmem:[#allocation12 + $0x3a4] sm:$0xf] }
 0x455   :  { %7481 = vmatpush.bf16.msra.mxu3 %v10229_v9  ;;  %7510 = vmatpush.bf16.msra.mxu2 %v11165_v26  ;;  %v14005_v9 = vld [vmem:[#allocation13 + $0x8] sm:$0xff]  ;;  %v9941_v26 = vor.u32 %v12614_v40, %v9938_v35  ;;  %v11525_v40 = vor.u32 %v13010_v52, %v11522_v53  ;;  %v9440_v53 = vld [vmem:[#allocation12 + $0x280] sm:$0xf] }
 0x456   :  { %7476 = vmatmul.bf16.vlgmr.msra.gmra.mxu1 %v13771_v42  ;;  %v2868_v15 = vperm.slane %v14005_v9, 3  ;;  %v12786_v35 = vld [vmem:[#allocation12 + $0xbc4] sm:$0xf0]  ;;  %v9586_v44 = vld [vmem:[#allocation12 + $0x3e8] sm:$0xf0] }
 0x457   :  { %7520 = vmatpush.bf16.msrb.mxu1 %v11957_v0  ;;  %7499 = vmatpush.bf16.msrb.mxu0 %v10445_v23  ;;  %v7258_v0 = vpop.f32.mrf.mxu2  ;;  %v12660_v23 = vld [vmem:[#allocation12 + $0x7d4] sm:$0xf0] }
 0x458   :  { %v7218_v24 = vadd.f32 %v13989_v60, %v2868_v15  ;;  %v10089_v31 = vor.u32 %v12660_v23, %v10088_v20  ;;  %v9872_v15 = vld [vmem:[#allocation12 + $0x5e0] sm:$0xf]  ;;  %v12534_v0 = vld [vmem:[#allocation12 + $0x3e4] sm:$0xf0] }
 0x459   :  { %7482 = vmatpush.bf16.msra.mxu3 %v10157_v22  ;;  %7511 = vmatpush.bf16.msra.mxu2 %v11093_v41  ;;  %v10736_v22 = vld [vmem:[#allocation12 + $0xca0] sm:$0xf]  ;;  %v13028_v41 = vld [vmem:[#allocation12 + $0x135c] sm:$0xf]  ;;  %v12966_v23 = vld [vmem:[#allocation12 + $0x1164] sm:$0xf0] }
 0x45a   :  { %v10737_v5 = vor.u32 %v12822_v25, %v10736_v22  ;;  %v11312_v20 = vld [vmem:[#allocation12 + $0x1120] sm:$0xf] }
 0x45b   :  { %7521 = vmatpush.bf16.msrb.mxu1 %v11885_v2  ;;  %7500 = vmatpush.bf16.msrb.mxu0 %v10373_v58  ;;  %v7230_v2 = vpop.f32.mrf.mxu3  ;;  %v11597_v58 = vor.u32 %v13028_v41, %v11594_v27  ;;  %v9585_v41 = vor.u32 %v12534_v0, %v9584_v46  ;;  %v9800_v27 = vld [vmem:[#allocation12 + $0x550] sm:$0xf]  ;;  %v11313_v39 = vor.u32 %v12966_v23, %v11312_v20  ;;  %v12462_v46 = vld [vmem:[#allocation12 + $0x1a4] sm:$0xf0]  ;;  %v12507_v20 = vld [vmem:[#allocation12 + $0x314] sm:$0xf] }
 0x45c   :  { %v7231_v43 = vadd.f32 %v7230_v2, %v7218_v24  ;;  %v9512_v2 = vld [vmem:[#allocation12 + $0x310] sm:$0xf]  ;;  %v9514_v23 = vld [vmem:[#allocation12 + $0x358] sm:$0xf0] }
 0x45d   :  { %7483 = vmatpush.bf16.msra.mxu3 %v10085_v49  ;;  %7512 = vmatpush.bf16.msra.mxu2 %v11021_v11  ;;  %v10016_v49 = vld [vmem:[#allocation12 + $0x700] sm:$0xf]  ;;  %v12804_v11 = vld [vmem:[#allocation12 + $0xc54] sm:$0xf0] }
 0x45e   :  { %v7244_v60 = vadd.f32 %v13996_v7, %v7231_v43  ;;  %v10017_v57 = vor.u32 %v12642_v50, %v10016_v49  ;;  %v10592_v7 = vld [vmem:[#allocation12 + $0xb80] sm:$0xf]  ;;  %v12750_v43 = vld [vmem:[#allocation12 + $0xaa4] sm:$0xf0] }
 0x45f   :  { %7522 = vmatpush.bf16.msrb.mxu1 %v11813_v56  ;;  %7501 = vmatpush.bf16.msrb.mxu0 %v10301_v21  ;;  %v12560_v56 = vld [vmem:[#allocation12 + $0x4bc] sm:$0xf]  ;;  %v7271_v21 = vpop.f32.mrf.mxu1  ;;  %v14013_v4 = vpop.f32.mrf.mxu0  ;;  %v10449_v52 = vor.u32 %v12750_v43, %v10448_v36  ;;  %v12444_v36 = vld [vmem:[#allocation12 + $0x114] sm:$0xf0] }
 0x460   :  { %v7257_v38 = vadd.f32 %v14003_v55, %v7244_v60  ;;  %v9725_v6 = vor.u32 %v12560_v56, %v9722_v28  ;;  %v12498_v60 = vld [vmem:[#allocation12 + $0x2c4] sm:$0xf0]  ;;  %v9658_v28 = vld [vmem:[#allocation12 + $0x478] sm:$0xf0] }
 0x461   :  { %7484 = vmatpush.bf16.msra.mxu3 %v10013_v62  ;;  %7513 = vmatpush.bf16.msra.mxu2 %v10949_v63  ;;  %v10665_v62 = vor.u32 %v12804_v11, %v10664_v51  ;;  %v12552_v63 = vld [vmem:[#allocation12 + $0x474] sm:$0xf0]  ;;  %v9728_v51 = vld [vmem:[#allocation12 + $0x4c0] sm:$0xf]  ;;  %v12570_v11 = vld [vmem:[#allocation12 + $0x504] sm:$0xf0] }
 0x462   :  { %7502 = vmatmul.bf16.vlgmr.msrb.gmra.mxu0 %v13782_v33  ;;  %v12930_v21 = vld [vmem:[#allocation12 + $0x1044] sm:$0xf0] }
 0x463   :  { %7546 = vmatpush.bf16.msra.mxu0 %v10233_v10  ;;  %7523 = vmatpush.bf16.msrb.mxu1 %v11741_v48  ;;  %v9656_v10 = vld [vmem:[#allocation12 + $0x430] sm:$0xf]  ;;  %v7270_v48 = vadd.f32 %v7269_v47, %v7257_v38  ;;  %v7232_v55 = vpop.f32.mrf.mxu3  ;;  %v11385_v47 = vor.u32 %v12984_v1, %v11384_v17  ;;  %v11168_v38 = vld [vmem:[#allocation12 + $0x1000] sm:$0xf]  ;;  %v12714_v17 = vld [vmem:[#allocation12 + $0x984] sm:$0xf0] }
 0x464   :  { %v9657_v8 = vor.u32 %v12552_v63, %v9656_v10  ;;  %v9368_v10 = vld [vmem:[#allocation12 + $0x1f0] sm:$0xf]  ;;  %v12687_v1 = vld [vmem:[#allocation12 + $0x8b4] sm:$0xf]  ;;  %v10234_v55 = vld [vmem:[#allocation12 + $0x8f8] sm:$0xf0] }
 0x465   :  { %7485 = vmatpush.bf16.msra.mxu3 %v9941_v26  ;;  %7514 = vmatpush.bf16.msra.mxu2 %v10877_v34  ;;  %v12606_v26 = vld [vmem:[#allocation12 + $0x624] sm:$0xf0]  ;;  %v10593_v34 = vor.u32 %v12786_v35, %v10592_v7  ;;  %v10377_v7 = vor.u32 %v12732_v45, %v10376_v29  ;;  %v12480_v35 = vld [vmem:[#allocation12 + $0x234] sm:$0xf0]  ;;  %v12471_v29 = vld [vmem:[#allocation12 + $0x1f4] sm:$0xf] }
 0x466   :  { %v9873_v25 = vor.u32 %v12606_v26, %v9872_v15  ;;  %v9369_v15 = vor.u32 %v12480_v35, %v9368_v10  ;;  %v9589_v26 = vor.u32 %v12525_v3, %v9586_v44  ;;  %v9370_v45 = vld [vmem:[#allocation12 + $0x238] sm:$0xf0]  ;;  %v13128_v10 = vld [vmem:[#allocation12 + $0x1674] sm:$0xf0]  ;;  %v10880_v35 = vld [vmem:[#allocation12 + $0xdc0] sm:$0xf] }
 0x467   :  { %7547 = vmatpush.bf16.msra.mxu0 %v10161_v61  ;;  %7524 = vmatpush.bf16.msrb.mxu1 %v11669_v19  ;;  %v7674_v61 = vmax.f32 %v7270_v48, 0.0  ;;  %v12768_v19 = vld [vmem:[#allocation12 + $0xb34] sm:$0xf0]  ;;  %v11169_v48 = vor.u32 %v12930_v21, %v11168_v38  ;;  %v12858_v3 = vld [vmem:[#allocation12 + $0xe04] sm:$0xf0] }
 0x468   :  { %7515 = vmatmul.bf16.vlgmr.msra.gmra.mxu2 %v13788_v13 }
 0x469   :  { %7559 = vmatpush.bf16.msrb.mxu2 %v10809_v30  ;;  %7486 = vmatpush.bf16.msra.mxu3 %v9869_v32  ;;  %v10520_v30 = vld [vmem:[#allocation12 + $0xaf0] sm:$0xf]  ;;  %v14016_v22 = vmax.f32 %v13981_v16, %v7674_v61  ;;  %v12588_v32 = vld [vmem:[#allocation12 + $0x594] sm:$0xf0]  ;;  %v2869_v61 = vperm.slane %v14005_v9, 4 }
 0x46a   :  { %v10521_v24 = vor.u32 %v12768_v19, %v10520_v30  ;;  %v11240_v16 = vld [vmem:[#allocation12 + $0x1090] sm:$0xf]  ;;  %v9801_v49 = vor.u32 %v12588_v32, %v9800_v27  ;;  %v10237_v30 = vor.u32 %v12687_v1, %v10234_v55  ;;  %v11024_v27 = vld [vmem:[#allocation12 + $0xee0] sm:$0xf] }
 0x46b   :  { %7548 = vmatpush.bf16.msra.mxu0 %v10089_v31  ;;  %7525 = vmatpush.bf16.msrb.mxu1 %v11597_v58  ;;  %v12516_v31 = vld [vmem:[#allocation12 + $0x354] sm:$0xf0]  ;;  %v14020_v56 = vpop.f32.mrf.mxu2 }
 0x46c   :  { %v12948_v58 = vld [vmem:[#allocation12 + $0x10d4] sm:$0xf0]  ;;  %v9513_v50 = vor.u32 %v12516_v31, %v9512_v2  ;;  %v9517_v31 = vor.u32 %v12507_v20, %v9514_v23  ;;  %v10738_v20 = vld [vmem:[#allocation12 + $0xce8] sm:$0xf0] }
 0x46d   :  { %7560 = vmatpush.bf16.msrb.mxu2 %v10737_v5  ;;  %7487 = vmatpush.bf16.msra.mxu3 %v9797_v54  ;;  %v7297_v5 = vpop.f32.mrf.mxu0  ;;  %v12543_v54 = vld [vmem:[#allocation12 + $0x434] sm:$0xf] }
 0x46e   :  { %v9661_v63 = vor.u32 %v12543_v54, %v9658_v28  ;;  %v9152_v54 = vld [vmem:[#allocation12 + $0x40] sm:$0xf]  ;;  %v12426_v28 = vld [vmem:[#allocation12 + $0x84] sm:$0xf0] }
 0x46f   :  { %7549 = vmatpush.bf16.msra.mxu0 %v10017_v57  ;;  %7526 = vmatpush.bf16.msrb.mxu1 %v11525_v40  ;;  %v11241_v57 = vor.u32 %v12948_v58, %v11240_v16  ;;  %v9441_v40 = vor.u32 %v12498_v60, %v9440_v53  ;;  %v12489_v58 = vld [vmem:[#allocation12 + $0x284] sm:$0xf] }
 0x471   :  { %7561 = vmatpush.bf16.msrb.mxu2 %v10665_v62  ;;  %7488 = vmatpush.bf16.msra.mxu3 %v9725_v6  ;;  %v9729_v62 = vor.u32 %v12570_v11, %v9728_v51  ;;  %v10304_v6 = vld [vmem:[#allocation12 + $0x940] sm:$0xf]  ;;  %v10090_v51 = vld [vmem:[#allocation12 + $0x7d8] sm:$0xf0]  ;;  %v10952_v11 = vld [vmem:[#allocation12 + $0xe50] sm:$0xf] }
 0x473   :  { %7550 = vmatpush.bf16.msra.mxu0 %v9945_v59  ;;  %7527 = vmatpush.bf16.msrb.mxu1 %v11453_v14  ;;  %v11096_v59 = vld [vmem:[#allocation12 + $0xf70] sm:$0xf]  ;;  %v9296_v14 = vld [vmem:[#allocation12 + $0x160] sm:$0xf]  ;;  %v7310_v0 = vpop.f32.mrf.mxu2 }
 0x474   :  { %7489 = vmatmul.bf16.vlgmr.msra.gmra.mxu3 %v13779_v12  ;;  %v9297_v32 = vor.u32 %v12462_v46, %v9296_v14  ;;  %v13110_v14 = vld [vmem:[#allocation12 + $0x15e4] sm:$0xf0]  ;;  %v12615_v0 = vld [vmem:[#allocation12 + $0x674] sm:$0xf] }
 0x475   :  { %7533 = vmatpush.bf16.msrb.mxu3 %v9657_v8  ;;  %7562 = vmatpush.bf16.msrb.mxu2 %v10593_v34  ;;  %v12912_v8 = vld [vmem:[#allocation12 + $0xfb4] sm:$0xf0]  ;;  %v10305_v34 = vor.u32 %v12714_v17, %v10304_v6  ;;  %v12831_v6 = vld [vmem:[#allocation12 + $0xd34] sm:$0xf]  ;;  %v10810_v17 = vld [vmem:[#allocation12 + $0xd78] sm:$0xf0] }
 0x476   :  { %7528 = vmatmul.bf16.vlgmr.msrb.gmra.mxu1 %v13798_v37  ;;  %v11097_v19 = vor.u32 %v12912_v8, %v11096_v59  ;;  %v9373_v59 = vor.u32 %v12471_v29, %v9370_v45  ;;  %v10813_v46 = vor.u32 %v12831_v6, %v10810_v17  ;;  %v11962_v29 = vld [vmem:[#allocation12 + $0x1678] sm:$0xf0]  ;;  %v12579_v45 = vld [vmem:[#allocation12 + $0x554] sm:$0xf]  ;;  %v11890_v6 = vld [vmem:[#allocation12 + $0x15e8] sm:$0xf0] }
 0x477   :  { %7572 = vmatpush.bf16.msra.mxu1 %v11385_v47  ;;  %7551 = vmatpush.bf16.msra.mxu0 %v9873_v25  ;;  %v7321_v47 = vpop.f32.mrf.mxu1  ;;  %v12669_v25 = vld [vmem:[#allocation12 + $0x824] sm:$0xf]  ;;  %v7282_v2 = vpop.f32.mrf.mxu3 }
 0x478   :  { %v7283_v43 = vadd.f32 %v7282_v2, %v2869_v61  ;;  %v10881_v61 = vor.u32 %v12858_v3, %v10880_v35  ;;  %v13092_v2 = vld [vmem:[#allocation12 + $0x1554] sm:$0xf0]  ;;  %v11672_v35 = vld [vmem:[#allocation12 + $0x13f0] sm:$0xf]  ;;  %v12561_v17 = vld [vmem:[#allocation12 + $0x4c4] sm:$0xf] }
 0x479   :  { %7534 = vmatpush.bf16.msrb.mxu3 %v9585_v41  ;;  %7563 = vmatpush.bf16.msrb.mxu2 %v10521_v24  ;;  %v10162_v41 = vld [vmem:[#allocation12 + $0x868] sm:$0xf0]  ;;  %v12894_v24 = vld [vmem:[#allocation12 + $0xf24] sm:$0xf0]  ;;  %v13056_v3 = vld [vmem:[#allocation12 + $0x1434] sm:$0xf0] }
 0x47a   :  { %v10165_v5 = vor.u32 %v12669_v25, %v10162_v41  ;;  %v11025_v16 = vor.u32 %v12894_v24, %v11024_v27  ;;  %v7296_v53 = vadd.f32 %v14013_v4, %v7283_v43  ;;  %v12435_v41 = vld [vmem:[#allocation12 + $0xd4] sm:$0xf]  ;;  %v9226_v24 = vld [vmem:[#allocation12 + $0x118] sm:$0xf0] }
 0x47b   :  { %7573 = vmatpush.bf16.msra.mxu1 %v11313_v39  ;;  %7552 = vmatpush.bf16.msra.mxu0 %v9801_v49  ;;  %v9224_v39 = vld [vmem:[#allocation12 + $0xd0] sm:$0xf]  ;;  %v9442_v49 = vld [vmem:[#allocation12 + $0x2c8] sm:$0xf0] }
 0x47c   :  { %v9225_v60 = vor.u32 %v12444_v36, %v9224_v39  ;;  %v7309_v4 = vadd.f32 %v14020_v56, %v7296_v53  ;;  %v9298_v56 = vld [vmem:[#allocation12 + $0x1a8] sm:$0xf0]  ;;  %v12597_v39 = vld [vmem:[#allocation12 + $0x5e4] sm:$0xf]  ;;  %v11744_v53 = vld [vmem:[#allocation12 + $0x1480] sm:$0xf] }
 0x47d   :  { %7535 = vmatpush.bf16.msrb.mxu3 %v9513_v50  ;;  %7564 = vmatpush.bf16.msrb.mxu2 %v10449_v52  ;;  %v12651_v50 = vld [vmem:[#allocation12 + $0x794] sm:$0xf]  ;;  %v12876_v52 = vld [vmem:[#allocation12 + $0xe94] sm:$0xf0]  ;;  %v9874_v36 = vld [vmem:[#allocation12 + $0x628] sm:$0xf0] }
 0x47e   :  { %v10093_v21 = vor.u32 %v12651_v50, %v10090_v51  ;;  %v14027_v1 = vadd.f32 %v7321_v47, %v7309_v4  ;;  %v2870_v47 = vperm.slane %v14005_v9, 5  ;;  %v12417_v50 = vld [vmem:[#allocation12 + $0x44] sm:$0xf]  ;;  %v9154_v51 = vld [vmem:[#allocation12 + $0x88] sm:$0xf0] }
 0x47f   :  { %7574 = vmatpush.bf16.msra.mxu1 %v11241_v57  ;;  %7553 = vmatpush.bf16.msra.mxu0 %v9729_v62  ;;  %v9445_v57 = vor.u32 %v12489_v58, %v9442_v49  ;;  %v7323_v38 = vpop.f32.mrf.mxu1  ;;  %v10953_v62 = vor.u32 %v12876_v52, %v10952_v11  ;;  %v7347_v44 = vpop.f32.mrf.mxu0  ;;  %v9229_v58 = vor.u32 %v12435_v41, %v9226_v24  ;;  %v11528_v24 = vld [vmem:[#allocation12 + $0x12d0] sm:$0xf] }
 0x480   :  { %v7284_v55 = vpop.f32.mrf.mxu3  ;;  %v7348_v11 = vadd.f32 %v7347_v44, %v2870_v47  ;;  %v9877_v52 = vor.u32 %v12597_v39, %v9874_v36  ;;  %v9802_v38 = vld [vmem:[#allocation12 + $0x598] sm:$0xf0]  ;;  %v13101_v44 = vld [vmem:[#allocation12 + $0x15a4] sm:$0xf]  ;;  %v11746_v36 = vld [vmem:[#allocation12 + $0x14c8] sm:$0xf0] }
 0x481   :  { %7536 = vmatpush.bf16.msrb.mxu3 %v9441_v40  ;;  %7565 = vmatpush.bf16.msrb.mxu2 %v10377_v7  ;;  %v11960_v40 = vld [vmem:[#allocation12 + $0x1630] sm:$0xf]  ;;  %v10018_v7 = vld [vmem:[#allocation12 + $0x748] sm:$0xf0]  ;;  %v12741_v47 = vld [vmem:[#allocation12 + $0xa64] sm:$0xf] }
 0x482   :  { %7554 = vmatmul.bf16.vlgmr.msra.gmra.mxu0 %v13779_v12  ;;  %v11961_v8 = vor.u32 %v13128_v10, %v11960_v40  ;;  %v10594_v40 = vld [vmem:[#allocation12 + $0xbc8] sm:$0xf0]  ;;  %v9157_v10 = vor.u32 %v12417_v50, %v9154_v51  ;;  %v13065_v39 = vld [vmem:[#allocation12 + $0x1484] sm:$0xf]  ;;  %v13002_v50 = vld [vmem:[#allocation12 + $0x1284] sm:$0xf0] }
 0x483   :  { %7598 = vmatpush.bf16.msrb.mxu0 %v9661_v63  ;;  %7575 = vmatpush.bf16.msra.mxu1 %v11169_v48  ;;  %v12633_v63 = vld [vmem:[#allocation12 + $0x704] sm:$0xf]  ;;  %v9153_v48 = vor.u32 %v12426_v28, %v9152_v54  ;;  %v13119_v54 = vld [vmem:[#allocation12 + $0x1634] sm:$0xf]  ;;  %v9730_v55 = vld [vmem:[#allocation12 + $0x508] sm:$0xf0] }
 0x484   :  { %v11965_v4 = vor.u32 %v13119_v54, %v11962_v29  ;;  %v13047_v51 = vld [vmem:[#allocation12 + $0x13f4] sm:$0xf]  ;;  %v11386_v54 = vld [vmem:[#allocation12 + $0x11f8] sm:$0xf0] }
 0x485   :  { %7537 = vmatpush.bf16.msrb.mxu3 %v9369_v15  ;;  %7566 = vmatpush.bf16.msrb.mxu2 %v10305_v34  ;;  %v12453_v15 = vld [vmem:[#allocation12 + $0x164] sm:$0xf]  ;;  %v11888_v34 = vld [vmem:[#allocation12 + $0x15a0] sm:$0xf] }
 0x486   :  { %v9301_v23 = vor.u32 %v12453_v15, %v9298_v56  ;;  %v11889_v25 = vor.u32 %v13110_v14, %v11888_v34  ;;  %v11673_v15 = vor.u32 %v13056_v3, %v11672_v35  ;;  %v11600_v56 = vld [vmem:[#allocation12 + $0x1360] sm:$0xf]  ;;  %v13038_v34 = vld [vmem:[#allocation12 + $0x13a4] sm:$0xf0]  ;;  %v13011_v35 = vld [vmem:[#allocation12 + $0x12d4] sm:$0xf] }
 0x487   :  { %7599 = vmatpush.bf16.msrb.mxu0 %v9589_v26  ;;  %7576 = vmatpush.bf16.msra.mxu1 %v11097_v19  ;;  %v10021_v26 = vor.u32 %v12633_v63, %v10018_v7  ;;  %v12813_v19 = vld [vmem:[#allocation12 + $0xca4] sm:$0xf]  ;;  %v7349_v43 = vpop.f32.mrf.mxu0  ;;  %v9805_v7 = vor.u32 %v12579_v45, %v9802_v38  ;;  %v11530_v3 = vld [vmem:[#allocation12 + $0x1318] sm:$0xf0] }
 0x488   :  { %7567 = vmatmul.bf16.vlgmr.msrb.gmra.mxu2 %v13782_v33  ;;  %v12723_v43 = vld [vmem:[#allocation12 + $0x9d4] sm:$0xf] }
 0x489   :  { %7611 = vmatpush.bf16.msra.mxu2 %v10237_v30  ;;  %7538 = vmatpush.bf16.msrb.mxu3 %v9297_v32  ;;  %v9946_v30 = vld [vmem:[#allocation12 + $0x6b8] sm:$0xf0]  ;;  %v11816_v32 = vld [vmem:[#allocation12 + $0x1510] sm:$0xf] }
 0x48a   :  { %v9949_v27 = vor.u32 %v12615_v0, %v9946_v30  ;;  %v11817_v49 = vor.u32 %v13092_v2, %v11816_v32  ;;  %v13083_v30 = vld [vmem:[#allocation12 + $0x1514] sm:$0xf]  ;;  %v13020_v32 = vld [vmem:[#allocation12 + $0x1314] sm:$0xf0] }
 0x48b   :  { %7600 = vmatpush.bf16.msrb.mxu0 %v9517_v31  ;;  %7577 = vmatpush.bf16.msra.mxu1 %v11025_v16  ;;  %v10741_v31 = vor.u32 %v12813_v19, %v10738_v20  ;;  %v10666_v16 = vld [vmem:[#allocation12 + $0xc58] sm:$0xf0] }
 0x48c   :  { %v11818_v19 = vld [vmem:[#allocation12 + $0x1558] sm:$0xf0] }
 0x48d   :  { %7612 = vmatpush.bf16.msra.mxu2 %v10165_v5  ;;  %7539 = vmatpush.bf16.msrb.mxu3 %v9225_v60  ;;  %v12795_v5 = vld [vmem:[#allocation12 + $0xc14] sm:$0xf]  ;;  %v13074_v60 = vld [vmem:[#allocation12 + $0x14c4] sm:$0xf0] }
 0x48e   :  { %v10669_v28 = vor.u32 %v12795_v5, %v10666_v16  ;;  %v11745_v63 = vor.u32 %v13074_v60, %v11744_v53  ;;  %v10378_v5 = vld [vmem:[#allocation12 + $0xa18] sm:$0xf0]  ;;  %v12975_v60 = vld [vmem:[#allocation12 + $0x11b4] sm:$0xf] }
 0x48f   :  { %7601 = vmatpush.bf16.msrb.mxu0 %v9445_v57  ;;  %7578 = vmatpush.bf16.msra.mxu1 %v10953_v62  ;;  %v7360_v57 = vpop.f32.mrf.mxu2  ;;  %v12777_v62 = vld [vmem:[#allocation12 + $0xb84] sm:$0xf]  ;;  %v11674_v53 = vld [vmem:[#allocation12 + $0x1438] sm:$0xf0] }
 0x490   :  { %v11677_v38 = vor.u32 %v13047_v51, %v11674_v53 }
 0x491   :  { %7613 = vmatpush.bf16.msra.mxu2 %v10093_v21  ;;  %7540 = vmatpush.bf16.msrb.mxu3 %v9153_v48  ;;  %v7361_v21 = vadd.f32 %v7360_v57, %v7348_v11  ;;  %v10597_v48 = vor.u32 %v12777_v62, %v10594_v40  ;;  %v12705_v57 = vld [vmem:[#allocation12 + $0x944] sm:$0xf] }
 0x492   :  { %v13029_v62 = vld [vmem:[#allocation12 + $0x1364] sm:$0xf] }
 0x493   :  { %7602 = vmatpush.bf16.msrb.mxu0 %v9373_v59  ;;  %7579 = vmatpush.bf16.msra.mxu1 %v10881_v61  ;;  %v12759_v59 = vld [vmem:[#allocation12 + $0xaf4] sm:$0xf]  ;;  %v9733_v61 = vor.u32 %v12561_v17, %v9730_v55  ;;  %v11533_v17 = vor.u32 %v13011_v35, %v11530_v3 }
 0x494   :  { %7541 = vmatmul.bf16.vlgmr.msrb.gmra.mxu3 %v13771_v42 }
 0x495   :  { %7585 = vmatpush.bf16.msra.mxu3 %v11961_v8  ;;  %7614 = vmatpush.bf16.msra.mxu2 %v10021_v26  ;;  %v10522_v8 = vld [vmem:[#allocation12 + $0xb38] sm:$0xf0]  ;;  %v11893_v26 = vor.u32 %v13101_v44, %v11890_v6  ;;  %v12939_v44 = vld [vmem:[#allocation12 + $0x1094] sm:$0xf] }
 0x496   :  { %7580 = vmatmul.bf16.vlgmr.msra.gmra.mxu1 %v13788_v13  ;;  %v10525_v0 = vor.u32 %v12759_v59, %v10522_v8  ;;  %v12993_v59 = vld [vmem:[#allocation12 + $0x1244] sm:$0xf]  ;;  %v11458_v8 = vld [vmem:[#allocation12 + $0x1288] sm:$0xf0] }
 0x497   :  { %7624 = vmatpush.bf16.msrb.mxu1 %v10813_v46  ;;  %7603 = vmatpush.bf16.msrb.mxu0 %v9301_v23  ;;  %v7362_v14 = vpop.f32.mrf.mxu2  ;;  %v7373_v46 = vpop.f32.mrf.mxu1  ;;  %v10450_v23 = vld [vmem:[#allocation12 + $0xaa8] sm:$0xf0] }
 0x498   :  { %v14032_v20 = vadd.f32 %v7373_v46, %v7361_v21  ;;  %v7334_v41 = vpop.f32.mrf.mxu3  ;;  %v11389_v21 = vor.u32 %v12975_v60, %v11386_v54  ;;  %v2871_v14 = vperm.slane %v14005_v9, 6  ;;  %v12903_v46 = vld [vmem:[#allocation12 + $0xf74] sm:$0xf] }
 0x499   :  { %7586 = vmatpush.bf16.msra.mxu3 %v11889_v25  ;;  %7615 = vmatpush.bf16.msra.mxu2 %v9949_v27  ;;  %v11601_v25 = vor.u32 %v13038_v34, %v11600_v56  ;;  %v11821_v27 = vor.u32 %v13083_v30, %v11818_v19  ;;  %v7335_v2 = vadd.f32 %v7334_v41, %v14027_v1 }
 0x49a   :  { %v11461_v56 = vor.u32 %v12993_v59, %v11458_v8  ;;  %v13142_v59 = vld [vmem:[#allocation15 + $0x64] sm:$0xf0]  ;;  %v13141_v8 = vld [vmem:[#allocation15 + $0x64] sm:$0xf] }
 0x49b   :  { %7625 = vmatpush.bf16.msrb.mxu1 %v10741_v31  ;;  %7604 = vmatpush.bf16.msrb.mxu0 %v9229_v58  ;;  %v10453_v31 = vor.u32 %v12741_v47, %v10450_v23  ;;  %v7675_v16 = vmax.f32 %v7335_v2, 0.0  ;;  %v11749_v58 = vor.u32 %v13065_v39, %v11746_v36  ;;  %v12885_v47 = vld [vmem:[#allocation12 + $0xee4] sm:$0xf]  ;;  %v11026_v23 = vld [vmem:[#allocation12 + $0xf28] sm:$0xf0] }
 0x49c   :  { %v10954_v2 = vld [vmem:[#allocation12 + $0xe98] sm:$0xf0] }
 0x49d   :  { %7587 = vmatpush.bf16.msra.mxu3 %v11817_v49  ;;  %7616 = vmatpush.bf16.msra.mxu2 %v9877_v52  ;;  %v11456_v49 = vld [vmem:[#allocation12 + $0x1240] sm:$0xf]  ;;  %v14038_v11 = vmax.f32 %v13999_v18, %v7675_v16  ;;  %v10381_v52 = vor.u32 %v12723_v43, %v10378_v5  ;;  %v11602_v18 = vld [vmem:[#allocation12 + $0x13a8] sm:$0xf0]  ;;  %v12849_v43 = vld [vmem:[#allocation12 + $0xdc4] sm:$0xf] }
 0x49e   :  { %v10882_v5 = vld [vmem:[#allocation12 + $0xe08] sm:$0xf0] }
 0x49f   :  { %7626 = vmatpush.bf16.msrb.mxu1 %v10669_v28  ;;  %7605 = vmatpush.bf16.msrb.mxu0 %v9157_v10  ;;  %v7375_v1 = vpop.f32.mrf.mxu1  ;;  %v10306_v28 = vld [vmem:[#allocation12 + $0x988] sm:$0xf0]  ;;  %v7399_v29 = vpop.f32.mrf.mxu0  ;;  %v12957_v10 = vld [vmem:[#allocation12 + $0x1124] sm:$0xf] }
 0x4a0   :  { %v7336_v45 = vpop.f32.mrf.mxu3  ;;  %v10309_v40 = vor.u32 %v12705_v57, %v10306_v28 }
 0x4a1   :  { %7588 = vmatpush.bf16.msra.mxu3 %v11745_v63  ;;  %7617 = vmatpush.bf16.msra.mxu2 %v9805_v7  ;;  %v11314_v63 = vld [vmem:[#allocation12 + $0x1168] sm:$0xf0] }
 0x4a2   :  { %7606 = vmatmul.bf16.vlgmr.msrb.gmra.mxu0 %v13771_v42  ;;  %v11529_v42 = vor.u32 %v13020_v32, %v11528_v24  ;;  %v11317_v7 = vor.u32 %v12957_v10, %v11314_v63  ;;  %v12867_v32 = vld [vmem:[#allocation12 + $0xe54] sm:$0xf] }
 0x4a3   :  { %7650 = vmatpush.bf16.msra.mxu0 %v11965_v4  ;;  %7627 = vmatpush.bf16.msrb.mxu1 %v10597_v48  ;;  %v11605_v4 = vor.u32 %v13029_v62, %v11602_v18  ;;  %v11242_v48 = vld [vmem:[#allocation12 + $0x10d8] sm:$0xf0]  ;;  %v10957_v36 = vor.u32 %v12867_v32, %v10954_v2  ;;  %v2872_v62 = vperm.slane %v14005_v9, 7 }
 0x4a4   :  { %v11245_v55 = vor.u32 %v12939_v44, %v11242_v48  ;;  %v13143_v44 = vld [vmem:[#allocation15 + $0x74] sm:$0xf]  ;;  %v12026_v48 = vld [vmem:[#allocation15 + $0x78] sm:$0xf0]  ;;  %v12002_v2 = vld [vmem:[#allocation15 + $0x48] sm:$0xf0] }
 0x4a5   :  { %7589 = vmatpush.bf16.msra.mxu3 %v11673_v15  ;;  %7618 = vmatpush.bf16.msra.mxu2 %v9733_v61  ;;  %v12921_v15 = vld [vmem:[#allocation12 + $0x1004] sm:$0xf] }
 0x4a7   :  { %7651 = vmatpush.bf16.msra.mxu0 %v11893_v26  ;;  %7628 = vmatpush.bf16.msrb.mxu1 %v10525_v0  ;;  %v7401_v6 = vpop.f32.mrf.mxu0  ;;  %v11170_v26 = vld [vmem:[#allocation12 + $0x1048] sm:$0xf0]  ;;  %v11098_v0 = vld [vmem:[#allocation12 + $0xfb8] sm:$0xf0] }
 0x4a8   :  { %7619 = vmatmul.bf16.vlgmr.msra.gmra.mxu2 %v13779_v12  ;;  %v11457_v12 = vor.u32 %v13002_v50, %v11456_v49  ;;  %v11173_v34 = vor.u32 %v12921_v15, %v11170_v26  ;;  %v11101_v30 = vor.u32 %v12903_v46, %v11098_v0  ;;  %v10885_v50 = vor.u32 %v12849_v43, %v10882_v5  ;;  %v12018_v15 = vld [vmem:[#allocation15 + $0x68] sm:$0xf0]  ;;  %v12008_v46 = vld [vmem:[#allocation15 + $0x50] sm:$0xf]  ;;  %v13140_v0 = vld [vmem:[#allocation15 + $0x54] sm:$0xf0] }
 0x4a9   :  { %7590 = vmatpush.bf16.msra.mxu3 %v11601_v25  ;;  %v12029_v6 = vor.u32 %v13143_v44, %v12026_v48  ;;  %v13135_v43 = vld [vmem:[#allocation15 + $0x34] sm:$0xf]  ;;  %v12080_v48 = vld [vmem:[#allocation15 + $0xe0] sm:$0xf] }
 0x4ab   :  { %7652 = vmatpush.bf16.msra.mxu0 %v11821_v27  ;;  %7629 = vmatpush.bf16.msrb.mxu1 %v10453_v31  ;;  %v7412_v61 = vpop.f32.mrf.mxu2  ;;  %v11029_v27 = vor.u32 %v12885_v47, %v11026_v23  ;;  %v12010_v47 = vld [vmem:[#allocation15 + $0x58] sm:$0xf0] }
 0x4ac   :  { %v7413_v19 = vadd.f32 %v7412_v61, %v2871_v14 }
 0x4ad   :  { %7591 = vmatpush.bf16.msra.mxu3 %v11529_v42 }
 0x4af   :  { %7653 = vmatpush.bf16.msra.mxu0 %v11749_v58  ;;  %7630 = vmatpush.bf16.msrb.mxu1 %v10381_v52 }
 0x4b1   :  { %7592 = vmatpush.bf16.msra.mxu3 %v11457_v12 }
 0x4b3   :  { %7654 = vmatpush.bf16.msra.mxu0 %v11677_v38  ;;  %7631 = vmatpush.bf16.msrb.mxu1 %v10309_v40  ;;  %v7414_v25 = vpop.f32.mrf.mxu2 }
 0x4b4   :  { %7593 = vmatmul.bf16.vlgmr.msra.gmra.mxu3 %v13798_v37 }
 0x4b5   :  { %7637 = vmatpush.bf16.msrb.mxu3 %v11389_v21 }
 0x4b6   :  { %7632 = vmatmul.bf16.vlgmr.msrb.gmra.mxu1 %v13782_v33  ;;  %v7425_v33 = vpop.f32.mrf.mxu1 }
 0x4b7   :  { %7655 = vmatpush.bf16.msra.mxu0 %v11605_v4  ;;  %v7426_v41 = vadd.f32 %v7425_v33, %v7413_v19  ;;  %v7386_v24 = vpop.f32.mrf.mxu3  ;;  %v12024_v4 = vld [vmem:[#allocation15 + $0x70] sm:$0xf]  ;;  %v12009_v19 = vor.u32 %v13140_v0, %v12008_v46  ;;  %v12000_v33 = vld [vmem:[#allocation15 + $0x40] sm:$0xf]  ;;  %v12074_v0 = vld [vmem:[#allocation15 + $0xd8] sm:$0xf0] }
 0x4b8   :  { %v7387_v31 = vadd.f32 %v7386_v24, %v14032_v20 }
 0x4b9   :  { %7638 = vmatpush.bf16.msrb.mxu3 %v11317_v7  ;;  %v13144_v7 = vld [vmem:[#allocation15 + $0x74] sm:$0xf0] }
 0x4ba   :  { %v7400_v39 = vadd.f32 %v7399_v29, %v7387_v31  ;;  %v12025_v3 = vor.u32 %v13144_v7, %v12024_v4  ;;  %v13159_v4 = vld [vmem:[#allocation15 + $0xf4] sm:$0xf] }
 0x4bb   :  { %7656 = vmatpush.bf16.msra.mxu0 %v11533_v17 }
 0x4bc   :  { %v7676_v16 = vmax.f32 %v7400_v39, 0.0  ;;  %7897 = vmatpush.bf16.msrb.mxu2 %v12025_v3  ;;  %v11992_v39 = vld [vmem:[#allocation15 + $0x30] sm:$0xf]  ;;  %v12090_v3 = vld [vmem:[#allocation15 + $0xf8] sm:$0xf0] }
 0x4bd   :  { %7639 = vmatpush.bf16.msrb.mxu3 %v11245_v55  ;;  %v12093_v44 = vor.u32 %v13159_v4, %v12090_v3 }
 0x4be   :  { %v7427_v42 = vpop.f32.mrf.mxu1  ;;  %v7692_v58 = vmax.f32 %v14016_v22, %v7676_v16  ;;  %v11994_v16 = vld [vmem:[#allocation15 + $0x38] sm:$0xf0] }
 0x4bf   :  { %7657 = vmatpush.bf16.msra.mxu0 %v11461_v56  ;;  %v7451_v49 = vpop.f32.mrf.mxu0  ;;  %v12021_v56 = vor.u32 %v13141_v8, %v12018_v15  ;;  %v14061_v8 = vld [vmem:[#allocation13 + $0x10] sm:$0x3] }
 0x4c1   :  { %7640 = vmatpush.bf16.msrb.mxu3 %v11173_v34 }
 0x4c2   :  { %7658 = vmatmul.bf16.vlgmr.msra.gmra.mxu0 %v13798_v37  ;;  %v7388_v37 = vpop.f32.mrf.mxu3 }
 0x4c3   :  { %v13133_v37 = vld [vmem:[#allocation15 + $0x24] sm:$0xf]  ;;  %7936 = vmatpush.bf16.msrb.mxu0 %v12093_v44 }
 0x4c5   :  { %7641 = vmatpush.bf16.msrb.mxu3 %v11101_v30  ;;  %v13139_v30 = vld [vmem:[#allocation15 + $0x54] sm:$0xf] }
 0x4c6   :  { %v12013_v25 = vor.u32 %v13139_v30, %v12010_v47  ;;  %v12064_v30 = vld [vmem:[#allocation15 + $0xc0] sm:$0xf] }
 0x4c7   :  { %v7453_v51 = vpop.f32.mrf.mxu0 }
 0x4c9   :  { %7642 = vmatpush.bf16.msrb.mxu3 %v11029_v27  ;;  %v13137_v27 = vld [vmem:[#allocation15 + $0x44] sm:$0xf] }
 0x4ca   :  { %v12005_v31 = vor.u32 %v13137_v27, %v12002_v2  ;;  %v12056_v2 = vld [vmem:[#allocation15 + $0xb0] sm:$0xf] }
 0x4cb   :  { %v7464_v1 = vpop.f32.mrf.mxu2 }
 0x4cd   :  { %7643 = vmatpush.bf16.msrb.mxu3 %v10957_v36  ;;  %v13136_v36 = vld [vmem:[#allocation15 + $0x34] sm:$0xf0] }
 0x4ce   :  { %v11993_v5 = vor.u32 %v13136_v36, %v11992_v39  ;;  %v13151_v39 = vld [vmem:[#allocation15 + $0xb4] sm:$0xf]  ;;  %v12058_v36 = vld [vmem:[#allocation15 + $0xb8] sm:$0xf0] }
 0x4d1   :  { %7644 = vmatpush.bf16.msrb.mxu3 %v10885_v50  ;;  %v13134_v50 = vld [vmem:[#allocation15 + $0x24] sm:$0xf0] }
 0x4d3   :  { %v7466_v52 = vpop.f32.mrf.mxu2  ;;  %v7477_v20 = vpop.f32.mrf.mxu1 }
 0x4d4   :  { %7645 = vmatmul.bf16.vlgmr.msrb.gmra.mxu3 %v13788_v13  ;;  %v7478_v18 = vadd.f32 %v7477_v20, %v2872_v62  ;;  %v13129_v62 = vld [vmem:[#allocation15 + $0x4] sm:$0xf] }
 0x4d5   :  { %7923 = vmatpush.bf16.msra.mxu3 %v12029_v6  ;;  %v13158_v6 = vld [vmem:[#allocation15 + $0xe4] sm:$0xf0] }
 0x4d7   :  { %v7438_v53 = vpop.f32.mrf.mxu3 }
 0x4d8   :  { %v7439_v60 = vadd.f32 %v7438_v53, %v7426_v41  ;;  %v13138_v41 = vld [vmem:[#allocation15 + $0x44] sm:$0xf0] }
 0x4d9   :  { %7924 = vmatpush.bf16.msra.mxu3 %v12021_v56  ;;  %v12001_v32 = vor.u32 %v13138_v41, %v12000_v33  ;;  %v12072_v56 = vld [vmem:[#allocation15 + $0xd0] sm:$0xf]  ;;  %v12066_v33 = vld [vmem:[#allocation15 + $0xc8] sm:$0xf0] }
 0x4da   :  { %v7452_v54 = vadd.f32 %v7451_v49, %v7439_v60  ;;  %v11984_v49 = vld [vmem:[#allocation15 + $0x20] sm:$0xf]  ;;  %v11976_v60 = vld [vmem:[#allocation15 + $0x10] sm:$0xf] }
 0x4db   :  { %v7479_v28 = vpop.f32.mrf.mxu1  ;;  %v11985_v51 = vor.u32 %v13134_v50, %v11984_v49  ;;  %v12048_v50 = vld [vmem:[#allocation15 + $0xa0] sm:$0xf] }
 0x4dc   :  { %v7465_v57 = vadd.f32 %v7464_v1, %v7452_v54  ;;  %v11986_v1 = vld [vmem:[#allocation15 + $0x28] sm:$0xf0]  ;;  %v13132_v54 = vld [vmem:[#allocation15 + $0x14] sm:$0xf0] }
 0x4dd   :  { %7925 = vmatpush.bf16.msra.mxu3 %v12013_v25  ;;  %v11989_v52 = vor.u32 %v13133_v37, %v11986_v1  ;;  %v11977_v28 = vor.u32 %v13132_v54, %v11976_v60  ;;  %v13153_v25 = vld [vmem:[#allocation15 + $0xc4] sm:$0xf]  ;;  %v13150_v37 = vld [vmem:[#allocation15 + $0xa4] sm:$0xf0] }
 0x4de   :  { %v7677_v29 = vmax.f32 %v7465_v57, 0.0  ;;  %v13131_v57 = vld [vmem:[#allocation15 + $0x14] sm:$0xf]  ;;  %v12049_v1 = vor.u32 %v13150_v37, %v12048_v50  ;;  %v13181_v50 = vld [vmem:[#allocation21 + $0x20] sm:$0xff]  ;;  %v7731_v37 = vld [vmem:[#allocation16] sm:$0x3] }
 0x4df   :  { %v7503_v12 = vpop.f32.mrf.mxu0  ;;  %v7440_v45 = vpop.f32.mrf.mxu3 }
 0x4e0   :  { %v14048_v22 = vmax.f32 %v14038_v11, %v7677_v29  ;;  %v12016_v11 = vld [vmem:[#allocation15 + $0x60] sm:$0xf]  ;;  %v11978_v29 = vld [vmem:[#allocation15 + $0x18] sm:$0xf0] }
 0x4e1   :  { %v12017_v9 = vor.u32 %v13142_v59, %v12016_v11  ;;  %7926 = vmatpush.bf16.msra.mxu3 %v12005_v31  ;;  %v12081_v11 = vor.u32 %v13158_v6, %v12080_v48  ;;  %v12082_v59 = vld [vmem:[#allocation15 + $0xe8] sm:$0xf0]  ;;  %v13152_v31 = vld [vmem:[#allocation15 + $0xb4] sm:$0xf0]  ;;  %v2874_v6 = vperm.slane %v14061_v8, 1 }
 0x4e3   :  { %7898 = vmatpush.bf16.msrb.mxu2 %v12017_v9 }
 0x4e7   :  { %v7505_v38 = vpop.f32.mrf.mxu0  ;;  %7899 = vmatpush.bf16.msrb.mxu2 %v12009_v19  ;;  %v13154_v19 = vld [vmem:[#allocation15 + $0xc4] sm:$0xf0] }
 0x4e8   :  { %v11968_v38 = vld [vmem:[#allocation15] sm:$0xf]  ;;  %v12065_v27 = vor.u32 %v13154_v19, %v12064_v30  ;;  %v13167_v30 = vld [vmem:[#allocation18 + $0x30] sm:$0xff]  ;;  %v13174_v19 = vld [vmem:[#allocation18 + $0x68] sm:$0xff] }
 0x4eb   :  { %v7516_v21 = vpop.f32.mrf.mxu2  ;;  %7900 = vmatpush.bf16.msrb.mxu2 %v12001_v32  ;;  %v12069_v32 = vor.u32 %v13153_v25, %v12066_v33  ;;  %v13173_v25 = vld [vmem:[#allocation18 + $0x60] sm:$0xff]  ;;  %v13172_v33 = vld [vmem:[#allocation18 + $0x58] sm:$0xff] }
 0x4ef   :  { %7901 = vmatpush.bf16.msrb.mxu2 %v11993_v5  ;;  %v12057_v5 = vor.u32 %v13152_v31, %v12056_v2  ;;  %v13161_v2 = vld [vmem:[#allocation18] sm:$0xff] }
 0x4f0   :  { %v13169_v31 = vld [vmem:[#allocation18 + $0x40] sm:$0xff] }
 0x4f3   :  { %v7518_v13 = vpop.f32.mrf.mxu2  ;;  %v7529_v40 = vpop.f32.mrf.mxu1  ;;  %7902 = vmatpush.bf16.msrb.mxu2 %v11985_v51  ;;  %v13149_v51 = vld [vmem:[#allocation15 + $0xa4] sm:$0xf] }
 0x4f7   :  { %v7490_v10 = vpop.f32.mrf.mxu3  ;;  %7903 = vmatpush.bf16.msrb.mxu2 %v11977_v28  ;;  %v12040_v28 = vld [vmem:[#allocation15 + $0x90] sm:$0xf] }
 0x4f8   :  { %v7491_v63 = vadd.f32 %v7490_v10, %v7478_v18  ;;  %v12088_v10 = vld [vmem:[#allocation15 + $0xf0] sm:$0xf] }
 0x4fa   :  { %v7504_v35 = vadd.f32 %v7503_v12, %v7491_v63  ;;  %v11981_v12 = vor.u32 %v13131_v57, %v11978_v29  ;;  %v13160_v63 = vld [vmem:[#allocation15 + $0xf4] sm:$0xf0]  ;;  %v13147_v29 = vld [vmem:[#allocation15 + $0x94] sm:$0xf] }
 0x4fb   :  { %v7531_v55 = vpop.f32.mrf.mxu1 }
 0x4fc   :  { %v7517_v17 = vadd.f32 %v7516_v21, %v7504_v35  ;;  %v13130_v21 = vld [vmem:[#allocation15 + $0x4] sm:$0xf0]  ;;  %v12089_v35 = vor.u32 %v13160_v63, %v12088_v10  ;;  %v13145_v10 = vld [vmem:[#allocation15 + $0x84] sm:$0xf]  ;;  %v12034_v63 = vld [vmem:[#allocation15 + $0x88] sm:$0xf0] }
 0x4fd   :  { %v11969_v13 = vor.u32 %v13130_v21, %v11968_v38  ;;  %v12042_v38 = vld [vmem:[#allocation15 + $0x98] sm:$0xf0] }
 0x4fe   :  { %v7530_v26 = vadd.f32 %v7529_v40, %v7517_v17  ;;  %v11970_v40 = vld [vmem:[#allocation15 + $0x8] sm:$0xf0]  ;;  %v13157_v17 = vld [vmem:[#allocation15 + $0xe4] sm:$0xf]  ;;  %7910 = vmatpush.bf16.msra.mxu1 %v12089_v35  ;;  %v12045_v21 = vor.u32 %v13147_v29, %v12042_v38 }
 0x4ff   :  { %v14051_v61 = vpop.f32.mrf.mxu0  ;;  %v7492_v34 = vpop.f32.mrf.mxu3  ;;  %v11973_v18 = vor.u32 %v13129_v62, %v11970_v40  ;;  %7904 = vmatpush.bf16.msrb.mxu2 %v11969_v13  ;;  %v12085_v15 = vor.u32 %v13157_v17, %v12082_v59  ;;  %v12032_v13 = vld [vmem:[#allocation15 + $0x80] sm:$0xf]  ;;  %v13146_v40 = vld [vmem:[#allocation15 + $0x84] sm:$0xf0] }
 0x500   :  { %v7678_v14 = vmax.f32 %v7530_v26, 0.0  ;;  %v2873_v26 = vperm.slane %v14061_v8, 0  ;;  %v13156_v34 = vld [vmem:[#allocation15 + $0xd4] sm:$0xf0] }
 0x501   :  { %7937 = vmatpush.bf16.msrb.mxu0 %v12085_v15  ;;  %v12073_v46 = vor.u32 %v13156_v34, %v12072_v56  ;;  %v13175_v8 = vld [vmem:[#allocation18 + $0x70] sm:$0xff] }
 0x502   :  { %v14053_v23 = vmax.f32 %v7692_v58, %v7678_v14  ;;  %v11997_v58 = vor.u32 %v13135_v43, %v11994_v16  ;;  %7911 = vmatpush.bf16.msra.mxu1 %v12081_v11  ;;  %v13155_v14 = vld [vmem:[#allocation15 + $0xd4] sm:$0xf] }
 0x503   :  { %v12077_v47 = vor.u32 %v13155_v14, %v12074_v0  ;;  %v13176_v0 = vld [vmem:[#allocation18 + $0x78] sm:$0xff] }
 0x504   :  { %7927 = vmatpush.bf16.msra.mxu3 %v11997_v58  ;;  %v12061_v58 = vor.u32 %v13151_v39, %v12058_v36 }
 0x505   :  { %7938 = vmatpush.bf16.msrb.mxu0 %v12077_v47  ;;  %v13165_v47 = vld [vmem:[#allocation18 + $0x20] sm:$0xff] }
 0x506   :  { %7912 = vmatpush.bf16.msra.mxu1 %v12073_v46  ;;  %v13168_v46 = vld [vmem:[#allocation18 + $0x38] sm:$0xff] }
 0x507   :  { %v7557_v24 = vpop.f32.mrf.mxu0  ;;  %8085 = vmatpush.bf16.msra.mxu2 %v13168_v46 }
 0x508   :  { %7928 = vmatpush.bf16.msra.mxu3 %v11989_v52  ;;  %v12050_v52 = vld [vmem:[#allocation15 + $0xa8] sm:$0xf0] }
 0x509   :  { %7939 = vmatpush.bf16.msrb.mxu0 %v12069_v32  ;;  %v12053_v54 = vor.u32 %v13149_v51, %v12050_v52  ;;  %v13170_v32 = vld [vmem:[#allocation18 + $0x48] sm:$0xff]  ;;  %v7733_v51 = vperm.slane %v7731_v37, 0 }
 0x50a   :  { %7913 = vmatpush.bf16.msra.mxu1 %v12065_v27  ;;  %v13171_v27 = vld [vmem:[#allocation18 + $0x50] sm:$0xff] }
 0x50b   :  { %v14055_v42 = vpop.f32.mrf.mxu2  ;;  %8086 = vmatpush.bf16.msra.mxu2 %v13167_v30 }
 0x50c   :  { %7929 = vmatpush.bf16.msra.mxu3 %v11981_v12 }
 0x50d   :  { %7940 = vmatpush.bf16.msrb.mxu0 %v12061_v58 }
 0x50e   :  { %7914 = vmatpush.bf16.msra.mxu1 %v12057_v5  ;;  %v13183_v5 = vld [vmem:[#allocation21 + $0x30] sm:$0xff] }
 0x510   :  { %7930 = vmatpush.bf16.msra.mxu3 %v11973_v18  ;;  %v12033_v18 = vor.u32 %v13146_v40, %v12032_v13  ;;  %v13178_v13 = vld [vmem:[#allocation21 + $0x8] sm:$0xff]  ;;  %v13177_v40 = vld [vmem:[#allocation21] sm:$0xff] }
 0x511   :  { %7941 = vmatpush.bf16.msrb.mxu0 %v12053_v54 }
 0x512   :  { %7915 = vmatpush.bf16.msra.mxu1 %v12049_v1  ;;  %v7734_v1 = vperm.slane %v7731_v37, 1 }
 0x513   :  { %v7570_v20 = vpop.f32.mrf.mxu2  ;;  %v14057_v53 = vpop.f32.mrf.mxu1 }
 0x515   :  { %7942 = vmatpush.bf16.msrb.mxu0 %v12045_v21  ;;  %v13180_v21 = vld [vmem:[#allocation21 + $0x18] sm:$0xff] }
 0x517   :  { %v7542_v45 = vpop.f32.mrf.mxu3 }
 0x518   :  { %v7543_v24 = vadd.f32 %v7542_v45, %v2873_v26 }
 0x51a   :  { %v7556_v16 = vadd.f32 %v14051_v61, %v7543_v24  ;;  %v13148_v61 = vld [vmem:[#allocation15 + $0x94] sm:$0xf0]  ;;  %v13162_v24 = vld [vmem:[#allocation18 + $0x8] sm:$0xff] }
 0x51b   :  { %v7583_v7 = vpop.f32.mrf.mxu1  ;;  %v12041_v45 = vor.u32 %v13148_v61, %v12040_v28 }
 0x51c   :  { %v7569_v49 = vadd.f32 %v14055_v42, %v7556_v16  ;;  %v12037_v7 = vor.u32 %v13145_v10, %v12034_v63  ;;  %v13182_v16 = vld [vmem:[#allocation21 + $0x28] sm:$0xff]  ;;  %v13209_v10 = vld [vmem:[#allocation19] ss:$0 sm:$0xff] }
 0x51d   :  { %7916 = vmatpush.bf16.msra.mxu1 %v12041_v45 }
 0x51e   :  { %v7582_v57 = vadd.f32 %v14057_v53, %v7569_v49  ;;  %7943 = vmatpush.bf16.msrb.mxu0 %v12037_v7 }
 0x51f   :  { %v14059_v55 = vpop.f32.mrf.mxu0  ;;  %v7544_v9 = vpop.f32.mrf.mxu3 }
 0x520   :  { %v7608_v17 = vadd.f32 %v14059_v55, %v2874_v6  ;;  %v13166_v55 = vld [vmem:[#allocation18 + $0x28] sm:$0xff] }
 0x521   :  { %7917 = vmatpush.bf16.msra.mxu1 %v12033_v18  ;;  %8087 = vmatpush.bf16.msra.mxu2 %v13166_v55 }
 0x525   :  { %8098 = vmatpush.bf16.msrb.mxu1 %v13176_v0  ;;  %8088 = vmatpush.bf16.msra.mxu2 %v13165_v47 }
 0x527   :  { %v7609_v41 = vpop.f32.mrf.mxu0 }
 0x528   :  { %v13163_v41 = vld [vmem:[#allocation18 + $0x10] sm:$0xff] }
 0x529   :  { %8099 = vmatpush.bf16.msrb.mxu1 %v13175_v8 }
 0x52b   :  { %v7620_v43 = vpop.f32.mrf.mxu2 }
 0x52c   :  { %v7621_v11 = vadd.f32 %v7620_v43, %v7608_v17  ;;  %v13184_v43 = vld [vmem:[#allocation21 + $0x38] sm:$0xff] }
 0x52d   :  { %8100 = vmatpush.bf16.msrb.mxu1 %v13174_v19  ;;  %8181 = vmatpush.bf16.msrb.mxu3 %v13184_v43 }
 0x531   :  { %8101 = vmatpush.bf16.msrb.mxu1 %v13173_v25  ;;  %8182 = vmatpush.bf16.msrb.mxu3 %v13183_v5 }
 0x533   :  { %v7622_v20 = vpop.f32.mrf.mxu2  ;;  %v7633_v60 = vpop.f32.mrf.mxu1 }
 0x534   :  { %v7634_v59 = vadd.f32 %v7633_v60, %v7621_v11 }
 0x535   :  { %8102 = vmatpush.bf16.msrb.mxu1 %v13172_v33  ;;  %8183 = vmatpush.bf16.msrb.mxu3 %v13182_v16 }
 0x537   :  { %v7594_v12 = vpop.f32.mrf.mxu3 }
 0x538   :  { %v7595_v42 = vadd.f32 %v7594_v12, %v7582_v57 }
 0x539   :  { %8103 = vmatpush.bf16.msrb.mxu1 %v13171_v27  ;;  %8184 = vmatpush.bf16.msrb.mxu3 %v13181_v50 }
 0x53a   :  { %v7679_v62 = vmax.f32 %v7595_v42, 0.0 }
 0x53b   :  { %v7635_v53 = vpop.f32.mrf.mxu1 }
 0x53c   :  { %v7695_v4 = vmax.f32 %v14048_v22, %v7679_v62  ;;  %v13179_v62 = vld [vmem:[#allocation21 + $0x10] sm:$0xff] }
 0x53d   :  { %8104 = vmatpush.bf16.msrb.mxu1 %v13170_v32  ;;  %8185 = vmatpush.bf16.msrb.mxu3 %v13180_v21 }
 0x53e   :  { %v7697_v35 = vpack.c.bf16 %v7695_v4, %v7695_v4 }
 0x53f   :  { %v7659_v3 = vpop.f32.mrf.mxu0  ;;  %v7596_v44 = vpop.f32.mrf.mxu3 }
 0x540   :  { %7905 = vmatmul.bf16.vlgmr.msrb.gmra.mxu2 %v7697_v35  ;;  %7931 = vmatmul.bf16.vlgmr.msra.gmra.mxu3 %v7697_v35 }
 0x541   :  { %8105 = vmatpush.bf16.msrb.mxu1 %v13169_v31  ;;  %8186 = vmatpush.bf16.msrb.mxu3 %v13179_v62 }
 0x545   :  { %8187 = vmatpush.bf16.msrb.mxu3 %v13178_v13 }
 0x547   :  { %v7661_v48 = vpop.f32.mrf.mxu0 }
 0x548   :  { %v13210_v48 = vld [vmem:[#allocation22] ss:$0 sm:$0xff] }
 0x549   :  { %8188 = vmatpush.bf16.msrb.mxu3 %v13177_v40 }
 0x557   :  { %v7646_v9 = vpop.f32.mrf.mxu3 }
 0x558   :  { %v7647_v15 = vadd.f32 %v7646_v9, %v7634_v59 }
 0x55a   :  { %v7660_v26 = vadd.f32 %v7659_v3, %v7647_v15 }
 0x55c   :  { %v7680_v22 = vmax.f32 %v7660_v26, 0.0 }
 0x55e   :  { %v7696_v56 = vmax.f32 %v14053_v23, %v7680_v22  ;;  %v13164_v23 = vld [vmem:[#allocation18 + $0x18] sm:$0xff] }
 0x55f   :  { %v7648_v34 = vpop.f32.mrf.mxu3  ;;  %8089 = vmatpush.bf16.msra.mxu2 %v13164_v23 }
 0x560   :  { %v7698_v14 = vpack.c.bf16 %v7696_v56, %v7696_v56 }
 0x562   :  { %7918 = vmatmul.bf16.vlgmr.msra.gmra.mxu1 %v7698_v14  ;;  %7944 = vmatmul.bf16.vlgmr.msrb.gmra.mxu0 %v7698_v14 }
 0x563   :  { %8090 = vmatpush.bf16.msra.mxu2 %v13163_v41 }
 0x567   :  { %8091 = vmatpush.bf16.msra.mxu2 %v13162_v24 }
 0x56b   :  { %8092 = vmatpush.bf16.msra.mxu2 %v13161_v2 }
 0x5c3   :  { %v7906_v39 = vpop.f32.mrf.mxu2  ;;  %v7932_v36 = vpop.f32.mrf.mxu3 }
 0x5c4   :  { %v7907_v52 = vadd.f32 %v7906_v39, %v7733_v51  ;;  %v7933_v20 = vadd.f32 %v7932_v36, %v7734_v1 }
 0x5cb   :  { %v7908_v58 = vpop.f32.mrf.mxu2  ;;  %v7934_v49 = vpop.f32.mrf.mxu3 }
 0x5df   :  { %v7919_v60 = vpop.f32.mrf.mxu1  ;;  %v7945_v54 = vpop.f32.mrf.mxu0 }
 0x5e0   :  { %v7920_v57 = vadd.f32 %v7919_v60, %v7907_v52  ;;  %v7946_v28 = vadd.f32 %v7945_v54, %v7933_v20 }
 0x5e2   :  { %v7949_v61 = vmax.f32 %v7920_v57, 0.0  ;;  %v7950_v29 = vmax.f32 %v7946_v28, 0.0 }
 0x5e4   :  { %v7951_v12 = vpack.c.bf16 %v7949_v61, %v7949_v61  ;;  %v7952_v45 = vpack.c.bf16 %v7950_v29, %v7950_v29 }
 0x5e6   :  { %8093 = vmatmul.bf16.vlgmr.msra.gmra.mxu2 %v7951_v12  ;;  %8106 = vmatmul.bf16.vlgmr.msrb.gmra.mxu1 %v7952_v45 }
 0x5e7   :  { %v7921_v38 = vpop.f32.mrf.mxu1  ;;  %v7947_v42 = vpop.f32.mrf.mxu0 }
 0x663   :  { %v8107_v18 = vpop.f32.mrf.mxu1 }
 0x669   :  { %v8094_v63 = vpop.f32.mrf.mxu2 }
 0x66a   :  { %v8095_v4 = vadd.f32 %v13209_v10, %v8094_v63 }
 0x66b   :  { %v8109_v53 = vpop.f32.mrf.mxu1 }
 0x66c   :  { %v8108_v7 = vadd.f32 %v8107_v18, %v8095_v4 }
 0x66e   :  { %v8111_v35 = vmax.f32 %v8108_v7, 0.0 }
 0x670   :  { %v8112_v3 = vpack.c.bf16 %v8111_v35, %v8111_v35 }
 0x671   :  { %v8096_v44 = vpop.f32.mrf.mxu2 }
 0x672   :  { %8189 = vmatmul.bf16.vlgmr.msrb.gmra.mxu3 %v8112_v3 }
 0x6f5   :  { %v8190_v6 = vpop.f32.mrf.mxu3 }
 0x6f6   :  { %v8191_v17 = vadd.f32 %v13210_v48, %v8190_v6 }
 0x6f8   :  { %8194 = vst [vmem:[%s14089_s15] sm:$0xff] %v8191_v17 }
 0x6fd   :  { %v8192_v11 = vpop.f32.mrf.mxu3 }
 0x6fe   :  { %8199 = vsyncpa [#allocation3], 1 }
 0x6ff   :  { %8200 = vsyncpa [#allocation5], 1 }
 0x700   :  { %8201 = vsyncpa [#allocation8], 1 }
 0x701   :  { %8202 = vsyncpa [#allocation11], 1 }
 0x702   :  { %8203 = vsyncpa [#allocation14], 1 }
 0x703   :  { %8204 = vsyncpa [#allocation17], 1 }
 0x704   :  { %8205 = vsyncpa [#allocation20], 1 }
 0x705   :  { %8206 = vsyncpa [#allocation23], 1 }

</bundles_post_ra>
